<compile_context>
chip_gen: v7x
topology: tpu7x:2x2x1
jax: 0.10.0
libtpu: 0.0.40
codegen_flags: <defaults>
</compile_context>

<pallas_src>
import jax
import jax.numpy as jnp
from jax.experimental import pallas as pl
from jax.experimental.pallas import tpu as pltpu

# --------------------------------------------------------------------------- geometry
H_IN = W_IN = 24           # input spatial size (fixed by the validated forward)
C_PAD = 128                # every channel dim padded to one 128-lane tile
C_IN = 3
K1, K2, K3 = 7, 3, 3       # conv kernel sizes
K1P = 256                  # conv1 im2col contraction: 7*7*3 = 147 padded to 256
H1 = H_IN - K1 + 1         # 18 (conv1 valid rows/cols)
H2 = H1 - K2 + 1           # 16 (conv2 valid rows/cols)
HP1 = H2 // 2              # 8  (pool1 valid rows/cols)
WP = 16                    # pool1 slab width (8 valid cols, multiple of 8)
H3 = HP1 - K3 + 1          # 6  (conv3 valid rows/cols)
HP2 = H3 // 2              # 3  (pool2 valid rows/cols)

# Flattened-slab row counts ("slab" = image flattened row-major to (H*W, C) plus a few
# margin rows so every shifted read stays in bounds; margin/garbage rows are finite and
# never feed a valid output — see the static proofs below).
R2 = H2 * W_IN             # 384 conv2 output slab rows (width 24, valid cols 0..15)
MC2 = 128                  # conv2 M-chunk (f32 accumulator = 16 vregs)
R1 = 440                   # conv1 slab rows consumed by conv2 (>= 434), multiple of 8
R1V = R1 + 8               # 448 conv1 rows computed (margin for the kw=1,2 shifted copies)
R3 = H3 * WP               # 96  conv3 output slab rows (width 16, valid cols 0..5)
RP1 = 136                  # pool1 slab rows consumed by conv3 (>= 130), multiple of 8
RP1V = RP1 + 8             # 144 pool1 rows produced (margin for kw shifted copies)
RH1 = HP1 * W_IN           # 192 rows after pool1 H-direction max
RW1 = 184                  # rows of pool1 W-direction max (selected col <= 182)
RH2 = HP2 * WP             # 48  rows after pool2 H-direction max
RW2 = 40                   # rows of pool2 W-direction max (selected col <= 36)

# ---- static proofs: every in-kernel read is in bounds, every slab base row is
# ---- 8-aligned, and garbage rows never feed a valid output (review: de-fragilize).
assert R2 % MC2 == 0 and MC2 % 8 == 0 and W_IN % 8 == 0 and WP % 8 == 0
assert R1 % 8 == 0 and R1V % 8 == 0 and RP1 % 8 == 0 and R3 % 8 == 0
assert (R2 - MC2) + (K2 - 1) * W_IN + (MC2 - 1) < R1          # max y1k row read = 431
assert (R1 - 1) + (K2 - 1) < R1V                              # y1k shift source <= 441
assert R1V <= (H1 + 1) * W_IN                                 # 448 <= 456 patch rows built
assert (K3 - 1) * WP + (R3 - 1) < RP1                         # max p1k row read = 127
assert (RP1 - 1) + (K3 - 1) < RP1V                            # p1k shift source <= 137
assert RW1 + 1 <= RH1 and (HP1 - 1) * W_IN + 2 * (HP1 - 1) < RW1
assert RW2 + 1 <= RH2 and (HP2 - 1) * WP + 2 * (HP2 - 1) < RW2
# Valid conv2 outputs only read conv1 rows (h<=17)*24+(w<=17): exact patches (no pad).
# Valid conv3 outputs only read pool1 rows (h<=7)*16+(p<=7): exact 2x2 windows of
# valid conv2 outputs. Garbage columns (w>=16 / p>=8) never reach valid outputs.


# --------------------------------------------------------------------------- kernel
def _fused_forward_kernel(x_ref, w1_ref, b1_ref, w2_ref, b2_ref, w3_ref, b3_ref,
                          s1_ref, s2_ref, wfc_ref, bfc_ref,
                          o_ref, y1k_ref, p1k_ref):
    f32, bf16 = jnp.float32, jnp.bfloat16

    # ---- conv1: ONE im2col MXU matmul (K = 7*7*3 padded to 256), f32 epilogue ---------
    y1 = jnp.dot(x_ref[0], w1_ref[...], preferred_element_type=f32)      # (448,128)
    y1 = jnp.maximum(y1 + b1_ref[...], 0.0)
    # Lane-pack the kw-shifted copies ONCE (two sublane shifts total), so every conv2
    # tap read below is a row-aligned, lane-dense load: y1k[r, kw*128+c] = y1[r+kw, c].
    for kw in range(K2):
        y1k_ref[:, kw * C_PAD:(kw + 1) * C_PAD] = y1[kw:kw + R1, :].astype(bf16)

    # ---- conv2: M-chunked, kw taps stacked along K=384 -> 3 aligned dots per chunk ----
    chunks = []
    for c in range(R2 // MC2):
        acc = None
        for kh in range(K2):
            a = y1k_ref[pl.ds(c * MC2 + kh * W_IN, MC2), :]              # (128,384), aligned
            d = jnp.dot(a, w2_ref[kh], preferred_element_type=f32)
            acc = d if acc is None else acc + d
        chunks.append(jnp.maximum(acc + b2_ref[...], 0.0))               # (128,128) f32
    y2 = jnp.concatenate(chunks, axis=0)                                 # (384,128) f32

    # ---- 2x2 max-pool #1: H = halves max, W = shift-by-1 max, ONE compaction matmul ---
    t = y2.reshape(HP1, 2 * W_IN, C_PAD)
    hm = jnp.maximum(t[:, :W_IN, :], t[:, W_IN:, :]).reshape(RH1, C_PAD)
    wm = jnp.maximum(hm[0:RW1, :], hm[1:RW1 + 1, :]).astype(bf16)        # (184,128)
    p1 = jnp.dot(s1_ref[...], wm, preferred_element_type=f32)            # (144,128)
    for kw in range(K3):
        p1k_ref[:, kw * C_PAD:(kw + 1) * C_PAD] = p1[kw:kw + RP1, :].astype(bf16)

    # ---- conv3: kw taps stacked along K=384 -> 3 aligned dots (single M chunk) --------
    acc = None
    for kh in range(K3):
        a = p1k_ref[pl.ds(kh * WP, R3), :]                               # (96,384), aligned
        d = jnp.dot(a, w3_ref[kh], preferred_element_type=f32)
        acc = d if acc is None else acc + d
    y3 = jnp.maximum(acc + b3_ref[...], 0.0)                             # (96,128) f32

    # ---- 2x2 max-pool #2 + global-average (selector row 0 sums the 9 valid positions,
    # ---- 1/9 is folded into wfc) + fc --------------------------------------------------
    t = y3.reshape(HP2, 2 * WP, C_PAD)
    hm2 = jnp.maximum(t[:, :WP, :], t[:, WP:, :]).reshape(RH2, C_PAD)
    wm2 = jnp.maximum(hm2[0:RW2, :], hm2[1:RW2 + 1, :]).astype(bf16)     # (40,128)
    pooled = jnp.dot(s2_ref[...], wm2, preferred_element_type=f32)       # (8,128): row0=sum
    logits = jnp.dot(pooled.astype(bf16), wfc_ref[...],
                     preferred_element_type=f32) + bfc_ref[...]          # (8,128) f32
    o_ref[0] = logits                                                    # lane-dense store


# --------------------------------------------------------------------------- pallas_call
def _const_spec(shape):
    return pl.BlockSpec(shape, lambda b, _n=len(shape): (0,) * _n)


def _fused_pallas_forward(xs, p):
    B = xs.shape[0]
    grid_spec = pltpu.PrefetchScalarGridSpec(
        num_scalar_prefetch=0,
        grid=(B,),
        in_specs=[
            pl.BlockSpec((1, R1V, K1P), lambda b: (b, 0, 0)),   # conv1 im2col slab
            _const_spec((K1P, C_PAD)),                          # w1 (im2col)
            _const_spec((1, C_PAD)),                            # b1
            _const_spec((K2, K2 * C_PAD, C_PAD)),               # w2 (kw stacked along K)
            _const_spec((1, C_PAD)),                            # b2
            _const_spec((K3, K3 * C_PAD, C_PAD)),               # w3 (kw stacked along K)
            _const_spec((1, C_PAD)),                            # b3
            _const_spec((RP1V, RW1)),                           # pool1 compaction selector
            _const_spec((8, RW2)),                              # pool2 + avg selector
            _const_spec((C_PAD, C_PAD)),                        # fc weight (incl. 1/9)
            _const_spec((1, C_PAD)),                            # fc bias
        ],
        out_specs=pl.BlockSpec((1, 8, C_PAD), lambda b: (b, 0, 0)),
        scratch_shapes=[
            pltpu.VMEM((R1, K2 * C_PAD), jnp.bfloat16),         # kw-packed conv1 acts
            pltpu.VMEM((RP1, K3 * C_PAD), jnp.bfloat16),        # kw-packed pool1 acts
        ],
    )
    return pl.pallas_call(
        _fused_forward_kernel,
        out_shape=jax.ShapeDtypeStruct((B, 8, C_PAD), jnp.float32),
        grid_spec=grid_spec,
        compiler_params=pltpu.CompilerParams(
            dimension_semantics=("parallel",),                  # batch across TCs (v7x)
            vmem_limit_bytes=32 * 1024 * 1024,
        ),
    )(xs, p["w1"], p["b1"], p["w2"], p["b2"], p["w3"], p["b3"],
      p["s1"], p["s2"], p["wfc"], p["bfc"])


# --------------------------------------------------------------------------- prepare
def prepare_params(params):
    """One-time weight re-layouts, 128-lane padding and bf16 casts (all hoisted)."""
    f32, bf16 = jnp.float32, jnp.bfloat16

    # conv1 -> single im2col weight, K ordered (kh, kw, cin), padded 147 -> 256.
    w1 = params["conv1_w"]                                    # (32, 3, 7, 7)
    o1, c1 = w1.shape[0], w1.shape[1]
    w1 = jnp.transpose(w1, (2, 3, 1, 0)).reshape(K1 * K1 * c1, o1)
    w1 = jnp.pad(w1, ((0, K1P - K1 * K1 * c1), (0, C_PAD - o1))).astype(bf16)

    def conv_k_stack(w):                                      # (O,C,3,3) -> (3, 3*128, 128)
        o, c, kh, kw = w.shape
        t = jnp.transpose(w, (2, 3, 1, 0))                    # (kh, kw, cin, cout)
        t = jnp.pad(t, ((0, 0), (0, 0), (0, C_PAD - c), (0, C_PAD - o)))
        return t.reshape(kh, kw * C_PAD, C_PAD).astype(bf16)

    def pad_bias(b):
        return jnp.pad(b, (0, C_PAD - b.shape[0])).reshape(1, C_PAD).astype(f32)

    # pool1 compaction: p1[h*16 + p] = wm[h*24 + 2p]  (h, p in 0..7); other rows -> 0.
    rows = [h * WP + q for h in range(HP1) for q in range(HP1)]
    cols = [h * W_IN + 2 * q for h in range(HP1) for q in range(HP1)]
    s1 = jnp.zeros((RP1V, RW1), f32).at[
        jnp.array(rows, jnp.int32), jnp.array(cols, jnp.int32)].set(1.0).astype(bf16)

    # pool2 + global-average: row 0 sums the 9 valid pooled positions.
    cols2 = [h * WP + 2 * q for h in range(HP2) for q in range(HP2)]
    s2 = jnp.zeros((8, RW2), f32).at[0, jnp.array(cols2, jnp.int32)].set(1.0).astype(bf16)

    fc_w, fc_b = params["fc_w"], params["fc_b"]               # (nc, 128), (nc,)
    nc = fc_w.shape[0]
    wfc = jnp.pad(fc_w.T / 9.0, ((0, 0), (0, C_PAD - nc))).astype(bf16)   # mean folded in
    bfc = jnp.pad(fc_b, (0, C_PAD - nc)).reshape(1, C_PAD).astype(f32)

    return {
        "w1": w1, "b1": pad_bias(params["conv1_b"]),
        "w2": conv_k_stack(params["conv2_w"]), "b2": pad_bias(params["conv2_b"]),
        "w3": conv_k_stack(params["conv3_w"]), "b3": pad_bias(params["conv3_b"]),
        "s1": s1, "s2": s2, "wfc": wfc, "bfc": bfc,
    }


def _prep_input(x_nchw):
    """NCHW -> conv1 im2col slab (B, R1V, K1P) bf16.

    Row r = conv1 output slot (r // 24, r % 24); K = (kh, kw, cin) flattened (147 real
    values, zero padded to 256). Out-of-range slots read zero-padded input: finite
    garbage that never feeds a valid output.
    """
    x = jnp.transpose(x_nchw, (0, 2, 3, 1)).astype(jnp.float32)          # (B,24,24,3)
    B = x.shape[0]
    xp = jnp.pad(x, ((0, 0), (0, K1 - 1), (0, K1 - 1), (0, 0)))          # (B,30,30,3)
    nrows = (R1V + W_IN - 1) // W_IN                                     # 19
    taps = [xp[:, kh:kh + nrows, kw:kw + W_IN, :]
            for kh in range(K1) for kw in range(K1)]
    p = jnp.concatenate(taps, axis=-1).reshape(B, nrows * W_IN, K1 * K1 * C_IN)
    p = p[:, :R1V, :]
    p = jnp.pad(p, ((0, 0), (0, 0), (0, K1P - K1 * K1 * C_IN)))
    return p.astype(jnp.bfloat16)


def base_model_forward(prepared, x_nchw, *, num_classes):
    xs = _prep_input(x_nchw)
    out = _fused_pallas_forward(xs, prepared)                            # (B, 8, 128)
    return out[:, 0, :num_classes]


# --------------------------------------------------------------------------- params
def init_params(num_classes, key):
    def conv_w(key, o, i, k):
        fan_in = i * k * k
        bound = 1.0 / jnp.sqrt(fan_in)
        kw_, kb = jax.random.split(key)
        w = jax.random.uniform(kw_, (o, i, k, k), jnp.float32, -bound, bound)
        b = jax.random.uniform(kb, (o,), jnp.float32, -bound, bound)
        return w, b

    k1, k2, k3, k4 = jax.random.split(key, 4)
    p = {}
    p["conv1_w"], p["conv1_b"] = conv_w(k1, 32, 3, 7)
    p["conv2_w"], p["conv2_b"] = conv_w(k2, 64, 32, 3)
    p["conv3_w"], p["conv3_b"] = conv_w(k3, 128, 64, 3)
    bound = 1.0 / jnp.sqrt(128.0)
    kw_, kb = jax.random.split(k4)
    p["fc_w"] = jax.random.uniform(kw_, (num_classes, 128), jnp.float32, -bound, bound)
    p["fc_b"] = jax.random.uniform(kb, (num_classes,), jnp.float32, -bound, bound)
    return p


# --------------------------------------------------------------------------- reference
def _ref_forward(params, x_nchw):
    def conv(x, w, b):
        y = jax.lax.conv_general_dilated(
            x, jnp.transpose(w, (2, 3, 1, 0)), (1, 1), "VALID",
            dimension_numbers=("NHWC", "HWIO", "NHWC"))
        return y + b

    x = jnp.transpose(x_nchw, (0, 2, 3, 1))
    x = jax.nn.relu(conv(x, params["conv1_w"], params["conv1_b"]))
    x = jax.nn.relu(conv(x, params["conv2_w"], params["conv2_b"]))
    B, H, W, C = x.shape
    x = x[:, :H // 2 * 2, :W // 2 * 2, :].reshape(B, H // 2, 2, W // 2, 2, C).max(axis=(2, 4))
    x = jax.nn.relu(conv(x, params["conv3_w"], params["conv3_b"]))
    B, H, W, C = x.shape
    x = x[:, :H // 2 * 2, :W // 2 * 2, :].reshape(B, H // 2, 2, W // 2, 2, C).max(axis=(2, 4))
    x = x.mean(axis=(1, 2))
    return x @ params["fc_w"].T + params["fc_b"]


# --------------------------------------------------------------------------- main
if __name__ == "__main__":
    num_classes = 10
    key = jax.random.PRNGKey(0)
    kp, kx = jax.random.split(key)
    params = init_params(num_classes, kp)
    prepared = prepare_params(params)

    # Input: NCHW, B=2, C=3, 24x24 (24 -> conv7 -> 18 -> conv3 -> 16 -> pool -> 8
    #                               -> conv3 -> 6 -> pool -> 3 -> avgpool -> 1)
    x = jax.random.normal(kx, (2, 3, 24, 24), jnp.float32)

    fwd = jax.jit(base_model_forward, static_argnames=("num_classes",))
    out = fwd(prepared, x, num_classes=num_classes)
    out = jax.block_until_ready(out)
    assert out.shape == (2, num_classes)

    ref = _ref_forward(params, x)
    # bf16 MXU operands -> loosen tolerance vs. the pure-f32 reference.
    assert jnp.allclose(out, ref, atol=5e-2, rtol=5e-2), "mismatch vs reference"

    print("KERNEL_OK")
</pallas_src>

<mosaic_0001>
module attributes {stable_mosaic.version = 11 : i64} {
  func.func @_fused_forward_kernel(%arg0: i32, %arg1: memref<1x448x256xbf16, #tpu.memory_space<vmem>>, %arg2: memref<256x128xbf16, #tpu.memory_space<vmem>>, %arg3: memref<1x128xf32, #tpu.memory_space<vmem>>, %arg4: memref<3x384x128xbf16, #tpu.memory_space<vmem>>, %arg5: memref<1x128xf32, #tpu.memory_space<vmem>>, %arg6: memref<3x384x128xbf16, #tpu.memory_space<vmem>>, %arg7: memref<1x128xf32, #tpu.memory_space<vmem>>, %arg8: memref<144x184xbf16, #tpu.memory_space<vmem>>, %arg9: memref<8x40xbf16, #tpu.memory_space<vmem>>, %arg10: memref<128x128xbf16, #tpu.memory_space<vmem>>, %arg11: memref<1x128xf32, #tpu.memory_space<vmem>>, %arg12: memref<1x8x128xf32, #tpu.memory_space<vmem>>, %arg13: memref<440x384xbf16, #tpu.memory_space<vmem>>, %arg14: memref<136x384xbf16, #tpu.memory_space<vmem>>) attributes {dimension_semantics = [#tpu.dimension_semantics<parallel>], iteration_bounds = array<i64: 2>, scalar_prefetch = 0 : i64, scratch_operands = 2 : i64, tpu.core_type = #tpu.core_type<tc>, window_params = [{transform_indices = @transform_0, window_bounds = array<i64: 1, 448, 256>}, {pipeline_mode = #tpu.pipeline_mode<synchronous>, transform_indices = @transform_1, window_bounds = array<i64: 256, 128>}, {pipeline_mode = #tpu.pipeline_mode<synchronous>, transform_indices = @transform_2, window_bounds = array<i64: 1, 128>}, {pipeline_mode = #tpu.pipeline_mode<synchronous>, transform_indices = @transform_3, window_bounds = array<i64: 3, 384, 128>}, {pipeline_mode = #tpu.pipeline_mode<synchronous>, transform_indices = @transform_4, window_bounds = array<i64: 1, 128>}, {pipeline_mode = #tpu.pipeline_mode<synchronous>, transform_indices = @transform_5, window_bounds = array<i64: 3, 384, 128>}, {pipeline_mode = #tpu.pipeline_mode<synchronous>, transform_indices = @transform_6, window_bounds = array<i64: 1, 128>}, {pipeline_mode = #tpu.pipeline_mode<synchronous>, transform_indices = @transform_7, window_bounds = array<i64: 144, 184>}, {pipeline_mode = #tpu.pipeline_mode<synchronous>, transform_indices = @transform_8, window_bounds = array<i64: 8, 40>}, {pipeline_mode = #tpu.pipeline_mode<synchronous>, transform_indices = @transform_9, window_bounds = array<i64: 128, 128>}, {pipeline_mode = #tpu.pipeline_mode<synchronous>, transform_indices = @transform_10, window_bounds = array<i64: 1, 128>}, {transform_indices = @transform_11, window_bounds = array<i64: 1, 8, 128>}]} {
    %c0 = arith.constant 0 : index
    %c0_0 = arith.constant 0 : index
    %c0_1 = arith.constant 0 : index
    %0 = vector.load %arg1[%c0, %c0_0, %c0_1] : memref<1x448x256xbf16, #tpu.memory_space<vmem>>, vector<1x448x256xbf16>
    %1 = vector.shape_cast %0 : vector<1x448x256xbf16> to vector<448x256xbf16>
    %c0_2 = arith.constant 0 : index
    %c0_3 = arith.constant 0 : index
    %2 = vector.load %arg2[%c0_2, %c0_3] : memref<256x128xbf16, #tpu.memory_space<vmem>>, vector<256x128xbf16>
    %cst = arith.constant dense<0.000000e+00> : vector<448x128xf32>
    %3 = tpu.matmul %1, %2, %cst {dimension_numbers = #tpu.dot_dimension_numbers<[1], [0], [0], [1], [0, 0, 1, 1], [], []>} : vector<448x256xbf16>, vector<256x128xbf16>, vector<448x128xf32> -> vector<448x128xf32>
    %c0_4 = arith.constant 0 : index
    %c0_5 = arith.constant 0 : index
    %4 = vector.load %arg3[%c0_4, %c0_5] : memref<1x128xf32, #tpu.memory_space<vmem>>, vector<1x128xf32>
    %5 = vector.broadcast %4 : vector<1x128xf32> to vector<448x128xf32>
    %6 = arith.addf %3, %5 : vector<448x128xf32>
    %cst_6 = arith.constant 0.000000e+00 : f32
    %7 = vector.broadcast %cst_6 : f32 to vector<448x128xf32>
    %8 = arith.maximumf %6, %7 : vector<448x128xf32>
    %9 = vector.extract_strided_slice %8 {offsets = [0, 0], sizes = [440, 128], strides = [1, 1]} : vector<448x128xf32> to vector<440x128xf32>
    %10 = arith.truncf %9 : vector<440x128xf32> to vector<440x128xbf16>
    %c0_7 = arith.constant 0 : index
    %c0_8 = arith.constant 0 : index
    %11 = vector.load %arg13[%c0_7, %c0_8] : memref<440x384xbf16, #tpu.memory_space<vmem>>, vector<440x128xbf16>
    tpu.vector_store %arg13[%c0_7, %c0_8], %10 {strides = array<i32>} : memref<440x384xbf16, #tpu.memory_space<vmem>>, vector<440x128xbf16>,
    %12 = vector.extract_strided_slice %8 {offsets = [1, 0], sizes = [440, 128], strides = [1, 1]} : vector<448x128xf32> to vector<440x128xf32>
    %13 = arith.truncf %12 : vector<440x128xf32> to vector<440x128xbf16>
    %c0_9 = arith.constant 0 : index
    %c128 = arith.constant 128 : index
    %14 = vector.load %arg13[%c0_9, %c128] : memref<440x384xbf16, #tpu.memory_space<vmem>>, vector<440x128xbf16>
    tpu.vector_store %arg13[%c0_9, %c128], %13 {strides = array<i32>} : memref<440x384xbf16, #tpu.memory_space<vmem>>, vector<440x128xbf16>,
    %15 = vector.extract_strided_slice %8 {offsets = [2, 0], sizes = [440, 128], strides = [1, 1]} : vector<448x128xf32> to vector<440x128xf32>
    %16 = arith.truncf %15 : vector<440x128xf32> to vector<440x128xbf16>
    %c0_10 = arith.constant 0 : index
    %c256 = arith.constant 256 : index
    %17 = vector.load %arg13[%c0_10, %c256] : memref<440x384xbf16, #tpu.memory_space<vmem>>, vector<440x128xbf16>
    tpu.vector_store %arg13[%c0_10, %c256], %16 {strides = array<i32>} : memref<440x384xbf16, #tpu.memory_space<vmem>>, vector<440x128xbf16>,
    %c0_11 = arith.constant 0 : index
    %c0_12 = arith.constant 0 : index
    %18 = vector.load %arg13[%c0_11, %c0_12] : memref<440x384xbf16, #tpu.memory_space<vmem>>, vector<128x384xbf16>
    %c0_13 = arith.constant 0 : index
    %c0_14 = arith.constant 0 : index
    %c0_15 = arith.constant 0 : index
    %19 = vector.load %arg4[%c0_13, %c0_14, %c0_15] : memref<3x384x128xbf16, #tpu.memory_space<vmem>>, vector<1x384x128xbf16>
    %20 = vector.shape_cast %19 : vector<1x384x128xbf16> to vector<384x128xbf16>
    %cst_16 = arith.constant dense<0.000000e+00> : vector<128x128xf32>
    %21 = tpu.matmul %18, %20, %cst_16 {dimension_numbers = #tpu.dot_dimension_numbers<[1], [0], [0], [1], [0, 0, 1, 1], [], []>} : vector<128x384xbf16>, vector<384x128xbf16>, vector<128x128xf32> -> vector<128x128xf32>
    %c24 = arith.constant 24 : index
    %c0_17 = arith.constant 0 : index
    %22 = vector.load %arg13[%c24, %c0_17] : memref<440x384xbf16, #tpu.memory_space<vmem>>, vector<128x384xbf16>
    %c1 = arith.constant 1 : index
    %c0_18 = arith.constant 0 : index
    %c0_19 = arith.constant 0 : index
    %23 = vector.load %arg4[%c1, %c0_18, %c0_19] : memref<3x384x128xbf16, #tpu.memory_space<vmem>>, vector<1x384x128xbf16>
    %24 = vector.shape_cast %23 : vector<1x384x128xbf16> to vector<384x128xbf16>
    %cst_20 = arith.constant dense<0.000000e+00> : vector<128x128xf32>
    %25 = tpu.matmul %22, %24, %cst_20 {dimension_numbers = #tpu.dot_dimension_numbers<[1], [0], [0], [1], [0, 0, 1, 1], [], []>} : vector<128x384xbf16>, vector<384x128xbf16>, vector<128x128xf32> -> vector<128x128xf32>
    %26 = arith.addf %21, %25 : vector<128x128xf32>
    %c48 = arith.constant 48 : index
    %c0_21 = arith.constant 0 : index
    %27 = vector.load %arg13[%c48, %c0_21] : memref<440x384xbf16, #tpu.memory_space<vmem>>, vector<128x384xbf16>
    %c2 = arith.constant 2 : index
    %c0_22 = arith.constant 0 : index
    %c0_23 = arith.constant 0 : index
    %28 = vector.load %arg4[%c2, %c0_22, %c0_23] : memref<3x384x128xbf16, #tpu.memory_space<vmem>>, vector<1x384x128xbf16>
    %29 = vector.shape_cast %28 : vector<1x384x128xbf16> to vector<384x128xbf16>
    %cst_24 = arith.constant dense<0.000000e+00> : vector<128x128xf32>
    %30 = tpu.matmul %27, %29, %cst_24 {dimension_numbers = #tpu.dot_dimension_numbers<[1], [0], [0], [1], [0, 0, 1, 1], [], []>} : vector<128x384xbf16>, vector<384x128xbf16>, vector<128x128xf32> -> vector<128x128xf32>
    %31 = arith.addf %26, %30 : vector<128x128xf32>
    %c0_25 = arith.constant 0 : index
    %c0_26 = arith.constant 0 : index
    %32 = vector.load %arg5[%c0_25, %c0_26] : memref<1x128xf32, #tpu.memory_space<vmem>>, vector<1x128xf32>
    %33 = vector.broadcast %32 : vector<1x128xf32> to vector<128x128xf32>
    %34 = arith.addf %31, %33 : vector<128x128xf32>
    %cst_27 = arith.constant 0.000000e+00 : f32
    %35 = vector.broadcast %cst_27 : f32 to vector<128x128xf32>
    %36 = arith.maximumf %34, %35 : vector<128x128xf32>
    %c128_28 = arith.constant 128 : index
    %c0_29 = arith.constant 0 : index
    %37 = vector.load %arg13[%c128_28, %c0_29] : memref<440x384xbf16, #tpu.memory_space<vmem>>, vector<128x384xbf16>
    %c0_30 = arith.constant 0 : index
    %c0_31 = arith.constant 0 : index
    %c0_32 = arith.constant 0 : index
    %38 = vector.load %arg4[%c0_30, %c0_31, %c0_32] : memref<3x384x128xbf16, #tpu.memory_space<vmem>>, vector<1x384x128xbf16>
    %39 = vector.shape_cast %38 : vector<1x384x128xbf16> to vector<384x128xbf16>
    %cst_33 = arith.constant dense<0.000000e+00> : vector<128x128xf32>
    %40 = tpu.matmul %37, %39, %cst_33 {dimension_numbers = #tpu.dot_dimension_numbers<[1], [0], [0], [1], [0, 0, 1, 1], [], []>} : vector<128x384xbf16>, vector<384x128xbf16>, vector<128x128xf32> -> vector<128x128xf32>
    %c152 = arith.constant 152 : index
    %c0_34 = arith.constant 0 : index
    %41 = vector.load %arg13[%c152, %c0_34] : memref<440x384xbf16, #tpu.memory_space<vmem>>, vector<128x384xbf16>
    %c1_35 = arith.constant 1 : index
    %c0_36 = arith.constant 0 : index
    %c0_37 = arith.constant 0 : index
    %42 = vector.load %arg4[%c1_35, %c0_36, %c0_37] : memref<3x384x128xbf16, #tpu.memory_space<vmem>>, vector<1x384x128xbf16>
    %43 = vector.shape_cast %42 : vector<1x384x128xbf16> to vector<384x128xbf16>
    %cst_38 = arith.constant dense<0.000000e+00> : vector<128x128xf32>
    %44 = tpu.matmul %41, %43, %cst_38 {dimension_numbers = #tpu.dot_dimension_numbers<[1], [0], [0], [1], [0, 0, 1, 1], [], []>} : vector<128x384xbf16>, vector<384x128xbf16>, vector<128x128xf32> -> vector<128x128xf32>
    %45 = arith.addf %40, %44 : vector<128x128xf32>
    %c176 = arith.constant 176 : index
    %c0_39 = arith.constant 0 : index
    %46 = vector.load %arg13[%c176, %c0_39] : memref<440x384xbf16, #tpu.memory_space<vmem>>, vector<128x384xbf16>
    %c2_40 = arith.constant 2 : index
    %c0_41 = arith.constant 0 : index
    %c0_42 = arith.constant 0 : index
    %47 = vector.load %arg4[%c2_40, %c0_41, %c0_42] : memref<3x384x128xbf16, #tpu.memory_space<vmem>>, vector<1x384x128xbf16>
    %48 = vector.shape_cast %47 : vector<1x384x128xbf16> to vector<384x128xbf16>
    %cst_43 = arith.constant dense<0.000000e+00> : vector<128x128xf32>
    %49 = tpu.matmul %46, %48, %cst_43 {dimension_numbers = #tpu.dot_dimension_numbers<[1], [0], [0], [1], [0, 0, 1, 1], [], []>} : vector<128x384xbf16>, vector<384x128xbf16>, vector<128x128xf32> -> vector<128x128xf32>
    %50 = arith.addf %45, %49 : vector<128x128xf32>
    %c0_44 = arith.constant 0 : index
    %c0_45 = arith.constant 0 : index
    %51 = vector.load %arg5[%c0_44, %c0_45] : memref<1x128xf32, #tpu.memory_space<vmem>>, vector<1x128xf32>
    %52 = vector.broadcast %51 : vector<1x128xf32> to vector<128x128xf32>
    %53 = arith.addf %50, %52 : vector<128x128xf32>
    %cst_46 = arith.constant 0.000000e+00 : f32
    %54 = vector.broadcast %cst_46 : f32 to vector<128x128xf32>
    %55 = arith.maximumf %53, %54 : vector<128x128xf32>
    %c256_47 = arith.constant 256 : index
    %c0_48 = arith.constant 0 : index
    %56 = vector.load %arg13[%c256_47, %c0_48] : memref<440x384xbf16, #tpu.memory_space<vmem>>, vector<128x384xbf16>
    %c0_49 = arith.constant 0 : index
    %c0_50 = arith.constant 0 : index
    %c0_51 = arith.constant 0 : index
    %57 = vector.load %arg4[%c0_49, %c0_50, %c0_51] : memref<3x384x128xbf16, #tpu.memory_space<vmem>>, vector<1x384x128xbf16>
    %58 = vector.shape_cast %57 : vector<1x384x128xbf16> to vector<384x128xbf16>
    %cst_52 = arith.constant dense<0.000000e+00> : vector<128x128xf32>
    %59 = tpu.matmul %56, %58, %cst_52 {dimension_numbers = #tpu.dot_dimension_numbers<[1], [0], [0], [1], [0, 0, 1, 1], [], []>} : vector<128x384xbf16>, vector<384x128xbf16>, vector<128x128xf32> -> vector<128x128xf32>
    %c280 = arith.constant 280 : index
    %c0_53 = arith.constant 0 : index
    %60 = vector.load %arg13[%c280, %c0_53] : memref<440x384xbf16, #tpu.memory_space<vmem>>, vector<128x384xbf16>
    %c1_54 = arith.constant 1 : index
    %c0_55 = arith.constant 0 : index
    %c0_56 = arith.constant 0 : index
    %61 = vector.load %arg4[%c1_54, %c0_55, %c0_56] : memref<3x384x128xbf16, #tpu.memory_space<vmem>>, vector<1x384x128xbf16>
    %62 = vector.shape_cast %61 : vector<1x384x128xbf16> to vector<384x128xbf16>
    %cst_57 = arith.constant dense<0.000000e+00> : vector<128x128xf32>
    %63 = tpu.matmul %60, %62, %cst_57 {dimension_numbers = #tpu.dot_dimension_numbers<[1], [0], [0], [1], [0, 0, 1, 1], [], []>} : vector<128x384xbf16>, vector<384x128xbf16>, vector<128x128xf32> -> vector<128x128xf32>
    %64 = arith.addf %59, %63 : vector<128x128xf32>
    %c304 = arith.constant 304 : index
    %c0_58 = arith.constant 0 : index
    %65 = vector.load %arg13[%c304, %c0_58] : memref<440x384xbf16, #tpu.memory_space<vmem>>, vector<128x384xbf16>
    %c2_59 = arith.constant 2 : index
    %c0_60 = arith.constant 0 : index
    %c0_61 = arith.constant 0 : index
    %66 = vector.load %arg4[%c2_59, %c0_60, %c0_61] : memref<3x384x128xbf16, #tpu.memory_space<vmem>>, vector<1x384x128xbf16>
    %67 = vector.shape_cast %66 : vector<1x384x128xbf16> to vector<384x128xbf16>
    %cst_62 = arith.constant dense<0.000000e+00> : vector<128x128xf32>
    %68 = tpu.matmul %65, %67, %cst_62 {dimension_numbers = #tpu.dot_dimension_numbers<[1], [0], [0], [1], [0, 0, 1, 1], [], []>} : vector<128x384xbf16>, vector<384x128xbf16>, vector<128x128xf32> -> vector<128x128xf32>
    %69 = arith.addf %64, %68 : vector<128x128xf32>
    %c0_63 = arith.constant 0 : index
    %c0_64 = arith.constant 0 : index
    %70 = vector.load %arg5[%c0_63, %c0_64] : memref<1x128xf32, #tpu.memory_space<vmem>>, vector<1x128xf32>
    %71 = vector.broadcast %70 : vector<1x128xf32> to vector<128x128xf32>
    %72 = arith.addf %69, %71 : vector<128x128xf32>
    %cst_65 = arith.constant 0.000000e+00 : f32
    %73 = vector.broadcast %cst_65 : f32 to vector<128x128xf32>
    %74 = arith.maximumf %72, %73 : vector<128x128xf32>
    %75 = tpu.concatenate %36, %55, %74 in 0 : vector<128x128xf32>, vector<128x128xf32>, vector<128x128xf32> -> vector<384x128xf32>
    %76 = vector.shape_cast %75 : vector<384x128xf32> to vector<8x48x128xf32>
    %77 = vector.extract_strided_slice %76 {offsets = [0, 0, 0], sizes = [8, 24, 128], strides = [1, 1, 1]} : vector<8x48x128xf32> to vector<8x24x128xf32>
    %78 = vector.extract_strided_slice %76 {offsets = [0, 24, 0], sizes = [8, 24, 128], strides = [1, 1, 1]} : vector<8x48x128xf32> to vector<8x24x128xf32>
    %79 = arith.maximumf %77, %78 : vector<8x24x128xf32>
    %80 = vector.shape_cast %79 : vector<8x24x128xf32> to vector<192x128xf32>
    %81 = vector.extract_strided_slice %80 {offsets = [0, 0], sizes = [184, 128], strides = [1, 1]} : vector<192x128xf32> to vector<184x128xf32>
    %82 = vector.extract_strided_slice %80 {offsets = [1, 0], sizes = [184, 128], strides = [1, 1]} : vector<192x128xf32> to vector<184x128xf32>
    %83 = arith.maximumf %81, %82 : vector<184x128xf32>
    %84 = arith.truncf %83 : vector<184x128xf32> to vector<184x128xbf16>
    %c0_66 = arith.constant 0 : index
    %c0_67 = arith.constant 0 : index
    %85 = vector.load %arg8[%c0_66, %c0_67] : memref<144x184xbf16, #tpu.memory_space<vmem>>, vector<144x184xbf16>
    %cst_68 = arith.constant dense<0.000000e+00> : vector<144x128xf32>
    %86 = tpu.matmul %85, %84, %cst_68 {dimension_numbers = #tpu.dot_dimension_numbers<[1], [0], [0], [1], [0, 0, 1, 1], [], []>} : vector<144x184xbf16>, vector<184x128xbf16>, vector<144x128xf32> -> vector<144x128xf32>
    %87 = vector.extract_strided_slice %86 {offsets = [0, 0], sizes = [136, 128], strides = [1, 1]} : vector<144x128xf32> to vector<136x128xf32>
    %88 = arith.truncf %87 : vector<136x128xf32> to vector<136x128xbf16>
    %c0_69 = arith.constant 0 : index
    %c0_70 = arith.constant 0 : index
    %89 = vector.load %arg14[%c0_69, %c0_70] : memref<136x384xbf16, #tpu.memory_space<vmem>>, vector<136x128xbf16>
    tpu.vector_store %arg14[%c0_69, %c0_70], %88 {strides = array<i32>} : memref<136x384xbf16, #tpu.memory_space<vmem>>, vector<136x128xbf16>,
    %90 = vector.extract_strided_slice %86 {offsets = [1, 0], sizes = [136, 128], strides = [1, 1]} : vector<144x128xf32> to vector<136x128xf32>
    %91 = arith.truncf %90 : vector<136x128xf32> to vector<136x128xbf16>
    %c0_71 = arith.constant 0 : index
    %c128_72 = arith.constant 128 : index
    %92 = vector.load %arg14[%c0_71, %c128_72] : memref<136x384xbf16, #tpu.memory_space<vmem>>, vector<136x128xbf16>
    tpu.vector_store %arg14[%c0_71, %c128_72], %91 {strides = array<i32>} : memref<136x384xbf16, #tpu.memory_space<vmem>>, vector<136x128xbf16>,
    %93 = vector.extract_strided_slice %86 {offsets = [2, 0], sizes = [136, 128], strides = [1, 1]} : vector<144x128xf32> to vector<136x128xf32>
    %94 = arith.truncf %93 : vector<136x128xf32> to vector<136x128xbf16>
    %c0_73 = arith.constant 0 : index
    %c256_74 = arith.constant 256 : index
    %95 = vector.load %arg14[%c0_73, %c256_74] : memref<136x384xbf16, #tpu.memory_space<vmem>>, vector<136x128xbf16>
    tpu.vector_store %arg14[%c0_73, %c256_74], %94 {strides = array<i32>} : memref<136x384xbf16, #tpu.memory_space<vmem>>, vector<136x128xbf16>,
    %c0_75 = arith.constant 0 : index
    %c0_76 = arith.constant 0 : index
    %96 = vector.load %arg14[%c0_75, %c0_76] : memref<136x384xbf16, #tpu.memory_space<vmem>>, vector<96x384xbf16>
    %c0_77 = arith.constant 0 : index
    %c0_78 = arith.constant 0 : index
    %c0_79 = arith.constant 0 : index
    %97 = vector.load %arg6[%c0_77, %c0_78, %c0_79] : memref<3x384x128xbf16, #tpu.memory_space<vmem>>, vector<1x384x128xbf16>
    %98 = vector.shape_cast %97 : vector<1x384x128xbf16> to vector<384x128xbf16>
    %cst_80 = arith.constant dense<0.000000e+00> : vector<96x128xf32>
    %99 = tpu.matmul %96, %98, %cst_80 {dimension_numbers = #tpu.dot_dimension_numbers<[1], [0], [0], [1], [0, 0, 1, 1], [], []>} : vector<96x384xbf16>, vector<384x128xbf16>, vector<96x128xf32> -> vector<96x128xf32>
    %c16 = arith.constant 16 : index
    %c0_81 = arith.constant 0 : index
    %100 = vector.load %arg14[%c16, %c0_81] : memref<136x384xbf16, #tpu.memory_space<vmem>>, vector<96x384xbf16>
    %c1_82 = arith.constant 1 : index
    %c0_83 = arith.constant 0 : index
    %c0_84 = arith.constant 0 : index
    %101 = vector.load %arg6[%c1_82, %c0_83, %c0_84] : memref<3x384x128xbf16, #tpu.memory_space<vmem>>, vector<1x384x128xbf16>
    %102 = vector.shape_cast %101 : vector<1x384x128xbf16> to vector<384x128xbf16>
    %cst_85 = arith.constant dense<0.000000e+00> : vector<96x128xf32>
    %103 = tpu.matmul %100, %102, %cst_85 {dimension_numbers = #tpu.dot_dimension_numbers<[1], [0], [0], [1], [0, 0, 1, 1], [], []>} : vector<96x384xbf16>, vector<384x128xbf16>, vector<96x128xf32> -> vector<96x128xf32>
    %104 = arith.addf %99, %103 : vector<96x128xf32>
    %c32 = arith.constant 32 : index
    %c0_86 = arith.constant 0 : index
    %105 = vector.load %arg14[%c32, %c0_86] : memref<136x384xbf16, #tpu.memory_space<vmem>>, vector<96x384xbf16>
    %c2_87 = arith.constant 2 : index
    %c0_88 = arith.constant 0 : index
    %c0_89 = arith.constant 0 : index
    %106 = vector.load %arg6[%c2_87, %c0_88, %c0_89] : memref<3x384x128xbf16, #tpu.memory_space<vmem>>, vector<1x384x128xbf16>
    %107 = vector.shape_cast %106 : vector<1x384x128xbf16> to vector<384x128xbf16>
    %cst_90 = arith.constant dense<0.000000e+00> : vector<96x128xf32>
    %108 = tpu.matmul %105, %107, %cst_90 {dimension_numbers = #tpu.dot_dimension_numbers<[1], [0], [0], [1], [0, 0, 1, 1], [], []>} : vector<96x384xbf16>, vector<384x128xbf16>, vector<96x128xf32> -> vector<96x128xf32>
    %109 = arith.addf %104, %108 : vector<96x128xf32>
    %c0_91 = arith.constant 0 : index
    %c0_92 = arith.constant 0 : index
    %110 = vector.load %arg7[%c0_91, %c0_92] : memref<1x128xf32, #tpu.memory_space<vmem>>, vector<1x128xf32>
    %111 = vector.broadcast %110 : vector<1x128xf32> to vector<96x128xf32>
    %112 = arith.addf %109, %111 : vector<96x128xf32>
    %cst_93 = arith.constant 0.000000e+00 : f32
    %113 = vector.broadcast %cst_93 : f32 to vector<96x128xf32>
    %114 = arith.maximumf %112, %113 : vector<96x128xf32>
    %115 = vector.shape_cast %114 : vector<96x128xf32> to vector<3x32x128xf32>
    %116 = vector.extract_strided_slice %115 {offsets = [0, 0, 0], sizes = [3, 16, 128], strides = [1, 1, 1]} : vector<3x32x128xf32> to vector<3x16x128xf32>
    %117 = vector.extract_strided_slice %115 {offsets = [0, 16, 0], sizes = [3, 16, 128], strides = [1, 1, 1]} : vector<3x32x128xf32> to vector<3x16x128xf32>
    %118 = arith.maximumf %116, %117 : vector<3x16x128xf32>
    %119 = vector.shape_cast %118 : vector<3x16x128xf32> to vector<48x128xf32>
    %120 = vector.extract_strided_slice %119 {offsets = [0, 0], sizes = [40, 128], strides = [1, 1]} : vector<48x128xf32> to vector<40x128xf32>
    %121 = vector.extract_strided_slice %119 {offsets = [1, 0], sizes = [40, 128], strides = [1, 1]} : vector<48x128xf32> to vector<40x128xf32>
    %122 = arith.maximumf %120, %121 : vector<40x128xf32>
    %123 = arith.truncf %122 : vector<40x128xf32> to vector<40x128xbf16>
    %c0_94 = arith.constant 0 : index
    %c0_95 = arith.constant 0 : index
    %124 = vector.load %arg9[%c0_94, %c0_95] : memref<8x40xbf16, #tpu.memory_space<vmem>>, vector<8x40xbf16>
    %cst_96 = arith.constant dense<0.000000e+00> : vector<8x128xf32>
    %125 = tpu.matmul %124, %123, %cst_96 {dimension_numbers = #tpu.dot_dimension_numbers<[1], [0], [0], [1], [0, 0, 1, 1], [], []>} : vector<8x40xbf16>, vector<40x128xbf16>, vector<8x128xf32> -> vector<8x128xf32>
    %126 = arith.truncf %125 : vector<8x128xf32> to vector<8x128xbf16>
    %c0_97 = arith.constant 0 : index
    %c0_98 = arith.constant 0 : index
    %127 = vector.load %arg10[%c0_97, %c0_98] : memref<128x128xbf16, #tpu.memory_space<vmem>>, vector<128x128xbf16>
    %cst_99 = arith.constant dense<0.000000e+00> : vector<8x128xf32>
    %128 = tpu.matmul %126, %127, %cst_99 {dimension_numbers = #tpu.dot_dimension_numbers<[1], [0], [0], [1], [0, 0, 1, 1], [], []>} : vector<8x128xbf16>, vector<128x128xbf16>, vector<8x128xf32> -> vector<8x128xf32>
    %c0_100 = arith.constant 0 : index
    %c0_101 = arith.constant 0 : index
    %129 = vector.load %arg11[%c0_100, %c0_101] : memref<1x128xf32, #tpu.memory_space<vmem>>, vector<1x128xf32>
    %130 = vector.broadcast %129 : vector<1x128xf32> to vector<8x128xf32>
    %131 = arith.addf %128, %130 : vector<8x128xf32>
    %c0_102 = arith.constant 0 : index
    %c0_103 = arith.constant 0 : index
    %c0_104 = arith.constant 0 : index
    %132 = vector.load %arg12[%c0_102, %c0_103, %c0_104] : memref<1x8x128xf32, #tpu.memory_space<vmem>>, vector<1x8x128xf32>
    %133 = vector.shape_cast %132 : vector<1x8x128xf32> to vector<8x128xf32>
    %134 = vector.shape_cast %131 : vector<8x128xf32> to vector<1x8x128xf32>
    tpu.vector_store %arg12[%c0_102, %c0_103, %c0_104], %134 {strides = array<i32>} : memref<1x8x128xf32, #tpu.memory_space<vmem>>, vector<1x8x128xf32>,
    return
  }
  func.func @transform_0(%arg0: i32) -> (i32, i32, i32) {
    %c0_i32 = arith.constant 0 : i32
    %c0_i32_0 = arith.constant 0 : i32
    %c0_i32_1 = arith.constant 0 : i32
    return %arg0, %c0_i32, %c0_i32_0 : i32, i32, i32
  }
  func.func @transform_1(%arg0: i32) -> (i32, i32) {
    %c0_i32 = arith.constant 0 : i32
    %c0_i32_0 = arith.constant 0 : i32
    %c0_i32_1 = arith.constant 0 : i32
    return %c0_i32, %c0_i32_0 : i32, i32
  }
  func.func @transform_2(%arg0: i32) -> (i32, i32) {
    %c0_i32 = arith.constant 0 : i32
    %c0_i32_0 = arith.constant 0 : i32
    %c0_i32_1 = arith.constant 0 : i32
    return %c0_i32, %c0_i32_0 : i32, i32
  }
  func.func @transform_3(%arg0: i32) -> (i32, i32, i32) {
    %c0_i32 = arith.constant 0 : i32
    %c0_i32_0 = arith.constant 0 : i32
    %c0_i32_1 = arith.constant 0 : i32
    %c0_i32_2 = arith.constant 0 : i32
    return %c0_i32, %c0_i32_0, %c0_i32_1 : i32, i32, i32
  }
  func.func @transform_4(%arg0: i32) -> (i32, i32) {
    %c0_i32 = arith.constant 0 : i32
    %c0_i32_0 = arith.constant 0 : i32
    %c0_i32_1 = arith.constant 0 : i32
    return %c0_i32, %c0_i32_0 : i32, i32
  }
  func.func @transform_5(%arg0: i32) -> (i32, i32, i32) {
    %c0_i32 = arith.constant 0 : i32
    %c0_i32_0 = arith.constant 0 : i32
    %c0_i32_1 = arith.constant 0 : i32
    %c0_i32_2 = arith.constant 0 : i32
    return %c0_i32, %c0_i32_0, %c0_i32_1 : i32, i32, i32
  }
  func.func @transform_6(%arg0: i32) -> (i32, i32) {
    %c0_i32 = arith.constant 0 : i32
    %c0_i32_0 = arith.constant 0 : i32
    %c0_i32_1 = arith.constant 0 : i32
    return %c0_i32, %c0_i32_0 : i32, i32
  }
  func.func @transform_7(%arg0: i32) -> (i32, i32) {
    %c0_i32 = arith.constant 0 : i32
    %c0_i32_0 = arith.constant 0 : i32
    %c0_i32_1 = arith.constant 0 : i32
    return %c0_i32, %c0_i32_0 : i32, i32
  }
  func.func @transform_8(%arg0: i32) -> (i32, i32) {
    %c0_i32 = arith.constant 0 : i32
    %c0_i32_0 = arith.constant 0 : i32
    %c0_i32_1 = arith.constant 0 : i32
    return %c0_i32, %c0_i32_0 : i32, i32
  }
  func.func @transform_9(%arg0: i32) -> (i32, i32) {
    %c0_i32 = arith.constant 0 : i32
    %c0_i32_0 = arith.constant 0 : i32
    %c0_i32_1 = arith.constant 0 : i32
    return %c0_i32, %c0_i32_0 : i32, i32
  }
  func.func @transform_10(%arg0: i32) -> (i32, i32) {
    %c0_i32 = arith.constant 0 : i32
    %c0_i32_0 = arith.constant 0 : i32
    %c0_i32_1 = arith.constant 0 : i32
    return %c0_i32, %c0_i32_0 : i32, i32
  }
  func.func @transform_11(%arg0: i32) -> (i32, i32, i32) {
    %c0_i32 = arith.constant 0 : i32
    %c0_i32_0 = arith.constant 0 : i32
    %c0_i32_1 = arith.constant 0 : i32
    return %arg0, %c0_i32, %c0_i32_0 : i32, i32, i32
  }
}

</mosaic_0001>

<bundles_post_ra>
// kernel: base_model_forward.1
= control target key start
LH: loop header
LB: loop body
LE: loop exit
PB: predicated region body
PF: predicated region fallthrough
CT: control target
= control target key end

     0   :  { %s11650_s17 = smov 0   ;;  %s14343_s0 = inlined_call_operand.vmem [shape: bf16[2,448,256], index: 0, kind: input, shape index: {}]   ;;  %s14344_s1 = inlined_call_operand.vmem [shape: bf16[256,128], index: 1, kind: input, shape index: {}]   ;;  %s14345_s2 = inlined_call_operand.vmem [shape: f32[1,128], index: 2, kind: input, shape index: {}]   ;;  %s14346_s3 = inlined_call_operand.vmem [shape: bf16[3,384,128], index: 3, kind: input, shape index: {}]   ;;  %s14347_s4 = inlined_call_operand.vmem [shape: f32[1,128], index: 4, kind: input, shape index: {}]   ;;  %s14348_s5 = inlined_call_operand.vmem [shape: bf16[3,384,128], index: 5, kind: input, shape index: {}]   ;;  %s14349_s6 = inlined_call_operand.vmem [shape: f32[1,128], index: 6, kind: input, shape index: {}]   ;;  %s14350_s7 = inlined_call_operand.vmem [shape: bf16[144,184], index: 7, kind: input, shape index: {}]   ;;  %s14351_s8 = inlined_call_operand.vmem [shape: bf16[8,40], index: 8, kind: input, shape index: {}]   ;;  %s14352_s9 = inlined_call_operand.vmem [shape: bf16[128,128], index: 9, kind: input, shape index: {}]   ;;  %s14353_s10 = inlined_call_operand.vmem [shape: f32[1,128], index: 10, kind: input, shape index: {}]   ;;  %s14354_s11 = inlined_call_operand.vmem [shape: f32[2,8,128], index: 11, kind: output, shape index: {}]  }
   0x1 LB: > { %s8433_s18 = sadd.s32 4294967295, %s11585_s17   ;;  %p8437_p0 = scmp.ge.s32.totalorder %s11585_s17, 1  ;;  %s11585_s17 = sphi %s11650_s17, %s21_s17  }
   0x2   : > { %p337_p1 = scmp.lt.s32.totalorder %s11585_s17, 3 }
   0x4   : > { %p338_p2 = pnand %p8437_p0, %p337_p1 }
   0x6   : > { %341 = sbr.rel (%p338_p2) target bundleno = 2117 (0x845), region = 64 }
   0xd   : > { %v10960_v0 = vld [vmem:[%s14344_s1] sm:$0xff]   ;;  %v14355_v1 = vmov 0   ;;  %v10961_v2 = vld [vmem:[%s14344_s1 + $0x8] sm:$0xff]   ;;  %p376_p3 = scmp.lt.s32.totalorder %s8433_s18, 1  ;;  %v10962_v3 = vld [vmem:[%s14344_s1 + $0x10] sm:$0xff]   ;;  %vm2119_vm0 = vcmask 1042432  }
   0xe   : > { %857 = vmatprep.subr.bf16.mxu0 %v14355_v1  ;;  %v10963_v4 = vld [vmem:[%s14344_s1 + $0x18] sm:$0xff]   ;;  %v10964_v5 = vld [vmem:[%s14344_s1 + $0x20] sm:$0xff]   ;;  %v10965_v7 = vld [vmem:[%s14344_s1 + $0x28] sm:$0xff]   ;;  %vm2120_vm1 = vcmask 1046532   ;;  %vm1452_vm2 = vsmask.f32 3328 }
   0xf   : > { %858 = vmatpush1.bf16.msra.mxu0 %v10960_v0  ;;  %s14562_s18 = smov (!%p376_p3, %s8433_s18), 1  ;;  %v10966_v8 = vld [vmem:[%s14344_s1 + $0x30] sm:$0xff]   ;;  %v10967_v9 = vld [vmem:[%s14344_s1 + $0x38] sm:$0xff]   ;;  %v10968_v10 = vld [vmem:[%s14344_s1 + $0x40] sm:$0xff]   ;;  %vm1453_vm3 = vsmask.f32 7440 }
  0x10   : > { %859 = vmatprep.subr.bf16.mxu0 %v14355_v1  ;;  %s10948_s27 = smul.u32 448, %s14562_s18  ;;  %v10969_v11 = vld [vmem:[%s14344_s1 + $0x48] sm:$0xff]   ;;  %v10970_v12 = vld [vmem:[%s14344_s1 + $0x50] sm:$0xff]   ;;  %v10971_v13 = vld [vmem:[%s14344_s1 + $0x58] sm:$0xff]   ;;  %vm6088_vm6 = vcmask 1046528   ;;  %vm6293_vm7 = vcmask 457728  }
  0x11   : > { %v10972_v14 = vld [vmem:[%s14344_s1 + $0x60] sm:$0xff]   ;;  %v10973_v15 = vld [vmem:[%s14344_s1 + $0x68] sm:$0xff]   ;;  %v10974_v16 = vld [vmem:[%s14344_s1 + $0x70] sm:$0xff]   ;;  %vm6321_vm8 = vcmask 1043456   ;;  %vm11589_vm9 = vmmov 0   ;;  %vm8220_vm10 = vcmask 326656  }
  0x12   : > { %s11683_s13 = scalar_lea.vmem %s14343_s0, %s10948_s27  ;;  %v10975_v17 = vld [vmem:[%s14344_s1 + $0x78] sm:$0xff]   ;;  %v11030_v22 = vld [vmem:[%s14346_s3 + $0x100] sm:$0xff]   ;;  %v11041_v46 = vld [vmem:[%s14346_s3 + $0x108] sm:$0xff]   ;;  %s8439_s25 = sshll.u32 %s14562_s18, 3 }
  0x13   : > { %860 = vmatpush1.bf16.msra.mxu0 %v10961_v2  ;;  %v10978_v6 = vld [vmem:[%s11683_s13 + $0x4] ss:$8 sps:$4 sm:$0xff]   ;;  %v10976_v18 = vld [vmem:[%s11683_s13] ss:$8 sps:$4 sm:$0xff]   ;;  %v10979_v19 = vld [vmem:[%s11683_s13 + $0x14] ss:$8 sps:$4 sm:$0xff]   ;;  %9299 = vmatprep.subr.bf16.mxu1 %v11030_v22  ;;  %s384_s29 = scalar_lea.vmem %s14354_s11, %s8439_s25 }
  0x14   : > { %861 = vmatprep.subr.bf16.mxu0 %v14355_v1  ;;  %889 = vmatprep.mubr.bf16.mxu0 %v10978_v6  ;;  %v10981_v20 = vld [vmem:[%s11683_s13 + $0x10] ss:$8 sps:$4 sm:$0xff]   ;;  %v10982_v21 = vld [vmem:[%s11683_s13 + $0x24] ss:$8 sps:$4 sm:$0xff]   ;;  %v10984_v24 = vld [vmem:[%s11683_s13 + $0x20] ss:$8 sps:$4 sm:$0xff]  }
  0x15   : > { %v11031_v23 = vld [vmem:[%s14346_s3 + $0xc0] sm:$0xff]   ;;  %v10985_v25 = vld [vmem:[%s11683_s13 + $0x34] ss:$8 sps:$4 sm:$0xff]   ;;  %v10987_v26 = vld [vmem:[%s11683_s13 + $0x30] ss:$8 sps:$4 sm:$0xff]  }
  0x16   : > { %9300 = vmatpush3.bf16.msra.mxu1 %v11031_v23  ;;  %v10988_v27 = vld [vmem:[%s11683_s13 + $0x44] ss:$8 sps:$4 sm:$0xff]   ;;  %v10990_v28 = vld [vmem:[%s11683_s13 + $0x40] ss:$8 sps:$4 sm:$0xff]   ;;  %v10991_v29 = vld [vmem:[%s11683_s13 + $0x54] ss:$8 sps:$4 sm:$0xff]  }
  0x17   : > { %862 = vmatpush1.bf16.msra.mxu0 %v10962_v3  ;;  %v10993_v30 = vld [vmem:[%s11683_s13 + $0x50] ss:$8 sps:$4 sm:$0xff]   ;;  %v10994_v31 = vld [vmem:[%s11683_s13 + $0x64] ss:$8 sps:$4 sm:$0xff]   ;;  %v10996_v32 = vld [vmem:[%s11683_s13 + $0x60] ss:$8 sps:$4 sm:$0xff]   ;;  %9301 = vmatprep.subr.bf16.mxu1 %v11041_v46 }
  0x18   : > { %863 = vmatprep.subr.bf16.mxu0 %v14355_v1  ;;  %v10997_v33 = vld [vmem:[%s11683_s13 + $0x74] ss:$8 sps:$4 sm:$0xff]   ;;  %v10999_v34 = vld [vmem:[%s11683_s13 + $0x70] ss:$8 sps:$4 sm:$0xff]   ;;  %v11000_v35 = vld [vmem:[%s11683_s13 + $0x84] ss:$8 sps:$4 sm:$0xff]  }
  0x19   : > { %v11002_v36 = vld [vmem:[%s11683_s13 + $0x80] ss:$8 sps:$4 sm:$0xff]   ;;  %v11003_v37 = vld [vmem:[%s11683_s13 + $0x94] ss:$8 sps:$4 sm:$0xff]   ;;  %v11005_v38 = vld [vmem:[%s11683_s13 + $0x90] ss:$8 sps:$4 sm:$0xff]  }
  0x1a   : > { %v11006_v39 = vld [vmem:[%s11683_s13 + $0xa4] ss:$8 sps:$4 sm:$0xff]   ;;  %v11008_v40 = vld [vmem:[%s11683_s13 + $0xa0] ss:$8 sps:$4 sm:$0xff]   ;;  %v11009_v41 = vld [vmem:[%s11683_s13 + $0xb4] ss:$8 sps:$4 sm:$0xff]  }
  0x1b   : > { %864 = vmatpush1.bf16.msra.mxu0 %v10963_v4  ;;  %v11011_v42 = vld [vmem:[%s11683_s13 + $0xb0] ss:$8 sps:$4 sm:$0xff]   ;;  %v11012_v43 = vld [vmem:[%s11683_s13 + $0xc4] ss:$8 sps:$4 sm:$0xff]   ;;  %v11014_v44 = vld [vmem:[%s11683_s13 + $0xc0] ss:$8 sps:$4 sm:$0xff]  }
  0x1c   : > { %865 = vmatprep.subr.bf16.mxu0 %v14355_v1  ;;  %v11015_v45 = vld [vmem:[%s11683_s13 + $0xd4] ss:$8 sps:$4 sm:$0xff]   ;;  %v11042_v47 = vld [vmem:[%s14346_s3 + $0xc8] sm:$0xff]   ;;  %v11017_v48 = vld [vmem:[%s11683_s13 + $0xd0] ss:$8 sps:$4 sm:$0xff]  }
  0x1d   : > { %9302 = vmatpush3.bf16.msra.mxu1 %v11042_v47  ;;  %v11018_v49 = vld [vmem:[%s11683_s13 + $0xe4] ss:$8 sps:$4 sm:$0xff]   ;;  %v11043_v50 = vld [vmem:[%s14346_s3 + $0x110] sm:$0xff]   ;;  %v11048_v52 = vld [vmem:[%s14346_s3 + $0x118] sm:$0xff]  }
  0x1e   : > { %v11046_v51 = vld [vmem:[%s14346_s3 + $0xd0] sm:$0xff]   ;;  %9303 = vmatprep.subr.bf16.mxu1 %v11043_v50  ;;  %v11049_v53 = vld [vmem:[%s14346_s3 + $0xd8] sm:$0xff]   ;;  %v11020_v54 = vld [vmem:[%s11683_s13 + $0xe0] ss:$8 sps:$4 sm:$0xff]  }
  0x1f   : > { %866 = vmatpush1.bf16.msra.mxu0 %v10964_v5  ;;  %v11021_v55 = vld [vmem:[%s11683_s13 + $0xf4] ss:$8 sps:$4 sm:$0xff]   ;;  %v11050_v56 = vld [vmem:[%s14346_s3 + $0x120] sm:$0xff]   ;;  %v11055_v58 = vld [vmem:[%s14346_s3 + $0x128] sm:$0xff]  }
  0x20   : > { %867 = vmatprep.subr.bf16.mxu0 %v14355_v1  ;;  %v11053_v57 = vld [vmem:[%s14346_s3 + $0xe0] sm:$0xff]   ;;  %v11056_v59 = vld [vmem:[%s14346_s3 + $0xe8] sm:$0xff]   ;;  %v11023_v60 = vld [vmem:[%s11683_s13 + $0xf0] ss:$8 sps:$4 sm:$0xff]  }
  0x21   : > { %9304 = vmatpush3.bf16.msra.mxu1 %v11046_v51  ;;  %v11024_v61 = vld [vmem:[%s11683_s13 + $0x104] ss:$8 sps:$4 sm:$0xff]   ;;  %v11057_v62 = vld [vmem:[%s14346_s3 + $0x130] sm:$0xff]   ;;  %v11062_v0 = vld [vmem:[%s14346_s3 + $0x138] sm:$0xff]  }
  0x22   : > { %9305 = vmatprep.subr.bf16.mxu1 %v11048_v52  ;;  %v11060_v63 = vld [vmem:[%s14346_s3 + $0xf0] sm:$0xff]   ;;  %v11063_v2 = vld [vmem:[%s14346_s3 + $0xf8] sm:$0xff]   ;;  %v11026_v3 = vld [vmem:[%s11683_s13 + $0x100] ss:$8 sps:$4 sm:$0xff]  }
  0x23   : > { %868 = vmatpush1.bf16.msra.mxu0 %v10965_v7  ;;  %v11027_v4 = vld [vmem:[%s11683_s13 + $0x114] ss:$8 sps:$4 sm:$0xff]   ;;  %v11029_v5 = vld [vmem:[%s11683_s13 + $0x110] ss:$8 sps:$4 sm:$0xff]   ;;  %v11032_v6 = vld [vmem:[%s11683_s13 + $0x124] ss:$8 sps:$4 sm:$0xff]  }
  0x24   : > { %869 = vmatprep.subr.bf16.mxu0 %v14355_v1  ;;  %v11034_v7 = vld [vmem:[%s11683_s13 + $0x120] ss:$8 sps:$4 sm:$0xff]   ;;  %vm11853_vm4 = vmor %vm2119_vm0, %vm2120_vm1 }
  0x25   : > { %9306 = vmatpush3.bf16.msra.mxu1 %v11049_v53  ;;  %vm11861_vm5 = vmor %vm1452_vm2, %vm1453_vm3 }
  0x26   : > { %9307 = vmatprep.subr.bf16.mxu1 %v11050_v56 }
  0x27   : > { %870 = vmatpush1.bf16.msra.mxu0 %v10966_v8  ;;  %v11819_v8 = vld [vmem:[%s14346_s3 + $0x140] sm:$0xff]  }
  0x28   : > { %871 = vmatprep.subr.bf16.mxu0 %v14355_v1 }
  0x29   : > { %9308 = vmatpush3.bf16.msra.mxu1 %v11053_v57 }
  0x2a   : > { %9309 = vmatprep.subr.bf16.mxu1 %v11055_v58 }
  0x2b   : > { %872 = vmatpush1.bf16.msra.mxu0 %v10967_v9  ;;  %v11035_v9 = vld [vmem:[%s11683_s13 + $0x134] ss:$8 sps:$4 sm:$0xff]  }
  0x2c   : > { %873 = vmatprep.subr.bf16.mxu0 %v14355_v1 }
  0x2d   : > { %9310 = vmatpush3.bf16.msra.mxu1 %v11056_v59 }
  0x2e   : > { %9311 = vmatprep.subr.bf16.mxu1 %v11057_v62 }
  0x2f   : > { %874 = vmatpush1.bf16.msra.mxu0 %v10968_v10  ;;  %v11037_v10 = vld [vmem:[%s11683_s13 + $0x130] ss:$8 sps:$4 sm:$0xff]  }
  0x30   : > { %875 = vmatprep.subr.bf16.mxu0 %v14355_v1 }
  0x31   : > { %9312 = vmatpush3.bf16.msra.mxu1 %v11060_v63 }
  0x32   : > { %9313 = vmatprep.subr.bf16.mxu1 %v11062_v0 }
  0x33   : > { %876 = vmatpush1.bf16.msra.mxu0 %v10969_v11  ;;  %v11038_v11 = vld [vmem:[%s11683_s13 + $0x144] ss:$8 sps:$4 sm:$0xff]  }
  0x34   : > { %877 = vmatprep.subr.bf16.mxu0 %v14355_v1 }
  0x35   : > { %9314 = vmatpush3.bf16.msra.mxu1 %v11063_v2 }
  0x36   : > { %10230 = vmatprep.subr.bf16.mxu1 %v11819_v8 }
  0x37   : > { %878 = vmatpush1.bf16.msra.mxu0 %v10970_v12  ;;  %v11040_v12 = vld [vmem:[%s11683_s13 + $0x140] ss:$8 sps:$4 sm:$0xff]  }
  0x38   : > { %879 = vmatprep.subr.bf16.mxu0 %v14355_v1 }
  0x3b   : > { %880 = vmatpush1.bf16.msra.mxu0 %v10971_v13  ;;  %v11044_v13 = vld [vmem:[%s11683_s13 + $0x154] ss:$8 sps:$4 sm:$0xff]  }
  0x3c   : > { %881 = vmatprep.subr.bf16.mxu0 %v14355_v1 }
  0x3f   : > { %882 = vmatpush1.bf16.msra.mxu0 %v10972_v14  ;;  %v11047_v14 = vld [vmem:[%s11683_s13 + $0x150] ss:$8 sps:$4 sm:$0xff]  }
  0x40   : > { %883 = vmatprep.subr.bf16.mxu0 %v14355_v1 }
  0x43   : > { %884 = vmatpush1.bf16.msra.mxu0 %v10973_v15  ;;  %v11051_v15 = vld [vmem:[%s11683_s13 + $0x164] ss:$8 sps:$4 sm:$0xff]  }
  0x44   : > { %885 = vmatprep.subr.bf16.mxu0 %v14355_v1 }
  0x47   : > { %886 = vmatpush1.bf16.msra.mxu0 %v10974_v16  ;;  %v11054_v16 = vld [vmem:[%s11683_s13 + $0x160] ss:$8 sps:$4 sm:$0xff]  }
  0x48   : > { %887 = vmatprep.subr.bf16.mxu0 %v14355_v1 }
  0x4b   : > { %888 = vmatpush1.bf16.msra.mxu0 %v10975_v17  ;;  %v11058_v17 = vld [vmem:[%s11683_s13 + $0x174] ss:$8 sps:$4 sm:$0xff]  }
  0x4c   : > { %9539 = vmatprep.subr.bf16.mxu0 %v11030_v22  ;;  %v11838_v22 = vld [vmem:[%s14346_s3 + $0x40] sm:$0xff]  }
  0x4e   : > { %890 = vmatmul.mubr.bf16.vlgmr.msra.gmra.mrb[0].mxu0 %v10976_v18  ;;  %v11061_v18 = vld [vmem:[%s11683_s13 + $0x170] ss:$8 sps:$4 sm:$0xff]  }
  0x4f   : > { %897 = vmatprep.mubr.bf16.mxu0 %v10979_v19  ;;  %9540 = vmatpush3.bf16.msra.mxu0 %v11031_v23  ;;  %v11066_v19 = vld [vmem:[%s11683_s13 + $0x184] ss:$8 sps:$4 sm:$0xff]   ;;  %v11074_v23 = vld [vmem:[%s11683_s13 + $0x190] ss:$8 sps:$4 sm:$0xff]  }
  0x50   : > { %9541 = vmatprep.subr.bf16.mxu0 %v11041_v46  ;;  %v14395_v46 = vmov 0 }
  0x51   : > { %v14396_v46 = vsel %vm11853_vm4, 4294967295, %v14395_v46 }
  0x52   : > { %14397 = vst [vmem:[#allocation4_spill] sm:$0xff] %v14396_v46 }
  0x53   : > { %9542 = vmatpush3.bf16.msra.mxu0 %v11042_v47 }
  0x54   : > { %9543 = vmatprep.subr.bf16.mxu0 %v11043_v50 }
  0x56   : > { %898 = vmatmul.mubr.bf16.gmra.mrb[4].mxu0 %v10981_v20  ;;  %v11068_v20 = vld [vmem:[%s11683_s13 + $0x180] ss:$8 sps:$4 sm:$0xff]  }
  0x57   : > { %905 = vmatprep.mubr.bf16.mxu0 %v10982_v21  ;;  %9544 = vmatpush3.bf16.msra.mxu0 %v11046_v51  ;;  %v11072_v21 = vld [vmem:[%s11683_s13 + $0x194] ss:$8 sps:$4 sm:$0xff]  }
  0x58   : > { %9545 = vmatprep.subr.bf16.mxu0 %v11048_v52 }
  0x5b   : > { %9546 = vmatpush3.bf16.msra.mxu0 %v11049_v53 }
  0x5c   : > { %9547 = vmatprep.subr.bf16.mxu0 %v11050_v56 }
  0x5e   : > { %906 = vmatmul.mubr.bf16.gmra.mrb[8].mxu0 %v10984_v24  ;;  %v11088_v24 = vld [vmem:[%s11683_s13 + $0x1a4] ss:$8 sps:$4 sm:$0xff]  }
  0x5f   : > { %913 = vmatprep.mubr.bf16.mxu0 %v10985_v25  ;;  %9548 = vmatpush3.bf16.msra.mxu0 %v11053_v57  ;;  %v11091_v25 = vld [vmem:[%s11683_s13 + $0x1a0] ss:$8 sps:$4 sm:$0xff]   ;;  %v14398_v57 = vmov 0 }
  0x60   : > { %9549 = vmatprep.subr.bf16.mxu0 %v11055_v58  ;;  %v14399_v57 = vsel %vm11861_vm5, 4294967295, %v14398_v57 }
  0x61   : > { %14400 = vst [vmem:[#allocation5_spill] sm:$0xff] %v14399_v57 }
  0x63   : > { %9550 = vmatpush3.bf16.msra.mxu0 %v11056_v59 }
  0x64   : > { %9551 = vmatprep.subr.bf16.mxu0 %v11057_v62 }
  0x66   : > { %914 = vmatmul.mubr.bf16.gmra.mrb[12].mxu0 %v10987_v26  ;;  %v11094_v26 = vld [vmem:[%s11683_s13 + $0x1b4] ss:$8 sps:$4 sm:$0xff]  }
  0x67   : > { %921 = vmatprep.mubr.bf16.mxu0 %v10988_v27  ;;  %9552 = vmatpush3.bf16.msra.mxu0 %v11060_v63  ;;  %v11848_v27 = vld [vmem:[%s14345_s2] ss:$0 sm:$0xff] }
  0x68   : > { %9553 = vmatprep.subr.bf16.mxu0 %v11062_v0 }
  0x6b   : > { %9554 = vmatpush3.bf16.msra.mxu0 %v11063_v2 }
  0x6c   : > { %9619 = vmatprep.subr.bf16.mxu0 %v11838_v22 }
  0x6e   : > { %922 = vmatmul.mubr.bf16.gmra.mrb[16].mxu0 %v10990_v28 }
  0x6f   : > { %929 = vmatprep.mubr.bf16.mxu0 %v10991_v29 }
  0x76   : > { %930 = vmatmul.mubr.bf16.gmra.mrb[20].mxu0 %v10993_v30 }
  0x77   : > { %937 = vmatprep.mubr.bf16.mxu0 %v10994_v31  ;;  %v11097_v31 = vld [vmem:[%s11683_s13 + $0x1b0] ss:$8 sps:$4 sm:$0xff]  }
  0x7e   : > { %938 = vmatmul.mubr.bf16.gmra.mrb[24].mxu0 %v10996_v32 }
  0x7f   : > { %945 = vmatprep.mubr.bf16.mxu0 %v10997_v33 }
  0x86   : > { %946 = vmatmul.mubr.bf16.gmra.mrb[28].mxu0 %v10999_v34 }
  0x87   : > { %953 = vmatprep.mubr.bf16.mxu0 %v11000_v35 }
  0x8e   : > { %954 = vmatmul.mubr.bf16.gmra.mrb[32].mxu0 %v11002_v36 }
  0x8f   : > { %961 = vmatprep.mubr.bf16.mxu0 %v11003_v37 }
  0x96   : > { %962 = vmatmul.mubr.bf16.gmra.mrb[36].mxu0 %v11005_v38 }
  0x97   : > { %969 = vmatprep.mubr.bf16.mxu0 %v11006_v39 }
  0x9e   : > { %970 = vmatmul.mubr.bf16.gmra.mrb[40].mxu0 %v11008_v40 }
  0x9f   : > { %977 = vmatprep.mubr.bf16.mxu0 %v11009_v41 }
  0xa6   : > { %978 = vmatmul.mubr.bf16.gmra.mrb[44].mxu0 %v11011_v42 }
  0xa7   : > { %985 = vmatprep.mubr.bf16.mxu0 %v11012_v43 }
  0xae   : > { %986 = vmatmul.mubr.bf16.gmra.mrb[48].mxu0 %v11014_v44 }
  0xaf   : > { %993 = vmatprep.mubr.bf16.mxu0 %v11015_v45 }
  0xb6   : > { %994 = vmatmul.mubr.bf16.gmra.mrb[52].mxu0 %v11017_v48 }
  0xb7   : > { %1001 = vmatprep.mubr.bf16.mxu0 %v11018_v49 }
  0xbe   : > { %1002 = vmatmul.mubr.bf16.gmra.mrb[56].mxu0 %v11020_v54 }
  0xbf   : > { %1009 = vmatprep.mubr.bf16.mxu0 %v11021_v55 }
  0xc6   : > { %1010 = vmatmul.mubr.bf16.gmra.mrb[60].mxu0 %v11023_v60 }
  0xc7   : > { %1017 = vmatprep.mubr.bf16.mxu0 %v11024_v61 }
  0xce   : > { %1018 = vmatmul.mubr.bf16.gmra.mrb[64].mxu0 %v11026_v3 }
  0xcf   : > { %1025 = vmatprep.mubr.bf16.mxu0 %v11027_v4 }
  0xd6   : > { %1026 = vmatmul.mubr.bf16.gmra.mrb[68].mxu0 %v11029_v5 }
  0xd7   : > { %1033 = vmatprep.mubr.bf16.mxu0 %v11032_v6 }
  0xde   : > { %1034 = vmatmul.mubr.bf16.gmra.mrb[72].mxu0 %v11034_v7 }
  0xdf   : > { %1041 = vmatprep.mubr.bf16.mxu0 %v11035_v9 }
  0xe6   : > { %1042 = vmatmul.mubr.bf16.gmra.mrb[76].mxu0 %v11037_v10 }
  0xe7   : > { %1049 = vmatprep.mubr.bf16.mxu0 %v11038_v11 }
  0xee   : > { %1050 = vmatmul.mubr.bf16.gmra.mrb[80].mxu0 %v11040_v12 }
  0xef   : > { %1057 = vmatprep.mubr.bf16.mxu0 %v11044_v13 }
  0xf6   : > { %1058 = vmatmul.mubr.bf16.gmra.mrb[84].mxu0 %v11047_v14 }
  0xf7   : > { %1065 = vmatprep.mubr.bf16.mxu0 %v11051_v15 }
  0xfe   : > { %1066 = vmatmul.mubr.bf16.gmra.mrb[88].mxu0 %v11054_v16 }
  0xff   : > { %1073 = vmatprep.mubr.bf16.mxu0 %v11058_v17 }
 0x106   : > { %1074 = vmatmul.mubr.bf16.gmra.mrb[92].mxu0 %v11061_v18 }
 0x107   : > { %1081 = vmatprep.mubr.bf16.mxu0 %v11066_v19 }
 0x10e   : > { %1082 = vmatmul.mubr.bf16.gmra.mrb[96].mxu0 %v11068_v20 }
 0x10f   : > { %1089 = vmatprep.mubr.bf16.mxu0 %v11072_v21 }
 0x116   : > { %1090 = vmatmul.mubr.bf16.gmra.mrb[100].mxu0 %v11074_v23 }
 0x117   : > { %1097 = vmatprep.mubr.bf16.mxu0 %v11088_v24 }
 0x11e   : > { %1098 = vmatmul.mubr.bf16.gmra.mrb[104].mxu0 %v11091_v25 }
 0x11f   : > { %1105 = vmatprep.mubr.bf16.mxu0 %v11094_v26 }
 0x121   : > { %v891_v28 = vpop.f32.mrb[0].mxu0 }
 0x122   : > { %v892_v29 = vadd.f32 %v11848_v27, %v891_v28  ;;  %v893_v30 = vpop.f32.mrb[1].mxu0 }
 0x123   : > { %v894_v32 = vpop.f32.mrb[2].mxu0 }
 0x124   : > { %v1114_v33 = vmax.f32 %v892_v29, 0.0  ;;  %v895_v34 = vadd.f32 %v11848_v27, %v894_v32  ;;  %v896_v35 = vpop.f32.mrb[3].mxu0 }
 0x126   : > { %v9223_v36 = vpack.c.bf16 %v1114_v33, %v1114_v33  ;;  %v1115_v37 = vmax.f32 %v895_v34, 0.0  ;;  %1106 = vmatmul.mubr.bf16.gmra.mrb[108].mxu0 %v11097_v31 }
 0x128   : > { %1391 = vst [vmem:[#allocation2] sm:$0xf] %v9223_v36  ;;  %v1456_v38 = vshrl.u32 %v9223_v36, 16  ;;  %v1459_v39 = vshll.u32 %v9223_v36, 16  ;;  %v9224_v40 = vpack.c.bf16 %v1115_v37, %v1115_v37  ;;  %v8570_v48 = vrot.slane %v9223_v36, 9 }
 0x129   : > { %v899_v41 = vpop.f32.mrb[4].mxu0 }
 0x12a   : > { %v1458_v42 = vrot.slane %v1456_v38, 4  ;;  %v1461_v43 = vrot.slane %v1459_v39, 5  ;;  %1392 = vst [vmem:[#allocation2 + $0xc] sm:$0xf] %v9224_v40  ;;  %v1465_v44 = vshll.u32 %v9224_v40, 16  ;;  %v1469_v45 = vshrl.u32 %v9224_v40, 16 }
 0x12b   : > { %v901_v47 = vpop.f32.mrb[5].mxu0  ;;  %v2124_v49 = vrot.slane %v9224_v40, 5  ;;  %v900_v50 = vadd.f32 %v11848_v27, %v899_v41 }
 0x12c   : > { %v902_v51 = vpop.f32.mrb[6].mxu0  ;;  %v1462_v52 = vor.u32 %v1461_v43, %v1458_v42  ;;  %v1467_v53 = vrot.slane %v1465_v44, 5  ;;  %v1471_v54 = vrot.slane %v1469_v45, 4 }
 0x12d   : > { %v903_v55 = vadd.f32 %v11848_v27, %v902_v51  ;;  %v904_v56 = vpop.f32.mrb[7].mxu0  ;;  %v2125_v58 = vsel %vm11853_vm4, %v8570_v48, %v2124_v49  ;;  %v1116_v59 = vmax.f32 %v900_v50, 0.0  ;;  %v2126_v2 = vrot.slane %v2124_v49, 4 }
 0x12e   : > { %v1463_v60 = vrot.slane %v1462_v52, 4  ;;  %v1472_v61 = vor.u32 %v1471_v54, %v1467_v53  ;;  %2343 = vst [vmem:[#allocation2 + $0x8] sm:$0xf] %v2125_v58 }
 0x12f   : > { %v1117_v62 = vmax.f32 %v903_v55, 0.0  ;;  %v9225_v63 = vpack.c.bf16 %v1116_v59, %v1116_v59 }
 0x130   : > { %v1468_v0 = vsel %vm11861_vm5, %v1463_v60, %v1467_v53  ;;  %v1473_v4 = vrot.slane %v1472_v61, 4 }
 0x131   : > { %v9226_v3 = vpack.c.bf16 %v1117_v62, %v1117_v62  ;;  %2064 = vst [vmem:[#allocation2 + $0x4] sm:$0xf] %v1468_v0  ;;  %1393 = vst [vmem:[#allocation2 + $0x18] sm:$0xf] %v9225_v63  ;;  %v1475_v5 = vshll.u32 %v9225_v63, 16  ;;  %v1479_v6 = vshrl.u32 %v9225_v63, 16 }
 0x132   : > { %v2127_v7 = vrot.slane %v9225_v63, 5  ;;  %v907_v9 = vpop.f32.mrb[8].mxu0 }
 0x133   : > { %1394 = vst [vmem:[#allocation2 + $0x24] sm:$0xf] %v9226_v3  ;;  %v1485_v10 = vshll.u32 %v9226_v3, 16  ;;  %v1489_v11 = vshrl.u32 %v9226_v3, 16  ;;  %v2130_v12 = vrot.slane %v9226_v3, 5  ;;  %v908_v13 = vadd.f32 %v11848_v27, %v907_v9  ;;  %v909_v14 = vpop.f32.mrb[9].mxu0 }
 0x134   : > { %v1477_v15 = vrot.slane %v1475_v5, 5  ;;  %v1481_v16 = vrot.slane %v1479_v6, 4  ;;  %v2128_v17 = vsel %vm11853_vm4, %v2126_v2, %v2127_v7  ;;  %v2129_v18 = vrot.slane %v2127_v7, 4  ;;  %v910_v19 = vpop.f32.mrb[10].mxu0 }
 0x135   : > { %2344 = vst [vmem:[#allocation2 + $0x14] sm:$0xf] %v2128_v17  ;;  %v1487_v20 = vrot.slane %v1485_v10, 5  ;;  %v1491_v21 = vrot.slane %v1489_v11, 4  ;;  %v1118_v23 = vmax.f32 %v908_v13, 0.0  ;;  %v912_v24 = vpop.f32.mrb[11].mxu0  ;;  %v911_v29 = vadd.f32 %v11848_v27, %v910_v19 }
 0x136   : > { %v1478_v25 = vsel %vm11861_vm5, %v1473_v4, %v1477_v15  ;;  %v1482_v26 = vor.u32 %v1481_v16, %v1477_v15  ;;  %v2131_v28 = vsel %vm11853_vm4, %v2129_v18, %v2130_v12  ;;  %v2132_v34 = vrot.slane %v2130_v12, 4 }
 0x137   : > { %2065 = vst [vmem:[#allocation2 + $0x10] sm:$0xf] %v1478_v25  ;;  %v1492_v30 = vor.u32 %v1491_v21, %v1487_v20  ;;  %2345 = vst [vmem:[#allocation2 + $0x20] sm:$0xf] %v2131_v28  ;;  %v9227_v31 = vpack.c.bf16 %v1118_v23, %v1118_v23  ;;  %v1119_v33 = vmax.f32 %v911_v29, 0.0 }
 0x138   : > { %v1483_v32 = vrot.slane %v1482_v26, 4 }
 0x139   : > { %1395 = vst [vmem:[#allocation2 + $0x30] sm:$0xf] %v9227_v31  ;;  %v1495_v35 = vshll.u32 %v9227_v31, 16  ;;  %v1499_v36 = vshrl.u32 %v9227_v31, 16  ;;  %v2133_v37 = vrot.slane %v9227_v31, 5  ;;  %v1493_v39 = vrot.slane %v1492_v30, 4 }
 0x13a   : > { %v1488_v38 = vsel %vm11861_vm5, %v1483_v32, %v1487_v20  ;;  %v9228_v40 = vpack.c.bf16 %v1119_v33, %v1119_v33  ;;  %v915_v41 = vpop.f32.mrb[12].mxu0 }
 0x13b   : > { %2066 = vst [vmem:[#allocation2 + $0x1c] sm:$0xf] %v1488_v38  ;;  %v1497_v42 = vrot.slane %v1495_v35, 5  ;;  %v1501_v43 = vrot.slane %v1499_v36, 4  ;;  %v2134_v44 = vsel %vm11853_vm4, %v2132_v34, %v2133_v37  ;;  %v2135_v45 = vrot.slane %v2133_v37, 4  ;;  %v917_v47 = vpop.f32.mrb[13].mxu0 }
 0x13c   : > { %2346 = vst [vmem:[#allocation2 + $0x2c] sm:$0xf] %v2134_v44  ;;  %1396 = vst [vmem:[#allocation2 + $0x3c] sm:$0xf] %v9228_v40  ;;  %v1505_v48 = vshll.u32 %v9228_v40, 16  ;;  %v1509_v49 = vshrl.u32 %v9228_v40, 16  ;;  %v916_v51 = vadd.f32 %v11848_v27, %v915_v41 }
 0x13d   : > { %v2136_v50 = vrot.slane %v9228_v40, 5  ;;  %v918_v52 = vpop.f32.mrb[14].mxu0  ;;  %v1498_v53 = vsel %vm11861_vm5, %v1493_v39, %v1497_v42  ;;  %v1502_v54 = vor.u32 %v1501_v43, %v1497_v42 }
 0x13e   : > { %v919_v55 = vadd.f32 %v11848_v27, %v918_v52  ;;  %v920_v56 = vpop.f32.mrb[15].mxu0  ;;  %2067 = vst [vmem:[#allocation2 + $0x28] sm:$0xf] %v1498_v53  ;;  %v1507_v58 = vrot.slane %v1505_v48, 5  ;;  %v1511_v59 = vrot.slane %v1509_v49, 4  ;;  %v1120_v62 = vmax.f32 %v916_v51, 0.0 }
 0x13f   : > { %v2137_v60 = vsel %vm11853_vm4, %v2135_v45, %v2136_v50  ;;  %v1503_v61 = vrot.slane %v1502_v54, 4  ;;  %v2138_v5 = vrot.slane %v2136_v50, 4 }
 0x140   : > { %2347 = vst [vmem:[#allocation2 + $0x38] sm:$0xf] %v2137_v60  ;;  %v1121_v63 = vmax.f32 %v919_v55, 0.0  ;;  %v1512_v0 = vor.u32 %v1511_v59, %v1507_v58  ;;  %v9229_v3 = vpack.c.bf16 %v1120_v62, %v1120_v62 }
 0x141   : > { %v1508_v2 = vsel %vm11861_vm5, %v1503_v61, %v1507_v58  ;;  %v923_v6 = vpop.f32.mrb[16].mxu0 }
 0x142   : > { %v9230_v4 = vpack.c.bf16 %v1121_v63, %v1121_v63  ;;  %2068 = vst [vmem:[#allocation2 + $0x34] sm:$0xf] %v1508_v2  ;;  %1397 = vst [vmem:[#allocation2 + $0x48] sm:$0xf] %v9229_v3  ;;  %v1515_v7 = vshll.u32 %v9229_v3, 16  ;;  %v1519_v9 = vshrl.u32 %v9229_v3, 16  ;;  %v924_v16 = vadd.f32 %v11848_v27, %v923_v6 }
 0x143   : > { %v2139_v10 = vrot.slane %v9229_v3, 5  ;;  %v925_v12 = vpop.f32.mrb[17].mxu0  ;;  %v1513_v13 = vrot.slane %v1512_v0, 4  ;;  %v11075_v2 = vld [vmem:[%s14346_s3 + $0x148] sm:$0xff]  }
 0x144   : > { %1398 = vst [vmem:[#allocation2 + $0x54] sm:$0xf] %v9230_v4  ;;  %v1525_v11 = vshll.u32 %v9230_v4, 16  ;;  %v1529_v14 = vshrl.u32 %v9230_v4, 16  ;;  %v2142_v15 = vrot.slane %v9230_v4, 5  ;;  %v926_v17 = vpop.f32.mrb[18].mxu0 }
 0x145   : > { %v1517_v18 = vrot.slane %v1515_v7, 5  ;;  %v1521_v19 = vrot.slane %v1519_v9, 4  ;;  %v2140_v20 = vsel %vm11853_vm4, %v2138_v5, %v2139_v10  ;;  %v2141_v21 = vrot.slane %v2139_v10, 4  ;;  %v928_v23 = vpop.f32.mrb[19].mxu0  ;;  %v2404_v43 = vld [vmem:[#allocation2 + $0x24] sm:$0xff] }
 0x146   : > { %2348 = vst [vmem:[#allocation2 + $0x44] sm:$0xf] %v2140_v20  ;;  %v1527_v24 = vrot.slane %v1525_v11, 5  ;;  %v1531_v25 = vrot.slane %v1529_v14, 4  ;;  %v1122_v26 = vmax.f32 %v924_v16, 0.0  ;;  %v927_v31 = vadd.f32 %v11848_v27, %v926_v17 }
 0x147   : > { %v1518_v28 = vsel %vm11861_vm5, %v1513_v13, %v1517_v18  ;;  %v1522_v29 = vor.u32 %v1521_v19, %v1517_v18  ;;  %v2143_v30 = vsel %vm11853_vm4, %v2141_v21, %v2142_v15  ;;  %v2144_v35 = vrot.slane %v2142_v15, 4  ;;  %v11918_v9 = vld [vmem:[#allocation2 + $0x38] sm:$0xf] }
 0x148   : > { %2069 = vst [vmem:[#allocation2 + $0x40] sm:$0xf] %v1518_v28  ;;  %v1532_v32 = vor.u32 %v1531_v25, %v1527_v24  ;;  %2349 = vst [vmem:[#allocation2 + $0x50] sm:$0xf] %v2143_v30  ;;  %v9231_v33 = vpack.c.bf16 %v1122_v26, %v1122_v26  ;;  %v1123_v36 = vmax.f32 %v927_v31, 0.0 }
 0x149   : > { %v1523_v34 = vrot.slane %v1522_v29, 4  ;;  %v11897_v37 = vld [vmem:[#allocation2 + $0x30] sm:$0xff]  ;;  %v931_v42 = vpop.f32.mrb[20].mxu0 }
 0x14a   : > { %v1533_v38 = vrot.slane %v1532_v32, 4  ;;  %1399 = vst [vmem:[#allocation2 + $0x60] sm:$0xf] %v9231_v33  ;;  %v1535_v39 = vshll.u32 %v9231_v33, 16  ;;  %v1539_v40 = vshrl.u32 %v9231_v33, 16  ;;  %v2145_v41 = vrot.slane %v9231_v33, 5 }
 0x14b   : > { %v1528_v44 = vsel %vm11861_vm5, %v1523_v34, %v1527_v24  ;;  %v9232_v45 = vpack.c.bf16 %v1123_v36, %v1123_v36  ;;  %v932_v47 = vadd.f32 %v11848_v27, %v931_v42  ;;  %v933_v48 = vpop.f32.mrb[21].mxu0  ;;  %v8620_v49 = vcombine.high %v2404_v43, %v11897_v37 }
 0x14c   : > { %2070 = vst [vmem:[#allocation2 + $0x4c] sm:$0xf] %v1528_v44  ;;  %v1537_v50 = vrot.slane %v1535_v39, 5  ;;  %v1541_v51 = vrot.slane %v1539_v40, 4  ;;  %v2146_v52 = vsel %vm11853_vm4, %v2144_v35, %v2145_v41  ;;  %v2147_v53 = vrot.slane %v2145_v41, 4  ;;  %v934_v54 = vpop.f32.mrb[22].mxu0 }
 0x14d   : > { %2350 = vst [vmem:[#allocation2 + $0x5c] sm:$0xf] %v2146_v52  ;;  %1400 = vst [vmem:[#allocation2 + $0x6c] sm:$0xf] %v9232_v45  ;;  %v1545_v55 = vshll.u32 %v9232_v45, 16  ;;  %v1549_v56 = vshrl.u32 %v9232_v45, 16  ;;  %2837 = vmatprep.mubr.bf16.mxu1 %v8620_v49  ;;  %v935_v63 = vadd.f32 %v11848_v27, %v934_v54  ;;  %v8619_v0 = vcombine.low %v2404_v43, %v11897_v37 }
 0x14e   : > { %v2148_v58 = vrot.slane %v9232_v45, 5  ;;  %v1124_v59 = vmax.f32 %v932_v47, 0.0  ;;  %v936_v60 = vpop.f32.mrb[23].mxu0  ;;  %v1538_v61 = vsel %vm11861_vm5, %v1533_v38, %v1537_v50  ;;  %v1542_v62 = vor.u32 %v1541_v51, %v1537_v50  ;;  %v11912_v3 = vld [vmem:[#allocation2 + $0x44] sm:$0xf]  ;;  %v11081_v47 = vld [vmem:[%s14346_s3 + $0x158] sm:$0xff]  }
 0x14f   : > { %2071 = vst [vmem:[#allocation2 + $0x58] sm:$0xf] %v1538_v61  ;;  %v1547_v4 = vrot.slane %v1545_v55, 5  ;;  %v1551_v5 = vrot.slane %v1549_v56, 4  ;;  %v11916_v7 = vld [vmem:[#allocation2 + $0x3c] sm:$0xff]  ;;  %v1125_v13 = vmax.f32 %v935_v63, 0.0  ;;  %2838 = vmatmul.mubr.bf16.vlgmr.msra.gmra.mrb[0].mxu1 %v8619_v0 }
 0x150   : > { %v2149_v6 = vsel %vm11853_vm4, %v2147_v53, %v2148_v58  ;;  %v1543_v10 = vrot.slane %v1542_v62, 4  ;;  %v2150_v11 = vrot.slane %v2148_v58, 4  ;;  %v9233_v12 = vpack.c.bf16 %v1124_v59, %v1124_v59  ;;  %10231 = vmatpush3.bf16.msra.mxu1 %v11819_v8  ;;  %v11078_v8 = vld [vmem:[%s14346_s3 + $0x150] sm:$0xff]   ;;  %v11084_v58 = vld [vmem:[%s14346_s3 + $0x160] sm:$0xff]   ;;  %v2402_v59 = vld [vmem:[#allocation2 + $0x18] sm:$0xff] }
 0x151   : > { %2351 = vst [vmem:[#allocation2 + $0x68] sm:$0xf] %v2149_v6  ;;  %v1552_v14 = vor.u32 %v1551_v5, %v1547_v4  ;;  %v939_v23 = vpop.f32.mrb[24].mxu0  ;;  %10232 = vmatprep.subr.bf16.mxu1 %v11075_v2  ;;  %v9234_v25 = vpack.c.bf16 %v1125_v13, %v1125_v13 }
 0x152   : > { %v1548_v18 = vsel %vm11861_vm5, %v1543_v10, %v1547_v4  ;;  %1401 = vst [vmem:[#allocation2 + $0x78] sm:$0xf] %v9233_v12  ;;  %v1555_v19 = vshll.u32 %v9233_v12, 16  ;;  %v1559_v20 = vshrl.u32 %v9233_v12, 16  ;;  %v2151_v21 = vrot.slane %v9233_v12, 5  ;;  %v941_v28 = vpop.f32.mrb[25].mxu0 }
 0x153   : > { %v1553_v24 = vrot.slane %v1552_v14, 4  ;;  %2072 = vst [vmem:[#allocation2 + $0x64] sm:$0xf] %v1548_v18  ;;  %v940_v26 = vadd.f32 %v11848_v27, %v939_v23  ;;  %v11933_v29 = vld [vmem:[#allocation2 + $0x48] sm:$0xff]  ;;  %v942_v34 = vpop.f32.mrb[26].mxu0  ;;  %v1565_v35 = vshll.u32 %v9234_v25, 16 }
 0x154   : > { %v1557_v30 = vrot.slane %v1555_v19, 5  ;;  %v1561_v31 = vrot.slane %v1559_v20, 4  ;;  %v2152_v32 = vsel %vm11853_vm4, %v2150_v11, %v2151_v21  ;;  %v2153_v33 = vrot.slane %v2151_v21, 4  ;;  %1402 = vst [vmem:[#allocation2 + $0x84] sm:$0xf] %v9234_v25  ;;  %v944_v40 = vpop.f32.mrb[27].mxu0  ;;  %10233 = vmatpush3.bf16.msra.mxu1 %v11075_v2 }
 0x155   : > { %2352 = vst [vmem:[#allocation2 + $0x74] sm:$0xf] %v2152_v32  ;;  %v1569_v36 = vshrl.u32 %v9234_v25, 16  ;;  %v2154_v38 = vrot.slane %v9234_v25, 5  ;;  %v1126_v39 = vmax.f32 %v940_v26, 0.0  ;;  %v943_v43 = vadd.f32 %v11848_v27, %v942_v34  ;;  %10234 = vmatprep.subr.bf16.mxu1 %v11078_v8  ;;  %v11087_v26 = vld [vmem:[%s14346_s3 + $0x168] sm:$0xff]  }
 0x156   : > { %v1558_v41 = vsel %vm11861_vm5, %v1553_v24, %v1557_v30  ;;  %v1562_v42 = vor.u32 %v1561_v31, %v1557_v30  ;;  %v8623_v44 = vcombine.high %v11916_v7, %v11933_v29  ;;  %v11942_v45 = vld [vmem:[#allocation2 + $0x54] sm:$0xff]  ;;  %v1567_v48 = vrot.slane %v1565_v35, 5  ;;  %v11977_v34 = vld [vmem:[#allocation2 + $0x5c] sm:$0xf] }
 0x157   : > { %2073 = vst [vmem:[#allocation2 + $0x70] sm:$0xf] %v1558_v41  ;;  %v1571_v49 = vrot.slane %v1569_v36, 4  ;;  %v2155_v50 = vsel %vm11853_vm4, %v2153_v33, %v2154_v38  ;;  %v9235_v52 = vpack.c.bf16 %v1126_v39, %v1126_v39  ;;  %v1127_v53 = vmax.f32 %v943_v43, 0.0  ;;  %v11981_v39 = vld [vmem:[#allocation2 + $0x50] sm:$0xf] }
 0x158   : > { %v1563_v51 = vrot.slane %v1562_v42, 4  ;;  %2353 = vst [vmem:[#allocation2 + $0x80] sm:$0xf] %v2155_v50  ;;  %2845 = vmatprep.mubr.bf16.mxu1 %v8623_v44  ;;  %v8622_v54 = vcombine.low %v11916_v7, %v11933_v29  ;;  %v2156_v56 = vrot.slane %v2154_v38, 4  ;;  %10235 = vmatpush3.bf16.msra.mxu1 %v11078_v8 }
 0x159   : > { %v1572_v55 = vor.u32 %v1571_v49, %v1567_v48  ;;  %1403 = vst [vmem:[#allocation2 + $0x90] sm:$0xf] %v9235_v52  ;;  %v1575_v62 = vshll.u32 %v9235_v52, 16  ;;  %v1579_v63 = vshrl.u32 %v9235_v52, 16  ;;  %v2157_v0 = vrot.slane %v9235_v52, 5  ;;  %v947_v2 = vpop.f32.mrb[28].mxu0  ;;  %10236 = vmatprep.subr.bf16.mxu1 %v11081_v47 }
 0x15a   : > { %v1568_v61 = vsel %vm11861_vm5, %v1563_v51, %v1567_v48  ;;  %2846 = vmatmul.mubr.bf16.gmra.mrb[4].mxu1 %v8622_v54  ;;  %v11960_v4 = vld [vmem:[#allocation2 + $0x60] sm:$0xff]  ;;  %v9236_v6 = vpack.c.bf16 %v1127_v53, %v1127_v53  ;;  %v948_v10 = vadd.f32 %v11848_v27, %v947_v2  ;;  %v949_v11 = vpop.f32.mrb[29].mxu0 }
 0x15b   : > { %v1573_v5 = vrot.slane %v1572_v55, 4  ;;  %2074 = vst [vmem:[#allocation2 + $0x7c] sm:$0xf] %v1568_v61  ;;  %v8626_v12 = vcombine.high %v11942_v45, %v11960_v4  ;;  %v1577_v13 = vrot.slane %v1575_v62, 5  ;;  %v1581_v14 = vrot.slane %v1579_v63, 4  ;;  %v950_v20 = vpop.f32.mrb[30].mxu0 }
 0x15c   : > { %v2158_v18 = vsel %vm11853_vm4, %v2156_v56, %v2157_v0  ;;  %v2159_v19 = vrot.slane %v2157_v0, 4  ;;  %1404 = vst [vmem:[#allocation2 + $0x9c] sm:$0xf] %v9236_v6  ;;  %v1585_v21 = vshll.u32 %v9236_v6, 16  ;;  %v1589_v23 = vshrl.u32 %v9236_v6, 16  ;;  %v952_v25 = vpop.f32.mrb[31].mxu0  ;;  %10237 = vmatpush3.bf16.msra.mxu1 %v11081_v47 }
 0x15d   : > { %2354 = vst [vmem:[#allocation2 + $0x8c] sm:$0xf] %v2158_v18  ;;  %v2160_v8 = vrot.slane %v9236_v6, 5  ;;  %v1128_v24 = vmax.f32 %v948_v10, 0.0  ;;  %2853 = vmatprep.mubr.bf16.mxu1 %v8626_v12  ;;  %v1578_v28 = vsel %vm11861_vm5, %v1573_v5, %v1577_v13  ;;  %v1582_v30 = vor.u32 %v1581_v14, %v1577_v13  ;;  %10238 = vmatprep.subr.bf16.mxu1 %v11084_v58  ;;  %v11093_v47 = vld [vmem:[%s14346_s3 + $0x170] sm:$0xff]  }
 0x15e   : > { %v951_v31 = vadd.f32 %v11848_v27, %v950_v20  ;;  %v8625_v32 = vcombine.low %v11942_v45, %v11960_v4  ;;  %v11975_v33 = vld [vmem:[#allocation2 + $0x6c] sm:$0xff]  ;;  %2075 = vst [vmem:[#allocation2 + $0x88] sm:$0xf] %v1578_v28  ;;  %v1587_v35 = vrot.slane %v1585_v21, 5  ;;  %v1591_v36 = vrot.slane %v1589_v23, 4  ;;  %v11101_v20 = vld [vmem:[%s14346_s3 + $0x178] sm:$0xff]  }
 0x15f   : > { %v2161_v38 = vsel %vm11853_vm4, %v2159_v19, %v2160_v8  ;;  %v1583_v40 = vrot.slane %v1582_v30, 4  ;;  %v2162_v41 = vrot.slane %v2160_v8, 4  ;;  %v9237_v42 = vpack.c.bf16 %v1128_v24, %v1128_v24  ;;  %v12011_v28 = vld [vmem:[#allocation2 + $0x74] sm:$0xf] }
 0x160   : > { %2355 = vst [vmem:[#allocation2 + $0x98] sm:$0xf] %v2161_v38  ;;  %v1129_v43 = vmax.f32 %v951_v31, 0.0  ;;  %v1592_v44 = vor.u32 %v1591_v36, %v1587_v35  ;;  %10239 = vmatpush3.bf16.msra.mxu1 %v11084_v58 }
 0x161   : > { %v1588_v51 = vsel %vm11861_vm5, %v1583_v40, %v1587_v35  ;;  %1405 = vst [vmem:[#allocation2 + $0xa8] sm:$0xf] %v9237_v42  ;;  %v1595_v52 = vshll.u32 %v9237_v42, 16  ;;  %v1599_v53 = vshrl.u32 %v9237_v42, 16  ;;  %v2163_v54 = vrot.slane %v9237_v42, 5  ;;  %v955_v55 = vpop.f32.mrb[32].mxu0  ;;  %10240 = vmatprep.subr.bf16.mxu1 %v11087_v26 }
 0x162   : > { %2854 = vmatmul.mubr.bf16.gmra.mrb[8].mxu1 %v8625_v32  ;;  %v11994_v56 = vld [vmem:[#allocation2 + $0x78] sm:$0xff]  ;;  %v1593_v58 = vrot.slane %v1592_v44, 4  ;;  %2076 = vst [vmem:[#allocation2 + $0x94] sm:$0xf] %v1588_v51  ;;  %v9238_v61 = vpack.c.bf16 %v1129_v43, %v1129_v43  ;;  %v956_v62 = vadd.f32 %v11848_v27, %v955_v55  ;;  %v957_v63 = vpop.f32.mrb[33].mxu0 }
 0x163   : > { %v8629_v0 = vcombine.high %v11975_v33, %v11994_v56  ;;  %v1597_v2 = vrot.slane %v1595_v52, 5  ;;  %v1601_v5 = vrot.slane %v1599_v53, 4  ;;  %v2164_v6 = vsel %vm11853_vm4, %v2162_v41, %v2163_v54  ;;  %v958_v11 = vpop.f32.mrb[34].mxu0  ;;  %v12015_v32 = vld [vmem:[#allocation2 + $0x68] sm:$0xf] }
 0x164   : > { %v2165_v10 = vrot.slane %v2163_v54, 4  ;;  %2356 = vst [vmem:[#allocation2 + $0xa4] sm:$0xf] %v2164_v6  ;;  %1406 = vst [vmem:[#allocation2 + $0xb4] sm:$0xf] %v9238_v61  ;;  %v1605_v12 = vshll.u32 %v9238_v61, 16  ;;  %10241 = vmatpush3.bf16.msra.mxu1 %v11087_v26  ;;  %v959_v8 = vadd.f32 %v11848_v27, %v958_v11  ;;  %v8628_v24 = vcombine.low %v11975_v33, %v11994_v56 }
 0x165   : > { %v1609_v13 = vshrl.u32 %v9238_v61, 16  ;;  %v2166_v14 = vrot.slane %v9238_v61, 5  ;;  %v1130_v18 = vmax.f32 %v956_v62, 0.0  ;;  %2861 = vmatprep.mubr.bf16.mxu1 %v8629_v0  ;;  %v960_v19 = vpop.f32.mrb[35].mxu0  ;;  %v1598_v21 = vsel %vm11861_vm5, %v1593_v58, %v1597_v2  ;;  %v12009_v25 = vld [vmem:[#allocation2 + $0x84] sm:$0xff]  ;;  %10242 = vmatprep.subr.bf16.mxu1 %v11093_v47 }
 0x166   : > { %v1602_v23 = vor.u32 %v1601_v5, %v1597_v2  ;;  %2077 = vst [vmem:[#allocation2 + $0xa0] sm:$0xf] %v1598_v21  ;;  %v1607_v26 = vrot.slane %v1605_v12, 5  ;;  %v1131_v40 = vmax.f32 %v959_v8, 0.0 }
 0x167   : > { %v1611_v30 = vrot.slane %v1609_v13, 4  ;;  %v2167_v31 = vsel %vm11853_vm4, %v2165_v10, %v2166_v14  ;;  %v2168_v36 = vrot.slane %v2166_v14, 4  ;;  %v9239_v38 = vpack.c.bf16 %v1130_v18, %v1130_v18 }
 0x168   : > { %v1603_v35 = vrot.slane %v1602_v23, 4  ;;  %2357 = vst [vmem:[#allocation2 + $0xb0] sm:$0xf] %v2167_v31  ;;  %10243 = vmatpush3.bf16.msra.mxu1 %v11093_v47  ;;  %v9240_v61 = vpack.c.bf16 %v1131_v40, %v1131_v40 }
 0x169   : > { %v1612_v41 = vor.u32 %v1611_v30, %v1607_v26  ;;  %1407 = vst [vmem:[#allocation2 + $0xc0] sm:$0xf] %v9239_v38  ;;  %v1615_v52 = vshll.u32 %v9239_v38, 16  ;;  %v1619_v53 = vshrl.u32 %v9239_v38, 16  ;;  %v2169_v54 = vrot.slane %v9239_v38, 5  ;;  %v963_v55 = vpop.f32.mrb[36].mxu0  ;;  %10244 = vmatprep.subr.bf16.mxu1 %v11101_v20 }
 0x16a   : > { %v1608_v51 = vsel %vm11861_vm5, %v1603_v35, %v1607_v26  ;;  %2862 = vmatmul.mubr.bf16.gmra.mrb[12].mxu1 %v8628_v24  ;;  %v12025_v58 = vld [vmem:[#allocation2 + $0x90] sm:$0xff]  ;;  %v964_v62 = vadd.f32 %v11848_v27, %v963_v55  ;;  %v965_v63 = vpop.f32.mrb[37].mxu0  ;;  %1408 = vst [vmem:[#allocation2 + $0xcc] sm:$0xf] %v9240_v61  ;;  %v1625_v12 = vshll.u32 %v9240_v61, 16  ;;  %v1629_v13 = vshrl.u32 %v9240_v61, 16 }
 0x16b   : > { %v1613_v47 = vrot.slane %v1612_v41, 4  ;;  %2078 = vst [vmem:[#allocation2 + $0xac] sm:$0xf] %v1608_v51  ;;  %v8632_v0 = vcombine.high %v12009_v25, %v12025_v58  ;;  %v1617_v2 = vrot.slane %v1615_v52, 5  ;;  %v1621_v5 = vrot.slane %v1619_v53, 4  ;;  %v966_v11 = vpop.f32.mrb[38].mxu0 }
 0x16c   : > { %v2170_v6 = vsel %vm11853_vm4, %v2168_v36, %v2169_v54  ;;  %v2171_v10 = vrot.slane %v2169_v54, 4  ;;  %v2172_v14 = vrot.slane %v9240_v61, 5  ;;  %v1132_v18 = vmax.f32 %v964_v62, 0.0  ;;  %v968_v19 = vpop.f32.mrb[39].mxu0  ;;  %10245 = vmatpush3.bf16.msra.mxu1 %v11101_v20  ;;  %v12040_v30 = vld [vmem:[#allocation2 + $0x8c] sm:$0xf] }
 0x16d   : > { %2358 = vst [vmem:[#allocation2 + $0xbc] sm:$0xf] %v2170_v6  ;;  %2869 = vmatprep.mubr.bf16.mxu1 %v8632_v0  ;;  %v1618_v21 = vsel %vm11861_vm5, %v1613_v47, %v1617_v2  ;;  %v1622_v23 = vor.u32 %v1621_v5, %v1617_v2  ;;  %v967_v8 = vadd.f32 %v11848_v27, %v966_v11  ;;  %v12037_v26 = vld [vmem:[#allocation2 + $0x9c] sm:$0xff]  ;;  %14401 = vst [vmem:[#allocation6_spill] sm:$0xff] %v12040_v30 }
 0x16e   : > { %v8631_v24 = vcombine.low %v12009_v25, %v12025_v58  ;;  %9379 = vmatprep.subr.bf16.mxu1 %v11838_v22  ;;  %2079 = vst [vmem:[#allocation2 + $0xb8] sm:$0xf] %v1618_v21  ;;  %v1627_v31 = vrot.slane %v1625_v12, 5  ;;  %v1631_v35 = vrot.slane %v1629_v13, 4  ;;  %v2173_v20 = vsel %vm11853_vm4, %v2171_v10, %v2172_v14  ;;  %v12044_v36 = vld [vmem:[#allocation2 + $0x80] sm:$0xf] }
 0x16f   : > { %v1623_v38 = vrot.slane %v1622_v23, 4  ;;  %v2174_v40 = vrot.slane %v2172_v14, 4  ;;  %2359 = vst [vmem:[#allocation2 + $0xc8] sm:$0xf] %v2173_v20  ;;  %v9241_v41 = vpack.c.bf16 %v1132_v18, %v1132_v18  ;;  %v1133_v51 = vmax.f32 %v967_v8, 0.0 }
 0x170   : > { %v1632_v52 = vor.u32 %v1631_v35, %v1627_v31 }
 0x171   : > { %v1628_v55 = vsel %vm11861_vm5, %v1623_v38, %v1627_v31  ;;  %1409 = vst [vmem:[#allocation2 + $0xd8] sm:$0xf] %v9241_v41  ;;  %v1635_v47 = vshll.u32 %v9241_v41, 16  ;;  %v1639_v61 = vshrl.u32 %v9241_v41, 16  ;;  %v2175_v62 = vrot.slane %v9241_v41, 5  ;;  %v971_v63 = vpop.f32.mrb[40].mxu0 }
 0x172   : > { %2870 = vmatmul.mubr.bf16.gmra.mrb[16].mxu1 %v8631_v24  ;;  %v12054_v0 = vld [vmem:[#allocation2 + $0xa8] sm:$0xff]  ;;  %v1633_v2 = vrot.slane %v1632_v52, 4  ;;  %2080 = vst [vmem:[#allocation2 + $0xc4] sm:$0xf] %v1628_v55  ;;  %v9242_v5 = vpack.c.bf16 %v1133_v51, %v1133_v51  ;;  %v972_v6 = vadd.f32 %v11848_v27, %v971_v63  ;;  %v973_v10 = vpop.f32.mrb[41].mxu0 }
 0x173   : > { %v8635_v11 = vcombine.high %v12037_v26, %v12054_v0  ;;  %v1637_v12 = vrot.slane %v1635_v47, 5  ;;  %v1641_v13 = vrot.slane %v1639_v61, 4  ;;  %v2176_v14 = vsel %vm11853_vm4, %v2174_v40, %v2175_v62  ;;  %v974_v19 = vpop.f32.mrb[42].mxu0  ;;  %v12068_v51 = vld [vmem:[#allocation2 + $0xa4] sm:$0xf] }
 0x174   : > { %v2177_v18 = vrot.slane %v2175_v62, 4  ;;  %2360 = vst [vmem:[#allocation2 + $0xd4] sm:$0xf] %v2176_v14  ;;  %1410 = vst [vmem:[#allocation2 + $0xe4] sm:$0xf] %v9242_v5  ;;  %v1645_v21 = vshll.u32 %v9242_v5, 16  ;;  %v975_v38 = vadd.f32 %v11848_v27, %v974_v19  ;;  %v8634_v41 = vcombine.low %v12037_v26, %v12054_v0 }
 0x175   : > { %v1649_v23 = vshrl.u32 %v9242_v5, 16  ;;  %v2178_v8 = vrot.slane %v9242_v5, 5  ;;  %v1134_v24 = vmax.f32 %v972_v6, 0.0  ;;  %2877 = vmatprep.mubr.bf16.mxu1 %v8635_v11  ;;  %v976_v31 = vpop.f32.mrb[43].mxu0  ;;  %v1638_v35 = vsel %vm11861_vm5, %v1633_v2, %v1637_v12  ;;  %v12066_v40 = vld [vmem:[#allocation2 + $0xb4] sm:$0xff]  ;;  %14402 = vst [vmem:[#allocation7_spill] sm:$0xff] %v12068_v51 }
 0x176   : > { %v1642_v20 = vor.u32 %v1641_v13, %v1637_v12  ;;  %2081 = vst [vmem:[#allocation2 + $0xd0] sm:$0xf] %v1638_v35  ;;  %v1647_v52 = vrot.slane %v1645_v21, 5  ;;  %v12072_v61 = vld [vmem:[#allocation2 + $0x98] sm:$0xf]  ;;  %v1135_v5 = vmax.f32 %v975_v38, 0.0 }
 0x177   : > { %v1651_v55 = vrot.slane %v1649_v23, 4  ;;  %v2179_v47 = vsel %vm11853_vm4, %v2177_v18, %v2178_v8  ;;  %14403 = vst [vmem:[#allocation8_spill] sm:$0xff] %v12072_v61  ;;  %v2180_v63 = vrot.slane %v2178_v8, 4  ;;  %v9243_v2 = vpack.c.bf16 %v1134_v24, %v1134_v24 }
 0x178   : > { %v1643_v62 = vrot.slane %v1642_v20, 4  ;;  %2361 = vst [vmem:[#allocation2 + $0xe0] sm:$0xf] %v2179_v47  ;;  %v9244_v24 = vpack.c.bf16 %v1135_v5, %v1135_v5 }
 0x179   : > { %v1652_v6 = vor.u32 %v1651_v55, %v1647_v52  ;;  %1411 = vst [vmem:[#allocation2 + $0xf0] sm:$0xf] %v9243_v2  ;;  %v1655_v14 = vshll.u32 %v9243_v2, 16  ;;  %v1659_v18 = vshrl.u32 %v9243_v2, 16  ;;  %v2181_v19 = vrot.slane %v9243_v2, 5  ;;  %v979_v21 = vpop.f32.mrb[44].mxu0 }
 0x17a   : > { %v1648_v13 = vsel %vm11861_vm5, %v1643_v62, %v1647_v52  ;;  %2878 = vmatmul.mubr.bf16.gmra.mrb[20].mxu1 %v8634_v41  ;;  %v12082_v23 = vld [vmem:[#allocation2 + $0xc0] sm:$0xff]  ;;  %v980_v31 = vadd.f32 %v11848_v27, %v979_v21  ;;  %v981_v20 = vpop.f32.mrb[45].mxu0  ;;  %1412 = vst [vmem:[#allocation2 + $0xfc] sm:$0xf] %v9244_v24  ;;  %v1665_v41 = vshll.u32 %v9244_v24, 16  ;;  %v1669_v2 = vshrl.u32 %v9244_v24, 16 }
 0x17b   : > { %v1653_v8 = vrot.slane %v1652_v6, 4  ;;  %2082 = vst [vmem:[#allocation2 + $0xdc] sm:$0xf] %v1648_v13  ;;  %v8638_v35 = vcombine.high %v12066_v40, %v12082_v23  ;;  %v1657_v38 = vrot.slane %v1655_v14, 5  ;;  %v1661_v55 = vrot.slane %v1659_v18, 4  ;;  %v982_v62 = vpop.f32.mrb[46].mxu0 }
 0x17c   : > { %v2182_v52 = vsel %vm11853_vm4, %v2180_v63, %v2181_v19  ;;  %v2183_v47 = vrot.slane %v2181_v19, 4  ;;  %v2184_v6 = vrot.slane %v9244_v24, 5  ;;  %v1136_v13 = vmax.f32 %v980_v31, 0.0  ;;  %v984_v5 = vpop.f32.mrb[47].mxu0  ;;  %v12096_v63 = vld [vmem:[%s14345_s2] ss:$0 sm:$0xff] }
 0x17d   : > { %2362 = vst [vmem:[#allocation2 + $0xec] sm:$0xf] %v2182_v52  ;;  %2885 = vmatprep.mubr.bf16.mxu1 %v8638_v35  ;;  %v1658_v27 = vsel %vm11861_vm5, %v1653_v8, %v1657_v38  ;;  %v1662_v21 = vor.u32 %v1661_v55, %v1657_v38  ;;  %v8637_v14 = vcombine.low %v12066_v40, %v12082_v23  ;;  %v12099_v19 = vld [vmem:[#allocation2 + $0xcc] sm:$0xff]  ;;  %v12101_v24 = vld [vmem:[#allocation2 + $0xbc] sm:$0xf]  ;;  %v1667_v31 = vrot.slane %v1665_v41, 5 }
 0x17e   : > { %v983_v18 = vadd.f32 %v12096_v63, %v982_v62  ;;  %14404 = vst [vmem:[#allocation9_spill] sm:$0xff] %v12101_v24  ;;  %2083 = vst [vmem:[#allocation2 + $0xe8] sm:$0xf] %v1658_v27  ;;  %v1671_v35 = vrot.slane %v1669_v2, 4  ;;  %v2185_v8 = vsel %vm11853_vm4, %v2183_v47, %v2184_v6  ;;  %v2186_v20 = vrot.slane %v2184_v6, 4 }
 0x17f   : > { %v1663_v38 = vrot.slane %v1662_v21, 4  ;;  %2363 = vst [vmem:[#allocation2 + $0xf8] sm:$0xf] %v2185_v8  ;;  %v9245_v55 = vpack.c.bf16 %v1136_v13, %v1136_v13  ;;  %v12105_v5 = vld [vmem:[#allocation2 + $0xb0] sm:$0xf] }
 0x180   : > { %v1137_v52 = vmax.f32 %v983_v18, 0.0  ;;  %14405 = vst [vmem:[#allocation10_spill] sm:$0xff] %v12105_v5  ;;  %v1672_v1 = vor.u32 %v1671_v35, %v1667_v31 }
 0x181   : > { %v1668_v47 = vsel %vm11861_vm5, %v1663_v38, %v1667_v31  ;;  %1413 = vst [vmem:[#allocation2 + $0x108] sm:$0xf] %v9245_v55  ;;  %v1675_v2 = vshll.u32 %v9245_v55, 16  ;;  %v1679_v6 = vshrl.u32 %v9245_v55, 16  ;;  %v2187_v13 = vrot.slane %v9245_v55, 5  ;;  %v987_v27 = vpop.f32.mrb[48].mxu0 }
 0x182   : > { %2886 = vmatmul.mubr.bf16.gmra.mrb[24].mxu1 %v8637_v14  ;;  %v12115_v21 = vld [vmem:[#allocation2 + $0xd8] sm:$0xff]  ;;  %v1673_v18 = vrot.slane %v1672_v1, 4  ;;  %2084 = vst [vmem:[#allocation2 + $0xf4] sm:$0xf] %v1668_v47  ;;  %v9246_v35 = vpack.c.bf16 %v1137_v52, %v1137_v52  ;;  %v988_v8 = vadd.f32 %v12096_v63, %v987_v27  ;;  %v989_v41 = vpop.f32.mrb[49].mxu0 }
 0x183   : > { %v8641_v54 = vcombine.high %v12099_v19, %v12115_v21  ;;  %v1677_v44 = vrot.slane %v1675_v2, 5  ;;  %v1681_v50 = vrot.slane %v1679_v6, 4  ;;  %v2188_v31 = vsel %vm11853_vm4, %v2186_v20, %v2187_v13  ;;  %v990_v55 = vpop.f32.mrb[50].mxu0 }
 0x184   : > { %v2189_v38 = vrot.slane %v2187_v13, 4  ;;  %2364 = vst [vmem:[#allocation2 + $0x104] sm:$0xf] %v2188_v31  ;;  %1414 = vst [vmem:[#allocation2 + $0x114] sm:$0xf] %v9246_v35  ;;  %v1685_v14 = vshll.u32 %v9246_v35, 16  ;;  %v8640_v41 = vcombine.low %v12099_v19, %v12115_v21  ;;  %v991_v2 = vadd.f32 %v12096_v63, %v990_v55 }
 0x185   : > { %v1689_v17 = vshrl.u32 %v9246_v35, 16  ;;  %v2190_v1 = vrot.slane %v9246_v35, 5  ;;  %v1138_v47 = vmax.f32 %v988_v8, 0.0  ;;  %2893 = vmatprep.mubr.bf16.mxu1 %v8641_v54  ;;  %v992_v52 = vpop.f32.mrb[51].mxu0  ;;  %v1678_v27 = vsel %vm11861_vm5, %v1673_v18, %v1677_v44  ;;  %v12127_v20 = vld [vmem:[#allocation2 + $0xe4] sm:$0xff] }
 0x186   : > { %v1682_v11 = vor.u32 %v1681_v50, %v1677_v44  ;;  %2085 = vst [vmem:[#allocation2 + $0x100] sm:$0xf] %v1678_v27  ;;  %v1687_v6 = vrot.slane %v1685_v14, 5  ;;  %v1139_v52 = vmax.f32 %v991_v2, 0.0  ;;  %v2405_v18 = vld [vmem:[#allocation2 + $0x2c] sm:$0xf]  ;;  %v8624_v27 = vcombine.low %v11912_v3, %v11981_v39 }
 0x187   : > { %v1691_v13 = vrot.slane %v1689_v17, 4  ;;  %v2191_v35 = vsel %vm11853_vm4, %v2189_v38, %v2190_v1  ;;  %v2192_v8 = vrot.slane %v2190_v1, 4  ;;  %v9247_v31 = vpack.c.bf16 %v1138_v47, %v1138_v47 }
 0x188   : > { %v1683_v54 = vrot.slane %v1682_v11, 4  ;;  %2365 = vst [vmem:[#allocation2 + $0x110] sm:$0xf] %v2191_v35  ;;  %v8621_v55 = vcombine.low %v2405_v18, %v11918_v9  ;;  %v9248_v35 = vpack.c.bf16 %v1139_v52, %v1139_v52 }
 0x189   : > { %v1692_v44 = vor.u32 %v1691_v13, %v1687_v6  ;;  %1415 = vst [vmem:[#allocation2 + $0x120] sm:$0xf] %v9247_v31  ;;  %v1695_v11 = vshll.u32 %v9247_v31, 16  ;;  %v1699_v14 = vshrl.u32 %v9247_v31, 16  ;;  %v2193_v1 = vrot.slane %v9247_v31, 5  ;;  %v995_v47 = vpop.f32.mrb[52].mxu0 }
 0x18a   : > { %v1688_v38 = vsel %vm11861_vm5, %v1683_v54, %v1687_v6  ;;  %2894 = vmatmul.mubr.bf16.gmra.mrb[28].mxu1 %v8640_v41  ;;  %v12140_v2 = vld [vmem:[#allocation2 + $0xf0] sm:$0xff]  ;;  %v996_v18 = vadd.f32 %v12096_v63, %v995_v47  ;;  %v997_v22 = vpop.f32.mrb[53].mxu0  ;;  %1416 = vst [vmem:[#allocation2 + $0x12c] sm:$0xf] %v9248_v35  ;;  %v1705_v43 = vshll.u32 %v9248_v35, 16 }
 0x18b   : > { %v1693_v13 = vrot.slane %v1692_v44, 4  ;;  %2086 = vst [vmem:[#allocation2 + $0x10c] sm:$0xf] %v1688_v38  ;;  %10246 = vmatprep.mubr.bf16.mxu1 %v8621_v55  ;;  %v8813_v10 = vcombine.high %v12127_v20, %v12140_v2  ;;  %v1697_v53 = vrot.slane %v1695_v11, 5  ;;  %v1701_v6 = vrot.slane %v1699_v14, 4  ;;  %v998_v41 = vpop.f32.mrb[54].mxu0 }
 0x18c   : > { %v2194_v54 = vsel %vm11853_vm4, %v2192_v8, %v2193_v1  ;;  %v2195_v31 = vrot.slane %v2193_v1, 4  ;;  %v1709_v44 = vshrl.u32 %v9248_v35, 16  ;;  %v2196_v38 = vrot.slane %v9248_v35, 5  ;;  %v1000_v55 = vpop.f32.mrb[55].mxu0 }
 0x18d   : > { %2366 = vst [vmem:[#allocation2 + $0x11c] sm:$0xf] %v2194_v54  ;;  %v1140_v52 = vmax.f32 %v996_v18, 0.0  ;;  %4200 = vmatprep.mubr.bf16.mxu0 %v8813_v10  ;;  %v1698_v47 = vsel %vm11861_vm5, %v1693_v13, %v1697_v53  ;;  %v1702_v17 = vor.u32 %v1701_v6, %v1697_v53  ;;  %v8812_v22 = vcombine.low %v12127_v20, %v12140_v2  ;;  %v11107_v10 = vld [vmem:[%s14346_s3] sm:$0xff]  }
 0x18e   : > { %v999_v11 = vadd.f32 %v12096_v63, %v998_v41  ;;  %2087 = vst [vmem:[#allocation2 + $0x118] sm:$0xf] %v1698_v47  ;;  %v1707_v8 = vrot.slane %v1705_v43, 5  ;;  %v1711_v14 = vrot.slane %v1709_v44, 4  ;;  %v2197_v1 = vsel %vm11853_vm4, %v2195_v31, %v2196_v38  ;;  %v12157_v35 = vld [vmem:[#allocation2 + $0xfc] sm:$0xff]  ;;  %v11108_v43 = vld [vmem:[%s14346_s3 + $0x48] sm:$0xff]  }
 0x18f   : > { %v2198_v54 = vrot.slane %v2196_v38, 4  ;;  %v1703_v13 = vrot.slane %v1702_v17, 4  ;;  %2367 = vst [vmem:[#allocation2 + $0x128] sm:$0xf] %v2197_v1  ;;  %v9249_v53 = vpack.c.bf16 %v1140_v52, %v1140_v52  ;;  %4201 = vmatmul.mubr.bf16.vlgmr.msra.gmra.mrb[112].mxu0 %v8812_v22  ;;  %v8627_v41 = vcombine.low %v11977_v34, %v12015_v32 }
 0x190   : > { %v1141_v18 = vmax.f32 %v999_v11, 0.0  ;;  %v1712_v31 = vor.u32 %v1711_v14, %v1707_v8  ;;  %v8630_v44 = vcombine.low %v12011_v28, %v12044_v36  ;;  %9620 = vmatpush3.bf16.msra.mxu0 %v11107_v10 }
 0x191   : > { %v1708_v38 = vsel %vm11861_vm5, %v1703_v13, %v1707_v8  ;;  %1417 = vst [vmem:[#allocation2 + $0x138] sm:$0xf] %v9249_v53  ;;  %v1715_v52 = vshll.u32 %v9249_v53, 16  ;;  %v1719_v55 = vshrl.u32 %v9249_v53, 16  ;;  %v2199_v47 = vrot.slane %v9249_v53, 5  ;;  %v1003_v22 = vpop.f32.mrb[56].mxu0  ;;  %9621 = vmatprep.subr.bf16.mxu0 %v11108_v43 }
 0x192   : > { %10247 = vmatmul.mubr.bf16.vlgmr.msra.gmra.mrb[32].mxu1 %v8624_v27  ;;  %v12172_v11 = vld [vmem:[#allocation2 + $0x108] sm:$0xff]  ;;  %v1713_v14 = vrot.slane %v1712_v31, 4  ;;  %2088 = vst [vmem:[#allocation2 + $0x124] sm:$0xf] %v1708_v38  ;;  %v9250_v1 = vpack.c.bf16 %v1141_v18, %v1141_v18  ;;  %v1004_v6 = vadd.f32 %v12096_v63, %v1003_v22  ;;  %v1005_v53 = vpop.f32.mrb[57].mxu0 }
 0x193   : > { %10250 = vmatprep.mubr.bf16.mxu1 %v8627_v41  ;;  %9380 = vmatpush3.bf16.msra.mxu1 %v11107_v10  ;;  %v11109_v8 = vld [vmem:[%s14346_s3 + $0x8] sm:$0xff]   ;;  %v8816_v13 = vcombine.high %v12157_v35, %v12172_v11  ;;  %v1717_v27 = vrot.slane %v1715_v52, 5  ;;  %v1721_v17 = vrot.slane %v1719_v55, 4  ;;  %v2200_v42 = vsel %vm11853_vm4, %v2198_v54, %v2199_v47  ;;  %v11112_v10 = vld [vmem:[%s14346_s3 + $0x50] sm:$0xff]   ;;  %v1006_v18 = vpop.f32.mrb[58].mxu0 }
 0x194   : > { %v2201_v31 = vrot.slane %v2199_v47, 4  ;;  %9381 = vmatprep.subr.bf16.mxu1 %v11108_v43  ;;  %2368 = vst [vmem:[#allocation2 + $0x134] sm:$0xf] %v2200_v42  ;;  %1418 = vst [vmem:[#allocation2 + $0x144] sm:$0xf] %v9250_v1  ;;  %v1725_v41 = vshll.u32 %v9250_v1, 16  ;;  %9622 = vmatpush3.bf16.msra.mxu0 %v11109_v8  ;;  %v8815_v43 = vcombine.low %v12157_v35, %v12172_v11 }
 0x195   : > { %v1729_v38 = vshrl.u32 %v9250_v1, 16  ;;  %v2202_v22 = vrot.slane %v9250_v1, 5  ;;  %v1142_v49 = vmax.f32 %v1004_v6, 0.0  ;;  %4208 = vmatprep.mubr.bf16.mxu0 %v8816_v13  ;;  %v1008_v53 = vpop.f32.mrb[59].mxu0  ;;  %v1718_v52 = vsel %vm11861_vm5, %v1713_v14, %v1717_v27  ;;  %9623 = vmatprep.subr.bf16.mxu0 %v11112_v10  ;;  %v11115_v13 = vld [vmem:[%s14346_s3 + $0x10] sm:$0xff]  }
 0x196   : > { %v1722_v54 = vor.u32 %v1721_v17, %v1717_v27  ;;  %v1007_v55 = vadd.f32 %v12096_v63, %v1006_v18  ;;  %2089 = vst [vmem:[#allocation2 + $0x130] sm:$0xf] %v1718_v52  ;;  %v1727_v42 = vrot.slane %v1725_v41, 5  ;;  %v12195_v14 = vld [vmem:[#allocation2 + $0x114] sm:$0xff] }
 0x197   : > { %v1731_v47 = vrot.slane %v1729_v38, 4  ;;  %v2203_v1 = vsel %vm11853_vm4, %v2201_v31, %v2202_v22  ;;  %v2204_v6 = vrot.slane %v2202_v22, 4  ;;  %9382 = vmatpush3.bf16.msra.mxu1 %v11109_v8  ;;  %v9251_v27 = vpack.c.bf16 %v1142_v49, %v1142_v49  ;;  %4209 = vmatmul.mubr.bf16.gmra.mrb[116].mxu0 %v8815_v43  ;;  %v11116_v41 = vld [vmem:[%s14346_s3 + $0x58] sm:$0xff]  }
 0x198   : > { %v1723_v17 = vrot.slane %v1722_v54, 4  ;;  %2369 = vst [vmem:[#allocation2 + $0x140] sm:$0xf] %v2203_v1  ;;  %9383 = vmatprep.subr.bf16.mxu1 %v11112_v10  ;;  %v1143_v18 = vmax.f32 %v1007_v55, 0.0  ;;  %v8633_v38 = vcombine.low %v12040_v30, %v12072_v61  ;;  %v8636_v22 = vcombine.low %v12068_v51, %v12105_v5  ;;  %9624 = vmatpush3.bf16.msra.mxu0 %v11115_v13 }
 0x199   : > { %v1732_v8 = vor.u32 %v1731_v47, %v1727_v42  ;;  %1419 = vst [vmem:[#allocation2 + $0x150] sm:$0xf] %v9251_v27  ;;  %v1735_v53 = vshll.u32 %v9251_v27, 16  ;;  %v1739_v52 = vshrl.u32 %v9251_v27, 16  ;;  %v2205_v54 = vrot.slane %v9251_v27, 5  ;;  %v1011_v43 = vpop.f32.mrb[60].mxu0  ;;  %9625 = vmatprep.subr.bf16.mxu0 %v11116_v41 }
 0x19a   : > { %v1728_v10 = vsel %vm11861_vm5, %v1723_v17, %v1727_v42  ;;  %10251 = vmatmul.mubr.bf16.gmra.mrb[36].mxu1 %v8630_v44  ;;  %v12213_v55 = vld [vmem:[#allocation2 + $0x120] sm:$0xff]  ;;  %v9252_v1 = vpack.c.bf16 %v1143_v18, %v1143_v18  ;;  %v1012_v49 = vadd.f32 %v12096_v63, %v1011_v43  ;;  %v11117_v42 = vld [vmem:[%s14346_s3 + $0x18] sm:$0xff]   ;;  %v1013_v27 = vpop.f32.mrb[61].mxu0 }
 0x19b   : > { %v1733_v47 = vrot.slane %v1732_v8, 4  ;;  %2090 = vst [vmem:[#allocation2 + $0x13c] sm:$0xf] %v1728_v10  ;;  %10254 = vmatprep.mubr.bf16.mxu1 %v8633_v38  ;;  %9384 = vmatpush3.bf16.msra.mxu1 %v11115_v13  ;;  %v8819_v17 = vcombine.high %v12195_v14, %v12213_v55  ;;  %v1737_v44 = vrot.slane %v1735_v53, 5  ;;  %v1741_v31 = vrot.slane %v1739_v52, 4  ;;  %v11120_v13 = vld [vmem:[%s14346_s3 + $0x60] sm:$0xff]  }
 0x19c   : > { %v2206_v50 = vsel %vm11853_vm4, %v2204_v6, %v2205_v54  ;;  %v2207_v8 = vrot.slane %v2205_v54, 4  ;;  %9385 = vmatprep.subr.bf16.mxu1 %v11116_v41  ;;  %v1014_v18 = vpop.f32.mrb[62].mxu0  ;;  %1420 = vst [vmem:[#allocation2 + $0x15c] sm:$0xf] %v9252_v1  ;;  %v1745_v38 = vshll.u32 %v9252_v1, 16  ;;  %v1749_v10 = vshrl.u32 %v9252_v1, 16  ;;  %9626 = vmatpush3.bf16.msra.mxu0 %v11117_v42 }
 0x19d   : > { %2370 = vst [vmem:[#allocation2 + $0x14c] sm:$0xf] %v2206_v50  ;;  %v2208_v43 = vrot.slane %v9252_v1, 5  ;;  %v1144_v62 = vmax.f32 %v1012_v49, 0.0  ;;  %4216 = vmatprep.mubr.bf16.mxu0 %v8819_v17  ;;  %v1016_v27 = vpop.f32.mrb[63].mxu0  ;;  %v1738_v53 = vsel %vm11861_vm5, %v1733_v47, %v1737_v44  ;;  %v1742_v6 = vor.u32 %v1741_v31, %v1737_v44  ;;  %9627 = vmatprep.subr.bf16.mxu0 %v11120_v13  ;;  %v11123_v47 = vld [vmem:[%s14346_s3 + $0x20] sm:$0xff]  }
 0x19e   : > { %v8818_v41 = vcombine.low %v12195_v14, %v12213_v55  ;;  %v1015_v52 = vadd.f32 %v12096_v63, %v1014_v18  ;;  %v2479_v54 = vld [vmem:[#allocation2 + $0xc8] sm:$0xf]  ;;  %2091 = vst [vmem:[#allocation2 + $0x148] sm:$0xf] %v1738_v53  ;;  %v1747_v50 = vrot.slane %v1745_v38, 5  ;;  %v1751_v48 = vrot.slane %v1749_v10, 4 }
 0x19f   : > { %v2209_v49 = vsel %vm11853_vm4, %v2207_v8, %v2208_v43  ;;  %v2210_v1 = vrot.slane %v2208_v43, 4  ;;  %9386 = vmatpush3.bf16.msra.mxu1 %v11117_v42  ;;  %v12236_v31 = vld [vmem:[#allocation2 + $0x12c] sm:$0xff]  ;;  %v1743_v17 = vrot.slane %v1742_v6, 4  ;;  %v9253_v44 = vpack.c.bf16 %v1144_v62, %v1144_v62 }
 0x1a0   : > { %2371 = vst [vmem:[#allocation2 + $0x158] sm:$0xf] %v2209_v49  ;;  %9387 = vmatprep.subr.bf16.mxu1 %v11120_v13  ;;  %4217 = vmatmul.mubr.bf16.gmra.mrb[120].mxu0 %v8818_v41  ;;  %v1145_v18 = vmax.f32 %v1015_v52, 0.0  ;;  %v11124_v38 = vld [vmem:[%s14346_s3 + $0x68] sm:$0xff]   ;;  %v1752_v42 = vor.u32 %v1751_v48, %v1747_v50  ;;  %v8639_v10 = vcombine.low %v12101_v24, %v2479_v54 }
 0x1a1   : > { %9628 = vmatpush3.bf16.msra.mxu0 %v11123_v47  ;;  %v1748_v62 = vsel %vm11861_vm5, %v1743_v17, %v1747_v50  ;;  %1421 = vst [vmem:[#allocation2 + $0x168] sm:$0xf] %v9253_v44  ;;  %v1755_v13 = vshll.u32 %v9253_v44, 16  ;;  %v1759_v27 = vshrl.u32 %v9253_v44, 16  ;;  %v2211_v53 = vrot.slane %v9253_v44, 5  ;;  %v1019_v6 = vpop.f32.mrb[64].mxu0 }
 0x1a2   : > { %10255 = vmatmul.mubr.bf16.gmra.mrb[40].mxu1 %v8636_v22  ;;  %v12251_v41 = vld [vmem:[#allocation2 + $0x138] sm:$0xff]  ;;  %9629 = vmatprep.subr.bf16.mxu0 %v11124_v38  ;;  %v1753_v48 = vrot.slane %v1752_v42, 4  ;;  %2092 = vst [vmem:[#allocation2 + $0x154] sm:$0xf] %v1748_v62  ;;  %v9254_v52 = vpack.c.bf16 %v1145_v18, %v1145_v18  ;;  %v1020_v54 = vadd.f32 %v12096_v63, %v1019_v6  ;;  %v11125_v50 = vld [vmem:[%s14346_s3 + $0x28] sm:$0xff]   ;;  %v1021_v17 = vpop.f32.mrb[65].mxu0 }
 0x1a3   : > { %10258 = vmatprep.mubr.bf16.mxu1 %v8639_v10  ;;  %9388 = vmatpush3.bf16.msra.mxu1 %v11123_v47  ;;  %v8822_v49 = vcombine.high %v12236_v31, %v12251_v41  ;;  %v1757_v22 = vrot.slane %v1755_v13, 5  ;;  %v1761_v44 = vrot.slane %v1759_v27, 4  ;;  %v2212_v43 = vsel %vm11853_vm4, %v2210_v1, %v2211_v53  ;;  %v11128_v47 = vld [vmem:[%s14346_s3 + $0x70] sm:$0xff]   ;;  %v1022_v18 = vpop.f32.mrb[66].mxu0 }
 0x1a4   : > { %v2213_v42 = vrot.slane %v2211_v53, 4  ;;  %9389 = vmatprep.subr.bf16.mxu1 %v11124_v38  ;;  %2372 = vst [vmem:[#allocation2 + $0x164] sm:$0xf] %v2212_v43  ;;  %1422 = vst [vmem:[#allocation2 + $0x174] sm:$0xf] %v9254_v52  ;;  %v1765_v10 = vshll.u32 %v9254_v52, 16  ;;  %v8821_v38 = vcombine.low %v12236_v31, %v12251_v41  ;;  %v1023_v27 = vadd.f32 %v12096_v63, %v1022_v18 }
 0x1a5   : > { %v1769_v62 = vshrl.u32 %v9254_v52, 16  ;;  %v2214_v6 = vrot.slane %v9254_v52, 5  ;;  %v1146_v8 = vmax.f32 %v1020_v54, 0.0  ;;  %4224 = vmatprep.mubr.bf16.mxu0 %v8822_v49  ;;  %v1024_v17 = vpop.f32.mrb[67].mxu0  ;;  %9630 = vmatpush3.bf16.msra.mxu0 %v11125_v50  ;;  %v1758_v13 = vsel %vm11861_vm5, %v1753_v48, %v1757_v22  ;;  %v11130_v49 = vld [vmem:[%s14346_s3 + $0x30] sm:$0xff]   ;;  %v11134_v48 = vld [vmem:[%s14346_s3 + $0x78] sm:$0xff]  }
 0x1a6   : > { %v1762_v1 = vor.u32 %v1761_v44, %v1757_v22  ;;  %9631 = vmatprep.subr.bf16.mxu0 %v11128_v47  ;;  %2093 = vst [vmem:[#allocation2 + $0x160] sm:$0xf] %v1758_v13  ;;  %v1767_v43 = vrot.slane %v1765_v10, 5  ;;  %v12277_v22 = vld [vmem:[#allocation2 + $0x144] sm:$0xff]  ;;  %v11127_v10 = vld [vmem:[#allocation2 + $0xd4] ss:$12 sps:$4 sm:$0xff]  }
 0x1a7   : > { %v1771_v53 = vrot.slane %v1769_v62, 4  ;;  %v2215_v52 = vsel %vm11853_vm4, %v2213_v42, %v2214_v6  ;;  %v2216_v54 = vrot.slane %v2214_v6, 4  ;;  %9390 = vmatpush3.bf16.msra.mxu1 %v11125_v50  ;;  %v9255_v18 = vpack.c.bf16 %v1146_v8, %v1146_v8  ;;  %v11133_v6 = vld [vmem:[#allocation2 + $0x4] ss:$12 sps:$4 sm:$0xff]  }
 0x1a8   : > { %v1763_v44 = vrot.slane %v1762_v1, 4  ;;  %2373 = vst [vmem:[#allocation2 + $0x170] sm:$0xf] %v2215_v52  ;;  %9391 = vmatprep.subr.bf16.mxu1 %v11128_v47  ;;  %4225 = vmatmul.mubr.bf16.gmra.mrb[124].mxu0 %v8821_v38  ;;  %v1147_v62 = vmax.f32 %v1023_v27, 0.0 }
 0x1a9   : > { %v1772_v42 = vor.u32 %v1771_v53, %v1767_v43  ;;  %9632 = vmatpush3.bf16.msra.mxu0 %v11130_v49  ;;  %1423 = vst [vmem:[#allocation2 + $0x180] sm:$0xf] %v9255_v18  ;;  %v1775_v1 = vshll.u32 %v9255_v18, 16  ;;  %v1779_v52 = vshrl.u32 %v9255_v18, 16  ;;  %v2217_v8 = vrot.slane %v9255_v18, 5  ;;  %v1027_v47 = vpop.f32.mrb[68].mxu0 }
 0x1aa   : > { %v1768_v13 = vsel %vm11861_vm5, %v1763_v44, %v1767_v43  ;;  %10259 = vmatmul.mubr.bf16.gmra.mrb[44].mxu1 %v11127_v10  ;;  %v12285_v38 = vld [vmem:[#allocation2 + $0x150] sm:$0xff]  ;;  %9633 = vmatprep.subr.bf16.mxu0 %v11134_v48  ;;  %v9256_v53 = vpack.c.bf16 %v1147_v62, %v1147_v62  ;;  %v1028_v50 = vadd.f32 %v12096_v63, %v1027_v47  ;;  %v11135_v43 = vld [vmem:[%s14346_s3 + $0x38] sm:$0xff]   ;;  %v1029_v18 = vpop.f32.mrb[69].mxu0 }
 0x1ab   : > { %v1773_v27 = vrot.slane %v1772_v42, 4  ;;  %2094 = vst [vmem:[#allocation2 + $0x16c] sm:$0xf] %v1768_v13  ;;  %9392 = vmatpush3.bf16.msra.mxu1 %v11130_v49  ;;  %3238 = vmatprep.mubr.bf16.mxu1 %v11133_v6  ;;  %v8825_v44 = vcombine.high %v12277_v22, %v12285_v38  ;;  %v1777_v10 = vrot.slane %v1775_v1, 5  ;;  %v1781_v17 = vrot.slane %v1779_v52, 4  ;;  %v1030_v62 = vpop.f32.mrb[70].mxu0 }
 0x1ac   : > { %v2218_v60 = vsel %vm11853_vm4, %v2216_v54, %v2217_v8  ;;  %v2219_v42 = vrot.slane %v2217_v8, 4  ;;  %9393 = vmatprep.subr.bf16.mxu1 %v11134_v48  ;;  %v11139_v49 = vld [vmem:[%s14346_s3 + $0x80] sm:$0xff]   ;;  %1424 = vst [vmem:[#allocation2 + $0x18c] sm:$0xf] %v9256_v53  ;;  %v1785_v6 = vshll.u32 %v9256_v53, 16  ;;  %v1789_v13 = vshrl.u32 %v9256_v53, 16 }
 0x1ad   : > { %2374 = vst [vmem:[#allocation2 + $0x17c] sm:$0xf] %v2218_v60  ;;  %v2220_v47 = vrot.slane %v9256_v53, 5  ;;  %v1148_v12 = vmax.f32 %v1028_v50, 0.0  ;;  %4232 = vmatprep.mubr.bf16.mxu0 %v8825_v44  ;;  %9634 = vmatpush3.bf16.msra.mxu0 %v11135_v43  ;;  %v1032_v1 = vpop.f32.mrb[71].mxu0  ;;  %v1778_v52 = vsel %vm11861_vm5, %v1773_v27, %v1777_v10  ;;  %v1782_v54 = vor.u32 %v1781_v17, %v1777_v10  ;;  %v11504_v60 = vld [vmem:[%s14346_s3 + $0x100] sm:$0xff]  }
 0x1ae   : > { %v8824_v48 = vcombine.low %v12277_v22, %v12285_v38  ;;  %v1031_v8 = vadd.f32 %v12096_v63, %v1030_v62  ;;  %9779 = vmatprep.subr.bf16.mxu0 %v11504_v60  ;;  %2095 = vst [vmem:[#allocation2 + $0x178] sm:$0xf] %v1778_v52  ;;  %v1787_v53 = vrot.slane %v1785_v6, 5  ;;  %v1791_v50 = vrot.slane %v1789_v13, 4  ;;  %v11131_v1 = vld [vmem:[#allocation2] ss:$12 sps:$4 sm:$0xff]  }
 0x1af   : > { %v2221_v44 = vsel %vm11853_vm4, %v2219_v42, %v2220_v47  ;;  %v2222_v18 = vrot.slane %v2220_v47, 4  ;;  %9394 = vmatpush3.bf16.msra.mxu1 %v11135_v43  ;;  %v12308_v17 = vld [vmem:[#allocation2 + $0x15c] sm:$0xff]  ;;  %v1783_v27 = vrot.slane %v1782_v54, 4  ;;  %v9257_v10 = vpack.c.bf16 %v1148_v12, %v1148_v12  ;;  %v11144_v6 = vld [vmem:[%s14346_s3 + $0x88] sm:$0xff]  }
 0x1b0   : > { %2375 = vst [vmem:[#allocation2 + $0x188] sm:$0xf] %v2221_v44  ;;  %4233 = vmatmul.mubr.bf16.gmra.mrb[128].mxu0 %v8824_v48  ;;  %v1149_v62 = vmax.f32 %v1031_v8, 0.0  ;;  %10262 = vmatprep.subr.bf16.mxu1 %v11139_v49  ;;  %v1792_v42 = vor.u32 %v1791_v50, %v1787_v53  ;;  %v11505_v47 = vld [vmem:[#allocation2 + $0x24] sm:$0xff] }
 0x1b1   : > { %v8671_v52 = vcombine.high %v2402_v59, %v11505_v47  ;;  %v1788_v12 = vsel %vm11861_vm5, %v1783_v27, %v1787_v53  ;;  %1425 = vst [vmem:[#allocation2 + $0x198] sm:$0xf] %v9257_v10  ;;  %v1795_v54 = vshll.u32 %v9257_v10, 16  ;;  %v1799_v48 = vshrl.u32 %v9257_v10, 16  ;;  %v1035_v44 = vpop.f32.mrb[72].mxu0 }
 0x1b2   : > { %v2223_v8 = vrot.slane %v9257_v10, 5  ;;  %3239 = vmatmul.mubr.bf16.vlgmr.msra.gmra.mrb[48].mxu1 %v11131_v1  ;;  %v12319_v60 = vld [vmem:[#allocation2 + $0x168] sm:$0xff]  ;;  %v1793_v16 = vrot.slane %v1792_v42, 4  ;;  %2096 = vst [vmem:[#allocation2 + $0x184] sm:$0xf] %v1788_v12  ;;  %v9258_v13 = vpack.c.bf16 %v1149_v62, %v1149_v62  ;;  %v1037_v53 = vpop.f32.mrb[73].mxu0  ;;  %v8670_v51 = vcombine.low %v2402_v59, %v11505_v47 }
 0x1b3   : > { %3246 = vmatprep.mubr.bf16.mxu1 %v8671_v52  ;;  %10263 = vmatpush3.bf16.msra.mxu1 %v11139_v49  ;;  %v8828_v50 = vcombine.high %v12308_v17, %v12319_v60  ;;  %v8827_v43 = vcombine.low %v12308_v17, %v12319_v60  ;;  %v1797_v27 = vrot.slane %v1795_v54, 5  ;;  %v1801_v15 = vrot.slane %v1799_v48, 4  ;;  %v11149_v62 = vld [vmem:[%s14346_s3 + $0x90] sm:$0xff]   ;;  %v1038_v42 = vpop.f32.mrb[74].mxu0 }
 0x1b4   : > { %v2224_v1 = vsel %vm11853_vm4, %v2222_v18, %v2223_v8  ;;  %v2225_v10 = vrot.slane %v2223_v8, 4  ;;  %10264 = vmatprep.subr.bf16.mxu1 %v11144_v6  ;;  %1426 = vst [vmem:[#allocation2 + $0x1a4] sm:$0xf] %v9258_v13  ;;  %v1805_v49 = vshll.u32 %v9258_v13, 16  ;;  %v1809_v52 = vshrl.u32 %v9258_v13, 16  ;;  %v1040_v54 = vpop.f32.mrb[75].mxu0 }
 0x1b5   : > { %2376 = vst [vmem:[#allocation2 + $0x194] sm:$0xf] %v2224_v1  ;;  %v2226_v12 = vrot.slane %v9258_v13, 5  ;;  %4240 = vmatprep.mubr.bf16.mxu0 %v8828_v50  ;;  %v1036_v53 = vadd.f32 %v12096_v63, %v1035_v44  ;;  %v1798_v48 = vsel %vm11861_vm5, %v1793_v16, %v1797_v27  ;;  %v1802_v18 = vor.u32 %v1801_v15, %v1797_v27  ;;  %v12336_v61 = vld [vmem:[#allocation2 + $0x174] sm:$0xff] }
 0x1b6   : > { %v1039_v8 = vadd.f32 %v12096_v63, %v1038_v42  ;;  %2097 = vst [vmem:[#allocation2 + $0x190] sm:$0xf] %v1798_v48  ;;  %v1807_v24 = vrot.slane %v1805_v49, 5  ;;  %v1811_v5 = vrot.slane %v1809_v52, 4  ;;  %v11157_v15 = vld [vmem:[%s14346_s3 + $0x98] sm:$0xff]  }
 0x1b7   : > { %v2227_v1 = vsel %vm11853_vm4, %v2225_v10, %v2226_v12  ;;  %10265 = vmatpush3.bf16.msra.mxu1 %v11144_v6  ;;  %v1803_v13 = vrot.slane %v1802_v18, 4  ;;  %v1150_v16 = vmax.f32 %v1036_v53, 0.0  ;;  %v2228_v47 = vrot.slane %v2226_v12, 4 }
 0x1b8   : > { %2377 = vst [vmem:[#allocation2 + $0x1a0] sm:$0xf] %v2227_v1  ;;  %4241 = vmatmul.mubr.bf16.gmra.mrb[132].mxu0 %v8827_v43  ;;  %10266 = vmatprep.subr.bf16.mxu1 %v11149_v62  ;;  %v1151_v44 = vmax.f32 %v1039_v8, 0.0  ;;  %v1812_v27 = vor.u32 %v1811_v5, %v1807_v24  ;;  %v14406_v53 = vcombine.high %v11897_v37, %v11916_v7 }
 0x1b9   : > { %v1808_v6 = vsel %vm11861_vm5, %v1803_v13, %v1807_v24  ;;  %v4034_v43 = vld [vmem:[#allocation2 + $0x180] sm:$0xff]  ;;  %v9259_v10 = vpack.c.bf16 %v1150_v16, %v1150_v16  ;;  %v1043_v49 = vpop.f32.mrb[76].mxu0 }
 0x1ba   : > { %3247 = vmatmul.mubr.bf16.gmra.mrb[52].mxu1 %v8670_v51  ;;  %v9260_v42 = vpack.c.bf16 %v1151_v44, %v1151_v44  ;;  %v1813_v52 = vrot.slane %v1812_v27, 4  ;;  %2098 = vst [vmem:[#allocation2 + $0x19c] sm:$0xf] %v1808_v6  ;;  %v8831_v5 = vcombine.high %v12336_v61, %v4034_v43  ;;  %v8830_v54 = vcombine.low %v12336_v61, %v4034_v43  ;;  %v1045_v24 = vpop.f32.mrb[77].mxu0  ;;  %v11161_v51 = vld [vmem:[%s14346_s3 + $0xa0] sm:$0xff]  }
 0x1bb   : > { %3254 = vmatprep.mubr.bf16.mxu1 %v14406_v53  ;;  %10267 = vmatpush3.bf16.msra.mxu1 %v11149_v62  ;;  %v1044_v48 = vadd.f32 %v12096_v63, %v1043_v49  ;;  %1427 = vst [vmem:[#allocation2 + $0x1b0] sm:$0xf] %v9259_v10  ;;  %v1815_v12 = vshll.u32 %v9259_v10, 16  ;;  %v1819_v18 = vshrl.u32 %v9259_v10, 16  ;;  %v2229_v8 = vrot.slane %v9259_v10, 5  ;;  %v1046_v13 = vpop.f32.mrb[78].mxu0 }
 0x1bc   : > { %10268 = vmatprep.subr.bf16.mxu1 %v11157_v15  ;;  %1428 = vst [vmem:[#allocation2 + $0x1bc] sm:$0xf] %v9260_v42  ;;  %v1825_v1 = vshll.u32 %v9260_v42, 16  ;;  %4248 = vmatprep.mubr.bf16.mxu0 %v8831_v5  ;;  %v1829_v16 = vshrl.u32 %v9260_v42, 16  ;;  %v2232_v44 = vrot.slane %v9260_v42, 5  ;;  %v1047_v62 = vadd.f32 %v12096_v63, %v1046_v13  ;;  %v1048_v6 = vpop.f32.mrb[79].mxu0 }
 0x1bd   : > { %v1152_v27 = vmax.f32 %v1044_v48, 0.0  ;;  %v1817_v43 = vrot.slane %v1815_v12, 5  ;;  %v1821_v49 = vrot.slane %v1819_v18, 4  ;;  %v2230_v53 = vsel %vm11853_vm4, %v2228_v47, %v2229_v8  ;;  %v11165_v42 = vld [vmem:[%s14346_s3 + $0xa8] sm:$0xff]  }
 0x1be   : > { %v2231_v24 = vrot.slane %v2229_v8, 4  ;;  %2378 = vst [vmem:[#allocation2 + $0x1ac] sm:$0xf] %v2230_v53  ;;  %v1827_v59 = vrot.slane %v1825_v1, 5  ;;  %v1831_v10 = vrot.slane %v1829_v16, 4  ;;  %v2234_v50 = vrot.slane %v2232_v44, 4 }
 0x1bf   : > { %10269 = vmatpush3.bf16.msra.mxu1 %v11157_v15  ;;  %v9261_v30 = vpack.c.bf16 %v1152_v27, %v1152_v27  ;;  %v1818_v63 = vsel %vm11861_vm5, %v1813_v52, %v1817_v43  ;;  %v1822_v5 = vor.u32 %v1821_v49, %v1817_v43  ;;  %v1153_v48 = vmax.f32 %v1047_v62, 0.0 }
 0x1c0   : > { %4249 = vmatmul.mubr.bf16.gmra.mrb[136].mxu0 %v8830_v54  ;;  %10270 = vmatprep.subr.bf16.mxu1 %v11161_v51  ;;  %v2233_v47 = vsel %vm11853_vm4, %v2231_v24, %v2232_v44  ;;  %2099 = vst [vmem:[#allocation2 + $0x1a8] sm:$0xf] %v1818_v63  ;;  %v1832_v15 = vor.u32 %v1831_v10, %v1827_v59  ;;  %v11170_v44 = vld [vmem:[%s14346_s3 + $0xb0] sm:$0xff]  }
 0x1c1   : > { %2379 = vst [vmem:[#allocation2 + $0x1b8] sm:$0xf] %v2233_v47  ;;  %1429 = vst [vmem:[#allocation2 + $0x1c8] sm:$0xf] %v9261_v30  ;;  %v1835_v12 = vshll.u32 %v9261_v30, 16  ;;  %v1839_v18 = vshrl.u32 %v9261_v30, 16  ;;  %v14407_v8 = vcombine.low %v11897_v37, %v11916_v7  ;;  %v9262_v16 = vpack.c.bf16 %v1153_v48, %v1153_v48 }
 0x1c2   : > { %v2235_v54 = vrot.slane %v9261_v30, 5  ;;  %v11150_v1 = vld [vmem:[#allocation2 + $0x190] ss:$12 sps:$4 sm:$0xff]   ;;  %v1823_v13 = vrot.slane %v1822_v5, 4  ;;  %v14408_v52 = vcombine.high %v11933_v29, %v11942_v45  ;;  %v1833_v27 = vrot.slane %v1832_v15, 4  ;;  %v1051_v37 = vpop.f32.mrb[80].mxu0 }
 0x1c3   : > { %3255 = vmatmul.mubr.bf16.gmra.mrb[56].mxu1 %v14407_v8  ;;  %v1837_v62 = vrot.slane %v1835_v12, 5  ;;  %v1841_v6 = vrot.slane %v1839_v18, 4  ;;  %4256 = vmatprep.mubr.bf16.mxu0 %v11150_v1  ;;  %v11153_v7 = vld [vmem:[#allocation2 + $0x18c] ss:$12 sps:$4 sm:$0xff]   ;;  %1430 = vst [vmem:[#allocation2 + $0x1d4] sm:$0xf] %v9262_v16 }
 0x1c4   : > { %3262 = vmatprep.mubr.bf16.mxu1 %v14408_v52  ;;  %10271 = vmatpush3.bf16.msra.mxu1 %v11161_v51  ;;  %v2236_v30 = vsel %vm11853_vm4, %v2234_v50, %v2235_v54  ;;  %v1828_v43 = vsel %vm11861_vm5, %v1823_v13, %v1827_v59  ;;  %v2237_v49 = vrot.slane %v2235_v54, 4  ;;  %v1845_v51 = vshll.u32 %v9262_v16, 16  ;;  %v1053_v24 = vpop.f32.mrb[81].mxu0  ;;  %v12384_v50 = vld [vmem:[%s14345_s2] ss:$0 sm:$0xff]  ;;  %v11175_v13 = vld [vmem:[%s14346_s3 + $0xb8] sm:$0xff]  }
 0x1c5   : > { %10272 = vmatprep.subr.bf16.mxu1 %v11165_v42  ;;  %2380 = vst [vmem:[#allocation2 + $0x1c4] sm:$0xf] %v2236_v30  ;;  %v1849_v53 = vshrl.u32 %v9262_v16, 16  ;;  %2100 = vst [vmem:[#allocation2 + $0x1b4] sm:$0xf] %v1828_v43  ;;  %v1838_v10 = vsel %vm11861_vm5, %v1833_v27, %v1837_v62  ;;  %v1842_v63 = vor.u32 %v1841_v6, %v1837_v62  ;;  %v2238_v5 = vrot.slane %v9262_v16, 5 }
 0x1c6   : > { %v1052_v47 = vadd.f32 %v12384_v50, %v1051_v37  ;;  %v1054_v59 = vpop.f32.mrb[82].mxu0  ;;  %2101 = vst [vmem:[#allocation2 + $0x1c0] sm:$0xf] %v1838_v10  ;;  %v1847_v48 = vrot.slane %v1845_v51, 5  ;;  %v14409_v27 = vcombine.high %v12082_v23, %v12099_v19  ;;  %v14410_v30 = vcombine.low %v11933_v29, %v11942_v45  ;;  %v11177_v29 = vld [vmem:[%s14346_s3 + $0x1c0] sm:$0xff]  }
 0x1c7   : > { %v1851_v15 = vrot.slane %v1849_v53, 4  ;;  %v1055_v12 = vadd.f32 %v12384_v50, %v1054_v59  ;;  %v1056_v18 = vpop.f32.mrb[83].mxu0  ;;  %v1843_v54 = vrot.slane %v1842_v63, 4  ;;  %v2239_v8 = vsel %vm11853_vm4, %v2237_v49, %v2238_v5 }
 0x1c8   : > { %10273 = vmatpush3.bf16.msra.mxu1 %v11165_v42  ;;  %v1154_v1 = vmax.f32 %v1052_v47, 0.0  ;;  %4257 = vmatmul.mubr.bf16.gmra.mrb[140].mxu0 %v11153_v7  ;;  %2381 = vst [vmem:[#allocation2 + $0x1d0] sm:$0xf] %v2239_v8  ;;  %v2240_v62 = vrot.slane %v2238_v5, 4  ;;  %v14411_v49 = vcombine.high %v11960_v4, %v11975_v33 }
 0x1c9   : > { %10274 = vmatprep.subr.bf16.mxu1 %v11170_v44  ;;  %v1852_v16 = vor.u32 %v1851_v15, %v1847_v48  ;;  %v1155_v52 = vmax.f32 %v1055_v12, 0.0  ;;  %4457 = vmatprep.mubr.bf16.mxu0 %v14409_v27  ;;  %v1848_v42 = vsel %vm11861_vm5, %v1843_v54, %v1847_v48  ;;  %v1059_v43 = vpop.f32.mrb[84].mxu0 }
 0x1ca   : > { %v9263_v6 = vpack.c.bf16 %v1154_v1, %v1154_v1  ;;  %2102 = vst [vmem:[#allocation2 + $0x1cc] sm:$0xf] %v1848_v42  ;;  %v1060_v10 = vadd.f32 %v12384_v50, %v1059_v43  ;;  %v1061_v63 = vpop.f32.mrb[85].mxu0  ;;  %v14412_v42 = vcombine.low %v12082_v23, %v12099_v19  ;;  %v14414_v23 = vcombine.low %v11960_v4, %v11975_v33  ;;  %v11508_v19 = vld [vmem:[%s14346_s3 + $0x108] sm:$0xff]  }
 0x1cb   : > { %3263 = vmatmul.mubr.bf16.gmra.mrb[60].mxu1 %v14410_v30  ;;  %v1853_v37 = vrot.slane %v1852_v16, 4  ;;  %v9264_v7 = vpack.c.bf16 %v1155_v52, %v1155_v52  ;;  %v1062_v59 = vpop.f32.mrb[86].mxu0  ;;  %v14415_v63 = vcombine.high %v11994_v56, %v12009_v25 }
 0x1cc   : > { %3270 = vmatprep.mubr.bf16.mxu1 %v14411_v49  ;;  %10275 = vmatpush3.bf16.msra.mxu1 %v11170_v44  ;;  %1431 = vst [vmem:[#allocation2 + $0x1e0] sm:$0xf] %v9263_v6  ;;  %v1855_v51 = vshll.u32 %v9263_v6, 16  ;;  %v1859_v53 = vshrl.u32 %v9263_v6, 16  ;;  %v2241_v24 = vrot.slane %v9263_v6, 5  ;;  %v1064_v18 = vpop.f32.mrb[87].mxu0  ;;  %v1063_v43 = vadd.f32 %v12384_v50, %v1062_v59 }
 0x1cd   : > { %10276 = vmatprep.subr.bf16.mxu1 %v11175_v13  ;;  %1432 = vst [vmem:[#allocation2 + $0x1ec] sm:$0xf] %v9264_v7  ;;  %v1865_v45 = vshll.u32 %v9264_v7, 16  ;;  %v1869_v5 = vshrl.u32 %v9264_v7, 16  ;;  %v2244_v47 = vrot.slane %v9264_v7, 5  ;;  %v1156_v1 = vmax.f32 %v1060_v10, 0.0 }
 0x1ce   : > { %v1857_v48 = vrot.slane %v1855_v51, 5  ;;  %v1861_v15 = vrot.slane %v1859_v53, 4  ;;  %v2242_v44 = vsel %vm11853_vm4, %v2240_v62, %v2241_v24  ;;  %v2243_v12 = vrot.slane %v2241_v24, 4 }
 0x1cf   : > { %2382 = vst [vmem:[#allocation2 + $0x1dc] sm:$0xf] %v2242_v44  ;;  %v1867_v54 = vrot.slane %v1865_v45, 5  ;;  %v1871_v8 = vrot.slane %v1869_v5, 4  ;;  %v2246_v6 = vrot.slane %v2244_v47, 4  ;;  %v9265_v30 = vpack.c.bf16 %v1156_v1, %v1156_v1  ;;  %v11510_v1 = vld [vmem:[%s14346_s3 + $0x110] sm:$0xff]  }
 0x1d0   : > { %10277 = vmatpush3.bf16.msra.mxu1 %v11175_v13  ;;  %v1858_v16 = vsel %vm11861_vm5, %v1853_v37, %v1857_v48  ;;  %v1862_v52 = vor.u32 %v1861_v15, %v1857_v48  ;;  %v2245_v27 = vsel %vm11853_vm4, %v2243_v12, %v2244_v47  ;;  %4458 = vmatmul.mubr.bf16.vlgmr.msra.gmra.mrb[144].mxu0 %v14412_v42  ;;  %v11507_v37 = vld [vmem:[%s14346_s3 + $0xc0] sm:$0xff]   ;;  %v1157_v4 = vmax.f32 %v1063_v43, 0.0  ;;  %v11509_v15 = vld [vmem:[%s14346_s3 + $0xc8] sm:$0xff]   ;;  %v11511_v43 = vld [vmem:[%s14346_s3 + $0xd0] sm:$0xff]  }
 0x1d1   : > { %9459 = vmatprep.subr.bf16.mxu1 %v11177_v29  ;;  %2103 = vst [vmem:[#allocation2 + $0x1d8] sm:$0xf] %v1858_v16  ;;  %v1872_v62 = vor.u32 %v1871_v8, %v1867_v54  ;;  %2383 = vst [vmem:[#allocation2 + $0x1e8] sm:$0xf] %v2245_v27  ;;  %v14413_v13 = vcombine.high %v12115_v21, %v12127_v20  ;;  %9780 = vmatpush3.bf16.msra.mxu0 %v11507_v37  ;;  %v1875_v51 = vshll.u32 %v9265_v30, 16  ;;  %v1067_v10 = vpop.f32.mrb[88].mxu0 }
 0x1d2   : > { %v1863_v7 = vrot.slane %v1862_v52, 4  ;;  %9781 = vmatprep.subr.bf16.mxu0 %v11508_v19  ;;  %1433 = vst [vmem:[#allocation2 + $0x1f8] sm:$0xf] %v9265_v30  ;;  %v1879_v53 = vshrl.u32 %v9265_v30, 16  ;;  %v2247_v24 = vrot.slane %v9265_v30, 5  ;;  %v1068_v33 = vadd.f32 %v12384_v50, %v1067_v10  ;;  %v1069_v45 = vpop.f32.mrb[89].mxu0 }
 0x1d3   : > { %4465 = vmatprep.mubr.bf16.mxu0 %v14413_v13  ;;  %3271 = vmatmul.mubr.bf16.gmra.mrb[64].mxu1 %v14414_v23  ;;  %v1873_v49 = vrot.slane %v1872_v62, 4  ;;  %v1877_v5 = vrot.slane %v1875_v51, 5  ;;  %v1070_v48 = vpop.f32.mrb[90].mxu0  ;;  %v9266_v12 = vpack.c.bf16 %v1157_v4, %v1157_v4  ;;  %v14416_v30 = vcombine.low %v12115_v21, %v12127_v20  ;;  %v11512_v20 = vld [vmem:[%s14346_s3 + $0x118] sm:$0xff]  }
 0x1d4   : > { %3278 = vmatprep.mubr.bf16.mxu1 %v14415_v63  ;;  %v1868_v29 = vsel %vm11861_vm5, %v1863_v7, %v1867_v54  ;;  %v1881_v47 = vrot.slane %v1879_v53, 4  ;;  %v2248_v59 = vsel %vm11853_vm4, %v2246_v6, %v2247_v24  ;;  %v2249_v44 = vrot.slane %v2247_v24, 4  ;;  %v1072_v8 = vpop.f32.mrb[91].mxu0 }
 0x1d5   : > { %2104 = vst [vmem:[#allocation2 + $0x1e4] sm:$0xf] %v1868_v29  ;;  %9782 = vmatpush3.bf16.msra.mxu0 %v11509_v15  ;;  %2384 = vst [vmem:[#allocation2 + $0x1f4] sm:$0xf] %v2248_v59  ;;  %v1158_v18 = vmax.f32 %v1068_v33, 0.0  ;;  %v1071_v54 = vadd.f32 %v12384_v50, %v1070_v48  ;;  %v1878_v16 = vsel %vm11861_vm5, %v1873_v49, %v1877_v5  ;;  %v1885_v27 = vshll.u32 %v9266_v12, 16 }
 0x1d6   : > { %9783 = vmatprep.subr.bf16.mxu0 %v11510_v1  ;;  %v1882_v52 = vor.u32 %v1881_v47, %v1877_v5  ;;  %2105 = vst [vmem:[#allocation2 + $0x1f0] sm:$0xf] %v1878_v16  ;;  %1434 = vst [vmem:[#allocation2 + $0x204] sm:$0xf] %v9266_v12  ;;  %v1889_v42 = vshrl.u32 %v9266_v12, 16  ;;  %v2250_v62 = vrot.slane %v9266_v12, 5  ;;  %v14417_v7 = vcombine.high %v12140_v2, %v12157_v35 }
 0x1d7   : > { %v9267_v6 = vpack.c.bf16 %v1158_v18, %v1158_v18  ;;  %v1159_v37 = vmax.f32 %v1071_v54, 0.0  ;;  %v1887_v23 = vrot.slane %v1885_v27, 5  ;;  %v14418_v21 = vcombine.low %v11994_v56, %v12009_v25  ;;  %v11514_v16 = vld [vmem:[%s14346_s3 + $0x120] sm:$0xff]  }
 0x1d8   : > { %4466 = vmatmul.mubr.bf16.gmra.mrb[148].mxu0 %v14416_v30  ;;  %v1883_v13 = vrot.slane %v1882_v52, 4  ;;  %v1891_v19 = vrot.slane %v1889_v42, 4  ;;  %v2251_v49 = vsel %vm11853_vm4, %v2249_v44, %v2250_v62  ;;  %v2252_v51 = vrot.slane %v2250_v62, 4  ;;  %v11513_v44 = vld [vmem:[%s14346_s3 + $0xd8] sm:$0xff]  }
 0x1d9   : > { %4473 = vmatprep.mubr.bf16.mxu0 %v14417_v7  ;;  %9784 = vmatpush3.bf16.msra.mxu0 %v11511_v43  ;;  %1435 = vst [vmem:[#allocation2 + $0x210] sm:$0xf] %v9267_v6  ;;  %2385 = vst [vmem:[#allocation2 + $0x200] sm:$0xf] %v2251_v49  ;;  %v1895_v53 = vshll.u32 %v9267_v6, 16  ;;  %v1899_v24 = vshrl.u32 %v9267_v6, 16  ;;  %v9268_v63 = vpack.c.bf16 %v1159_v37, %v1159_v37 }
 0x1da   : > { %9785 = vmatprep.subr.bf16.mxu0 %v11512_v20  ;;  %v2253_v10 = vrot.slane %v9267_v6, 5  ;;  %v1075_v29 = vpop.f32.mrb[92].mxu0  ;;  %v14419_v4 = vcombine.high %v12025_v58, %v12037_v26  ;;  %v1888_v33 = vsel %vm11861_vm5, %v1883_v13, %v1887_v23  ;;  %v1892_v56 = vor.u32 %v1891_v19, %v1887_v23  ;;  %v11515_v49 = vld [vmem:[%s14346_s3 + $0xe0] sm:$0xff]  }
 0x1db   : > { %3279 = vmatmul.mubr.bf16.gmra.mrb[68].mxu1 %v14418_v21  ;;  %v1076_v25 = vadd.f32 %v12384_v50, %v1075_v29  ;;  %v1077_v45 = vpop.f32.mrb[93].mxu0  ;;  %2106 = vst [vmem:[#allocation2 + $0x1fc] sm:$0xf] %v1888_v33  ;;  %v1897_v5 = vrot.slane %v1895_v53, 5  ;;  %v1901_v47 = vrot.slane %v1899_v24, 4  ;;  %v1905_v18 = vshll.u32 %v9268_v63, 16 }
 0x1dc   : > { %3286 = vmatprep.mubr.bf16.mxu1 %v14419_v4  ;;  %v2254_v59 = vsel %vm11853_vm4, %v2252_v51, %v2253_v10  ;;  %v2255_v48 = vrot.slane %v2253_v10, 4  ;;  %1436 = vst [vmem:[#allocation2 + $0x21c] sm:$0xf] %v9268_v63  ;;  %v1078_v15 = vpop.f32.mrb[94].mxu0  ;;  %v1893_v12 = vrot.slane %v1892_v56, 4  ;;  %v1909_v54 = vshrl.u32 %v9268_v63, 16 }
 0x1dd   : > { %9786 = vmatpush3.bf16.msra.mxu0 %v11513_v44  ;;  %2386 = vst [vmem:[#allocation2 + $0x20c] sm:$0xf] %v2254_v59  ;;  %v2256_v8 = vrot.slane %v9268_v63, 5  ;;  %v1080_v1 = vpop.f32.mrb[95].mxu0  ;;  %v1902_v52 = vor.u32 %v1901_v47, %v1897_v5  ;;  %v1160_v27 = vmax.f32 %v1076_v25, 0.0  ;;  %v1907_v62 = vrot.slane %v1905_v18, 5 }
 0x1de   : > { %9787 = vmatprep.subr.bf16.mxu0 %v11514_v16  ;;  %v1898_v42 = vsel %vm11861_vm5, %v1893_v12, %v1897_v5  ;;  %v1911_v6 = vrot.slane %v1909_v54, 4  ;;  %v14420_v13 = vcombine.low %v12140_v2, %v12157_v35  ;;  %v1079_v23 = vadd.f32 %v12384_v50, %v1078_v15  ;;  %v11516_v35 = vld [vmem:[%s14346_s3 + $0x128] sm:$0xff]   ;;  %v11518_v44 = vld [vmem:[%s14346_s3 + $0x130] sm:$0xff]  }
 0x1df   : > { %v2257_v30 = vsel %vm11853_vm4, %v2255_v48, %v2256_v8  ;;  %v1903_v37 = vrot.slane %v1902_v52, 4  ;;  %2107 = vst [vmem:[#allocation2 + $0x208] sm:$0xf] %v1898_v42  ;;  %v2258_v7 = vrot.slane %v2256_v8, 4  ;;  %v9269_v43 = vpack.c.bf16 %v1160_v27, %v1160_v27  ;;  %v11517_v5 = vld [vmem:[%s14346_s3 + $0xe8] sm:$0xff]  }
 0x1e0   : > { %4474 = vmatmul.mubr.bf16.gmra.mrb[152].mxu0 %v14420_v13  ;;  %2387 = vst [vmem:[#allocation2 + $0x218] sm:$0xf] %v2257_v30  ;;  %v14421_v19 = vcombine.high %v12172_v11, %v12195_v14  ;;  %v1912_v51 = vor.u32 %v1911_v6, %v1907_v62  ;;  %v14422_v2 = vcombine.low %v12025_v58, %v12037_v26  ;;  %v1161_v58 = vmax.f32 %v1079_v23, 0.0  ;;  %v11174_v6 = vld [vmem:[#allocation2 + $0x8] ss:$12 sps:$4 sm:$0xff]  }
 0x1e1   : > { %9788 = vmatpush3.bf16.msra.mxu0 %v11515_v49  ;;  %v1908_v21 = vsel %vm11861_vm5, %v1903_v37, %v1907_v62  ;;  %1437 = vst [vmem:[#allocation2 + $0x228] sm:$0xf] %v9269_v43  ;;  %v1915_v20 = vshll.u32 %v9269_v43, 16  ;;  %v1919_v53 = vshrl.u32 %v9269_v43, 16  ;;  %v2259_v24 = vrot.slane %v9269_v43, 5  ;;  %v1083_v10 = vpop.f32.mrb[96].mxu0 }
 0x1e2   : > { %4481 = vmatprep.mubr.bf16.mxu0 %v14421_v19  ;;  %9789 = vmatprep.subr.bf16.mxu0 %v11516_v35  ;;  %v14423_v63 = vcombine.high %v12054_v0, %v12066_v40  ;;  %v1913_v29 = vrot.slane %v1912_v51, 4  ;;  %2108 = vst [vmem:[#allocation2 + $0x214] sm:$0xf] %v1908_v21  ;;  %v1084_v26 = vadd.f32 %v12384_v50, %v1083_v10  ;;  %v1085_v4 = vpop.f32.mrb[97].mxu0  ;;  %v11519_v13 = vld [vmem:[%s14346_s3 + $0xf0] sm:$0xff]  }
 0x1e3   : > { %3287 = vmatmul.mubr.bf16.gmra.mrb[72].mxu1 %v14422_v2  ;;  %v1917_v33 = vrot.slane %v1915_v20, 5  ;;  %v1921_v56 = vrot.slane %v1919_v53, 4  ;;  %v2260_v25 = vsel %vm11853_vm4, %v2258_v7, %v2259_v24  ;;  %v1086_v45 = vpop.f32.mrb[98].mxu0  ;;  %v2261_v47 = vrot.slane %v2259_v24, 4 }
 0x1e4   : > { %3294 = vmatprep.mubr.bf16.mxu1 %v14423_v63  ;;  %2388 = vst [vmem:[#allocation2 + $0x224] sm:$0xf] %v2260_v25  ;;  %v9270_v59 = vpack.c.bf16 %v1161_v58, %v1161_v58  ;;  %v1162_v48 = vmax.f32 %v1084_v26, 0.0  ;;  %v1088_v15 = vpop.f32.mrb[99].mxu0  ;;  %v1087_v54 = vadd.f32 %v12384_v50, %v1086_v45  ;;  %v14424_v27 = vcombine.low %v12172_v11, %v12195_v14  ;;  %v11520_v14 = vld [vmem:[%s14346_s3 + $0x138] sm:$0xff]  }
 0x1e5   : > { %9790 = vmatpush3.bf16.msra.mxu0 %v11517_v5  ;;  %v1918_v12 = vsel %vm11861_vm5, %v1913_v29, %v1917_v33  ;;  %v1922_v18 = vor.u32 %v1921_v56, %v1917_v33  ;;  %v14425_v30 = vcombine.high %v12213_v55, %v12236_v31  ;;  %v14426_v11 = vcombine.low %v12054_v0, %v12066_v40  ;;  %v2403_v40 = vld [vmem:[#allocation2 + $0x20] sm:$0xf]  ;;  %v11521_v26 = vld [vmem:[%s14346_s3 + $0xf8] sm:$0xff]   ;;  %v11522_v5 = vld [vmem:[#allocation2 + $0x2c] sm:$0xf] }
 0x1e6   : > { %9791 = vmatprep.subr.bf16.mxu0 %v11518_v44  ;;  %2109 = vst [vmem:[#allocation2 + $0x220] sm:$0xf] %v1918_v12  ;;  %1438 = vst [vmem:[#allocation2 + $0x234] sm:$0xf] %v9270_v59  ;;  %v1925_v8 = vshll.u32 %v9270_v59, 16  ;;  %v1929_v1 = vshrl.u32 %v9270_v59, 16  ;;  %v9271_v52 = vpack.c.bf16 %v1162_v48, %v1162_v48 }
 0x1e7   : > { %v2262_v16 = vrot.slane %v9270_v59, 5  ;;  %v1923_v42 = vrot.slane %v1922_v18, 4  ;;  %v1163_v62 = vmax.f32 %v1087_v54, 0.0  ;;  %v12543_v15 = vld [vmem:[%s14346_s3 + $0x140] sm:$0xff]  }
 0x1e8   : > { %4482 = vmatmul.mubr.bf16.gmra.mrb[156].mxu0 %v14424_v27  ;;  %v1927_v37 = vrot.slane %v1925_v8, 5  ;;  %v1931_v7 = vrot.slane %v1929_v1, 4  ;;  %1439 = vst [vmem:[#allocation2 + $0x240] sm:$0xf] %v9271_v52  ;;  %v1935_v19 = vshll.u32 %v9271_v52, 16  ;;  %v1939_v49 = vshrl.u32 %v9271_v52, 16 }
 0x1e9   : > { %4489 = vmatprep.mubr.bf16.mxu0 %v14425_v30  ;;  %9792 = vmatpush3.bf16.msra.mxu0 %v11519_v13  ;;  %v2263_v43 = vsel %vm11853_vm4, %v2261_v47, %v2262_v16  ;;  %v2264_v23 = vrot.slane %v2262_v16, 4  ;;  %v2265_v51 = vrot.slane %v9271_v52, 5  ;;  %v9272_v2 = vpack.c.bf16 %v1163_v62, %v1163_v62  ;;  %v1091_v35 = vpop.f32.mrb[100].mxu0  ;;  %v12550_v12 = vld [vmem:[%s14346_s3 + $0x180] sm:$0xff]   ;;  %v12562_v52 = vld [vmem:[%s14346_s3 + $0x1c8] sm:$0xff]  }
 0x1ea   : > { %9793 = vmatprep.subr.bf16.mxu0 %v11520_v14  ;;  %2389 = vst [vmem:[#allocation2 + $0x230] sm:$0xf] %v2263_v43  ;;  %v1928_v21 = vsel %vm11861_vm5, %v1923_v42, %v1927_v37  ;;  %v1932_v20 = vor.u32 %v1931_v7, %v1927_v37  ;;  %v1092_v53 = vadd.f32 %v12384_v50, %v1091_v35  ;;  %v1093_v0 = vpop.f32.mrb[101].mxu0  ;;  %v1937_v24 = vrot.slane %v1935_v19, 5 }
 0x1eb   : > { %3295 = vmatmul.mubr.bf16.gmra.mrb[76].mxu1 %v14426_v11  ;;  %2110 = vst [vmem:[#allocation2 + $0x22c] sm:$0xf] %v1928_v21  ;;  %v1941_v10 = vrot.slane %v1939_v49, 4  ;;  %v2266_v63 = vsel %vm11853_vm4, %v2264_v23, %v2265_v51  ;;  %v2267_v29 = vrot.slane %v2265_v51, 4  ;;  %1440 = vst [vmem:[#allocation2 + $0x24c] sm:$0xf] %v9272_v2  ;;  %v8672_v47 = vcombine.low %v2403_v40, %v11522_v5 }
 0x1ec   : > { %10278 = vmatprep.mubr.bf16.mxu1 %v11174_v6  ;;  %v1094_v58 = vpop.f32.mrb[102].mxu0  ;;  %v1933_v4 = vrot.slane %v1932_v20, 4  ;;  %2390 = vst [vmem:[#allocation2 + $0x23c] sm:$0xf] %v2266_v63  ;;  %v1945_v33 = vshll.u32 %v9272_v2, 16  ;;  %v1949_v56 = vshrl.u32 %v9272_v2, 16  ;;  %v14427_v16 = vcombine.low %v12213_v55, %v12236_v31 }
 0x1ed   : > { %9794 = vmatpush3.bf16.msra.mxu0 %v11521_v26  ;;  %v2268_v25 = vrot.slane %v9272_v2, 5  ;;  %v1096_v45 = vpop.f32.mrb[103].mxu0  ;;  %v1942_v59 = vor.u32 %v1941_v10, %v1937_v24  ;;  %v1164_v48 = vmax.f32 %v1092_v53, 0.0  ;;  %v1095_v44 = vadd.f32 %v12384_v50, %v1094_v58  ;;  %v12576_v11 = vld [vmem:[%s14346_s3 + $0x188] sm:$0xff]   ;;  %v12593_v58 = vld [vmem:[%s14346_s3 + $0x190] sm:$0xff]  }
 0x1ee   : > { %10422 = vmatprep.subr.bf16.mxu0 %v12543_v15  ;;  %v1938_v18 = vsel %vm11861_vm5, %v1933_v4, %v1937_v24  ;;  %v1947_v54 = vrot.slane %v1945_v33, 5  ;;  %v1951_v8 = vrot.slane %v1949_v56, 4  ;;  %v14428_v30 = vcombine.high %v12251_v41, %v12277_v22 }
 0x1ef   : > { %v2269_v1 = vsel %vm11853_vm4, %v2267_v29, %v2268_v25  ;;  %v1943_v27 = vrot.slane %v1942_v59, 4  ;;  %2111 = vst [vmem:[#allocation2 + $0x238] sm:$0xf] %v1938_v18  ;;  %v2270_v42 = vrot.slane %v2268_v25, 4  ;;  %v9273_v62 = vpack.c.bf16 %v1164_v48, %v1164_v48  ;;  %v12604_v25 = vld [vmem:[%s14346_s3 + $0x1d8] sm:$0xff]  }
 0x1f0   : > { %4490 = vmatmul.mubr.bf16.gmra.mrb[160].mxu0 %v14427_v16  ;;  %2391 = vst [vmem:[#allocation2 + $0x248] sm:$0xf] %v2269_v1  ;;  %v1165_v6 = vmax.f32 %v1095_v44, 0.0  ;;  %v1952_v13 = vor.u32 %v1951_v8, %v1947_v54  ;;  %v14429_v23 = vcombine.low %v11918_v9, %v11912_v3  ;;  %v12583_v3 = vld [vmem:[%s14346_s3 + $0x1d0] sm:$0xff]   ;;  %v14430_v56 = vcombine.low %v12251_v41, %v12277_v22 }
 0x1f1   : > { %4497 = vmatprep.mubr.bf16.mxu0 %v14428_v30  ;;  %v1948_v55 = vsel %vm11861_vm5, %v1943_v27, %v1947_v54  ;;  %1441 = vst [vmem:[#allocation2 + $0x258] sm:$0xf] %v9273_v62  ;;  %v1955_v31 = vshll.u32 %v9273_v62, 16  ;;  %v1959_v37 = vshrl.u32 %v9273_v62, 16  ;;  %v2271_v7 = vrot.slane %v9273_v62, 5  ;;  %v1099_v43 = vpop.f32.mrb[104].mxu0 }
 0x1f2   : > { %v1953_v14 = vrot.slane %v1952_v13, 4  ;;  %2112 = vst [vmem:[#allocation2 + $0x244] sm:$0xf] %v1948_v55  ;;  %v9274_v19 = vpack.c.bf16 %v1165_v6, %v1165_v6  ;;  %v1100_v49 = vadd.f32 %v12384_v50, %v1099_v43  ;;  %v1101_v51 = vpop.f32.mrb[105].mxu0  ;;  %v14431_v48 = vcombine.high %v12285_v38, %v12308_v17  ;;  %v12622_v27 = vld [vmem:[%s14346_s3 + $0x198] sm:$0xff]   ;;  %v12628_v62 = vld [vmem:[%s14346_s3 + $0x1e0] sm:$0xff]  }
 0x1f3   : > { %10279 = vmatmul.mubr.bf16.vlgmr.msra.gmra.mrb[32].mxu1 %v8672_v47  ;;  %v1957_v9 = vrot.slane %v1955_v31, 5  ;;  %v1961_v2 = vrot.slane %v1959_v37, 4  ;;  %v2272_v35 = vsel %vm11853_vm4, %v2270_v42, %v2271_v7  ;;  %v2273_v21 = vrot.slane %v2271_v7, 4  ;;  %v1102_v20 = vpop.f32.mrb[106].mxu0  ;;  %v12636_v7 = vld [vmem:[%s14346_s3 + $0x1a0] sm:$0xff]   ;;  %v12638_v43 = vld [vmem:[#allocation2 + $0x1b0] sm:$0xff] }
 0x1f4   : > { %10282 = vmatprep.mubr.bf16.mxu1 %v14429_v23  ;;  %9460 = vmatpush3.bf16.msra.mxu1 %v12550_v12  ;;  %2392 = vst [vmem:[#allocation2 + $0x254] sm:$0xf] %v2272_v35  ;;  %1442 = vst [vmem:[#allocation2 + $0x264] sm:$0xf] %v9274_v19  ;;  %v1965_v53 = vshll.u32 %v9274_v19, 16  ;;  %v1969_v0 = vshrl.u32 %v9274_v19, 16  ;;  %v1103_v59 = vadd.f32 %v12384_v50, %v1102_v20 }
 0x1f5   : > { %9461 = vmatprep.subr.bf16.mxu1 %v12562_v52  ;;  %v2274_v40 = vrot.slane %v9274_v19, 5  ;;  %v1104_v24 = vpop.f32.mrb[107].mxu0  ;;  %v1958_v10 = vsel %vm11861_vm5, %v1953_v14, %v1957_v9  ;;  %v1962_v63 = vor.u32 %v1961_v2, %v1957_v9  ;;  %v1166_v29 = vmax.f32 %v1100_v49, 0.0  ;;  %14434 = vst [vmem:[#allocation11_spill] sm:$0xff] %v12638_v43  ;;  %v12640_v23 = vld [vmem:[#allocation2 + $0x1bc] sm:$0xff]  ;;  %v12652_v35 = vld [vmem:[%s14346_s3 + $0x1e8] sm:$0xff]  }
 0x1f6   : > { %2113 = vst [vmem:[#allocation2 + $0x250] sm:$0xf] %v1958_v10  ;;  %v1967_v26 = vrot.slane %v1965_v53, 5  ;;  %v1971_v4 = vrot.slane %v1969_v0, 4  ;;  %v14432_v41 = vcombine.low %v11981_v39, %v11977_v34  ;;  %v14433_v16 = vcombine.low %v12015_v32, %v12011_v28  ;;  %14435 = vst [vmem:[#allocation12_spill] sm:$0xff] %v12640_v23  ;;  %v5027_v10 = vld [vmem:[#allocation2 + $0x1a4] sm:$0xff] }
 0x1f7   : > { %v2275_v33 = vsel %vm11853_vm4, %v2273_v21, %v2274_v40  ;;  %v1963_v45 = vrot.slane %v1962_v63, 4  ;;  %v2276_v5 = vrot.slane %v2274_v40, 4  ;;  %v9275_v47 = vpack.c.bf16 %v1166_v29, %v1166_v29 }
 0x1f8   : > { %9462 = vmatpush3.bf16.msra.mxu1 %v12576_v11  ;;  %4498 = vmatmul.mubr.bf16.gmra.mrb[164].mxu0 %v14430_v56  ;;  %2393 = vst [vmem:[#allocation2 + $0x260] sm:$0xf] %v2275_v33  ;;  %v1972_v44 = vor.u32 %v1971_v4, %v1967_v26  ;;  %v1167_v39 = vmax.f32 %v1103_v59, 0.0  ;;  %v14436_v2 = vcombine.low %v12285_v38, %v12308_v17  ;;  %v14438_v38 = vld [vmem:[#allocation6_spill] sm:$0xff]  ;;  %v14440_v4 = vld [vmem:[#allocation8_spill] sm:$0xff]  ;;  %v14441_v33 = vld [vmem:[#allocation7_spill] sm:$0xff] }
 0x1f9   : > { %9463 = vmatprep.subr.bf16.mxu1 %v12583_v3  ;;  %4505 = vmatprep.mubr.bf16.mxu0 %v14431_v48  ;;  %v1968_v22 = vsel %vm11861_vm5, %v1963_v45, %v1967_v26  ;;  %1443 = vst [vmem:[#allocation2 + $0x270] sm:$0xf] %v9275_v47  ;;  %v1975_v18 = vshll.u32 %v9275_v47, 16  ;;  %v1979_v54 = vshrl.u32 %v9275_v47, 16  ;;  %v2277_v8 = vrot.slane %v9275_v47, 5  ;;  %v1107_v1 = vpop.f32.mrb[108].mxu0 }
 0x1fa   : > { %v1973_v34 = vrot.slane %v1972_v44, 4  ;;  %2114 = vst [vmem:[#allocation2 + $0x25c] sm:$0xf] %v1968_v22  ;;  %v1109_v42 = vpop.f32.mrb[109].mxu0  ;;  %v9276_v55 = vpack.c.bf16 %v1167_v39, %v1167_v39  ;;  %v1108_v31 = vadd.f32 %v12384_v50, %v1107_v1  ;;  %v14437_v53 = vcombine.high %v12319_v60, %v12336_v61  ;;  %v12673_v45 = vld [vmem:[%s14346_s3 + $0x1a8] sm:$0xff]   ;;  %v12694_v1 = vld [vmem:[#allocation2 + $0x1d4] sm:$0xff] }
 0x1fb   : > { %10283 = vmatmul.mubr.bf16.gmra.mrb[36].mxu1 %v14432_v41  ;;  %v1977_v28 = vrot.slane %v1975_v18, 5  ;;  %v1981_v32 = vrot.slane %v1979_v54, 4  ;;  %v2278_v6 = vsel %vm11853_vm4, %v2276_v5, %v2277_v8  ;;  %v1110_v30 = vpop.f32.mrb[110].mxu0  ;;  %v2279_v13 = vrot.slane %v2277_v8, 4  ;;  %v12681_v5 = vld [vmem:[%s14346_s3 + $0x1f0] sm:$0xff]   ;;  %v12692_v8 = vld [vmem:[#allocation2 + $0x1c8] sm:$0xff] }
 0x1fc   : > { %10286 = vmatprep.mubr.bf16.mxu1 %v14433_v16  ;;  %9464 = vmatpush3.bf16.msra.mxu1 %v12593_v58  ;;  %2394 = vst [vmem:[#allocation2 + $0x26c] sm:$0xf] %v2278_v6  ;;  %v1112_v37 = vpop.f32.mrb[111].mxu0  ;;  %1444 = vst [vmem:[#allocation2 + $0x27c] sm:$0xf] %v9276_v55  ;;  %v1985_v49 = vshll.u32 %v9276_v55, 16  ;;  %v14439_v17 = vcombine.low %v12044_v36, %v14438_v38  ;;  %v14442_v56 = vcombine.low %v14440_v4, %v14441_v33 }
 0x1fd   : > { %9465 = vmatprep.subr.bf16.mxu1 %v12604_v25  ;;  %v1978_v14 = vsel %vm11861_vm5, %v1973_v34, %v1977_v28  ;;  %v1982_v19 = vor.u32 %v1981_v32, %v1977_v28  ;;  %v1989_v50 = vshrl.u32 %v9276_v55, 16  ;;  %v2280_v51 = vrot.slane %v9276_v55, 5  ;;  %v12690_v54 = vld [vmem:[%s14346_s3 + $0x1b0] sm:$0xff]   ;;  %14443 = vst [vmem:[#allocation6_spill] sm:$0xff] %v12692_v8  ;;  %14444 = vst [vmem:[#allocation8_spill] sm:$0xff] %v12694_v1  ;;  %v12703_v34 = vld [vmem:[%s14346_s3 + $0x1f8] sm:$0xff]  }
 0x1fe   : > { %2115 = vst [vmem:[#allocation2 + $0x268] sm:$0xf] %v1978_v14  ;;  %v1168_v9 = vmax.f32 %v1108_v31, 0.0  ;;  %v1987_v0 = vrot.slane %v1985_v49, 5  ;;  %v8885_v44 = vcombine.high %v5027_v10, %v12638_v43  ;;  %v14445_v16 = vcombine.low %v12319_v60, %v12336_v61  ;;  %v11206_v28 = vld [vmem:[#allocation2 + $0x4c] ss:$12 sps:$4 sm:$0xff]  }
 0x1ff   : > { %v1983_v21 = vrot.slane %v1982_v19, 4  ;;  %v1991_v40 = vrot.slane %v1989_v50, 4  ;;  %v2281_v24 = vsel %vm11853_vm4, %v2279_v13, %v2280_v51  ;;  %v2282_v63 = vrot.slane %v2280_v51, 4  ;;  %v14446_v6 = vld [vmem:[#allocation10_spill] sm:$0xff]  ;;  %v14447_v61 = vld [vmem:[#allocation9_spill] sm:$0xff]  ;;  %v12718_v30 = vld [vmem:[%s14346_s3 + $0x1b8] sm:$0xff]  }
 0x200   : > { %9466 = vmatpush3.bf16.msra.mxu1 %v12622_v27  ;;  %4506 = vmatmul.mubr.bf16.gmra.mrb[168].mxu0 %v14436_v2  ;;  %2395 = vst [vmem:[#allocation2 + $0x278] sm:$0xf] %v2281_v24  ;;  %v9277_v29 = vpack.c.bf16 %v1168_v9, %v1168_v9  ;;  %v14448_v60 = vcombine.low %v14446_v6, %v14447_v61  ;;  %v12725_v55 = vld [vmem:[%s14346_s3 + $0x200] sm:$0xff]   ;;  %v12732_v14 = vld [vmem:[#allocation2 + $0x1ec] sm:$0xff]  ;;  %v11204_v19 = vld [vmem:[#allocation2 + $0x48] ss:$12 sps:$4 sm:$0xff]  }
 0x201   : > { %9467 = vmatprep.subr.bf16.mxu1 %v12628_v62  ;;  %4513 = vmatprep.mubr.bf16.mxu0 %v14437_v53  ;;  %v1988_v36 = vsel %vm11861_vm5, %v1983_v21, %v1987_v0  ;;  %v1992_v47 = vor.u32 %v1991_v40, %v1987_v0  ;;  %v8884_v13 = vcombine.low %v5027_v10, %v12638_v43  ;;  %v12730_v37 = vld [vmem:[#allocation2 + $0x1e0] sm:$0xff]  ;;  %v12738_v49 = vld [vmem:[%s14346_s3 + $0x208] sm:$0xff]   ;;  %v12758_v53 = vld [vmem:[%s14346_s3 + $0x210] sm:$0xff]  }
 0x202   : > { %2116 = vst [vmem:[#allocation2 + $0x274] sm:$0xf] %v1988_v36  ;;  %v1995_v59 = vshll.u32 %v9277_v29, 16  ;;  %v2283_v48 = vrot.slane %v9277_v29, 5  ;;  %v8888_v31 = vcombine.high %v12640_v23, %v12692_v8  ;;  %14449 = vst [vmem:[#allocation7_spill] sm:$0xff] %v12730_v37  ;;  %v12748_v2 = vld [vmem:[%s14346_s3 + $0x148] sm:$0xff]   ;;  %v8887_v21 = vcombine.low %v12640_v23, %v12692_v8 }
 0x203   : > { %10287 = vmatmul.mubr.bf16.gmra.mrb[40].mxu1 %v14439_v17  ;;  %v1993_v41 = vrot.slane %v1992_v47, 4  ;;  %v11211_v51 = vld [vmem:[#allocation2 + $0x64] ss:$12 sps:$4 sm:$0xff]   ;;  %v8891_v0 = vcombine.high %v12694_v1, %v12730_v37  ;;  %v12770_v24 = vld [vmem:[#allocation2 + $0x1f8] sm:$0xff]  ;;  %v11215_v17 = vld [vmem:[#allocation2 + $0x60] ss:$12 sps:$4 sm:$0xff]  }
 0x204   : > { %10290 = vmatprep.mubr.bf16.mxu1 %v14442_v56  ;;  %9468 = vmatpush3.bf16.msra.mxu1 %v12636_v7  ;;  %v1997_v22 = vrot.slane %v1995_v59, 5  ;;  %v2284_v18 = vsel %vm11853_vm4, %v2282_v63, %v2283_v48  ;;  %v12766_v40 = vld [vmem:[%s14346_s3 + $0x150] sm:$0xff]   ;;  %14450 = vst [vmem:[#allocation10_spill] sm:$0xff] %v12770_v24  ;;  %v12772_v38 = vld [vmem:[#allocation2 + $0x204] sm:$0xff]  ;;  %v12778_v10 = vld [vmem:[%s14346_s3 + $0x218] sm:$0xff]   ;;  %v8890_v56 = vcombine.low %v12694_v1, %v12730_v37 }
 0x205   : > { %9469 = vmatprep.subr.bf16.mxu1 %v12652_v35  ;;  %2396 = vst [vmem:[#allocation2 + $0x284] sm:$0xf] %v2284_v18  ;;  %v11217_v29 = vld [vmem:[#allocation2 + $0x7c] ss:$12 sps:$4 sm:$0xff]   ;;  %v12798_v36 = vld [vmem:[%s14346_s3 + $0x220] sm:$0xff]   ;;  %v8894_v47 = vcombine.high %v12732_v14, %v12770_v24  ;;  %v5045_v48 = vld [vmem:[#allocation2 + $0x210] sm:$0xff] }
 0x206   : > { %v1998_v39 = vsel %vm11861_vm5, %v1993_v41, %v1997_v22  ;;  %v12788_v33 = vld [vmem:[%s14346_s3 + $0x158] sm:$0xff]   ;;  %v12806_v59 = vld [vmem:[%s14346_s3 + $0x160] sm:$0xff]   ;;  %v12816_v22 = vld [vmem:[%s14346_s3 + $0x228] sm:$0xff]  }
 0x207   : > { %2117 = vst [vmem:[#allocation2 + $0x280] sm:$0xf] %v1998_v39  ;;  %v11221_v41 = vld [vmem:[#allocation2 + $0x78] ss:$12 sps:$4 sm:$0xff]   ;;  %14451 = vst [vmem:[#allocation9_spill] sm:$0xff] %v12816_v22 }
 0x208   : > { %9470 = vmatpush3.bf16.msra.mxu1 %v12673_v45  ;;  %4514 = vmatmul.mubr.bf16.gmra.mrb[172].mxu0 %v14445_v16  ;;  %v11223_v39 = vld [vmem:[#allocation2 + $0x94] ss:$12 sps:$4 sm:$0xff]   ;;  %v12914_v26 = vld [vmem:[#allocation2 + $0x1ac] sm:$0xf]  ;;  %v12924_v23 = vld [vmem:[#allocation2 + $0x1d0] sm:$0xf] }
 0x209   : > { %9471 = vmatprep.subr.bf16.mxu1 %v12681_v5  ;;  %5219 = vmatprep.mubr.bf16.mxu0 %v8885_v44  ;;  %v12810_v44 = vld [vmem:[#allocation2 + $0x21c] sm:$0xff]  ;;  %v11233_v32 = vld [vmem:[#allocation2 + $0xa8] ss:$12 sps:$4 sm:$0xff]  }
 0x20a   : > { %v12819_v18 = vcombine.high %v5045_v48, %v12810_v44  ;;  %v12822_v16 = vcombine.low %v5045_v48, %v12810_v44  ;;  %v12878_v4 = vld [vmem:[%s14346_s3 + $0x80] sm:$0xff]   ;;  %v12926_v43 = vld [vmem:[#allocation2 + $0x1dc] sm:$0xf] }
 0x20b   : > { %10291 = vmatmul.mubr.bf16.gmra.mrb[44].mxu1 %v14448_v60  ;;  %v8893_v60 = vcombine.low %v12732_v14, %v12770_v24  ;;  %v12883_v9 = vld [vmem:[#allocation2 + $0x240] sm:$0xff] }
 0x20c   : > { %9472 = vmatpush3.bf16.msra.mxu1 %v12690_v54  ;;  %3785 = vmatprep.mubr.bf16.mxu1 %v11206_v28  ;;  %14452 = vst [vmem:[#allocation13_spill] sm:$0xff] %v12819_v18  ;;  %14453 = vst [vmem:[#allocation14_spill] sm:$0xff] %v12822_v16  ;;  %v12828_v28 = vld [vmem:[%s14346_s3 + $0x168] sm:$0xff]   ;;  %v12973_v16 = vld [vmem:[#allocation2 + $0x224] sm:$0xf] }
 0x20d   : > { %9473 = vmatprep.subr.bf16.mxu1 %v12703_v34  ;;  %14458 = vst [vmem:[#allocation19_spill] sm:$0xff] %v12883_v9  ;;  %v11239_v42 = vld [vmem:[#allocation2 + $0xc0] ss:$12 sps:$4 sm:$0xff]   ;;  %v13055_v18 = vld [vmem:[#allocation2 + $0x104] sm:$0xf] }
 0x210   : > { %9474 = vmatpush3.bf16.msra.mxu1 %v12718_v30  ;;  %5220 = vmatmul.mubr.bf16.vlgmr.msra.gmra.mrb[176].mxu0 %v8884_v13  ;;  %v12838_v13 = vld [vmem:[%s14346_s3 + $0x230] sm:$0xff]  }
 0x211   : > { %10294 = vmatprep.subr.bf16.mxu1 %v12725_v55  ;;  %5227 = vmatprep.mubr.bf16.mxu0 %v8888_v31  ;;  %14454 = vst [vmem:[#allocation15_spill] sm:$0xff] %v12838_v13 }
 0x212   : > { %10423 = vmatpush3.bf16.msra.mxu0 %v12543_v15 }
 0x213   : > { %3786 = vmatmul.mubr.bf16.vlgmr.msra.gmra.mrb[80].mxu1 %v11204_v19  ;;  %10424 = vmatprep.subr.bf16.mxu0 %v12748_v2 }
 0x214   : > { %3793 = vmatprep.mubr.bf16.mxu1 %v11211_v51  ;;  %10295 = vmatpush3.bf16.msra.mxu1 %v12725_v55  ;;  %v8897_v51 = vcombine.high %v12772_v38, %v5045_v48 }
 0x215   : > { %10296 = vmatprep.subr.bf16.mxu1 %v12738_v49 }
 0x216   : > { %10425 = vmatpush3.bf16.msra.mxu0 %v12748_v2 }
 0x217   : > { %10426 = vmatprep.subr.bf16.mxu0 %v12766_v40 }
 0x218   : > { %10297 = vmatpush3.bf16.msra.mxu1 %v12738_v49  ;;  %5228 = vmatmul.mubr.bf16.gmra.mrb[180].mxu0 %v8887_v21 }
 0x219   : > { %10298 = vmatprep.subr.bf16.mxu1 %v12758_v53  ;;  %5235 = vmatprep.mubr.bf16.mxu0 %v8891_v0  ;;  %v12847_v0 = vld [vmem:[%s14346_s3 + $0x170] sm:$0xff]  }
 0x21a   : > { %10427 = vmatpush3.bf16.msra.mxu0 %v12766_v40 }
 0x21b   : > { %3794 = vmatmul.mubr.bf16.gmra.mrb[84].mxu1 %v11215_v17  ;;  %10428 = vmatprep.subr.bf16.mxu0 %v12788_v33 }
 0x21c   : > { %3801 = vmatprep.mubr.bf16.mxu1 %v11217_v29  ;;  %10299 = vmatpush3.bf16.msra.mxu1 %v12758_v53  ;;  %v5049_v29 = vld [vmem:[#allocation2 + $0x228] sm:$0xff] }
 0x21d   : > { %10300 = vmatprep.subr.bf16.mxu1 %v12778_v10  ;;  %v8899_v20 = vcombine.low %v12810_v44, %v5049_v29 }
 0x21e   : > { %10429 = vmatpush3.bf16.msra.mxu0 %v12788_v33 }
 0x21f   : > { %10430 = vmatprep.subr.bf16.mxu0 %v12806_v59 }
 0x220   : > { %10301 = vmatpush3.bf16.msra.mxu1 %v12778_v10  ;;  %5236 = vmatmul.mubr.bf16.gmra.mrb[184].mxu0 %v8890_v56  ;;  %v5051_v56 = vld [vmem:[#allocation2 + $0x234] sm:$0xff] }
 0x221   : > { %10302 = vmatprep.subr.bf16.mxu1 %v12798_v36  ;;  %5243 = vmatprep.mubr.bf16.mxu0 %v8894_v47  ;;  %v11227_v47 = vld [vmem:[#allocation2 + $0x90] ss:$12 sps:$4 sm:$0xff]   ;;  %v8903_v46 = vcombine.high %v5051_v56, %v12883_v9 }
 0x222   : > { %10431 = vmatpush3.bf16.msra.mxu0 %v12806_v59  ;;  %v9315_v6 = vpop.f32.mrb[0].mxu1 }
 0x223   : > { %3802 = vmatmul.mubr.bf16.gmra.mrb[88].mxu1 %v11221_v41  ;;  %10432 = vmatprep.subr.bf16.mxu0 %v12828_v28  ;;  %v9316_v61 = vpop.f32.mrb[1].mxu1  ;;  %v12857_v41 = vld [vmem:[%s14346_s3 + $0x238] sm:$0xff]  }
 0x224   : > { %3809 = vmatprep.mubr.bf16.mxu1 %v11223_v39  ;;  %10303 = vmatpush3.bf16.msra.mxu1 %v12798_v36  ;;  %v12840_v31 = vadd.f32 %v9316_v61, %v9315_v6  ;;  %v9318_v19 = vpop.f32.mrb[2].mxu1  ;;  %14455 = vst [vmem:[#allocation16_spill] sm:$0xff] %v12857_v41  ;;  %v12859_v39 = vcombine.high %v5049_v29, %v5051_v56  ;;  %v11229_v61 = vld [vmem:[#allocation2 + $0xac] ss:$12 sps:$4 sm:$0xff]  }
 0x225   : > { %10304 = vmatprep.subr.bf16.mxu1 %v12816_v22  ;;  %v9319_v21 = vpop.f32.mrb[3].mxu1  ;;  %v12861_v6 = vcombine.low %v5049_v29, %v5051_v56 }
 0x226   : > { %10433 = vmatpush3.bf16.msra.mxu0 %v12828_v28  ;;  %v12850_v17 = vadd.f32 %v9319_v21, %v9318_v19  ;;  %14456 = vst [vmem:[#allocation17_spill] sm:$0xff] %v12859_v39  ;;  %v8896_v19 = vcombine.low %v12772_v38, %v5045_v48  ;;  %v12885_v48 = vld [vmem:[#allocation2 + $0x24c] sm:$0xff] }
 0x227   : > { %10434 = vmatprep.subr.bf16.mxu0 %v12847_v0  ;;  %14457 = vst [vmem:[#allocation18_spill] sm:$0xff] %v12861_v6  ;;  %14459 = vst [vmem:[#allocation20_spill] sm:$0xff] %v12885_v48  ;;  %v11259_v6 = vld [vmem:[#allocation2 + $0x80] ss:$12 sps:$4 sm:$0xff]  }
 0x228   : > { %10305 = vmatpush3.bf16.msra.mxu1 %v12816_v22  ;;  %5244 = vmatmul.mubr.bf16.gmra.mrb[188].mxu0 %v8893_v60  ;;  %v12867_v60 = vld [vmem:[%s14346_s3 + $0x178] sm:$0xff]   ;;  %v13049_v22 = vld [vmem:[%s14346_s3 + $0x1c0] sm:$0xff]  }
 0x229   : > { %10306 = vmatprep.subr.bf16.mxu1 %v12838_v13  ;;  %5251 = vmatprep.mubr.bf16.mxu0 %v8897_v51  ;;  %v8900_v51 = vcombine.high %v12810_v44, %v5049_v29 }
 0x22a   : > { %10435 = vmatpush3.bf16.msra.mxu0 %v12847_v0 }
 0x22b   : > { %3810 = vmatmul.mubr.bf16.gmra.mrb[92].mxu1 %v11227_v47  ;;  %10436 = vmatprep.subr.bf16.mxu0 %v12867_v60 }
 0x22c   : > { %3817 = vmatprep.mubr.bf16.mxu1 %v11229_v61  ;;  %10307 = vmatpush3.bf16.msra.mxu1 %v12838_v13  ;;  %v12975_v13 = vld [vmem:[#allocation2 + $0x230] sm:$0xf] }
 0x22d   : > { %10308 = vmatprep.subr.bf16.mxu1 %v12857_v41  ;;  %v9321_v21 = vpop.f32.mrb[4].mxu1 }
 0x22e   : > { %10437 = vmatpush3.bf16.msra.mxu0 %v12867_v60  ;;  %v9322_v47 = vpop.f32.mrb[5].mxu1 }
 0x22f   : > { %10454 = vmatprep.subr.bf16.mxu0 %v12878_v4  ;;  %v12881_v61 = vadd.f32 %v9322_v47, %v9321_v21  ;;  %v9324_v63 = vpop.f32.mrb[6].mxu1  ;;  %v11235_v47 = vld [vmem:[#allocation2 + $0xc4] ss:$12 sps:$4 sm:$0xff]  }
 0x230   : > { %10309 = vmatpush3.bf16.msra.mxu1 %v12857_v41  ;;  %v9325_v50 = vpop.f32.mrb[7].mxu1  ;;  %5252 = vmatmul.mubr.bf16.gmra.mrb[192].mxu0 %v8896_v19  ;;  %v11261_v41 = vld [vmem:[#allocation2 + $0x98] ss:$12 sps:$4 sm:$0xff]  }
 0x231   : > { %10326 = vmatprep.subr.bf16.mxu1 %v12543_v15  ;;  %v12893_v21 = vadd.f32 %v9325_v50, %v9324_v63  ;;  %5259 = vmatprep.mubr.bf16.mxu0 %v8900_v51  ;;  %v11241_v50 = vld [vmem:[#allocation2 + $0xdc] ss:$12 sps:$4 sm:$0xff]  }
 0x232   : > { %v12901_v63 = vld [vmem:[#allocation2 + $0x258] sm:$0xff] }
 0x233   : > { %3818 = vmatmul.mubr.bf16.gmra.mrb[96].mxu1 %v11233_v32  ;;  %14460 = vst [vmem:[#allocation21_spill] sm:$0xff] %v12901_v63  ;;  %v8902_v32 = vcombine.low %v5051_v56, %v12883_v9  ;;  %v8906_v29 = vcombine.high %v12885_v48, %v12901_v63  ;;  %v11257_v9 = vld [vmem:[#allocation2 + $0x68] ss:$12 sps:$4 sm:$0xff]  }
 0x234   : > { %3825 = vmatprep.mubr.bf16.mxu1 %v11235_v47 }
 0x235   : > { %v9327_v57 = vpop.f32.mrb[8].mxu1 }
 0x236   : > { %v9328_v19 = vpop.f32.mrb[9].mxu1 }
 0x237   : > { %v12897_v24 = vadd.f32 %v9328_v19, %v9327_v57  ;;  %v9330_v37 = vpop.f32.mrb[10].mxu1 }
 0x238   : > { %v9331_v1 = vpop.f32.mrb[11].mxu1  ;;  %5260 = vmatmul.mubr.bf16.gmra.mrb[196].mxu0 %v8899_v20  ;;  %v11245_v20 = vld [vmem:[#allocation2 + $0xd8] ss:$12 sps:$4 sm:$0xff]  }
 0x239   : > { %v12899_v8 = vadd.f32 %v9331_v1, %v9330_v37  ;;  %5267 = vmatprep.mubr.bf16.mxu0 %v8903_v46  ;;  %v11247_v46 = vld [vmem:[#allocation2 + $0xf4] ss:$12 sps:$4 sm:$0xff]   ;;  %v12912_v37 = vld [vmem:[#allocation2 + $0x1b8] sm:$0xf] }
 0x23b   : > { %3826 = vmatmul.mubr.bf16.gmra.mrb[100].mxu1 %v11239_v42  ;;  %v8905_v42 = vcombine.low %v12885_v48, %v12901_v63 }
 0x23c   : > { %3833 = vmatprep.mubr.bf16.mxu1 %v11241_v50 }
 0x23d   : > { %v9333_v44 = vpop.f32.mrb[12].mxu1 }
 0x23e   : > { %v9334_v57 = vpop.f32.mrb[13].mxu1 }
 0x23f   : > { %v12906_v51 = vadd.f32 %v9334_v57, %v9333_v44  ;;  %v9336_v47 = vpop.f32.mrb[14].mxu1 }
 0x240   : > { %v9337_v19 = vpop.f32.mrb[15].mxu1  ;;  %5268 = vmatmul.mubr.bf16.gmra.mrb[200].mxu0 %v8902_v32  ;;  %v8886_v32 = vcombine.low %v12914_v26, %v12912_v37 }
 0x241   : > { %v12908_v1 = vadd.f32 %v9337_v19, %v9336_v47  ;;  %5275 = vmatprep.mubr.bf16.mxu0 %v8906_v29  ;;  %v11251_v19 = vld [vmem:[#allocation2 + $0xf0] ss:$12 sps:$4 sm:$0xff]  }
 0x243   : > { %14461 = vst [vmem:[#allocation22_spill] sm:$0xff] %v12908_v1  ;;  %3834 = vmatmul.mubr.bf16.gmra.mrb[104].mxu1 %v11245_v20  ;;  %v11253_v20 = vld [vmem:[#allocation2 + $0x50] ss:$12 sps:$4 sm:$0xff]  }
 0x244   : > { %3841 = vmatprep.mubr.bf16.mxu1 %v11247_v46  ;;  %v12922_v46 = vld [vmem:[#allocation2 + $0x1c4] sm:$0xf] }
 0x245   : > { %v9339_v56 = vpop.f32.mrb[16].mxu1 }
 0x246   : > { %v9340_v50 = vpop.f32.mrb[17].mxu1 }
 0x247   : > { %v12916_v44 = vadd.f32 %v9340_v50, %v9339_v56  ;;  %v9342_v57 = vpop.f32.mrb[18].mxu1  ;;  %v12928_v56 = vld [vmem:[#allocation2 + $0x1e8] sm:$0xf]  ;;  %v8889_v50 = vcombine.low %v12922_v46, %v12924_v23 }
 0x248   : > { %v9343_v47 = vpop.f32.mrb[19].mxu1  ;;  %5276 = vmatmul.mubr.bf16.gmra.mrb[204].mxu0 %v8905_v42  ;;  %v8892_v42 = vcombine.low %v12926_v43, %v12928_v56 }
 0x249   : > { %14462 = vst [vmem:[#allocation23_spill] sm:$0xff] %v12916_v44  ;;  %v12920_v29 = vadd.f32 %v9343_v47, %v9342_v57  ;;  %10438 = vmatprep.mubr.bf16.mxu0 %v8886_v32  ;;  %v11263_v44 = vld [vmem:[#allocation2 + $0xb0] ss:$12 sps:$4 sm:$0xff]  }
 0x24b   : > { %14463 = vst [vmem:[#allocation24_spill] sm:$0xff] %v12920_v29  ;;  %3842 = vmatmul.mubr.bf16.gmra.mrb[108].mxu1 %v11251_v19  ;;  %v12941_v29 = vld [vmem:[#allocation2 + $0x200] sm:$0xf] }
 0x24c   : > { %10310 = vmatprep.mubr.bf16.mxu1 %v11253_v20  ;;  %v12939_v20 = vld [vmem:[#allocation2 + $0x1f4] sm:$0xf] }
 0x24d   : > { %v9345_v63 = vpop.f32.mrb[20].mxu1 }
 0x24e   : > { %v9346_v57 = vpop.f32.mrb[21].mxu1 }
 0x24f   : > { %v12934_v47 = vadd.f32 %v9346_v57, %v9345_v63  ;;  %v9348_v32 = vpop.f32.mrb[22].mxu1  ;;  %v12946_v63 = vld [vmem:[%s14346_s3 + $0x88] sm:$0xff]  }
 0x250   : > { %v9349_v48 = vpop.f32.mrb[23].mxu1  ;;  %10439 = vmatmul.mubr.bf16.vlgmr.msra.gmra.mrb[208].mxu0 %v8889_v50  ;;  %v12949_v57 = vld [vmem:[#allocation2 + $0x20c] sm:$0xf]  ;;  %v8895_v50 = vcombine.low %v12939_v20, %v12941_v29 }
 0x251   : > { %14464 = vst [vmem:[#allocation25_spill] sm:$0xff] %v12934_v47  ;;  %v12936_v19 = vadd.f32 %v9349_v48, %v9348_v32  ;;  %10455 = vmatpush3.bf16.msra.mxu0 %v12878_v4  ;;  %10442 = vmatprep.mubr.bf16.mxu0 %v8892_v42  ;;  %v12951_v48 = vld [vmem:[#allocation2 + $0x218] sm:$0xf] }
 0x252   : > { %10456 = vmatprep.subr.bf16.mxu0 %v12946_v63  ;;  %v8898_v42 = vcombine.low %v12949_v57, %v12951_v48 }
 0x253   : > { %14465 = vst [vmem:[#allocation26_spill] sm:$0xff] %v12936_v19  ;;  %10311 = vmatmul.mubr.bf16.vlgmr.msra.gmra.mrb[32].mxu1 %v11257_v9  ;;  %v12963_v19 = vld [vmem:[%s14346_s3 + $0x90] sm:$0xff]  }
 0x254   : > { %10314 = vmatprep.mubr.bf16.mxu1 %v11259_v6  ;;  %10327 = vmatpush3.bf16.msra.mxu1 %v12543_v15 }
 0x255   : > { %10328 = vmatprep.subr.bf16.mxu1 %v12748_v2  ;;  %v9351_v9 = vpop.f32.mrb[24].mxu1  ;;  %10457 = vmatpush3.bf16.msra.mxu0 %v12946_v63 }
 0x256   : > { %v9352_v32 = vpop.f32.mrb[25].mxu1  ;;  %10458 = vmatprep.subr.bf16.mxu0 %v12963_v19 }
 0x257   : > { %v12966_v15 = vadd.f32 %v9352_v32, %v9351_v9  ;;  %v9354_v6 = vpop.f32.mrb[26].mxu1  ;;  %v12983_v9 = vld [vmem:[#allocation2 + $0x23c] sm:$0xf] }
 0x258   : > { %10329 = vmatpush3.bf16.msra.mxu1 %v12748_v2  ;;  %v9355_v47 = vpop.f32.mrb[27].mxu1  ;;  %10443 = vmatmul.mubr.bf16.gmra.mrb[212].mxu0 %v8895_v50  ;;  %v12980_v2 = vld [vmem:[%s14346_s3 + $0x98] sm:$0xff]   ;;  %v8901_v50 = vcombine.low %v12973_v16, %v12975_v13 }
 0x259   : > { %14466 = vst [vmem:[#allocation27_spill] sm:$0xff] %v12966_v15  ;;  %10330 = vmatprep.subr.bf16.mxu1 %v12766_v40  ;;  %v12970_v39 = vadd.f32 %v9355_v47, %v9354_v6  ;;  %10459 = vmatpush3.bf16.msra.mxu0 %v12963_v19  ;;  %v5054_v47 = vld [vmem:[#allocation2 + $0x248] sm:$0xf]  ;;  %v12994_v6 = vld [vmem:[%s14346_s3 + $0xa0] sm:$0xff]  }
 0x25a   : > { %10446 = vmatprep.mubr.bf16.mxu0 %v8898_v42  ;;  %10460 = vmatprep.subr.bf16.mxu0 %v12980_v2  ;;  %v11265_v15 = vld [vmem:[#allocation2 + $0xc8] ss:$12 sps:$4 sm:$0xff]  }
 0x25b   : > { %14467 = vst [vmem:[#allocation28_spill] sm:$0xff] %v12970_v39  ;;  %10315 = vmatmul.mubr.bf16.gmra.mrb[36].mxu1 %v11261_v41  ;;  %v8904_v41 = vcombine.low %v12983_v9, %v5054_v47  ;;  %v11267_v47 = vld [vmem:[#allocation2 + $0xe0] ss:$12 sps:$4 sm:$0xff]  }
 0x25c   : > { %10318 = vmatprep.mubr.bf16.mxu1 %v11263_v44  ;;  %10331 = vmatpush3.bf16.msra.mxu1 %v12766_v40 }
 0x25d   : > { %10332 = vmatprep.subr.bf16.mxu1 %v12788_v33  ;;  %v9357_v42 = vpop.f32.mrb[28].mxu1  ;;  %10461 = vmatpush3.bf16.msra.mxu0 %v12980_v2 }
 0x25e   : > { %v9358_v32 = vpop.f32.mrb[29].mxu1  ;;  %10462 = vmatprep.subr.bf16.mxu0 %v12994_v6 }
 0x25f   : > { %v12997_v44 = vadd.f32 %v9358_v32, %v9357_v42  ;;  %v9360_v40 = vpop.f32.mrb[30].mxu1  ;;  %v13007_v42 = vld [vmem:[%s14346_s3 + $0xa8] sm:$0xff]  }
 0x260   : > { %10333 = vmatpush3.bf16.msra.mxu1 %v12788_v33  ;;  %v9361_v39 = vpop.f32.mrb[31].mxu1  ;;  %10447 = vmatmul.mubr.bf16.gmra.mrb[216].mxu0 %v8901_v50 }
 0x261   : > { %14468 = vst [vmem:[#allocation29_spill] sm:$0xff] %v12997_v44  ;;  %10334 = vmatprep.subr.bf16.mxu1 %v12806_v59  ;;  %v13001_v1 = vadd.f32 %v9361_v39, %v9360_v40  ;;  %10463 = vmatpush3.bf16.msra.mxu0 %v12994_v6  ;;  %v11270_v39 = vld [vmem:[#allocation2 + $0x254] ss:$12 sps:$4 sm:$0xff]  }
 0x262   : > { %10450 = vmatprep.mubr.bf16.mxu0 %v8904_v41  ;;  %10464 = vmatprep.subr.bf16.mxu0 %v13007_v42  ;;  %v9555_v33 = vpop.f32.mrb[112].mxu0  ;;  %v13018_v41 = vld [vmem:[%s14346_s3 + $0xb0] sm:$0xff]  }
 0x263   : > { %14469 = vst [vmem:[#allocation30_spill] sm:$0xff] %v13001_v1  ;;  %10319 = vmatmul.mubr.bf16.gmra.mrb[40].mxu1 %v11265_v15  ;;  %v9556_v32 = vpop.f32.mrb[113].mxu0  ;;  %v11273_v1 = vld [vmem:[#allocation2 + $0x188] ss:$12 sps:$4 sm:$0xff]  }
 0x264   : > { %10322 = vmatprep.mubr.bf16.mxu1 %v11267_v47  ;;  %10335 = vmatpush3.bf16.msra.mxu1 %v12806_v59  ;;  %v13012_v50 = vadd.f32 %v9556_v32, %v9555_v33  ;;  %v9558_v40 = vpop.f32.mrb[114].mxu0  ;;  %v13021_v47 = vld [vmem:[#allocation2 + $0xf8] sm:$0xf]  ;;  %v13027_v32 = vld [vmem:[#allocation2 + $0xec] sm:$0xf] }
 0x265   : > { %10336 = vmatprep.subr.bf16.mxu1 %v12828_v28  ;;  %10465 = vmatpush3.bf16.msra.mxu0 %v13007_v42  ;;  %v9559_v15 = vpop.f32.mrb[115].mxu0  ;;  %v11269_v33 = vld [vmem:[#allocation2 + $0xf8] ss:$12 sps:$4 sm:$0xff]   ;;  %v8814_v44 = vcombine.low %v13027_v32, %v13021_v47 }
 0x266   : > { %14470 = vst [vmem:[#allocation31_spill] sm:$0xff] %v13012_v50  ;;  %10466 = vmatprep.subr.bf16.mxu0 %v13018_v41  ;;  %v13024_v59 = vadd.f32 %v9559_v15, %v9558_v40  ;;  %v5026_v40 = vld [vmem:[#allocation2 + $0x1a0] sm:$0xf] }
 0x267   : > { %v8913_v50 = vcombine.low %v5026_v40, %v12914_v26  ;;  %v13064_v40 = vld [vmem:[#allocation2 + $0x11c] sm:$0xf] }
 0x268   : > { %10337 = vmatpush3.bf16.msra.mxu1 %v12828_v28  ;;  %14471 = vst [vmem:[#allocation32_spill] sm:$0xff] %v13024_v59  ;;  %10451 = vmatmul.mubr.bf16.gmra.mrb[220].mxu0 %v11270_v39  ;;  %v13035_v28 = vld [vmem:[%s14346_s3 + $0xb8] sm:$0xff]   ;;  %v13041_v59 = vld [vmem:[#allocation2 + $0x110] sm:$0xf] }
 0x269   : > { %10338 = vmatprep.subr.bf16.mxu1 %v12847_v0  ;;  %10467 = vmatpush3.bf16.msra.mxu0 %v13018_v41  ;;  %v8817_v26 = vcombine.low %v13055_v18, %v13041_v59 }
 0x26a   : > { %10470 = vmatprep.mubr.bf16.mxu0 %v11273_v1  ;;  %10468 = vmatprep.subr.bf16.mxu0 %v13035_v28  ;;  %v9561_v39 = vpop.f32.mrb[116].mxu0 }
 0x26b   : > { %10323 = vmatmul.mubr.bf16.gmra.mrb[44].mxu1 %v11269_v33  ;;  %v9562_v15 = vpop.f32.mrb[117].mxu0 }
 0x26c   : > { %10339 = vmatpush3.bf16.msra.mxu1 %v12847_v0  ;;  %10342 = vmatprep.mubr.bf16.mxu1 %v8814_v44  ;;  %v13043_v1 = vadd.f32 %v9562_v15, %v9561_v39  ;;  %v9564_v33 = vpop.f32.mrb[118].mxu0  ;;  %v13052_v0 = vld [vmem:[#allocation2 + $0x128] sm:$0xf]  ;;  %v8916_v39 = vcombine.low %v12912_v37, %v12922_v46  ;;  %v13073_v46 = vld [vmem:[#allocation2 + $0x140] sm:$0xf] }
 0x26d   : > { %10340 = vmatprep.subr.bf16.mxu1 %v12867_v60  ;;  %10469 = vmatpush3.bf16.msra.mxu0 %v13035_v28  ;;  %v9565_v44 = vpop.f32.mrb[119].mxu0 }
 0x26e   : > { %14472 = vst [vmem:[#allocation33_spill] sm:$0xff] %v13043_v1  ;;  %9939 = vmatprep.subr.bf16.mxu0 %v13049_v22  ;;  %v13059_v15 = vadd.f32 %v9565_v44, %v9564_v33  ;;  %v8820_v1 = vcombine.low %v13064_v40, %v13052_v0  ;;  %v13085_v44 = vld [vmem:[#allocation2 + $0x134] sm:$0xf] }
 0x270   : > { %10341 = vmatpush3.bf16.msra.mxu1 %v12867_v60  ;;  %10471 = vmatmul.mubr.bf16.vlgmr.msra.gmra.mrb[208].mxu0 %v8913_v50  ;;  %v8922_v50 = vcombine.low %v12928_v56, %v12939_v20  ;;  %v8823_v56 = vcombine.low %v13085_v44, %v13073_v46  ;;  %v13092_v20 = vld [vmem:[#allocation2 + $0x14c] sm:$0xf] }
 0x271   : > { %10358 = vmatprep.subr.bf16.mxu1 %v12878_v4  ;;  %10474 = vmatprep.mubr.bf16.mxu0 %v8916_v39  ;;  %v13103_v39 = vld [vmem:[#allocation2 + $0x170] sm:$0xf] }
 0x272   : > { %9940 = vmatpush3.bf16.msra.mxu0 %v12550_v12 }
 0x273   : > { %10343 = vmatmul.mubr.bf16.vlgmr.msra.gmra.mrb[112].mxu1 %v8817_v26  ;;  %9941 = vmatprep.subr.bf16.mxu0 %v12562_v52  ;;  %v9567_v60 = vpop.f32.mrb[120].mxu0  ;;  %v8919_v52 = vcombine.low %v12924_v23, %v12926_v43  ;;  %v8925_v23 = vcombine.low %v12941_v29, %v12949_v57 }
 0x274   : > { %10346 = vmatprep.mubr.bf16.mxu1 %v8820_v1  ;;  %10359 = vmatpush3.bf16.msra.mxu1 %v12878_v4  ;;  %v9568_v37 = vpop.f32.mrb[121].mxu0  ;;  %v13082_v4 = vld [vmem:[#allocation2 + $0x158] sm:$0xf] }
 0x275   : > { %10360 = vmatprep.subr.bf16.mxu1 %v12946_v63  ;;  %v13077_v33 = vadd.f32 %v9568_v37, %v9567_v60  ;;  %v9570_v12 = vpop.f32.mrb[122].mxu0  ;;  %v13111_v37 = vld [vmem:[#allocation2 + $0x164] sm:$0xf] }
 0x276   : > { %9942 = vmatpush3.bf16.msra.mxu0 %v12576_v11  ;;  %v9571_v1 = vpop.f32.mrb[123].mxu0 }
 0x277   : > { %9943 = vmatprep.subr.bf16.mxu0 %v12583_v3  ;;  %v13087_v11 = vadd.f32 %v9571_v1, %v9570_v12  ;;  %v8826_v3 = vcombine.low %v13092_v20, %v13082_v4 }
 0x278   : > { %10361 = vmatpush3.bf16.msra.mxu1 %v12946_v63  ;;  %10475 = vmatmul.mubr.bf16.gmra.mrb[212].mxu0 %v8919_v52 }
 0x279   : > { %10362 = vmatprep.subr.bf16.mxu1 %v12963_v19  ;;  %10478 = vmatprep.mubr.bf16.mxu0 %v8922_v50 }
 0x27a   : > { %9944 = vmatpush3.bf16.msra.mxu0 %v12593_v58  ;;  %v8928_v58 = vcombine.low %v12951_v48, %v12973_v16  ;;  %v13118_v16 = vld [vmem:[#allocation2 + $0x17c] sm:$0xf]  ;;  %v8931_v48 = vcombine.low %v12975_v13, %v12983_v9  ;;  %v11285_v13 = vld [vmem:[#allocation2 + $0x194] ss:$12 sps:$4 sm:$0xff]  }
 0x27b   : > { %10347 = vmatmul.mubr.bf16.gmra.mrb[116].mxu1 %v8823_v56  ;;  %9945 = vmatprep.subr.bf16.mxu0 %v12604_v25  ;;  %v9573_v43 = vpop.f32.mrb[124].mxu0  ;;  %v11287_v9 = vld [vmem:[#allocation2 + $0xc8] ss:$12 sps:$4 sm:$0xff]  }
 0x27c   : > { %10350 = vmatprep.mubr.bf16.mxu1 %v8826_v3  ;;  %10363 = vmatpush3.bf16.msra.mxu1 %v12963_v19  ;;  %v9574_v63 = vpop.f32.mrb[125].mxu0  ;;  %v4035_v19 = vld [vmem:[#allocation2 + $0x188] sm:$0xf] }
 0x27d   : > { %10364 = vmatprep.subr.bf16.mxu1 %v12980_v2  ;;  %v13107_v26 = vadd.f32 %v9574_v63, %v9573_v43  ;;  %v9576_v25 = vpop.f32.mrb[126].mxu0  ;;  %v8832_v57 = vcombine.low %v13118_v16, %v4035_v19  ;;  %v5642_v63 = vld [vmem:[#allocation2 + $0x1e0] sm:$0xff]  ;;  %v11288_v19 = vld [vmem:[#allocation2 + $0x1c8] ss:$12 sps:$4 sm:$0xff]  }
 0x27e   : > { %9946 = vmatpush3.bf16.msra.mxu0 %v12622_v27  ;;  %v9577_v60 = vpop.f32.mrb[127].mxu0  ;;  %v8829_v27 = vcombine.low %v13111_v37, %v13103_v39 }
 0x27f   : > { %9947 = vmatprep.subr.bf16.mxu0 %v12628_v62  ;;  %v13113_v29 = vadd.f32 %v9577_v60, %v9576_v25 }
 0x280   : > { %10365 = vmatpush3.bf16.msra.mxu1 %v12980_v2  ;;  %10479 = vmatmul.mubr.bf16.gmra.mrb[216].mxu0 %v8925_v23 }
 0x281   : > { %10366 = vmatprep.subr.bf16.mxu1 %v12994_v6  ;;  %10482 = vmatprep.mubr.bf16.mxu0 %v8928_v58 }
 0x282   : > { %9948 = vmatpush3.bf16.msra.mxu0 %v12636_v7 }
 0x283   : > { %10351 = vmatmul.mubr.bf16.gmra.mrb[120].mxu1 %v8829_v27  ;;  %9949 = vmatprep.subr.bf16.mxu0 %v12652_v35  ;;  %v9579_v62 = vpop.f32.mrb[128].mxu0 }
 0x284   : > { %10354 = vmatprep.mubr.bf16.mxu1 %v8832_v57  ;;  %10367 = vmatpush3.bf16.msra.mxu1 %v12994_v6  ;;  %v9580_v2 = vpop.f32.mrb[129].mxu0  ;;  %v11290_v6 = vld [vmem:[#allocation2 + $0x1cc] ss:$12 sps:$4 sm:$0xff]  }
 0x285   : > { %10368 = vmatprep.subr.bf16.mxu1 %v13007_v42  ;;  %v9395_v50 = vpop.f32.mrb[48].mxu1  ;;  %v13128_v12 = vadd.f32 %v9580_v2, %v9579_v62  ;;  %v9582_v7 = vpop.f32.mrb[130].mxu0 }
 0x286   : > { %9950 = vmatpush3.bf16.msra.mxu0 %v12673_v45  ;;  %v9396_v52 = vpop.f32.mrb[49].mxu1  ;;  %v9583_v35 = vpop.f32.mrb[131].mxu0 }
 0x287   : > { %9951 = vmatprep.subr.bf16.mxu0 %v12681_v5  ;;  %v9397_v1 = vadd.f32 %v9396_v52, %v9395_v50  ;;  %v9398_v56 = vpop.f32.mrb[50].mxu1  ;;  %v13132_v3 = vadd.f32 %v9583_v35, %v9582_v7  ;;  %v8844_v52 = vcombine.low %v13021_v47, %v13055_v18  ;;  %v11541_v18 = vld [vmem:[%s14346_s3 + $0x1c8] sm:$0xff]   ;;  %v5646_v47 = vld [vmem:[#allocation2 + $0x1f8] sm:$0xff] }
 0x288   : > { %10369 = vmatpush3.bf16.msra.mxu1 %v13007_v42  ;;  %v9399_v43 = vpop.f32.mrb[51].mxu1  ;;  %10483 = vmatmul.mubr.bf16.gmra.mrb[220].mxu0 %v8931_v48 }
 0x289   : > { %10370 = vmatprep.subr.bf16.mxu1 %v13018_v41  ;;  %v9400_v45 = vadd.f32 %v9399_v43, %v9398_v56  ;;  %5830 = vmatprep.mubr.bf16.mxu0 %v11290_v6  ;;  %v13137_v5 = vadd.f32 %v9397_v1, %v12840_v31  ;;  %v8935_v6 = vcombine.low %v5642_v63, %v12732_v14 }
 0x28a   : > { %9952 = vmatpush3.bf16.msra.mxu0 %v12690_v54 }
 0x28b   : > { %10355 = vmatmul.mubr.bf16.gmra.mrb[124].mxu1 %v11285_v13  ;;  %9953 = vmatprep.subr.bf16.mxu0 %v12703_v34  ;;  %v9585_v42 = vpop.f32.mrb[132].mxu0  ;;  %v13142_v23 = vadd.f32 %v9400_v45, %v12850_v17  ;;  %v8936_v17 = vcombine.high %v5642_v63, %v12732_v14  ;;  %v11543_v63 = vld [vmem:[%s14346_s3 + $0x1d0] sm:$0xff]  }
 0x28c   : > { %10371 = vmatpush3.bf16.msra.mxu1 %v13018_v41  ;;  %10374 = vmatprep.mubr.bf16.mxu1 %v11287_v9  ;;  %v9586_v58 = vpop.f32.mrb[133].mxu0  ;;  %v4007_v41 = vld [vmem:[#allocation2 + $0xe0] sm:$0xf]  ;;  %v11542_v9 = vld [vmem:[%s14346_s3 + $0x188] sm:$0xff]  }
 0x28d   : > { %10372 = vmatprep.subr.bf16.mxu1 %v13035_v28  ;;  %v9401_v25 = vpop.f32.mrb[52].mxu1  ;;  %v13146_v54 = vadd.f32 %v9586_v58, %v9585_v42  ;;  %v9588_v31 = vpop.f32.mrb[134].mxu0  ;;  %v8841_v48 = vcombine.low %v4007_v41, %v13027_v32  ;;  %v8939_v42 = vcombine.high %v5646_v47, %v12772_v38 }
 0x28e   : > { %9954 = vmatpush3.bf16.msra.mxu0 %v12718_v30  ;;  %v9402_v60 = vpop.f32.mrb[53].mxu1  ;;  %v9589_v34 = vpop.f32.mrb[135].mxu0 }
 0x28f   : > { %10486 = vmatprep.subr.bf16.mxu0 %v12725_v55  ;;  %v9403_v27 = vadd.f32 %v9402_v60, %v9401_v25  ;;  %v9404_v57 = vpop.f32.mrb[54].mxu1  ;;  %v13151_v62 = vadd.f32 %v9589_v34, %v9588_v31  ;;  %v8847_v31 = vcombine.low %v13041_v59, %v13064_v40  ;;  %v8850_v34 = vcombine.low %v13052_v0, %v13085_v44  ;;  %v11544_v40 = vld [vmem:[%s14346_s3 + $0x190] sm:$0xff]   ;;  %v11545_v0 = vld [vmem:[%s14346_s3 + $0x1d8] sm:$0xff]  }
 0x290   : > { %10373 = vmatpush3.bf16.msra.mxu1 %v13035_v28  ;;  %v9405_v2 = vpop.f32.mrb[55].mxu1 }
 0x291   : > { %9699 = vmatprep.subr.bf16.mxu1 %v13049_v22  ;;  %5831 = vmatmul.mubr.bf16.vlgmr.msra.gmra.mrb[224].mxu0 %v11288_v19  ;;  %v13156_v50 = vadd.f32 %v9403_v27, %v12881_v61  ;;  %v9406_v7 = vadd.f32 %v9405_v2, %v9404_v57  ;;  %v11540_v22 = vld [vmem:[%s14346_s3 + $0x180] sm:$0xff]  }
 0x292   : > { %5838 = vmatprep.mubr.bf16.mxu0 %v8936_v17  ;;  %10487 = vmatpush3.bf16.msra.mxu0 %v12725_v55  ;;  %v8938_v17 = vcombine.low %v5646_v47, %v12772_v38 }
 0x293   : > { %10375 = vmatmul.mubr.bf16.vlgmr.msra.gmra.mrb[112].mxu1 %v8841_v48  ;;  %10488 = vmatprep.subr.bf16.mxu0 %v12738_v49  ;;  %v13163_v28 = vadd.f32 %v9406_v7, %v12893_v21  ;;  %v9591_v61 = vpop.f32.mrb[136].mxu0 }
 0x294   : > { %10378 = vmatprep.mubr.bf16.mxu1 %v8844_v52  ;;  %9700 = vmatpush3.bf16.msra.mxu1 %v11540_v22  ;;  %v9592_v32 = vpop.f32.mrb[137].mxu0  ;;  %v11546_v52 = vld [vmem:[%s14346_s3 + $0x198] sm:$0xff]  }
 0x295   : > { %9701 = vmatprep.subr.bf16.mxu1 %v11541_v18  ;;  %v13171_v1 = vadd.f32 %v9592_v32, %v9591_v61  ;;  %v9594_v56 = vpop.f32.mrb[138].mxu0  ;;  %v8853_v18 = vcombine.low %v13073_v46, %v13092_v20  ;;  %v14475_v46 = vld [vmem:[#allocation22_spill] sm:$0xff] }
 0x296   : > { %v9407_v35 = vpop.f32.mrb[56].mxu1  ;;  %10489 = vmatpush3.bf16.msra.mxu0 %v12738_v49  ;;  %v9595_v43 = vpop.f32.mrb[139].mxu0 }
 0x297   : > { %v9408_v21 = vpop.f32.mrb[57].mxu1  ;;  %10490 = vmatprep.subr.bf16.mxu0 %v12758_v53  ;;  %v13180_v58 = vadd.f32 %v9595_v43, %v9594_v56  ;;  %v14473_v56 = vld [vmem:[#allocation13_spill] sm:$0xff] }
 0x298   : > { %v9409_v13 = vadd.f32 %v9408_v21, %v9407_v35  ;;  %v9410_v45 = vpop.f32.mrb[58].mxu1  ;;  %9702 = vmatpush3.bf16.msra.mxu1 %v11542_v9  ;;  %v8856_v35 = vcombine.low %v13082_v4, %v13111_v37  ;;  %v14474_v21 = vld [vmem:[#allocation9_spill] sm:$0xff] }
 0x299   : > { %v9411_v25 = vpop.f32.mrb[59].mxu1  ;;  %9703 = vmatprep.subr.bf16.mxu1 %v11543_v63  ;;  %5839 = vmatmul.mubr.bf16.gmra.mrb[228].mxu0 %v8935_v6  ;;  %v11549_v4 = vld [vmem:[%s14346_s3 + $0x1e8] sm:$0xff]  }
 0x29a   : > { %v13188_v19 = vadd.f32 %v9409_v13, %v12897_v24  ;;  %v9412_v60 = vadd.f32 %v9411_v25, %v9410_v45  ;;  %5846 = vmatprep.mubr.bf16.mxu0 %v8939_v42  ;;  %10491 = vmatpush3.bf16.msra.mxu0 %v12758_v53  ;;  %v14476_v42 = vld [vmem:[#allocation15_spill] sm:$0xff] }
 0x29b   : > { %10379 = vmatmul.mubr.bf16.gmra.mrb[116].mxu1 %v8847_v31  ;;  %10492 = vmatprep.subr.bf16.mxu0 %v12778_v10  ;;  %v9597_v24 = vpop.f32.mrb[140].mxu0  ;;  %v14477_v31 = vld [vmem:[#allocation31_spill] sm:$0xff] }
 0x29c   : > { %v13195_v59 = vadd.f32 %v9412_v60, %v12899_v8  ;;  %10382 = vmatprep.mubr.bf16.mxu1 %v8850_v34  ;;  %9704 = vmatpush3.bf16.msra.mxu1 %v11544_v40  ;;  %v9598_v44 = vpop.f32.mrb[141].mxu0  ;;  %v11550_v34 = vld [vmem:[%s14346_s3 + $0x1a8] sm:$0xff]  }
 0x29d   : > { %9705 = vmatprep.subr.bf16.mxu1 %v11545_v0  ;;  %v13203_v27 = vadd.f32 %v9598_v44, %v9597_v24  ;;  %v9600_v57 = vpop.f32.mrb[142].mxu0  ;;  %v8859_v0 = vcombine.low %v13103_v39, %v13118_v16  ;;  %v11551_v44 = vld [vmem:[%s14346_s3 + $0x1f0] sm:$0xff]   ;;  %v14482_v39 = vld [vmem:[#allocation16_spill] sm:$0xff] }
 0x29e   : > { %v9413_v41 = vpop.f32.mrb[60].mxu1  ;;  %10493 = vmatpush3.bf16.msra.mxu0 %v12778_v10  ;;  %v9601_v48 = vpop.f32.mrb[143].mxu0  ;;  %v11547_v10 = vld [vmem:[%s14346_s3 + $0x1e0] sm:$0xff]  }
 0x29f   : > { %v9414_v8 = vpop.f32.mrb[61].mxu1  ;;  %10494 = vmatprep.subr.bf16.mxu0 %v12798_v36  ;;  %v13211_v22 = vadd.f32 %v9601_v48, %v9600_v57  ;;  %v14479_v57 = vld [vmem:[#allocation23_spill] sm:$0xff]  ;;  %v14480_v48 = vld [vmem:[#allocation32_spill] sm:$0xff] }
 0x2a0   : > { %v9415_v2 = vadd.f32 %v9414_v8, %v9413_v41  ;;  %v9416_v7 = vpop.f32.mrb[62].mxu1  ;;  %9706 = vmatpush3.bf16.msra.mxu1 %v11546_v52  ;;  %v14478_v41 = vld [vmem:[#allocation14_spill] sm:$0xff]  ;;  %v14481_v52 = vld [vmem:[#allocation17_spill] sm:$0xff]  ;;  %v14483_v16 = vld [vmem:[#allocation24_spill] sm:$0xff] }
 0x2a1   : > { %v9417_v61 = vpop.f32.mrb[63].mxu1  ;;  %9707 = vmatprep.subr.bf16.mxu1 %v11547_v10  ;;  %5847 = vmatmul.mubr.bf16.gmra.mrb[232].mxu0 %v8938_v17 }
 0x2a2   : > { %v13219_v47 = vadd.f32 %v9415_v2, %v12906_v51  ;;  %v9418_v32 = vadd.f32 %v9417_v61, %v9416_v7  ;;  %5854 = vmatprep.mubr.bf16.mxu0 %v14473_v56  ;;  %10495 = vmatpush3.bf16.msra.mxu0 %v12798_v36  ;;  %v11548_v51 = vld [vmem:[%s14346_s3 + $0x1a0] sm:$0xff]   ;;  %v11305_v7 = vld [vmem:[#allocation2 + $0x10c] ss:$12 sps:$4 sm:$0xff]  }
 0x2a3   : > { %10383 = vmatmul.mubr.bf16.gmra.mrb[120].mxu1 %v8853_v18  ;;  %10496 = vmatprep.subr.bf16.mxu0 %v14474_v21  ;;  %v9635_v6 = vpop.f32.mrb[144].mxu0  ;;  %v11552_v18 = vld [vmem:[%s14346_s3 + $0x1b0] sm:$0xff]  }
 0x2a4   : > { %v13227_v20 = vadd.f32 %v9418_v32, %v14475_v46  ;;  %10386 = vmatprep.mubr.bf16.mxu1 %v8856_v35  ;;  %9708 = vmatpush3.bf16.msra.mxu1 %v11548_v51  ;;  %v9636_v43 = vpop.f32.mrb[145].mxu0  ;;  %v11553_v35 = vld [vmem:[%s14346_s3 + $0x1f8] sm:$0xff]  }
 0x2a5   : > { %9709 = vmatprep.subr.bf16.mxu1 %v11549_v4  ;;  %v9637_v37 = vadd.f32 %v9636_v43, %v9635_v6  ;;  %v9638_v13 = vpop.f32.mrb[146].mxu0 }
 0x2a6   : > { %v9419_v36 = vpop.f32.mrb[64].mxu1  ;;  %10497 = vmatpush3.bf16.msra.mxu0 %v14474_v21  ;;  %v9639_v9 = vpop.f32.mrb[147].mxu0 }
 0x2a7   : > { %v9420_v45 = vpop.f32.mrb[65].mxu1  ;;  %10498 = vmatprep.subr.bf16.mxu0 %v14476_v42  ;;  %v13238_v63 = vadd.f32 %v9637_v37, %v14477_v31  ;;  %v9640_v40 = vadd.f32 %v9639_v9, %v9638_v13  ;;  %v11303_v9 = vld [vmem:[#allocation2 + $0x108] ss:$12 sps:$4 sm:$0xff]  }
 0x2a8   : > { %v9421_v25 = vadd.f32 %v9420_v45, %v9419_v36  ;;  %v9422_v60 = vpop.f32.mrb[66].mxu1  ;;  %9710 = vmatpush3.bf16.msra.mxu1 %v11550_v34  ;;  %v14484_v36 = vld [vmem:[#allocation33_spill] sm:$0xff] }
 0x2a9   : > { %v9423_v24 = vpop.f32.mrb[67].mxu1  ;;  %9711 = vmatprep.subr.bf16.mxu1 %v11551_v44  ;;  %5855 = vmatmul.mubr.bf16.gmra.mrb[236].mxu0 %v14478_v41  ;;  %v13253_v2 = vadd.f32 %v9640_v40, %v14480_v48  ;;  %v14486_v31 = vld [vmem:[#allocation25_spill] sm:$0xff]  ;;  %v14488_v44 = vld [vmem:[#allocation20_spill] sm:$0xff] }
 0x2aa   : > { %v13250_v8 = vadd.f32 %v9421_v25, %v14479_v57  ;;  %v9424_v17 = vadd.f32 %v9423_v24, %v9422_v60  ;;  %5862 = vmatprep.mubr.bf16.mxu0 %v14481_v52  ;;  %10499 = vmatpush3.bf16.msra.mxu0 %v14476_v42  ;;  %v14485_v25 = vld [vmem:[#allocation18_spill] sm:$0xff] }
 0x2ab   : > { %10387 = vmatmul.mubr.bf16.gmra.mrb[124].mxu1 %v8859_v0  ;;  %10500 = vmatprep.subr.bf16.mxu0 %v14482_v39  ;;  %v9641_v10 = vpop.f32.mrb[148].mxu0  ;;  %v11308_v24 = vld [vmem:[#allocation2 + $0x124] ss:$12 sps:$4 sm:$0xff]   ;;  %v14487_v0 = vld [vmem:[#allocation19_spill] sm:$0xff] }
 0x2ac   : > { %v13259_v61 = vadd.f32 %v9424_v17, %v14483_v16  ;;  %9712 = vmatpush3.bf16.msra.mxu1 %v11552_v18  ;;  %4811 = vmatprep.mubr.bf16.mxu1 %v11305_v7  ;;  %v9642_v32 = vpop.f32.mrb[149].mxu0  ;;  %v14489_v57 = vcombine.high %v14487_v0, %v14488_v44  ;;  %v5664_v7 = vld [vmem:[#allocation2 + $0x264] sm:$0xff] }
 0x2ad   : > { %9713 = vmatprep.subr.bf16.mxu1 %v11553_v35  ;;  %v9643_v46 = vadd.f32 %v9642_v32, %v9641_v10  ;;  %v9644_v51 = vpop.f32.mrb[150].mxu0 }
 0x2ae   : > { %v9425_v21 = vpop.f32.mrb[68].mxu1  ;;  %10501 = vmatpush3.bf16.msra.mxu0 %v14482_v39  ;;  %v9645_v43 = vpop.f32.mrb[151].mxu0 }
 0x2af   : > { %v9426_v6 = vpop.f32.mrb[69].mxu1  ;;  %v13269_v37 = vadd.f32 %v9643_v46, %v14484_v36  ;;  %v9646_v45 = vadd.f32 %v9645_v43, %v9644_v51  ;;  %v14491_v51 = vld [vmem:[#allocation21_spill] sm:$0xff] }
 0x2b0   : > { %v9427_v4 = vadd.f32 %v9426_v6, %v9425_v21  ;;  %v9428_v13 = vpop.f32.mrb[70].mxu1  ;;  %9714 = vmatpush3.bf16.msra.mxu1 %v12718_v30  ;;  %v14490_v30 = vld [vmem:[#allocation26_spill] sm:$0xff]  ;;  %v8951_v6 = vcombine.high %v14491_v51, %v5664_v7 }
 0x2b1   : > { %v9429_v42 = vpop.f32.mrb[71].mxu1  ;;  %5863 = vmatmul.mubr.bf16.gmra.mrb[240].mxu0 %v14485_v25  ;;  %10390 = vmatprep.subr.bf16.mxu1 %v12725_v55  ;;  %v13278_v40 = vadd.f32 %v9646_v45, %v13059_v15  ;;  %v11554_v55 = vld [vmem:[%s14346_s3 + $0x200] sm:$0xff]   ;;  %v14492_v45 = vcombine.low %v14487_v0, %v14488_v44  ;;  %v11556_v0 = vld [vmem:[%s14346_s3 + $0x210] sm:$0xff]   ;;  %v11557_v44 = vld [vmem:[%s14346_s3 + $0x218] sm:$0xff]  }
 0x2b2   : > { %v13275_v60 = vadd.f32 %v9427_v4, %v14486_v31  ;;  %v9430_v34 = vadd.f32 %v9429_v42, %v9428_v13  ;;  %5870 = vmatprep.mubr.bf16.mxu0 %v14489_v57  ;;  %v11555_v4 = vld [vmem:[%s14346_s3 + $0x208] sm:$0xff]  }
 0x2b3   : > { %4812 = vmatmul.mubr.bf16.vlgmr.msra.gmra.mrb[128].mxu1 %v11303_v9  ;;  %v9647_v48 = vpop.f32.mrb[152].mxu0  ;;  %v11311_v13 = vld [vmem:[#allocation2 + $0x120] ss:$12 sps:$4 sm:$0xff]   ;;  %v14493_v9 = vld [vmem:[#allocation27_spill] sm:$0xff] }
 0x2b4   : > { %v13284_v17 = vadd.f32 %v9430_v34, %v14490_v30  ;;  %4819 = vmatprep.mubr.bf16.mxu1 %v11308_v24  ;;  %10391 = vmatpush3.bf16.msra.mxu1 %v11554_v55  ;;  %v9648_v15 = vpop.f32.mrb[153].mxu0  ;;  %v14494_v24 = vld [vmem:[#allocation28_spill] sm:$0xff] }
 0x2b5   : > { %10392 = vmatprep.subr.bf16.mxu1 %v12738_v49  ;;  %v9649_v18 = vadd.f32 %v9648_v15, %v9647_v48  ;;  %v9650_v10 = vpop.f32.mrb[154].mxu0  ;;  %v11318_v15 = vld [vmem:[#allocation2 + $0x274] ss:$12 sps:$4 sm:$0xff]  }
 0x2b6   : > { %v9431_v16 = vpop.f32.mrb[72].mxu1  ;;  %v9651_v35 = vpop.f32.mrb[155].mxu0 }
 0x2b7   : > { %v9432_v32 = vpop.f32.mrb[73].mxu1  ;;  %v13292_v43 = vadd.f32 %v9649_v18, %v13077_v33  ;;  %v9652_v36 = vadd.f32 %v9651_v35, %v9650_v10  ;;  %v11313_v33 = vld [vmem:[#allocation2 + $0x13c] ss:$12 sps:$4 sm:$0xff]   ;;  %v8950_v18 = vcombine.low %v14491_v51, %v5664_v7  ;;  %v11316_v51 = vld [vmem:[#allocation2 + $0x154] ss:$12 sps:$4 sm:$0xff]  }
 0x2b8   : > { %v9433_v21 = vadd.f32 %v9432_v32, %v9431_v16  ;;  %v9434_v46 = vpop.f32.mrb[74].mxu1  ;;  %10393 = vmatpush3.bf16.msra.mxu1 %v11555_v4  ;;  %v11315_v4 = vld [vmem:[#allocation2 + $0x138] ss:$12 sps:$4 sm:$0xff]  }
 0x2b9   : > { %v9435_v49 = vpop.f32.mrb[75].mxu1  ;;  %5871 = vmatmul.mubr.bf16.gmra.mrb[244].mxu0 %v14492_v45  ;;  %10394 = vmatprep.subr.bf16.mxu1 %v12758_v53  ;;  %v13305_v34 = vadd.f32 %v9652_v36, %v13087_v11  ;;  %v11558_v36 = vld [vmem:[%s14346_s3 + $0x220] sm:$0xff]  }
 0x2ba   : > { %v13302_v42 = vadd.f32 %v9433_v21, %v14493_v9  ;;  %v9436_v31 = vadd.f32 %v9435_v49, %v9434_v46  ;;  %5878 = vmatprep.mubr.bf16.mxu0 %v8951_v6  ;;  %v14495_v49 = vld [vmem:[#allocation29_spill] sm:$0xff] }
 0x2bb   : > { %4820 = vmatmul.mubr.bf16.gmra.mrb[132].mxu1 %v11311_v13  ;;  %v9653_v30 = vpop.f32.mrb[156].mxu0 }
 0x2bc   : > { %v13308_v57 = vadd.f32 %v9436_v31, %v14494_v24  ;;  %4827 = vmatprep.mubr.bf16.mxu1 %v11313_v33  ;;  %10395 = vmatpush3.bf16.msra.mxu1 %v11556_v0  ;;  %v9654_v53 = vpop.f32.mrb[157].mxu0  ;;  %v11321_v33 = vld [vmem:[#allocation2 + $0x270] ss:$12 sps:$4 sm:$0xff]  }
 0x2bd   : > { %10396 = vmatprep.subr.bf16.mxu1 %v11557_v44  ;;  %v9655_v11 = vadd.f32 %v9654_v53, %v9653_v30  ;;  %v9656_v48 = vpop.f32.mrb[158].mxu0  ;;  %v11559_v30 = vld [vmem:[%s14346_s3 + $0x228] sm:$0xff]  }
 0x2be   : > { %v9437_v55 = vpop.f32.mrb[76].mxu1  ;;  %v9657_v10 = vpop.f32.mrb[159].mxu0 }
 0x2bf   : > { %v9438_v16 = vpop.f32.mrb[77].mxu1  ;;  %v13318_v21 = vadd.f32 %v9655_v11, %v13107_v26  ;;  %v9658_v46 = vadd.f32 %v9657_v10, %v9656_v48  ;;  %v14496_v26 = vld [vmem:[#allocation30_spill] sm:$0xff] }
 0x2c0   : > { %v9439_v32 = vadd.f32 %v9438_v16, %v9437_v55  ;;  %v9440_v35 = vpop.f32.mrb[78].mxu1  ;;  %10397 = vmatpush3.bf16.msra.mxu1 %v11557_v44  ;;  %v11320_v48 = vld [vmem:[#allocation2 + $0x150] ss:$12 sps:$4 sm:$0xff]   ;;  %v11322_v16 = vld [vmem:[#allocation2 + $0x16c] ss:$12 sps:$4 sm:$0xff]  }
 0x2c1   : > { %v9441_v6 = vpop.f32.mrb[79].mxu1  ;;  %5879 = vmatmul.mubr.bf16.gmra.mrb[248].mxu0 %v8950_v18  ;;  %10398 = vmatprep.subr.bf16.mxu1 %v11558_v36  ;;  %v13327_v45 = vadd.f32 %v9658_v46, %v13113_v29  ;;  %v11324_v29 = vld [vmem:[#allocation2 + $0x1d0] ss:$12 sps:$4 sm:$0xff]   ;;  %v11326_v46 = vld [vmem:[#allocation2 + $0x1e8] ss:$12 sps:$4 sm:$0xff]  }
 0x2c2   : > { %v13324_v13 = vadd.f32 %v9439_v32, %v14495_v49  ;;  %v9442_v7 = vadd.f32 %v9441_v6, %v9440_v35  ;;  %5886 = vmatprep.mubr.bf16.mxu0 %v11318_v15  ;;  %v11560_v15 = vld [vmem:[%s14346_s3 + $0x230] sm:$0xff]  }
 0x2c3   : > { %4828 = vmatmul.mubr.bf16.gmra.mrb[136].mxu1 %v11315_v4  ;;  %v9659_v31 = vpop.f32.mrb[160].mxu0  ;;  %v11329_v4 = vld [vmem:[#allocation2 + $0x200] ss:$12 sps:$4 sm:$0xff]  }
 0x2c4   : > { %v13330_v9 = vadd.f32 %v9442_v7, %v14496_v26  ;;  %4835 = vmatprep.mubr.bf16.mxu1 %v11316_v51  ;;  %10399 = vmatpush3.bf16.msra.mxu1 %v11558_v36  ;;  %v9660_v24 = vpop.f32.mrb[161].mxu0  ;;  %v11325_v7 = vld [vmem:[#allocation2 + $0x168] ss:$12 sps:$4 sm:$0xff]   ;;  %v13354_v51 = vld [vmem:[#allocation2 + $0x184] ss:$12 sps:$4 sm:$0xff]  }
 0x2c5   : > { %10400 = vmatprep.subr.bf16.mxu1 %v11559_v30  ;;  %v9661_v0 = vadd.f32 %v9660_v24, %v9659_v31  ;;  %v9662_v53 = vpop.f32.mrb[162].mxu0 }
 0x2c6   : > { %v9663_v44 = vpop.f32.mrb[163].mxu0 }
 0x2c7   : > { %v13336_v55 = vadd.f32 %v9661_v0, %v13128_v12  ;;  %v9664_v11 = vadd.f32 %v9663_v44, %v9662_v53  ;;  %v13360_v0 = vld [vmem:[#allocation2 + $0x198] sm:$0xff]  ;;  %v4645_v53 = vld [vmem:[#allocation2 + $0x1a4] sm:$0xff] }
 0x2c8   : > { %10401 = vmatpush3.bf16.msra.mxu1 %v11559_v30  ;;  %v11331_v30 = vld [vmem:[#allocation2 + $0x218] ss:$12 sps:$4 sm:$0xff]  }
 0x2c9   : > { %5887 = vmatmul.mubr.bf16.gmra.mrb[252].mxu0 %v11321_v33  ;;  %10402 = vmatprep.subr.bf16.mxu1 %v11560_v15  ;;  %v13342_v18 = vadd.f32 %v9664_v11, %v13132_v3  ;;  %v11561_v3 = vld [vmem:[%s14346_s3 + $0x238] sm:$0xff]  }
 0x2ca   : > { %10502 = vmatprep.mubr.bf16.mxu0 %v11324_v29  ;;  %v11333_v29 = vld [vmem:[#allocation2 + $0x230] ss:$12 sps:$4 sm:$0xff]  }
 0x2cb   : > { %4836 = vmatmul.mubr.bf16.gmra.mrb[140].mxu1 %v11320_v48  ;;  %v9665_v10 = vpop.f32.mrb[164].mxu0 }
 0x2cc   : > { %4843 = vmatprep.mubr.bf16.mxu1 %v11322_v16  ;;  %10403 = vmatpush3.bf16.msra.mxu1 %v11560_v15  ;;  %v9666_v12 = vpop.f32.mrb[165].mxu0  ;;  %v13365_v15 = vld [vmem:[#allocation2 + $0x180] ss:$12 sps:$4 sm:$0xff]  }
 0x2cd   : > { %10404 = vmatprep.subr.bf16.mxu1 %v14482_v39  ;;  %v9667_v32 = vadd.f32 %v9666_v12, %v9665_v10  ;;  %v9668_v35 = vpop.f32.mrb[166].mxu0  ;;  %v11562_v39 = vld [vmem:[%s14346_s3 + $0x40] sm:$0xff]  }
 0x2ce   : > { %v9669_v6 = vpop.f32.mrb[167].mxu0 }
 0x2cf   : > { %v13346_v36 = vadd.f32 %v9667_v32, %v13146_v54  ;;  %v9670_v49 = vadd.f32 %v9669_v6, %v9668_v35  ;;  %v11338_v6 = vld [vmem:[#allocation2 + $0x260] ss:$12 sps:$4 sm:$0xff]  }
 0x2d0   : > { %10405 = vmatpush3.bf16.msra.mxu1 %v11561_v3  ;;  %v8878_v3 = vcombine.low %v13360_v0, %v4645_v53 }
 0x2d1   : > { %10503 = vmatmul.mubr.bf16.vlgmr.msra.gmra.mrb[208].mxu0 %v11326_v46  ;;  %9859 = vmatprep.subr.bf16.mxu1 %v11562_v39  ;;  %v13357_v26 = vadd.f32 %v9670_v49, %v13151_v62  ;;  %v8879_v62 = vcombine.high %v13360_v0, %v4645_v53  ;;  %v11335_v46 = vld [vmem:[#allocation2 + $0x248] ss:$12 sps:$4 sm:$0xff]  }
 0x2d2   : > { %10506 = vmatprep.mubr.bf16.mxu0 %v11329_v4 }
 0x2d3   : > { %4844 = vmatmul.mubr.bf16.gmra.mrb[144].mxu1 %v11325_v7  ;;  %v9671_v54 = vpop.f32.mrb[168].mxu0  ;;  %v11336_v7 = vld [vmem:[#allocation2 + $0x1b4] ss:$12 sps:$4 sm:$0xff]  }
 0x2d4   : > { %4851 = vmatprep.mubr.bf16.mxu1 %v13354_v51  ;;  %v9672_v31 = vpop.f32.mrb[169].mxu0 }
 0x2d5   : > { %v9673_v33 = vadd.f32 %v9672_v31, %v9671_v54  ;;  %v9674_v24 = vpop.f32.mrb[170].mxu0 }
 0x2d6   : > { %v9675_v44 = vpop.f32.mrb[171].mxu0 }
 0x2d7   : > { %v13363_v11 = vadd.f32 %v9673_v33, %v13171_v1  ;;  %v9676_v48 = vadd.f32 %v9675_v44, %v9674_v24 }
 0x2d9   : > { %10507 = vmatmul.mubr.bf16.gmra.mrb[212].mxu0 %v11331_v30  ;;  %v13369_v16 = vadd.f32 %v9676_v48, %v13180_v58 }
 0x2da   : > { %10510 = vmatprep.mubr.bf16.mxu0 %v11333_v29 }
 0x2db   : > { %4852 = vmatmul.mubr.bf16.gmra.mrb[148].mxu1 %v13365_v15  ;;  %v9677_v10 = vpop.f32.mrb[172].mxu0 }
 0x2dc   : > { %4859 = vmatprep.mubr.bf16.mxu1 %v8879_v62  ;;  %v9678_v12 = vpop.f32.mrb[173].mxu0 }
 0x2dd   : > { %v9679_v32 = vadd.f32 %v9678_v12, %v9677_v10  ;;  %v9680_v35 = vpop.f32.mrb[174].mxu0  ;;  %v11339_v10 = vld [vmem:[#allocation2 + $0x1b0] ss:$12 sps:$4 sm:$0xff]  }
 0x2de   : > { %v9681_v1 = vpop.f32.mrb[175].mxu0  ;;  %v11341_v12 = vld [vmem:[#allocation2 + $0x110] ss:$12 sps:$4 sm:$0xff]  }
 0x2df   : > { %v13373_v4 = vadd.f32 %v9679_v32, %v13203_v27  ;;  %v9682_v49 = vadd.f32 %v9681_v1, %v9680_v35  ;;  %v11340_v27 = vld [vmem:[#allocation2 + $0x278] ss:$12 sps:$4 sm:$0xff]  }
 0x2e1   : > { %10511 = vmatmul.mubr.bf16.gmra.mrb[216].mxu0 %v11335_v46  ;;  %v13377_v58 = vadd.f32 %v9682_v49, %v13211_v22 }
 0x2e2   : > { %10514 = vmatprep.mubr.bf16.mxu0 %v11338_v6 }
 0x2e3   : > { %4860 = vmatmul.mubr.bf16.gmra.mrb[152].mxu1 %v8878_v3  ;;  %v9795_v39 = vpop.f32.mrb[176].mxu0 }
 0x2e4   : > { %4867 = vmatprep.mubr.bf16.mxu1 %v11336_v7  ;;  %v9796_v54 = vpop.f32.mrb[177].mxu0 }
 0x2e5   : > { %v13379_v33 = vadd.f32 %v9796_v54, %v9795_v39  ;;  %v9798_v24 = vpop.f32.mrb[178].mxu0 }
 0x2e6   : > { %v9475_v31 = vpop.f32.mrb[80].mxu1  ;;  %v9799_v44 = vpop.f32.mrb[179].mxu0 }
 0x2e7   : > { %v9476_v30 = vpop.f32.mrb[81].mxu1  ;;  %v13381_v53 = vadd.f32 %v9799_v44, %v9798_v24  ;;  %v11343_v44 = vld [vmem:[#allocation2 + $0x140] ss:$12 sps:$4 sm:$0xff]  }
 0x2e8   : > { %v9477_v29 = vadd.f32 %v9476_v30, %v9475_v31  ;;  %v9478_v48 = vpop.f32.mrb[82].mxu1 }
 0x2e9   : > { %v9479_v62 = vpop.f32.mrb[83].mxu1  ;;  %10515 = vmatmul.mubr.bf16.gmra.mrb[220].mxu0 %v11340_v27 }
 0x2ea   : > { %v9480_v22 = vadd.f32 %v9479_v62, %v9478_v48  ;;  %v13384_v32 = vadd.f32 %v13137_v5, %v9477_v29  ;;  %v11342_v5 = vld [vmem:[#allocation2 + $0x128] ss:$12 sps:$4 sm:$0xff]  }
 0x2eb   : > { %4868 = vmatmul.mubr.bf16.gmra.mrb[156].mxu1 %v11339_v10  ;;  %v9801_v46 = vpop.f32.mrb[180].mxu0  ;;  %v11564_v10 = vld [vmem:[%s14346_s3 + $0x48] sm:$0xff]  }
 0x2ec   : > { %10406 = vmatprep.mubr.bf16.mxu1 %v11341_v12  ;;  %v13387_v35 = vadd.f32 %v13142_v23, %v9480_v22  ;;  %v9802_v1 = vpop.f32.mrb[181].mxu0  ;;  %v11563_v23 = vld [vmem:[%s14346_s3] sm:$0xff]  }
 0x2ed   : > { %v13389_v49 = vadd.f32 %v9802_v1, %v9801_v46  ;;  %v9804_v3 = vpop.f32.mrb[182].mxu0 }
 0x2ee   : > { %v9481_v6 = vpop.f32.mrb[84].mxu1  ;;  %v9805_v39 = vpop.f32.mrb[183].mxu0 }
 0x2ef   : > { %v9482_v7 = vpop.f32.mrb[85].mxu1  ;;  %v13391_v24 = vadd.f32 %v9805_v39, %v9804_v3 }
 0x2f0   : > { %v9483_v54 = vadd.f32 %v9482_v7, %v9481_v6  ;;  %v9484_v31 = vpop.f32.mrb[86].mxu1 }
 0x2f1   : > { %v9485_v30 = vpop.f32.mrb[87].mxu1 }
 0x2f2   : > { %v9486_v27 = vadd.f32 %v9485_v30, %v9484_v31  ;;  %v13394_v29 = vadd.f32 %v13156_v50, %v9483_v54  ;;  %v11344_v31 = vld [vmem:[#allocation2 + $0x158] ss:$12 sps:$4 sm:$0xff]   ;;  %v11566_v30 = vld [vmem:[%s14346_s3 + $0x50] sm:$0xff]  }
 0x2f3   : > { %10407 = vmatmul.mubr.bf16.vlgmr.msra.gmra.mrb[112].mxu1 %v11342_v5  ;;  %v9807_v62 = vpop.f32.mrb[184].mxu0 }
 0x2f4   : > { %10410 = vmatprep.mubr.bf16.mxu1 %v11343_v44  ;;  %9860 = vmatpush3.bf16.msra.mxu1 %v11563_v23  ;;  %v13400_v48 = vadd.f32 %v13163_v28, %v9486_v27  ;;  %v9808_v22 = vpop.f32.mrb[185].mxu0  ;;  %v11565_v28 = vld [vmem:[%s14346_s3 + $0x8] sm:$0xff]   ;;  %v11345_v27 = vld [vmem:[#allocation2 + $0x170] ss:$12 sps:$4 sm:$0xff]  }
 0x2f5   : > { %9861 = vmatprep.subr.bf16.mxu1 %v11564_v10  ;;  %v13405_v50 = vadd.f32 %v9808_v22, %v9807_v62  ;;  %v9810_v46 = vpop.f32.mrb[186].mxu0  ;;  %v11567_v23 = vld [vmem:[%s14346_s3 + $0x10] sm:$0xff]   ;;  %v11568_v22 = vld [vmem:[%s14346_s3 + $0x58] sm:$0xff]  }
 0x2f6   : > { %v9487_v12 = vpop.f32.mrb[88].mxu1  ;;  %v9811_v6 = vpop.f32.mrb[187].mxu0 }
 0x2f7   : > { %v9488_v1 = vpop.f32.mrb[89].mxu1  ;;  %v13410_v39 = vadd.f32 %v9811_v6, %v9810_v46 }
 0x2f8   : > { %v9489_v3 = vadd.f32 %v9488_v1, %v9487_v12  ;;  %v9490_v7 = vpop.f32.mrb[90].mxu1  ;;  %9862 = vmatpush3.bf16.msra.mxu1 %v11565_v28 }
 0x2f9   : > { %v9491_v54 = vpop.f32.mrb[91].mxu1  ;;  %9863 = vmatprep.subr.bf16.mxu1 %v11566_v30  ;;  %v11346_v30 = vld [vmem:[#allocation2 + $0x188] ss:$12 sps:$4 sm:$0xff]  }
 0x2fa   : > { %v9492_v5 = vadd.f32 %v9491_v54, %v9490_v7  ;;  %v13416_v44 = vadd.f32 %v13188_v19, %v9489_v3 }
 0x2fb   : > { %10411 = vmatmul.mubr.bf16.gmra.mrb[116].mxu1 %v11344_v31  ;;  %v9813_v10 = vpop.f32.mrb[188].mxu0 }
 0x2fc   : > { %10414 = vmatprep.mubr.bf16.mxu1 %v11345_v27  ;;  %9864 = vmatpush3.bf16.msra.mxu1 %v11567_v23  ;;  %v13422_v62 = vadd.f32 %v13195_v59, %v9492_v5  ;;  %v9814_v12 = vpop.f32.mrb[189].mxu0  ;;  %v11569_v59 = vld [vmem:[%s14346_s3 + $0x18] sm:$0xff]   ;;  %v11570_v5 = vld [vmem:[%s14346_s3 + $0x60] sm:$0xff]  }
 0x2fd   : > { %9865 = vmatprep.subr.bf16.mxu1 %v11568_v22  ;;  %v13427_v19 = vadd.f32 %v9814_v12, %v9813_v10  ;;  %v9816_v1 = vpop.f32.mrb[190].mxu0  ;;  %v11347_v23 = vld [vmem:[#allocation2 + $0x1a0] ss:$12 sps:$4 sm:$0xff]  }
 0x2fe   : > { %v9493_v46 = vpop.f32.mrb[92].mxu1  ;;  %v9817_v3 = vpop.f32.mrb[191].mxu0  ;;  %v11571_v22 = vld [vmem:[%s14346_s3 + $0x20] sm:$0xff]  }
 0x2ff   : > { %14497 = vst [vmem:[#allocation13_spill] sm:$0xff] %v13427_v19  ;;  %v9494_v6 = vpop.f32.mrb[93].mxu1  ;;  %v13432_v54 = vadd.f32 %v9817_v3, %v9816_v1  ;;  %v11572_v1 = vld [vmem:[%s14346_s3 + $0x68] sm:$0xff]  }
 0x300   : > { %v9495_v7 = vadd.f32 %v9494_v6, %v9493_v46  ;;  %v9496_v28 = vpop.f32.mrb[94].mxu1  ;;  %9866 = vmatpush3.bf16.msra.mxu1 %v11569_v59 }
 0x301   : > { %14498 = vst [vmem:[#allocation9_spill] sm:$0xff] %v13432_v54  ;;  %v9497_v31 = vpop.f32.mrb[95].mxu1  ;;  %9867 = vmatprep.subr.bf16.mxu1 %v11570_v5 }
 0x302   : > { %v9498_v27 = vadd.f32 %v9497_v31, %v9496_v28  ;;  %v13438_v10 = vadd.f32 %v13219_v47, %v9495_v7 }
 0x303   : > { %10415 = vmatmul.mubr.bf16.gmra.mrb[120].mxu1 %v11346_v30  ;;  %v9819_v46 = vpop.f32.mrb[192].mxu0 }
 0x304   : > { %10418 = vmatprep.mubr.bf16.mxu1 %v11347_v23  ;;  %9868 = vmatpush3.bf16.msra.mxu1 %v11571_v22  ;;  %v13444_v12 = vadd.f32 %v13227_v20, %v9498_v27  ;;  %v9820_v6 = vpop.f32.mrb[193].mxu0  ;;  %v11573_v20 = vld [vmem:[%s14346_s3 + $0x28] sm:$0xff]   ;;  %v11348_v23 = vld [vmem:[#allocation2 + $0x1b8] ss:$12 sps:$4 sm:$0xff]   ;;  %v11574_v22 = vld [vmem:[%s14346_s3 + $0x70] sm:$0xff]  }
 0x305   : > { %9869 = vmatprep.subr.bf16.mxu1 %v11572_v1  ;;  %v13449_v47 = vadd.f32 %v9820_v6, %v9819_v46  ;;  %v9822_v7 = vpop.f32.mrb[194].mxu0  ;;  %v11575_v6 = vld [vmem:[%s14346_s3 + $0x30] sm:$0xff]  }
 0x306   : > { %v9499_v3 = vpop.f32.mrb[96].mxu1  ;;  %v9823_v59 = vpop.f32.mrb[195].mxu0 }
 0x307   : > { %14499 = vst [vmem:[#allocation22_spill] sm:$0xff] %v13449_v47  ;;  %v9500_v28 = vpop.f32.mrb[97].mxu1  ;;  %v13454_v5 = vadd.f32 %v9823_v59, %v9822_v7 }
 0x308   : > { %v9501_v31 = vadd.f32 %v9500_v28, %v9499_v3  ;;  %v9502_v30 = vpop.f32.mrb[98].mxu1  ;;  %9870 = vmatpush3.bf16.msra.mxu1 %v11573_v20  ;;  %v11576_v28 = vld [vmem:[%s14346_s3 + $0x78] sm:$0xff]  }
 0x309   : > { %14500 = vst [vmem:[#allocation15_spill] sm:$0xff] %v13454_v5  ;;  %v9503_v27 = vpop.f32.mrb[99].mxu1  ;;  %9871 = vmatprep.subr.bf16.mxu1 %v11574_v22  ;;  %v11578_v5 = vld [vmem:[#allocation2 + $0x1a4] sm:$0xff] }
 0x30a   : > { %v9504_v46 = vadd.f32 %v9503_v27, %v9502_v30  ;;  %v13460_v1 = vadd.f32 %v13250_v8, %v9501_v31 }
 0x30b   : > { %10419 = vmatmul.mubr.bf16.gmra.mrb[124].mxu1 %v11348_v23  ;;  %v9825_v7 = vpop.f32.mrb[196].mxu0 }
 0x30c   : > { %9872 = vmatpush3.bf16.msra.mxu1 %v11575_v6  ;;  %5476 = vmatprep.mubr.bf16.mxu1 %v13354_v51  ;;  %v13467_v3 = vadd.f32 %v13259_v61, %v9504_v46  ;;  %v9826_v59 = vpop.f32.mrb[197].mxu0  ;;  %v11577_v61 = vld [vmem:[%s14346_s3 + $0x38] sm:$0xff]   ;;  %v14503_v6 = vmov 0  }
 0x30d   : > { %9873 = vmatprep.subr.bf16.mxu1 %v11576_v28  ;;  %v13472_v31 = vadd.f32 %v9826_v59, %v9825_v7  ;;  %v9828_v30 = vpop.f32.mrb[198].mxu0  ;;  %v8912_v7 = vcombine.high %v13360_v0, %v11578_v5 }
 0x30e   : > { %v9505_v8 = vpop.f32.mrb[100].mxu1  ;;  %v9829_v27 = vpop.f32.mrb[199].mxu0 }
 0x30f   : > { %14501 = vst [vmem:[#allocation31_spill] sm:$0xff] %v13472_v31  ;;  %v9506_v20 = vpop.f32.mrb[101].mxu1  ;;  %v13477_v51 = vadd.f32 %v9829_v27, %v9828_v30 }
 0x310   : > { %v9507_v23 = vadd.f32 %v9506_v20, %v9505_v8  ;;  %v9508_v22 = vpop.f32.mrb[102].mxu1  ;;  %9874 = vmatpush3.bf16.msra.mxu1 %v11577_v61 }
 0x311   : > { %14502 = vst [vmem:[#allocation14_spill] sm:$0xff] %v13477_v51  ;;  %v9509_v46 = vpop.f32.mrb[103].mxu1  ;;  %6325 = vmatprep.subr.bf16.mxu1 %v14503_v6 }
 0x312   : > { %v9510_v28 = vadd.f32 %v9509_v46, %v9508_v22  ;;  %v13482_v59 = vadd.f32 %v13275_v60, %v9507_v23  ;;  %v8911_v23 = vcombine.low %v13360_v0, %v11578_v5 }
 0x313   : > { %5477 = vmatmul.mubr.bf16.vlgmr.msra.gmra.mrb[160].mxu1 %v13365_v15  ;;  %v9831_v20 = vpop.f32.mrb[200].mxu0 }
 0x314   : > { %5484 = vmatprep.mubr.bf16.mxu1 %v8912_v7  ;;  %v13486_v8 = vadd.f32 %v13284_v17, %v9510_v28  ;;  %v9832_v61 = vpop.f32.mrb[201].mxu0  ;;  %v14506_v17 = vld [vmem:[#allocation11_spill] sm:$0xff]  ;;  %v14507_v28 = vld [vmem:[#allocation12_spill] sm:$0xff] }
 0x315   : > { %v13488_v27 = vadd.f32 %v9832_v61, %v9831_v20  ;;  %v9834_v51 = vpop.f32.mrb[202].mxu0  ;;  %v14508_v19 = vcombine.high %v14506_v17, %v14507_v28 }
 0x316   : > { %v9511_v30 = vpop.f32.mrb[104].mxu1  ;;  %v9835_v22 = vpop.f32.mrb[203].mxu0 }
 0x317   : > { %14504 = vst [vmem:[#allocation23_spill] sm:$0xff] %v13488_v27  ;;  %v9512_v31 = vpop.f32.mrb[105].mxu1  ;;  %v13490_v54 = vadd.f32 %v9835_v22, %v9834_v51 }
 0x318   : > { %v9513_v46 = vadd.f32 %v9512_v31, %v9511_v30  ;;  %v9514_v47 = vpop.f32.mrb[106].mxu1 }
 0x319   : > { %14505 = vst [vmem:[#allocation32_spill] sm:$0xff] %v13490_v54  ;;  %v9515_v60 = vpop.f32.mrb[107].mxu1 }
 0x31a   : > { %v9516_v15 = vadd.f32 %v9515_v60, %v9514_v47  ;;  %v13494_v7 = vadd.f32 %v13302_v42, %v9513_v46 }
 0x31b   : > { %5485 = vmatmul.mubr.bf16.gmra.mrb[164].mxu1 %v8911_v23  ;;  %v9837_v61 = vpop.f32.mrb[204].mxu0 }
 0x31c   : > { %5492 = vmatprep.mubr.bf16.mxu1 %v14508_v19  ;;  %v13500_v20 = vadd.f32 %v13308_v57, %v9516_v15  ;;  %v9838_v31 = vpop.f32.mrb[205].mxu0  ;;  %v14511_v57 = vcombine.low %v14506_v17, %v14507_v28  ;;  %v14512_v19 = vld [vmem:[#allocation6_spill] sm:$0xff]  ;;  %v14513_v15 = vld [vmem:[#allocation8_spill] sm:$0xff] }
 0x31d   : > { %v13502_v51 = vadd.f32 %v9838_v31, %v9837_v61  ;;  %v9840_v22 = vpop.f32.mrb[206].mxu0  ;;  %v14514_v61 = vcombine.high %v14512_v19, %v14513_v15 }
 0x31e   : > { %v9517_v30 = vpop.f32.mrb[108].mxu1  ;;  %v9841_v0 = vpop.f32.mrb[207].mxu0 }
 0x31f   : > { %14509 = vst [vmem:[#allocation17_spill] sm:$0xff] %v13502_v51  ;;  %v9518_v54 = vpop.f32.mrb[109].mxu1  ;;  %v13504_v42 = vadd.f32 %v9841_v0, %v9840_v22  ;;  %v13522_v22 = vld [vmem:[%s14347_s4] ss:$0 sm:$0xff] }
 0x320   : > { %v9519_v47 = vadd.f32 %v9518_v54, %v9517_v30  ;;  %v9520_v5 = vpop.f32.mrb[110].mxu1 }
 0x321   : > { %14510 = vst [vmem:[#allocation16_spill] sm:$0xff] %v13504_v42  ;;  %v9521_v46 = vpop.f32.mrb[111].mxu1 }
 0x322   : > { %v9522_v60 = vadd.f32 %v9521_v46, %v9520_v5  ;;  %v13507_v23 = vadd.f32 %v13324_v13, %v9519_v47 }
 0x323   : > { %5493 = vmatmul.mubr.bf16.gmra.mrb[168].mxu1 %v14511_v57  ;;  %v14516_v57 = vld [vmem:[#allocation7_spill] sm:$0xff] }
 0x324   : > { %5500 = vmatprep.mubr.bf16.mxu1 %v14514_v61  ;;  %v13516_v31 = vadd.f32 %v13330_v9, %v9522_v60  ;;  %v14517_v61 = vcombine.high %v14516_v57, %v12732_v14 }
 0x326   : > { %v10312_v54 = vpop.f32.mrb[32].mxu1 }
 0x327   : > { %v10650_v30 = vadd.f32 %v13394_v29, %v10312_v54  ;;  %v3884_v13 = vpop.f32.mrb[33].mxu1  ;;  %v14515_v29 = vcombine.low %v14512_v19, %v14513_v15 }
 0x328   : > { %v10653_v0 = vadd.f32 %v13384_v32, %v3884_v13  ;;  %v10313_v17 = vpop.f32.mrb[34].mxu1 }
 0x329   : > { %v10656_v28 = vadd.f32 %v13400_v48, %v10313_v17  ;;  %v3887_v47 = vpop.f32.mrb[35].mxu1  ;;  %v3972_v15 = vadd.f32 %v10650_v30, %v13522_v22 }
 0x32a   : > { %v3970_v5 = vadd.f32 %v10653_v0, %v13522_v22  ;;  %v10659_v9 = vadd.f32 %v13387_v35, %v3887_v47 }
 0x32b   : > { %v3973_v46 = vadd.f32 %v10656_v28, %v13522_v22  ;;  %5501 = vmatmul.mubr.bf16.gmra.mrb[172].mxu1 %v14515_v29 }
 0x32c   : > { %v3986_v60 = vmax.f32 %v3970_v5, 0.0  ;;  %5508 = vmatprep.mubr.bf16.mxu1 %v14517_v61  ;;  %v3971_v0 = vadd.f32 %v10659_v9, %v13522_v22  ;;  %v14519_v61 = vld [vmem:[#allocation10_spill] sm:$0xff] }
 0x32d   : > { %v3989_v32 = vmax.f32 %v3973_v46, 0.0  ;;  %v14518_v46 = vcombine.low %v14516_v57, %v12732_v14 }
 0x32e   : > { %v10316_v54 = vpop.f32.mrb[36].mxu1 }
 0x32f   : > { %v6040_v13 = vmax.f32 %v3986_v60, %v3989_v32  ;;  %v10662_v48 = vadd.f32 %v13438_v10, %v10316_v54  ;;  %v3900_v17 = vpop.f32.mrb[37].mxu1  ;;  %v3987_v10 = vmax.f32 %v3971_v0, 0.0 }
 0x330   : > { %v10665_v35 = vadd.f32 %v13416_v44, %v3900_v17  ;;  %v10317_v28 = vpop.f32.mrb[38].mxu1  ;;  %v14520_v44 = vcombine.high %v14519_v61, %v12772_v38 }
 0x331   : > { %v10668_v47 = vadd.f32 %v13444_v12, %v10317_v28  ;;  %v3903_v19 = vpop.f32.mrb[39].mxu1  ;;  %v3988_v12 = vmax.f32 %v3972_v15, 0.0  ;;  %v6089_v14 = vrot.slane %v6040_v13, 1 }
 0x332   : > { %v3974_v5 = vadd.f32 %v10665_v35, %v13522_v22  ;;  %v10671_v29 = vadd.f32 %v13422_v62, %v3903_v19 }
 0x333   : > { %5509 = vmatmul.mubr.bf16.gmra.mrb[176].mxu1 %v14518_v46  ;;  %v3977_v17 = vadd.f32 %v10668_v47, %v13522_v22 }
 0x334   : > { %v3990_v60 = vmax.f32 %v3974_v5, 0.0  ;;  %v3975_v9 = vadd.f32 %v10671_v29, %v13522_v22  ;;  %5516 = vmatprep.mubr.bf16.mxu1 %v14520_v44  ;;  %v3976_v5 = vadd.f32 %v10662_v48, %v13522_v22 }
 0x336   : > { %v6041_v32 = vmax.f32 %v3987_v10, %v3990_v60  ;;  %v3991_v54 = vmax.f32 %v3975_v9, 0.0  ;;  %v10320_v30 = vpop.f32.mrb[40].mxu1  ;;  %v3993_v9 = vmax.f32 %v3977_v17, 0.0 }
 0x337   : > { %v10674_v62 = vadd.f32 %v13482_v59, %v10320_v30  ;;  %v3916_v35 = vpop.f32.mrb[41].mxu1 }
 0x338   : > { %v6090_v57 = vrot.slane %v6041_v32, 1  ;;  %v6042_v0 = vmax.f32 %v3988_v12, %v3991_v54  ;;  %v10677_v28 = vadd.f32 %v13460_v1, %v3916_v35  ;;  %v10321_v19 = vpop.f32.mrb[42].mxu1  ;;  %v14521_v1 = vcombine.low %v14519_v61, %v12772_v38 }
 0x339   : > { %v3980_v29 = vadd.f32 %v10674_v62, %v13522_v22  ;;  %v10680_v15 = vadd.f32 %v13486_v8, %v10321_v19  ;;  %v3919_v46 = vpop.f32.mrb[43].mxu1 }
 0x33a   : > { %v6092_v10 = vrot.slane %v6042_v0, 1  ;;  %v3978_v47 = vadd.f32 %v10677_v28, %v13522_v22  ;;  %v10683_v59 = vadd.f32 %v13467_v3, %v3919_v46  ;;  %v6091_v60 = vsel %vm6088_vm6, %v6089_v14, %v6090_v57 }
 0x33b   : > { %v3996_v44 = vmax.f32 %v3980_v29, 0.0  ;;  %v3981_v12 = vadd.f32 %v10680_v15, %v13522_v22  ;;  %5517 = vmatmul.mubr.bf16.gmra.mrb[180].mxu1 %v14521_v1  ;;  %v6159_v48 = vmax.f32 %v6040_v13, %v6091_v60  ;;  %v3992_v14 = vmax.f32 %v3976_v5, 0.0 }
 0x33c   : > { %v3994_v54 = vmax.f32 %v3978_v47, 0.0  ;;  %v3979_v8 = vadd.f32 %v10683_v59, %v13522_v22  ;;  %5524 = vmatprep.mubr.bf16.mxu1 %v14473_v56  ;;  %v6093_v30 = vsel %vm6088_vm6, %v6090_v57, %v6092_v10 }
 0x33d   : > { %v6044_v62 = vmax.f32 %v3993_v9, %v3996_v44  ;;  %v3997_v3 = vmax.f32 %v3981_v12, 0.0  ;;  %v6160_v35 = vmax.f32 %v6041_v32, %v6093_v30 }
 0x33e   : > { %v3995_v17 = vmax.f32 %v3979_v8, 0.0  ;;  %v10324_v28 = vpop.f32.mrb[44].mxu1 }
 0x33f   : > { %v6045_v19 = vmax.f32 %v3994_v54, %v3997_v3  ;;  %v13566_v29 = vadd.f32 %v13507_v23, %v10324_v28  ;;  %v3932_v38 = vpop.f32.mrb[45].mxu1  ;;  %v6182_v61 = vpack.c.bf16 %v6160_v35, %v6159_v48  ;;  %v6096_v47 = vrot.slane %v6044_v62, 1 }
 0x340   : > { %v6043_v13 = vmax.f32 %v3992_v14, %v3995_v17  ;;  %v10689_v15 = vadd.f32 %v13494_v7, %v3932_v38  ;;  %v10325_v46 = vpop.f32.mrb[46].mxu1 }
 0x341   : > { %v6098_v56 = vrot.slane %v6045_v19, 1  ;;  %v10692_v57 = vadd.f32 %v13516_v31, %v10325_v46  ;;  %v3935_v59 = vpop.f32.mrb[47].mxu1  ;;  %6326 = vmatpush1.bf16.msra.mxu1 %v6182_v61 }
 0x342   : > { %v6094_v32 = vrot.slane %v6043_v13, 1  ;;  %v3982_v5 = vadd.f32 %v10689_v15, %v13522_v22  ;;  %v13572_v60 = vadd.f32 %v13500_v20, %v3935_v59  ;;  %6327 = vmatprep.subr.bf16.mxu1 %v14503_v6 }
 0x343   : > { %v3985_v23 = vadd.f32 %v10692_v57, %v13522_v22  ;;  %5525 = vmatmul.mubr.bf16.gmra.mrb[184].mxu1 %v14478_v41  ;;  %v6099_v7 = vsel %vm6088_vm6, %v6096_v47, %v6098_v56 }
 0x344   : > { %v6097_v9 = vsel %vm6088_vm6, %v6094_v32, %v6096_v47  ;;  %v3998_v44 = vmax.f32 %v3982_v5, 0.0  ;;  %5532 = vmatprep.mubr.bf16.mxu1 %v14481_v52  ;;  %v6095_v31 = vsel %vm6088_vm6, %v6092_v10, %v6094_v32  ;;  %v6163_v20 = vmax.f32 %v6044_v62, %v6099_v7 }
 0x345   : > { %v6162_v12 = vmax.f32 %v6043_v13, %v6097_v9  ;;  %v4001_v1 = vmax.f32 %v3985_v23, 0.0  ;;  %v6161_v48 = vmax.f32 %v6042_v0, %v6095_v31 }
 0x347   : > { %v13581_v54 = vmax.f32 %v3998_v44, %v4001_v1  ;;  %v6183_v8 = vpack.c.bf16 %v6162_v12, %v6161_v48 }
 0x349   : > { %v14394_v30 = vrot.slane %v13581_v54, 1  ;;  %6328 = vmatpush1.bf16.msra.mxu1 %v6183_v8 }
 0x34a   : > { %6329 = vmatprep.subr.bf16.mxu1 %v14503_v6 }
 0x34b   : > { %5533 = vmatmul.mubr.bf16.gmra.mrb[188].mxu1 %v14485_v25  ;;  %v6101_v41 = vsel %vm6088_vm6, %v6098_v56, %v14394_v30 }
 0x34c   : > { %v6164_v52 = vmax.f32 %v6045_v19, %v6101_v41 }
 0x34e   : > { %v6184_v10 = vpack.c.bf16 %v6164_v52, %v6163_v20 }
 0x350   : > { %6330 = vmatpush1.bf16.msra.mxu1 %v6184_v10 }
 0x351   : > { %6331 = vmatprep.subr.bf16.mxu1 %v14503_v6 }
 0x364   : > { %v9955_v0 = vpop.f32.mrb[224].mxu0 }
 0x365   : > { %v9956_v62 = vpop.f32.mrb[225].mxu0 }
 0x366   : > { %v13590_v3 = vadd.f32 %v9956_v62, %v9955_v0  ;;  %v9958_v35 = vpop.f32.mrb[226].mxu0 }
 0x367   : > { %v9959_v14 = vpop.f32.mrb[227].mxu0 }
 0x368   : > { %v13592_v17 = vadd.f32 %v9959_v14, %v9958_v35 }
 0x36c   : > { %v9961_v28 = vpop.f32.mrb[228].mxu0 }
 0x36d   : > { %v9962_v38 = vpop.f32.mrb[229].mxu0 }
 0x36e   : > { %v13594_v25 = vadd.f32 %v9962_v38, %v9961_v28  ;;  %v9964_v61 = vpop.f32.mrb[230].mxu0 }
 0x36f   : > { %v9965_v13 = vpop.f32.mrb[231].mxu0 }
 0x370   : > { %v13596_v15 = vadd.f32 %v9965_v13, %v9964_v61 }
 0x374   : > { %v9967_v19 = vpop.f32.mrb[232].mxu0 }
 0x375   : > { %v9968_v46 = vpop.f32.mrb[233].mxu0 }
 0x376   : > { %v13598_v47 = vadd.f32 %v9968_v46, %v9967_v19  ;;  %v9970_v56 = vpop.f32.mrb[234].mxu0 }
 0x377   : > { %v9971_v57 = vpop.f32.mrb[235].mxu0 }
 0x378   : > { %v13600_v59 = vadd.f32 %v9971_v57, %v9970_v56 }
 0x37c   : > { %v9973_v32 = vpop.f32.mrb[236].mxu0 }
 0x37d   : > { %v9974_v5 = vpop.f32.mrb[237].mxu0 }
 0x37e   : > { %v13602_v23 = vadd.f32 %v9974_v5, %v9973_v32  ;;  %v9976_v7 = vpop.f32.mrb[238].mxu0 }
 0x37f   : > { %v9977_v9 = vpop.f32.mrb[239].mxu0 }
 0x380   : > { %v13604_v44 = vadd.f32 %v9977_v9, %v9976_v7 }
 0x384   : > { %v9979_v31 = vpop.f32.mrb[240].mxu0 }
 0x385   : > { %v9980_v12 = vpop.f32.mrb[241].mxu0 }
 0x386   : > { %v9715_v1 = vpop.f32.mrb[128].mxu1  ;;  %v13606_v48 = vadd.f32 %v9980_v12, %v9979_v31  ;;  %v9982_v20 = vpop.f32.mrb[242].mxu0 }
 0x387   : > { %v9716_v8 = vpop.f32.mrb[129].mxu1  ;;  %v9983_v41 = vpop.f32.mrb[243].mxu0 }
 0x388   : > { %v9717_v52 = vadd.f32 %v9716_v8, %v9715_v1  ;;  %v9718_v10 = vpop.f32.mrb[130].mxu1  ;;  %v13608_v0 = vadd.f32 %v9983_v41, %v9982_v20 }
 0x389   : > { %v9719_v62 = vpop.f32.mrb[131].mxu1 }
 0x38a   : > { %v9720_v35 = vadd.f32 %v9719_v62, %v9718_v10  ;;  %v13611_v14 = vadd.f32 %v13238_v63, %v9717_v52 }
 0x38c   : > { %v9985_v28 = vpop.f32.mrb[244].mxu0  ;;  %v13614_v38 = vadd.f32 %v13253_v2, %v9720_v35 }
 0x38d   : > { %v9986_v61 = vpop.f32.mrb[245].mxu0 }
 0x38e   : > { %v9721_v13 = vpop.f32.mrb[132].mxu1  ;;  %v13616_v19 = vadd.f32 %v9986_v61, %v9985_v28  ;;  %v9988_v46 = vpop.f32.mrb[246].mxu0 }
 0x38f   : > { %v9722_v56 = vpop.f32.mrb[133].mxu1  ;;  %v9989_v57 = vpop.f32.mrb[247].mxu0 }
 0x390   : > { %14522 = vst [vmem:[#allocation24_spill] sm:$0xff] %v13616_v19  ;;  %v9723_v32 = vadd.f32 %v9722_v56, %v9721_v13  ;;  %v9724_v5 = vpop.f32.mrb[134].mxu1  ;;  %v13618_v7 = vadd.f32 %v9989_v57, %v9988_v46 }
 0x391   : > { %v9725_v9 = vpop.f32.mrb[135].mxu1 }
 0x392   : > { %14523 = vst [vmem:[#allocation33_spill] sm:$0xff] %v13618_v7  ;;  %v9726_v31 = vadd.f32 %v9725_v9, %v9724_v5  ;;  %v13621_v63 = vadd.f32 %v13269_v37, %v9723_v32 }
 0x394   : > { %v9991_v12 = vpop.f32.mrb[248].mxu0  ;;  %v13624_v2 = vadd.f32 %v13278_v40, %v9726_v31 }
 0x395   : > { %v9992_v1 = vpop.f32.mrb[249].mxu0 }
 0x396   : > { %v9727_v20 = vpop.f32.mrb[136].mxu1  ;;  %v13626_v8 = vadd.f32 %v9992_v1, %v9991_v12  ;;  %v9994_v41 = vpop.f32.mrb[250].mxu0 }
 0x397   : > { %v9728_v52 = vpop.f32.mrb[137].mxu1  ;;  %v9995_v10 = vpop.f32.mrb[251].mxu0 }
 0x398   : > { %14524 = vst [vmem:[#allocation18_spill] sm:$0xff] %v13626_v8  ;;  %v9729_v62 = vadd.f32 %v9728_v52, %v9727_v20  ;;  %v9730_v35 = vpop.f32.mrb[138].mxu1  ;;  %v13628_v28 = vadd.f32 %v9995_v10, %v9994_v41 }
 0x399   : > { %v9731_v61 = vpop.f32.mrb[139].mxu1 }
 0x39a   : > { %14525 = vst [vmem:[#allocation25_spill] sm:$0xff] %v13628_v28  ;;  %v9732_v13 = vadd.f32 %v9731_v61, %v9730_v35  ;;  %v13631_v37 = vadd.f32 %v13292_v43, %v9729_v62 }
 0x39c   : > { %v9997_v46 = vpop.f32.mrb[252].mxu0  ;;  %v13634_v40 = vadd.f32 %v13305_v34, %v9732_v13 }
 0x39d   : > { %v9998_v56 = vpop.f32.mrb[253].mxu0 }
 0x39e   : > { %v9733_v57 = vpop.f32.mrb[140].mxu1  ;;  %v13636_v32 = vadd.f32 %v9998_v56, %v9997_v46  ;;  %v10000_v5 = vpop.f32.mrb[254].mxu0 }
 0x39f   : > { %v9734_v9 = vpop.f32.mrb[141].mxu1  ;;  %v10001_v31 = vpop.f32.mrb[255].mxu0 }
 0x3a0   : > { %14526 = vst [vmem:[#allocation19_spill] sm:$0xff] %v13636_v32  ;;  %v9735_v12 = vadd.f32 %v9734_v9, %v9733_v57  ;;  %v9736_v1 = vpop.f32.mrb[142].mxu1  ;;  %v13638_v20 = vadd.f32 %v10001_v31, %v10000_v5 }
 0x3a1   : > { %v9737_v41 = vpop.f32.mrb[143].mxu1 }
 0x3a2   : > { %14527 = vst [vmem:[#allocation20_spill] sm:$0xff] %v13638_v20  ;;  %v9738_v52 = vadd.f32 %v9737_v41, %v9736_v1  ;;  %v13641_v43 = vadd.f32 %v13318_v21, %v9735_v12 }
 0x3a4   : > { %v13643_v10 = vpop.f32.mrb[208].mxu0  ;;  %v13646_v34 = vadd.f32 %v13327_v45, %v9738_v52 }
 0x3a5   : > { %v13648_v62 = vpop.f32.mrb[209].mxu0 }
 0x3a6   : > { %v9739_v35 = vpop.f32.mrb[144].mxu1  ;;  %v13650_v61 = vpop.f32.mrb[210].mxu0 }
 0x3a7   : > { %v9740_v13 = vpop.f32.mrb[145].mxu1  ;;  %v13652_v46 = vpop.f32.mrb[211].mxu0 }
 0x3a8   : > { %v9741_v56 = vadd.f32 %v9740_v13, %v9739_v35  ;;  %v9742_v57 = vpop.f32.mrb[146].mxu1 }
 0x3a9   : > { %v9743_v5 = vpop.f32.mrb[147].mxu1 }
 0x3aa   : > { %v9744_v9 = vadd.f32 %v9743_v5, %v9742_v57  ;;  %v13655_v21 = vadd.f32 %v13336_v55, %v9741_v56 }
 0x3ac   : > { %v13657_v31 = vpop.f32.mrb[212].mxu0  ;;  %v13660_v45 = vadd.f32 %v13342_v18, %v9744_v9 }
 0x3ad   : > { %v13662_v12 = vpop.f32.mrb[213].mxu0 }
 0x3ae   : > { %v9745_v1 = vpop.f32.mrb[148].mxu1  ;;  %v13664_v41 = vpop.f32.mrb[214].mxu0 }
 0x3af   : > { %v9746_v52 = vpop.f32.mrb[149].mxu1  ;;  %v13666_v30 = vpop.f32.mrb[215].mxu0 }
 0x3b0   : > { %v9747_v35 = vadd.f32 %v9746_v52, %v9745_v1  ;;  %v9748_v13 = vpop.f32.mrb[150].mxu1 }
 0x3b1   : > { %v9749_v20 = vpop.f32.mrb[151].mxu1 }
 0x3b2   : > { %v9750_v57 = vadd.f32 %v9749_v20, %v9748_v13  ;;  %v13669_v55 = vadd.f32 %v13346_v36, %v9747_v35  ;;  %v11361_v36 = vld [vmem:[%s14350_s7 + $0x4] ss:$8 sps:$4 sm:$0xff]  }
 0x3b3   : > { %8974 = vmatprep.mubr.msk.bf16.mxu1 %vm6293_vm7, %v11361_v36 }
 0x3b4   : > { %v13671_v56 = vpop.f32.mrb[216].mxu0  ;;  %v13674_v18 = vadd.f32 %v13357_v26, %v9750_v57 }
 0x3b5   : > { %14528 = vst [vmem:[#allocation26_spill] sm:$0xff] %v13671_v56  ;;  %v13676_v5 = vpop.f32.mrb[217].mxu0 }
 0x3b6   : > { %v9751_v9 = vpop.f32.mrb[152].mxu1  ;;  %v13678_v42 = vpop.f32.mrb[218].mxu0 }
 0x3b7   : > { %14529 = vst [vmem:[#allocation21_spill] sm:$0xff] %v13678_v42  ;;  %v9752_v32 = vpop.f32.mrb[153].mxu1  ;;  %v13680_v51 = vpop.f32.mrb[219].mxu0 }
 0x3b8   : > { %14530 = vst [vmem:[#allocation27_spill] sm:$0xff] %v13680_v51  ;;  %v9753_v1 = vadd.f32 %v9752_v32, %v9751_v9  ;;  %v9754_v52 = vpop.f32.mrb[154].mxu1 }
 0x3b9   : > { %v9755_v28 = vpop.f32.mrb[155].mxu1 }
 0x3ba   : > { %v9756_v20 = vadd.f32 %v9755_v28, %v9754_v52  ;;  %v13686_v26 = vadd.f32 %v13363_v11, %v9753_v1 }
 0x3bc   : > { %v13689_v35 = vpop.f32.mrb[220].mxu0  ;;  %v13692_v13 = vadd.f32 %v13369_v16, %v9756_v20 }
 0x3bd   : > { %14531 = vst [vmem:[#allocation28_spill] sm:$0xff] %v13689_v35  ;;  %v13694_v57 = vpop.f32.mrb[221].mxu0 }
 0x3be   : > { %14532 = vst [vmem:[#allocation29_spill] sm:$0xff] %v13694_v57  ;;  %v9757_v32 = vpop.f32.mrb[156].mxu1  ;;  %v13696_v9 = vpop.f32.mrb[222].mxu0 }
 0x3bf   : > { %14533 = vst [vmem:[#allocation30_spill] sm:$0xff] %v13696_v9  ;;  %v9758_v8 = vpop.f32.mrb[157].mxu1  ;;  %v13698_v27 = vpop.f32.mrb[223].mxu0  ;;  %v3983_v9 = vadd.f32 %v13572_v60, %v13522_v22 }
 0x3c0   : > { %14534 = vst [vmem:[#allocation11_spill] sm:$0xff] %v13698_v27  ;;  %v9759_v42 = vadd.f32 %v9758_v8, %v9757_v32  ;;  %v9760_v28 = vpop.f32.mrb[158].mxu1 }
 0x3c1   : > { %v9761_v52 = vpop.f32.mrb[159].mxu1 }
 0x3c2   : > { %v9762_v11 = vadd.f32 %v9761_v52, %v9760_v28  ;;  %v13701_v1 = vadd.f32 %v13373_v4, %v9759_v42  ;;  %v3984_v4 = vadd.f32 %v13566_v29, %v13522_v22  ;;  %v3999_v28 = vmax.f32 %v3983_v9, 0.0 }
 0x3c4   : > { %v13704_v36 = vadd.f32 %v13377_v58, %v9762_v11  ;;  %v4000_v11 = vmax.f32 %v3984_v4, 0.0 }
 0x3c6   : > { %v10408_v16 = vpop.f32.mrb[112].mxu1 }
 0x3c7   : > { %v10698_v20 = vadd.f32 %v13621_v63, %v10408_v16  ;;  %v4910_v35 = vpop.f32.mrb[113].mxu1 }
 0x3c8   : > { %v10701_v57 = vadd.f32 %v13611_v14, %v4910_v35  ;;  %v10409_v27 = vpop.f32.mrb[114].mxu1 }
 0x3c9   : > { %v10704_v8 = vadd.f32 %v13624_v2, %v10409_v27  ;;  %v4913_v32 = vpop.f32.mrb[115].mxu1 }
 0x3ca   : > { %v4989_v42 = vadd.f32 %v10701_v57, %v13522_v22  ;;  %v10707_v58 = vadd.f32 %v13614_v38, %v4913_v32  ;;  %v4991_v38 = vadd.f32 %v10698_v20, %v13522_v22 }
 0x3cb   : > { %v4992_v14 = vadd.f32 %v10704_v8, %v13522_v22 }
 0x3cc   : > { %v5005_v52 = vmax.f32 %v4989_v42, 0.0  ;;  %v4990_v63 = vadd.f32 %v10707_v58, %v13522_v22 }
 0x3ce   : > { %v6047_v16 = vmax.f32 %v3999_v28, %v5005_v52  ;;  %v5006_v60 = vmax.f32 %v4990_v63, 0.0  ;;  %v10412_v7 = vpop.f32.mrb[116].mxu1  ;;  %v5008_v28 = vmax.f32 %v4992_v14, 0.0 }
 0x3cf   : > { %v10710_v27 = vadd.f32 %v13641_v43, %v10412_v7  ;;  %v4926_v2 = vpop.f32.mrb[117].mxu1  ;;  %v14535_v7 = vrot.slane %v13581_v54, 1 }
 0x3d0   : > { %v6102_v35 = vrot.slane %v6047_v16, 1  ;;  %v6048_v56 = vmax.f32 %v4000_v11, %v5006_v60  ;;  %v10713_v29 = vadd.f32 %v13631_v37, %v4926_v2  ;;  %v10413_v57 = vpop.f32.mrb[118].mxu1 }
 0x3d1   : > { %v4995_v9 = vadd.f32 %v10710_v27, %v13522_v22  ;;  %v10716_v32 = vadd.f32 %v13646_v34, %v10413_v57  ;;  %v4929_v4 = vpop.f32.mrb[119].mxu1 }
 0x3d2   : > { %v6104_v42 = vrot.slane %v6048_v56, 1  ;;  %v4993_v58 = vadd.f32 %v10713_v29, %v13522_v22  ;;  %v10719_v8 = vadd.f32 %v13634_v40, %v4929_v4  ;;  %v6103_v43 = vsel %vm6088_vm6, %v14535_v7, %v6102_v35 }
 0x3d3   : > { %v5011_v52 = vmax.f32 %v4995_v9, 0.0  ;;  %v4996_v37 = vadd.f32 %v10716_v32, %v13522_v22  ;;  %v6165_v27 = vmax.f32 %v13581_v54, %v6103_v43  ;;  %v5007_v29 = vmax.f32 %v4991_v38, 0.0 }
 0x3d4   : > { %v5009_v63 = vmax.f32 %v4993_v58, 0.0  ;;  %v4994_v20 = vadd.f32 %v10719_v8, %v13522_v22  ;;  %v6105_v11 = vsel %vm6088_vm6, %v6102_v35, %v6104_v42 }
 0x3d5   : > { %v6050_v34 = vmax.f32 %v5008_v28, %v5011_v52  ;;  %v5012_v60 = vmax.f32 %v4996_v37, 0.0  ;;  %v6166_v2 = vmax.f32 %v6047_v16, %v6105_v11 }
 0x3d6   : > { %v5010_v40 = vmax.f32 %v4994_v20, 0.0  ;;  %v10416_v57 = vpop.f32.mrb[120].mxu1 }
 0x3d7   : > { %v6051_v4 = vmax.f32 %v5009_v63, %v5012_v60  ;;  %v10722_v7 = vadd.f32 %v13669_v55, %v10416_v57  ;;  %v4942_v14 = vpop.f32.mrb[121].mxu1  ;;  %v6185_v9 = vpack.c.bf16 %v6166_v2, %v6165_v27  ;;  %v6108_v8 = vrot.slane %v6050_v34, 1 }
 0x3d8   : > { %v6049_v19 = vmax.f32 %v5007_v29, %v5010_v40  ;;  %v10725_v32 = vadd.f32 %v13655_v21, %v4942_v14  ;;  %v10417_v58 = vpop.f32.mrb[122].mxu1 }
 0x3d9   : > { %v6110_v51 = vrot.slane %v6051_v4, 1  ;;  %v10728_v35 = vadd.f32 %v13674_v18, %v10417_v58  ;;  %v4945_v28 = vpop.f32.mrb[123].mxu1  ;;  %6332 = vmatpush1.bf16.msra.mxu1 %v6185_v9 }
 0x3da   : > { %v6106_v54 = vrot.slane %v6049_v19, 1  ;;  %v4997_v16 = vadd.f32 %v10725_v32, %v13522_v22  ;;  %v10731_v38 = vadd.f32 %v13660_v45, %v4945_v28  ;;  %6333 = vmatprep.subr.bf16.mxu1 %v14503_v6 }
 0x3db   : > { %v5000_v55 = vadd.f32 %v10728_v35, %v13522_v22  ;;  %v6111_v43 = vsel %vm6088_vm6, %v6108_v8, %v6110_v51 }
 0x3dc   : > { %v6109_v21 = vsel %vm6088_vm6, %v6106_v54, %v6108_v8  ;;  %v5013_v52 = vmax.f32 %v4997_v16, 0.0  ;;  %v6107_v37 = vsel %vm6088_vm6, %v6104_v42, %v6106_v54  ;;  %v6169_v11 = vmax.f32 %v6050_v34, %v6111_v43 }
 0x3dd   : > { %v6168_v63 = vmax.f32 %v6049_v19, %v6109_v21  ;;  %v5016_v18 = vmax.f32 %v5000_v55, 0.0  ;;  %v6167_v20 = vmax.f32 %v6048_v56, %v6107_v37  ;;  %v4998_v40 = vadd.f32 %v10731_v38, %v13522_v22 }
 0x3de   : > { %v10420_v60 = vpop.f32.mrb[124].mxu1  ;;  %v4999_v19 = vadd.f32 %v10722_v7, %v13522_v22 }
 0x3df   : > { %v6052_v27 = vmax.f32 %v5013_v52, %v5016_v18  ;;  %v10734_v2 = vadd.f32 %v13701_v1, %v10420_v60  ;;  %v4958_v45 = vpop.f32.mrb[125].mxu1  ;;  %v6186_v29 = vpack.c.bf16 %v6168_v63, %v6167_v20  ;;  %v5014_v34 = vmax.f32 %v4998_v40, 0.0 }
 0x3e0   : > { %v10737_v57 = vadd.f32 %v13686_v26, %v4958_v45  ;;  %v10421_v14 = vpop.f32.mrb[126].mxu1  ;;  %v5015_v28 = vmax.f32 %v4999_v19, 0.0 }
 0x3e1   : > { %v6112_v9 = vrot.slane %v6052_v27, 1  ;;  %v10740_v32 = vadd.f32 %v13704_v36, %v10421_v14  ;;  %v4961_v58 = vpop.f32.mrb[127].mxu1  ;;  %6334 = vmatpush1.bf16.msra.mxu1 %v6186_v29 }
 0x3e2   : > { %v5001_v56 = vadd.f32 %v10737_v57, %v13522_v22  ;;  %v10743_v42 = vadd.f32 %v13692_v13, %v4961_v58  ;;  %6335 = vmatprep.subr.bf16.mxu1 %v14503_v6 }
 0x3e3   : > { %v6113_v1 = vsel %vm6088_vm6, %v6110_v51, %v6112_v9 }
 0x3e4   : > { %v5017_v8 = vmax.f32 %v5001_v56, 0.0  ;;  %v5002_v26 = vadd.f32 %v10743_v42, %v13522_v22  ;;  %v6170_v35 = vmax.f32 %v6051_v4, %v6113_v1 }
 0x3e6   : > { %v6053_v54 = vmax.f32 %v5014_v34, %v5017_v8  ;;  %v5018_v36 = vmax.f32 %v5002_v26, 0.0  ;;  %v9875_v16 = vpop.f32.mrb[160].mxu1  ;;  %v6187_v38 = vpack.c.bf16 %v6170_v35, %v6169_v11 }
 0x3e7   : > { %v9876_v55 = vpop.f32.mrb[161].mxu1 }
 0x3e8   : > { %v6114_v7 = vrot.slane %v6053_v54, 1  ;;  %v13751_v43 = vmax.f32 %v5015_v28, %v5018_v36  ;;  %v9877_v21 = vadd.f32 %v9876_v55, %v9875_v16  ;;  %v9878_v13 = vpop.f32.mrb[162].mxu1  ;;  %6336 = vmatpush1.bf16.msra.mxu1 %v6187_v38 }
 0x3e9   : > { %v9879_v52 = vpop.f32.mrb[163].mxu1  ;;  %6337 = vmatprep.subr.bf16.mxu1 %v14503_v6 }
 0x3ea   : > { %v6116_v51 = vrot.slane %v13751_v43, 1  ;;  %v10747_v37 = vadd.f32 %v9877_v21, %v13379_v33  ;;  %v9880_v4 = vadd.f32 %v9879_v52, %v9878_v13  ;;  %v6115_v63 = vsel %vm6088_vm6, %v6112_v9, %v6114_v7 }
 0x3eb   : > { %v6171_v18 = vmax.f32 %v6052_v27, %v6115_v63  ;;  %v5003_v33 = vadd.f32 %v10734_v2, %v13522_v22  ;;  %v5004_v2 = vadd.f32 %v10740_v32, %v13522_v22 }
 0x3ec   : > { %v10748_v20 = vadd.f32 %v10747_v37, %v13590_v3  ;;  %v10753_v11 = vadd.f32 %v9880_v4, %v13381_v53  ;;  %v6117_v60 = vsel %vm6088_vm6, %v6114_v7, %v6116_v51 }
 0x3ed   : > { %v6172_v45 = vmax.f32 %v6053_v54, %v6117_v60  ;;  %v5020_v55 = vmax.f32 %v5004_v2, 0.0 }
 0x3ee   : > { %v10749_v29 = vadd.f32 %v10748_v20, %v13648_v62  ;;  %v10754_v40 = vadd.f32 %v10753_v11, %v13592_v17  ;;  %v9881_v57 = vpop.f32.mrb[164].mxu1  ;;  %v5019_v62 = vmax.f32 %v5003_v33, 0.0 }
 0x3ef   : > { %v9882_v14 = vpop.f32.mrb[165].mxu1  ;;  %v6188_v58 = vpack.c.bf16 %v6172_v45, %v6171_v18 }
 0x3f0   : > { %v10755_v19 = vadd.f32 %v10754_v40, %v13652_v46  ;;  %v9883_v9 = vadd.f32 %v9882_v14, %v9881_v57  ;;  %v9884_v27 = vpop.f32.mrb[166].mxu1  ;;  %v6008_v28 = vadd.f32 %v10749_v29, %v13522_v22 }
 0x3f1   : > { %v9885_v56 = vpop.f32.mrb[167].mxu1  ;;  %6338 = vmatpush1.bf16.msra.mxu1 %v6188_v58 }
 0x3f2   : > { %v6009_v53 = vadd.f32 %v10755_v19, %v13522_v22  ;;  %v10744_v3 = vadd.f32 %v9883_v9, %v13389_v49  ;;  %v9886_v42 = vadd.f32 %v9885_v56, %v9884_v27  ;;  %6339 = vmatprep.subr.bf16.mxu1 %v14503_v6 }
 0x3f4   : > { %v6025_v17 = vmax.f32 %v6009_v53, 0.0  ;;  %v10745_v1 = vadd.f32 %v10744_v3, %v13594_v25  ;;  %v10750_v34 = vadd.f32 %v9886_v42, %v13391_v24 }
 0x3f6   : > { %v6055_v46 = vmax.f32 %v5019_v62, %v6025_v17  ;;  %v10746_v8 = vadd.f32 %v10745_v1, %v13643_v10  ;;  %v10751_v26 = vadd.f32 %v10750_v34, %v13596_v15  ;;  %v9887_v35 = vpop.f32.mrb[168].mxu1  ;;  %v6024_v15 = vmax.f32 %v6008_v28, 0.0  ;;  %v14539_v28 = vld [vmem:[#allocation15_spill] sm:$0xff] }
 0x3f7   : > { %v9888_v49 = vpop.f32.mrb[169].mxu1 }
 0x3f8   : > { %v6118_v54 = vrot.slane %v6055_v46, 1  ;;  %v6010_v36 = vadd.f32 %v10746_v8, %v13522_v22  ;;  %v10752_v16 = vadd.f32 %v10751_v26, %v13650_v61  ;;  %v9889_v38 = vadd.f32 %v9888_v49, %v9887_v35  ;;  %v9890_v25 = vpop.f32.mrb[170].mxu1 }
 0x3f9   : > { %v9891_v24 = vpop.f32.mrb[171].mxu1 }
 0x3fa   : > { %v6026_v7 = vmax.f32 %v6010_v36, 0.0  ;;  %v6011_v32 = vadd.f32 %v10752_v16, %v13522_v22  ;;  %v10759_v10 = vadd.f32 %v9889_v38, %v13405_v50  ;;  %v9892_v21 = vadd.f32 %v9891_v24, %v9890_v25 }
 0x3fb   : > { %v6119_v13 = vsel %vm6088_vm6, %v6116_v51, %v6118_v54 }
 0x3fc   : > { %v13778_v52 = vmax.f32 %v5020_v55, %v6026_v7  ;;  %v6027_v37 = vmax.f32 %v6011_v32, 0.0  ;;  %v10760_v4 = vadd.f32 %v10759_v10, %v13598_v47  ;;  %v10765_v61 = vadd.f32 %v9892_v21, %v13410_v39  ;;  %v14540_v32 = vld [vmem:[#allocation27_spill] sm:$0xff] }
 0x3fd   : > { %v6173_v63 = vmax.f32 %v13751_v43, %v6119_v13  ;;  %v14536_v43 = vld [vmem:[#allocation13_spill] sm:$0xff] }
 0x3fe   : > { %v6120_v18 = vrot.slane %v13778_v52, 1  ;;  %v13784_v20 = vmax.f32 %v6024_v15, %v6027_v37  ;;  %v10761_v11 = vadd.f32 %v10760_v4, %v13662_v12  ;;  %v10766_v50 = vadd.f32 %v10765_v61, %v13600_v59  ;;  %v9893_v60 = vpop.f32.mrb[172].mxu1  ;;  %v14537_v59 = vld [vmem:[#allocation9_spill] sm:$0xff]  ;;  %v14541_v4 = vld [vmem:[#allocation31_spill] sm:$0xff] }
 0x3ff   : > { %v9894_v45 = vpop.f32.mrb[173].mxu1 }
 0x400   : > { %v6122_v51 = vrot.slane %v13784_v20, 1  ;;  %v10767_v29 = vadd.f32 %v10766_v50, %v13666_v30  ;;  %v9895_v40 = vadd.f32 %v9894_v45, %v9893_v60  ;;  %v9896_v47 = vpop.f32.mrb[174].mxu1  ;;  %v6121_v39 = vsel %vm6088_vm6, %v6118_v54, %v6120_v18  ;;  %v14542_v50 = vld [vmem:[#allocation24_spill] sm:$0xff]  ;;  %v14543_v45 = vld [vmem:[#allocation14_spill] sm:$0xff] }
 0x401   : > { %v9897_v57 = vpop.f32.mrb[175].mxu1  ;;  %v6174_v33 = vmax.f32 %v6055_v46, %v6121_v39  ;;  %v6012_v62 = vadd.f32 %v10761_v11, %v13522_v22  ;;  %v14538_v46 = vld [vmem:[#allocation22_spill] sm:$0xff] }
 0x402   : > { %v10756_v14 = vadd.f32 %v9895_v40, %v14536_v43  ;;  %v9898_v58 = vadd.f32 %v9897_v57, %v9896_v47  ;;  %v6123_v19 = vsel %vm6088_vm6, %v6120_v18, %v6122_v51  ;;  %v6013_v54 = vadd.f32 %v10767_v29, %v13522_v22  ;;  %v14544_v39 = vld [vmem:[#allocation26_spill] sm:$0xff] }
 0x403   : > { %v6175_v27 = vmax.f32 %v13778_v52, %v6123_v19  ;;  %v6189_v56 = vpack.c.bf16 %v6174_v33, %v6173_v63 }
 0x404   : > { %v10757_v12 = vadd.f32 %v10756_v14, %v13602_v23  ;;  %v10762_v9 = vadd.f32 %v9898_v58, %v14537_v59  ;;  %v6029_v15 = vmax.f32 %v6013_v54, 0.0  ;;  %v14545_v14 = vld [vmem:[#allocation33_spill] sm:$0xff] }
 0x405   : > { %6340 = vmatpush1.bf16.msra.mxu1 %v6189_v56  ;;  %v14546_v59 = vld [vmem:[#allocation21_spill] sm:$0xff] }
 0x406   : > { %v10758_v30 = vadd.f32 %v10757_v12, %v13657_v31  ;;  %v10763_v53 = vadd.f32 %v10762_v9, %v13604_v44  ;;  %v9899_v3 = vpop.f32.mrb[176].mxu1  ;;  %6341 = vmatprep.subr.bf16.mxu1 %v14503_v6  ;;  %v6028_v31 = vmax.f32 %v6012_v62, 0.0 }
 0x407   : > { %v9900_v42 = vpop.f32.mrb[177].mxu1 }
 0x408   : > { %v10764_v17 = vadd.f32 %v10763_v53, %v13664_v41  ;;  %v9901_v1 = vadd.f32 %v9900_v42, %v9899_v3  ;;  %v9902_v34 = vpop.f32.mrb[178].mxu1  ;;  %v6014_v25 = vadd.f32 %v10758_v30, %v13522_v22  ;;  %v14547_v3 = vld [vmem:[#allocation23_spill] sm:$0xff] }
 0x409   : > { %v9903_v23 = vpop.f32.mrb[179].mxu1 }
 0x40a   : > { %v6015_v2 = vadd.f32 %v10764_v17, %v13522_v22  ;;  %v10771_v8 = vadd.f32 %v9901_v1, %v14538_v46  ;;  %v9904_v26 = vadd.f32 %v9903_v23, %v9902_v34  ;;  %v14548_v34 = vld [vmem:[#allocation18_spill] sm:$0xff]  ;;  %v14549_v23 = vld [vmem:[#allocation32_spill] sm:$0xff] }
 0x40c   : > { %v6031_v35 = vmax.f32 %v6015_v2, 0.0  ;;  %v10772_v44 = vadd.f32 %v10771_v8, %v13606_v48  ;;  %v10777_v49 = vadd.f32 %v9904_v26, %v14539_v28  ;;  %v14550_v8 = vld [vmem:[#allocation29_spill] sm:$0xff] }
 0x40e   : > { %v6058_v36 = vmax.f32 %v6028_v31, %v6031_v35  ;;  %v10773_v41 = vadd.f32 %v10772_v44, %v13676_v5  ;;  %v10778_v16 = vadd.f32 %v10777_v49, %v13608_v0  ;;  %v9905_v38 = vpop.f32.mrb[180].mxu1  ;;  %v6030_v0 = vmax.f32 %v6014_v25, 0.0  ;;  %v14551_v31 = vld [vmem:[#allocation25_spill] sm:$0xff] }
 0x40f   : > { %v9906_v55 = vpop.f32.mrb[181].mxu1 }
 0x410   : > { %v6124_v24 = vrot.slane %v6058_v36, 1  ;;  %v6016_v7 = vadd.f32 %v10773_v41, %v13522_v22  ;;  %v10779_v10 = vadd.f32 %v10778_v16, %v14540_v32  ;;  %v9907_v21 = vadd.f32 %v9906_v55, %v9905_v38  ;;  %v9908_v48 = vpop.f32.mrb[182].mxu1  ;;  %v14552_v41 = vld [vmem:[#allocation11_spill] sm:$0xff] }
 0x411   : > { %v9909_v13 = vpop.f32.mrb[183].mxu1 }
 0x412   : > { %v6032_v52 = vmax.f32 %v6016_v7, 0.0  ;;  %v6017_v37 = vadd.f32 %v10779_v10, %v13522_v22  ;;  %v10768_v5 = vadd.f32 %v9907_v21, %v14541_v4  ;;  %v9910_v61 = vadd.f32 %v9909_v13, %v9908_v48  ;;  %v14554_v48 = vld [vmem:[#allocation19_spill] sm:$0xff]  ;;  %v14555_v13 = vld [vmem:[#allocation16_spill] sm:$0xff] }
 0x413   : > { %v6125_v63 = vsel %vm6088_vm6, %v6122_v51, %v6124_v24 }
 0x414   : > { %v6059_v18 = vmax.f32 %v6029_v15, %v6032_v52  ;;  %v6033_v11 = vmax.f32 %v6017_v37, 0.0  ;;  %v10769_v60 = vadd.f32 %v10768_v5, %v14542_v50  ;;  %v10774_v29 = vadd.f32 %v9910_v61, %v14543_v45  ;;  %v14556_v5 = vld [vmem:[#allocation28_spill] sm:$0xff] }
 0x415   : > { %v6176_v40 = vmax.f32 %v13784_v20, %v6125_v63 }
 0x416   : > { %v6126_v47 = vrot.slane %v6059_v18, 1  ;;  %v13817_v57 = vmax.f32 %v6030_v0, %v6033_v11  ;;  %v10770_v43 = vadd.f32 %v10769_v60, %v14544_v39  ;;  %v10775_v58 = vadd.f32 %v10774_v29, %v14545_v14  ;;  %v9911_v33 = vpop.f32.mrb[184].mxu1  ;;  %v14557_v0 = vld [vmem:[#allocation20_spill] sm:$0xff]  ;;  %v14558_v60 = vld [vmem:[#allocation30_spill] sm:$0xff] }
 0x417   : > { %v9912_v19 = vpop.f32.mrb[185].mxu1  ;;  %v6190_v12 = vpack.c.bf16 %v6176_v40, %v6175_v27 }
 0x418   : > { %v6128_v51 = vrot.slane %v13817_v57, 1  ;;  %v10776_v9 = vadd.f32 %v10775_v58, %v14546_v59  ;;  %v9913_v56 = vadd.f32 %v9912_v19, %v9911_v33  ;;  %v9914_v30 = vpop.f32.mrb[186].mxu1  ;;  %v6127_v20 = vsel %vm6088_vm6, %v6124_v24, %v6126_v47  ;;  %v14553_v24 = vld [vmem:[#allocation17_spill] sm:$0xff] }
 0x419   : > { %6342 = vmatpush1.bf16.msra.mxu1 %v6190_v12  ;;  %v9915_v53 = vpop.f32.mrb[187].mxu1  ;;  %v6177_v1 = vmax.f32 %v6058_v36, %v6127_v20  ;;  %v6018_v54 = vadd.f32 %v10770_v43, %v13522_v22 }
 0x41a   : > { %v10783_v42 = vadd.f32 %v9913_v56, %v14547_v3  ;;  %v9916_v62 = vadd.f32 %v9915_v53, %v9914_v30  ;;  %6343 = vmatprep.subr.bf16.mxu1 %v14503_v6  ;;  %v6129_v17 = vsel %vm6088_vm6, %v6126_v47, %v6128_v51  ;;  %v6019_v37 = vadd.f32 %v10776_v9, %v13522_v22  ;;  %v11359_v3 = vld [vmem:[%s14350_s7] ss:$8 sps:$4 sm:$0xff]  }
 0x41b   : > { %v6178_v46 = vmax.f32 %v6059_v18, %v6129_v17  ;;  %v6034_v10 = vmax.f32 %v6018_v54, 0.0  ;;  %v11389_v17 = vld [vmem:[%s14348_s5 + $0xc8] sm:$0xff]   ;;  %v11382_v54 = vld [vmem:[%s14350_s7 + $0x70] ss:$8 sps:$4 sm:$0xff]  }
 0x41c   : > { %v10784_v27 = vadd.f32 %v10783_v42, %v14548_v34  ;;  %v10789_v2 = vadd.f32 %v9916_v62, %v14549_v23  ;;  %v6035_v29 = vmax.f32 %v6019_v37, 0.0  ;;  %v11362_v42 = vld [vmem:[%s14350_s7 + $0x14] ss:$8 sps:$4 sm:$0xff]   ;;  %v11387_v62 = vld [vmem:[%s14348_s5 + $0xc0] sm:$0xff]   ;;  %v11364_v34 = vld [vmem:[%s14350_s7 + $0x10] ss:$8 sps:$4 sm:$0xff]  }
 0x41d   : > { %v6191_v28 = vpack.c.bf16 %v6178_v46, %v6177_v1  ;;  %v11390_v1 = vld [vmem:[%s14348_s5 + $0x110] sm:$0xff]   ;;  %v11367_v23 = vld [vmem:[%s14350_s7 + $0x20] ss:$8 sps:$4 sm:$0xff]  }
 0x41e   : > { %v10785_v26 = vadd.f32 %v10784_v27, %v14550_v8  ;;  %v10790_v35 = vadd.f32 %v10789_v2, %v14551_v31  ;;  %v9917_v44 = vpop.f32.mrb[188].mxu1  ;;  %v11365_v27 = vld [vmem:[%s14350_s7 + $0x24] ss:$8 sps:$4 sm:$0xff]   ;;  %v11368_v2 = vld [vmem:[%s14350_s7 + $0x34] ss:$8 sps:$4 sm:$0xff]  }
 0x41f   : > { %v9918_v49 = vpop.f32.mrb[189].mxu1  ;;  %6344 = vmatpush1.bf16.msra.mxu1 %v6191_v28  ;;  %v11370_v46 = vld [vmem:[%s14350_s7 + $0x30] ss:$8 sps:$4 sm:$0xff]   ;;  %v11371_v8 = vld [vmem:[%s14350_s7 + $0x44] ss:$8 sps:$4 sm:$0xff]  }
 0x420   : > { %v10791_v16 = vadd.f32 %v10790_v35, %v14552_v41  ;;  %v9919_v38 = vadd.f32 %v9918_v49, %v9917_v44  ;;  %v9920_v25 = vpop.f32.mrb[190].mxu1  ;;  %6345 = vmatprep.subr.bf16.mxu1 %v14503_v6  ;;  %v6020_v18 = vadd.f32 %v10785_v26, %v13522_v22  ;;  %v11373_v26 = vld [vmem:[%s14350_s7 + $0x40] ss:$8 sps:$4 sm:$0xff]   ;;  %v11374_v31 = vld [vmem:[%s14350_s7 + $0x54] ss:$8 sps:$4 sm:$0xff]  }
 0x421   : > { %v9921_v36 = vpop.f32.mrb[191].mxu1  ;;  %v11376_v35 = vld [vmem:[%s14350_s7 + $0x50] ss:$8 sps:$4 sm:$0xff]   ;;  %v11377_v44 = vld [vmem:[%s14350_s7 + $0x64] ss:$8 sps:$4 sm:$0xff]  }
 0x422   : > { %v6021_v55 = vadd.f32 %v10791_v16, %v13522_v22  ;;  %v10780_v7 = vadd.f32 %v9919_v38, %v14553_v24  ;;  %v9922_v32 = vadd.f32 %v9921_v36, %v9920_v25  ;;  %v6036_v14 = vmax.f32 %v6020_v18, 0.0  ;;  %v11379_v28 = vld [vmem:[%s14350_s7 + $0x60] ss:$8 sps:$4 sm:$0xff]   ;;  %v11380_v49 = vld [vmem:[%s14350_s7 + $0x74] ss:$8 sps:$4 sm:$0xff]  }
 0x423   : > { %v11383_v41 = vld [vmem:[%s14350_s7 + $0x84] ss:$8 sps:$4 sm:$0xff]   ;;  %v11385_v16 = vld [vmem:[%s14350_s7 + $0x80] ss:$8 sps:$4 sm:$0xff]   ;;  %v11391_v38 = vld [vmem:[%s14348_s5 + $0xd0] sm:$0xff]  }
 0x424   : > { %v6037_v21 = vmax.f32 %v6021_v55, 0.0  ;;  %v10781_v15 = vadd.f32 %v10780_v7, %v14554_v48  ;;  %v10786_v52 = vadd.f32 %v9922_v32, %v14555_v13  ;;  %v11392_v25 = vld [vmem:[%s14348_s5 + $0x118] sm:$0xff]   ;;  %v11393_v36 = vld [vmem:[%s14348_s5 + $0x140] sm:$0xff]   ;;  %v11395_v24 = vld [vmem:[%s14348_s5 + $0x148] sm:$0xff]  }
 0x425   : > { %v11394_v55 = vld [vmem:[%s14348_s5 + $0xd8] sm:$0xff]   ;;  %10518 = vmatprep.subr.bf16.mxu0 %v11393_v36  ;;  %v11396_v7 = vld [vmem:[%s14348_s5 + $0x150] sm:$0xff]   ;;  %v11397_v32 = vld [vmem:[%s14348_s5 + $0x120] sm:$0xff]  }
 0x426   : > { %v6061_v4 = vmax.f32 %v6034_v10, %v6037_v21  ;;  %v10782_v61 = vadd.f32 %v10781_v15, %v14556_v5  ;;  %v10787_v63 = vadd.f32 %v10786_v52, %v14557_v0  ;;  %10519 = vmatpush3.bf16.msra.mxu0 %v11393_v36  ;;  %v11398_v10 = vld [vmem:[%s14348_s5 + $0xe0] sm:$0xff]   ;;  %v11399_v21 = vld [vmem:[%s14348_s5 + $0x158] sm:$0xff]   ;;  %v11400_v48 = vld [vmem:[%s14348_s5 + $0x128] sm:$0xff]  }
 0x427   : > { %10520 = vmatprep.subr.bf16.mxu0 %v11395_v24  ;;  %v11401_v15 = vld [vmem:[%s14348_s5 + $0xe8] sm:$0xff]   ;;  %v11402_v13 = vld [vmem:[%s14348_s5 + $0x160] sm:$0xff]   ;;  %v11403_v52 = vld [vmem:[%s14348_s5 + $0x130] sm:$0xff]  }
 0x428   : > { %v6130_v11 = vrot.slane %v6061_v4, 1  ;;  %v6022_v50 = vadd.f32 %v10782_v61, %v13522_v22  ;;  %v10788_v45 = vadd.f32 %v10787_v63, %v14558_v60  ;;  %v11404_v37 = vld [vmem:[%s14348_s5 + $0xf0] sm:$0xff]   ;;  %v11406_v5 = vld [vmem:[%s14348_s5 + $0x138] sm:$0xff]   ;;  %v13985_v18 = vld [vmem:[%s14348_s5 + $0x80] sm:$0xff]  }
 0x429   : > { %v11407_v61 = vld [vmem:[%s14348_s5 + $0xf8] sm:$0xff]   ;;  %v11408_v0 = vld [vmem:[%s14348_s5 + $0x170] sm:$0xff]  }
 0x42a   : > { %v6038_v40 = vmax.f32 %v6022_v50, 0.0  ;;  %v6023_v47 = vadd.f32 %v10788_v45, %v13522_v22  ;;  %v6131_v39 = vsel %vm6088_vm6, %v6128_v51, %v6130_v11  ;;  %10521 = vmatpush3.bf16.msra.mxu0 %v11395_v24  ;;  %v11413_v63 = vld [vmem:[%s14348_s5 + $0x178] sm:$0xff]  }
 0x42b   : > { %v6179_v43 = vmax.f32 %v13817_v57, %v6131_v39  ;;  %v11386_v57 = vld [vmem:[%s14348_s5 + $0x100] sm:$0xff]   ;;  %10522 = vmatprep.subr.bf16.mxu0 %v11396_v7 }
 0x42c   : > { %v6062_v58 = vmax.f32 %v6035_v29, %v6038_v40  ;;  %v6039_v33 = vmax.f32 %v6023_v47, 0.0 }
 0x42e   : > { %v6132_v19 = vrot.slane %v6062_v58, 1  ;;  %v6063_v12 = vmax.f32 %v6036_v14, %v6039_v33  ;;  %10523 = vmatpush3.bf16.msra.mxu0 %v11396_v7 }
 0x42f   : > { %10524 = vmatprep.subr.bf16.mxu0 %v11399_v21 }
 0x430   : > { %v6133_v59 = vsel %vm6088_vm6, %v6130_v11, %v6132_v19  ;;  %v6134_v9 = vrot.slane %v6063_v12, 1  ;;  %v11423_v11 = vld [vmem:[%s14348_s5 + $0x40] sm:$0xff]  }
 0x431   : > { %v6180_v56 = vmax.f32 %v6061_v4, %v6133_v59  ;;  %v11405_v4 = vld [vmem:[%s14348_s5 + $0x168] sm:$0xff]  }
 0x432   : > { %v6135_v30 = vsel %vm6088_vm6, %v6132_v19, %v6134_v9  ;;  %10525 = vmatpush3.bf16.msra.mxu0 %v11399_v21 }
 0x433   : > { %v6192_v53 = vpack.c.bf16 %v6180_v56, %v6179_v43  ;;  %v6181_v20 = vmax.f32 %v6062_v58, %v6135_v30  ;;  %10526 = vmatprep.subr.bf16.mxu0 %v11402_v13 }
 0x435   : > { %6346 = vmatpush1.bf16.msra.mxu1 %v6192_v53  ;;  %v6193_v22 = vpack.c.bf16 %v6181_v20, %v6181_v20  ;;  %v11463_v53 = vld [vmem:[%s14348_s5 + $0x180] sm:$0xff]  }
 0x436   : > { %6347 = vmatprep.subr.bf16.mxu1 %v14503_v6  ;;  %v11388_v6 = vld [vmem:[%s14348_s5 + $0x108] sm:$0xff]   ;;  %10527 = vmatpush3.bf16.msra.mxu0 %v11402_v13 }
 0x437   : > { %v6323_v51 = vsel %vm6321_vm8, %v6193_v22, 0  ;;  %10528 = vmatprep.subr.bf16.mxu0 %v11405_v4 }
 0x439   : > { %6348 = vmatpush1.bf16.msra.mxu1 %v6323_v51 }
 0x43a   : > { %10019 = vmatprep.subr.bf16.mxu1 %v11386_v57  ;;  %10529 = vmatpush3.bf16.msra.mxu0 %v11405_v4 }
 0x43b   : > { %10530 = vmatprep.subr.bf16.mxu0 %v11408_v0 }
 0x43c   : > { %6358 = vmatmul.mubr.bf16.vlgmr.msra.gmra.mrb[192].mxu1 %v11359_v3 }
 0x43d   : > { %8975 = vmatprep.mubr.msk.bf16.mxu1 %vm6293_vm7, %v11362_v42  ;;  %10020 = vmatpush3.bf16.msra.mxu1 %v11387_v62 }
 0x43e   : > { %10021 = vmatprep.subr.bf16.mxu1 %v11388_v6  ;;  %10531 = vmatpush3.bf16.msra.mxu0 %v11408_v0  ;;  %v11464_v6 = vld [vmem:[%s14348_s5 + $0x1c8] sm:$0xff]  }
 0x43f   : > { %10532 = vmatprep.subr.bf16.mxu0 %v11413_v63 }
 0x441   : > { %10022 = vmatpush3.bf16.msra.mxu1 %v11389_v17 }
 0x442   : > { %10023 = vmatprep.subr.bf16.mxu1 %v11390_v1  ;;  %10533 = vmatpush3.bf16.msra.mxu0 %v11413_v63 }
 0x443   : > { %10546 = vmatprep.subr.bf16.mxu0 %v13985_v18 }
 0x444   : > { %6366 = vmatmul.mubr.bf16.gmra.mrb[196].mxu1 %v11364_v34 }
 0x445   : > { %8976 = vmatprep.mubr.msk.bf16.mxu1 %vm6293_vm7, %v11365_v27  ;;  %10024 = vmatpush3.bf16.msra.mxu1 %v11391_v38 }
 0x446   : > { %10025 = vmatprep.subr.bf16.mxu1 %v11392_v25 }
 0x449   : > { %10026 = vmatpush3.bf16.msra.mxu1 %v11394_v55 }
 0x44a   : > { %10027 = vmatprep.subr.bf16.mxu1 %v11397_v32 }
 0x44c   : > { %6374 = vmatmul.mubr.bf16.gmra.mrb[200].mxu1 %v11367_v23 }
 0x44d   : > { %8977 = vmatprep.mubr.msk.bf16.mxu1 %vm6293_vm7, %v11368_v2  ;;  %10028 = vmatpush3.bf16.msra.mxu1 %v11398_v10 }
 0x44e   : > { %10029 = vmatprep.subr.bf16.mxu1 %v11400_v48 }
 0x451   : > { %10030 = vmatpush3.bf16.msra.mxu1 %v11401_v15 }
 0x452   : > { %10031 = vmatprep.subr.bf16.mxu1 %v11403_v52 }
 0x454   : > { %6382 = vmatmul.mubr.bf16.gmra.mrb[204].mxu1 %v11370_v46 }
 0x455   : > { %8978 = vmatprep.mubr.msk.bf16.mxu1 %vm6293_vm7, %v11371_v8  ;;  %10032 = vmatpush3.bf16.msra.mxu1 %v11404_v37 }
 0x456   : > { %10033 = vmatprep.subr.bf16.mxu1 %v11406_v5 }
 0x459   : > { %10034 = vmatpush3.bf16.msra.mxu1 %v11407_v61 }
 0x45a   : > { %10085 = vmatprep.subr.bf16.mxu1 %v11423_v11 }
 0x45c   : > { %6390 = vmatmul.mubr.bf16.gmra.mrb[208].mxu1 %v11373_v26 }
 0x45d   : > { %8979 = vmatprep.mubr.msk.bf16.mxu1 %vm6293_vm7, %v11374_v31 }
 0x464   : > { %6398 = vmatmul.mubr.bf16.gmra.mrb[212].mxu1 %v11376_v35 }
 0x465   : > { %8980 = vmatprep.mubr.msk.bf16.mxu1 %vm6293_vm7, %v11377_v44 }
 0x46c   : > { %6406 = vmatmul.mubr.bf16.gmra.mrb[216].mxu1 %v11379_v28 }
 0x46d   : > { %8981 = vmatprep.mubr.msk.bf16.mxu1 %vm6293_vm7, %v11380_v49 }
 0x474   : > { %6414 = vmatmul.mubr.bf16.gmra.mrb[220].mxu1 %v11382_v54 }
 0x475   : > { %8982 = vmatprep.mubr.msk.bf16.mxu1 %vm6293_vm7, %v11383_v41 }
 0x47c   : > { %6422 = vmatmul.mubr.bf16.gmra.mrb[224].mxu1 %v11385_v16 }
 0x50f   : > { %v6359_v50 = vpop.f32.mrb[192].mxu1 }
 0x510   : > { %v9280_v60 = vpack.c.bf16 %v6359_v50, %v6359_v50  ;;  %v6361_v45 = vpop.f32.mrb[193].mxu1 }
 0x511   : > { %v6362_v29 = vpop.f32.mrb[194].mxu1 }
 0x512   : > { %6499 = vst [vmem:[#allocation3] sm:$0xf] %v9280_v60  ;;  %v6523_v40 = vshrl.u32 %v9280_v60, 16  ;;  %v6526_v47 = vshll.u32 %v9280_v60, 16  ;;  %v9281_v39 = vpack.c.bf16 %v6362_v29, %v6362_v29  ;;  %v6364_v43 = vpop.f32.mrb[195].mxu1  ;;  %v9002_v12 = vrot.slane %v9280_v60, 9 }
 0x514   : > { %v6525_v14 = vrot.slane %v6523_v40, 4  ;;  %v6528_v58 = vrot.slane %v6526_v47, 5  ;;  %6500 = vst [vmem:[#allocation3 + $0xc] sm:$0xf] %v9281_v39  ;;  %v6532_v33 = vshll.u32 %v9281_v39, 16  ;;  %v6536_v19 = vshrl.u32 %v9281_v39, 16 }
 0x515   : > { %v6732_v59 = vrot.slane %v9281_v39, 5 }
 0x516   : > { %v6529_v9 = vor.u32 %v6528_v58, %v6525_v14  ;;  %v6534_v56 = vrot.slane %v6532_v33, 5  ;;  %v6538_v30 = vrot.slane %v6536_v19, 4 }
 0x517   : > { %v6733_v20 = vsel %vm11853_vm4, %v9002_v12, %v6732_v59  ;;  %v6367_v22 = vpop.f32.mrb[196].mxu1  ;;  %v6734_v23 = vrot.slane %v6732_v59, 4 }
 0x518   : > { %v6530_v57 = vrot.slane %v6529_v9, 4  ;;  %v6539_v51 = vor.u32 %v6538_v30, %v6534_v56  ;;  %6799 = vst [vmem:[#allocation3 + $0x8] sm:$0xf] %v6733_v20  ;;  %v9282_v3 = vpack.c.bf16 %v6367_v22, %v6367_v22  ;;  %v6369_v42 = vpop.f32.mrb[197].mxu1 }
 0x519   : > { %v6370_v62 = vpop.f32.mrb[198].mxu1 }
 0x51a   : > { %v6535_v17 = vsel %vm11861_vm5, %v6530_v57, %v6534_v56  ;;  %6501 = vst [vmem:[#allocation3 + $0x18] sm:$0xf] %v9282_v3  ;;  %v6542_v1 = vshll.u32 %v9282_v3, 16  ;;  %v6546_v34 = vshrl.u32 %v9282_v3, 16  ;;  %v6372_v27 = vpop.f32.mrb[199].mxu1  ;;  %v6735_v2 = vrot.slane %v9282_v3, 5 }
 0x51b   : > { %6713 = vst [vmem:[#allocation3 + $0x4] sm:$0xf] %v6535_v17  ;;  %v9283_v46 = vpack.c.bf16 %v6370_v62, %v6370_v62  ;;  %v6540_v8 = vrot.slane %v6539_v51, 4 }
 0x51c   : > { %v6544_v26 = vrot.slane %v6542_v1, 5  ;;  %v6548_v31 = vrot.slane %v6546_v34, 4  ;;  %v6736_v35 = vsel %vm11853_vm4, %v6734_v23, %v6735_v2  ;;  %v6737_v44 = vrot.slane %v6735_v2, 4 }
 0x51d   : > { %6502 = vst [vmem:[#allocation3 + $0x24] sm:$0xf] %v9283_v46  ;;  %v6552_v28 = vshll.u32 %v9283_v46, 16  ;;  %v6556_v49 = vshrl.u32 %v9283_v46, 16  ;;  %6800 = vst [vmem:[#allocation3 + $0x14] sm:$0xf] %v6736_v35 }
 0x51e   : > { %v6545_v54 = vsel %vm11861_vm5, %v6540_v8, %v6544_v26  ;;  %v6549_v41 = vor.u32 %v6548_v31, %v6544_v26  ;;  %v6738_v16 = vrot.slane %v9283_v46, 5  ;;  %v11425_v8 = vld [vmem:[%s14348_s5] sm:$0xff]  }
 0x51f   : > { %6714 = vst [vmem:[#allocation3 + $0x10] sm:$0xf] %v6545_v54  ;;  %v6554_v38 = vrot.slane %v6552_v28, 5  ;;  %v6558_v25 = vrot.slane %v6556_v49, 4  ;;  %v6375_v36 = vpop.f32.mrb[200].mxu1 }
 0x520   : > { %v6550_v55 = vrot.slane %v6549_v41, 4  ;;  %v6739_v24 = vsel %vm11853_vm4, %v6737_v44, %v6738_v16  ;;  %v9284_v7 = vpack.c.bf16 %v6375_v36, %v6375_v36  ;;  %v6377_v32 = vpop.f32.mrb[201].mxu1  ;;  %v6740_v21 = vrot.slane %v6738_v16, 4  ;;  %v11426_v16 = vld [vmem:[%s14348_s5 + $0x48] sm:$0xff]  }
 0x521   : > { %v6559_v10 = vor.u32 %v6558_v25, %v6554_v38  ;;  %6801 = vst [vmem:[#allocation3 + $0x20] sm:$0xf] %v6739_v24  ;;  %v6378_v48 = vpop.f32.mrb[202].mxu1 }
 0x522   : > { %v6555_v15 = vsel %vm11861_vm5, %v6550_v55, %v6554_v38  ;;  %6503 = vst [vmem:[#allocation3 + $0x30] sm:$0xf] %v9284_v7  ;;  %v6562_v13 = vshll.u32 %v9284_v7, 16  ;;  %v6566_v52 = vshrl.u32 %v9284_v7, 16  ;;  %v6741_v37 = vrot.slane %v9284_v7, 5  ;;  %v6380_v4 = vpop.f32.mrb[203].mxu1 }
 0x523   : > { %v6560_v5 = vrot.slane %v6559_v10, 4  ;;  %6715 = vst [vmem:[#allocation3 + $0x1c] sm:$0xf] %v6555_v15  ;;  %v9285_v61 = vpack.c.bf16 %v6378_v48, %v6378_v48  ;;  %v11433_v4 = vld [vmem:[%s14348_s5 + $0x50] sm:$0xff]  }
 0x524   : > { %v6564_v0 = vrot.slane %v6562_v13, 5  ;;  %v6568_v63 = vrot.slane %v6566_v52, 4  ;;  %v6742_v11 = vsel %vm11853_vm4, %v6740_v21, %v6741_v37  ;;  %v6743_v50 = vrot.slane %v6741_v37, 4  ;;  %v14020_v35 = vld [vmem:[#allocation3 + $0x18] ss:$12 sps:$4 sm:$0xff]  }
 0x525   : > { %6802 = vst [vmem:[#allocation3 + $0x2c] sm:$0xf] %v6742_v11  ;;  %6504 = vst [vmem:[#allocation3 + $0x3c] sm:$0xf] %v9285_v61  ;;  %v6572_v60 = vshll.u32 %v9285_v61, 16  ;;  %v6576_v45 = vshrl.u32 %v9285_v61, 16 }
 0x526   : > { %v6744_v29 = vrot.slane %v9285_v61, 5  ;;  %v6565_v40 = vsel %vm11861_vm5, %v6560_v5, %v6564_v0  ;;  %v6569_v47 = vor.u32 %v6568_v63, %v6564_v0  ;;  %v11429_v13 = vld [vmem:[%s14348_s5 + $0x8] sm:$0xff]  }
 0x527   : > { %6716 = vst [vmem:[#allocation3 + $0x28] sm:$0xf] %v6565_v40  ;;  %v6574_v39 = vrot.slane %v6572_v60, 5  ;;  %v6578_v43 = vrot.slane %v6576_v45, 4  ;;  %v6383_v58 = vpop.f32.mrb[204].mxu1  ;;  %v11424_v11 = vld [vmem:[%s14348_s5 + $0x88] sm:$0xff]  }
 0x528   : > { %v6745_v14 = vsel %vm11853_vm4, %v6743_v50, %v6744_v29  ;;  %v6570_v33 = vrot.slane %v6569_v47, 4  ;;  %v9286_v19 = vpack.c.bf16 %v6383_v58, %v6383_v58  ;;  %v6385_v12 = vpop.f32.mrb[205].mxu1  ;;  %v6746_v9 = vrot.slane %v6744_v29, 4  ;;  %v11435_v40 = vld [vmem:[%s14348_s5 + $0x10] sm:$0xff]  }
 0x529   : > { %6803 = vst [vmem:[#allocation3 + $0x38] sm:$0xf] %v6745_v14  ;;  %v6579_v59 = vor.u32 %v6578_v43, %v6574_v39  ;;  %v6386_v56 = vpop.f32.mrb[206].mxu1 }
 0x52a   : > { %v6575_v30 = vsel %vm11861_vm5, %v6570_v33, %v6574_v39  ;;  %6505 = vst [vmem:[#allocation3 + $0x48] sm:$0xf] %v9286_v19  ;;  %v6582_v20 = vshll.u32 %v9286_v19, 16  ;;  %v6586_v22 = vshrl.u32 %v9286_v19, 16  ;;  %v6747_v57 = vrot.slane %v9286_v19, 5  ;;  %v6388_v51 = vpop.f32.mrb[207].mxu1 }
 0x52b   : > { %v6580_v3 = vrot.slane %v6579_v59, 4  ;;  %6717 = vst [vmem:[#allocation3 + $0x34] sm:$0xf] %v6575_v30  ;;  %v9287_v42 = vpack.c.bf16 %v6386_v56, %v6386_v56  ;;  %v11436_v59 = vld [vmem:[%s14348_s5 + $0x58] sm:$0xff]   ;;  %v11427_v51 = vld [vmem:[%s14348_s5 + $0x90] sm:$0xff]  }
 0x52c   : > { %v6584_v62 = vrot.slane %v6582_v20, 5  ;;  %v6588_v17 = vrot.slane %v6586_v22, 4  ;;  %v6748_v1 = vsel %vm11853_vm4, %v6746_v9, %v6747_v57  ;;  %v6749_v34 = vrot.slane %v6747_v57, 4  ;;  %v14013_v46 = vld [vmem:[#allocation3 + $0x20] ss:$12 sps:$4 sm:$0xff]  }
 0x52d   : > { %6804 = vst [vmem:[#allocation3 + $0x44] sm:$0xf] %v6748_v1  ;;  %6506 = vst [vmem:[#allocation3 + $0x54] sm:$0xf] %v9287_v42  ;;  %v6592_v27 = vshll.u32 %v9287_v42, 16  ;;  %v6596_v23 = vshrl.u32 %v9287_v42, 16  ;;  %10534 = vmatprep.mubr.bf16.mxu0 %v14013_v46 }
 0x52e   : > { %v6750_v2 = vrot.slane %v9287_v42, 5  ;;  %v6585_v26 = vsel %vm11861_vm5, %v6580_v3, %v6584_v62  ;;  %v6589_v31 = vor.u32 %v6588_v17, %v6584_v62  ;;  %v14022_v44 = vld [vmem:[#allocation3 + $0x1c] ss:$12 sps:$4 sm:$0xff]  }
 0x52f   : > { %6718 = vst [vmem:[#allocation3 + $0x40] sm:$0xf] %v6585_v26  ;;  %v6594_v28 = vrot.slane %v6592_v27, 5  ;;  %v6598_v49 = vrot.slane %v6596_v23, 4  ;;  %v6391_v41 = vpop.f32.mrb[208].mxu1  ;;  %7213 = vmatprep.mubr.bf16.mxu1 %v14022_v44  ;;  %v11443_v23 = vld [vmem:[%s14348_s5 + $0x60] sm:$0xff]  }
 0x530   : > { %v6751_v54 = vsel %vm11853_vm4, %v6749_v34, %v6750_v2  ;;  %v6590_v38 = vrot.slane %v6589_v31, 4  ;;  %v9288_v25 = vpack.c.bf16 %v6391_v41, %v6391_v41  ;;  %v6393_v36 = vpop.f32.mrb[209].mxu1  ;;  %v6752_v24 = vrot.slane %v6750_v2, 4  ;;  %7214 = vmatmul.mubr.bf16.vlgmr.msra.gmra.mrb[228].mxu1 %v14020_v35  ;;  %v14054_v14 = vld [vmem:[#allocation3 + $0x30] ss:$12 sps:$4 sm:$0xff]  }
 0x531   : > { %6805 = vst [vmem:[#allocation3 + $0x50] sm:$0xf] %v6751_v54  ;;  %v6599_v55 = vor.u32 %v6598_v49, %v6594_v28  ;;  %v6394_v7 = vpop.f32.mrb[210].mxu1  ;;  %10086 = vmatpush3.bf16.msra.mxu1 %v11425_v8 }
 0x532   : > { %v6595_v32 = vsel %vm11861_vm5, %v6590_v38, %v6594_v28  ;;  %6507 = vst [vmem:[#allocation3 + $0x60] sm:$0xf] %v9288_v25  ;;  %v6602_v10 = vshll.u32 %v9288_v25, 16  ;;  %v6606_v21 = vshrl.u32 %v9288_v25, 16  ;;  %v6753_v48 = vrot.slane %v9288_v25, 5  ;;  %v6396_v15 = vpop.f32.mrb[211].mxu1  ;;  %10087 = vmatprep.subr.bf16.mxu1 %v11426_v16 }
 0x533   : > { %v6600_v52 = vrot.slane %v6599_v55, 4  ;;  %6719 = vst [vmem:[#allocation3 + $0x4c] sm:$0xf] %v6595_v32  ;;  %v9289_v37 = vpack.c.bf16 %v6394_v7, %v6394_v7  ;;  %v11434_v28 = vld [vmem:[%s14348_s5 + $0x98] sm:$0xff]   ;;  %v11445_v38 = vld [vmem:[%s14348_s5 + $0x20] sm:$0xff]  }
 0x534   : > { %v6604_v5 = vrot.slane %v6602_v10, 5  ;;  %v6608_v61 = vrot.slane %v6606_v21, 4  ;;  %v6754_v0 = vsel %vm11853_vm4, %v6752_v24, %v6753_v48  ;;  %v6755_v63 = vrot.slane %v6753_v48, 4  ;;  %v14045_v29 = vld [vmem:[#allocation3 + $0x38] ss:$12 sps:$4 sm:$0xff]  }
 0x535   : > { %6806 = vst [vmem:[#allocation3 + $0x5c] sm:$0xf] %v6754_v0  ;;  %6508 = vst [vmem:[#allocation3 + $0x6c] sm:$0xf] %v9289_v37  ;;  %v6612_v50 = vshll.u32 %v9289_v37, 16  ;;  %v6616_v60 = vshrl.u32 %v9289_v37, 16  ;;  %10088 = vmatpush3.bf16.msra.mxu1 %v11429_v13  ;;  %10535 = vmatmul.mubr.bf16.vlgmr.msra.gmra.mrb[0].mxu0 %v14045_v29 }
 0x536   : > { %v6756_v45 = vrot.slane %v9289_v37, 5  ;;  %v6605_v47 = vsel %vm11861_vm5, %v6600_v52, %v6604_v5  ;;  %v6609_v39 = vor.u32 %v6608_v61, %v6604_v5  ;;  %v14052_v43 = vld [vmem:[#allocation3 + $0x34] ss:$12 sps:$4 sm:$0xff]   ;;  %10089 = vmatprep.subr.bf16.mxu1 %v11433_v4  ;;  %10547 = vmatpush3.bf16.msra.mxu0 %v13985_v18  ;;  %v11439_v18 = vld [vmem:[%s14348_s5 + $0x18] sm:$0xff]   ;;  %v11437_v61 = vld [vmem:[%s14348_s5 + $0xa0] sm:$0xff]  }
 0x537   : > { %6720 = vst [vmem:[#allocation3 + $0x58] sm:$0xf] %v6605_v47  ;;  %v6614_v58 = vrot.slane %v6612_v50, 5  ;;  %v6618_v33 = vrot.slane %v6616_v60, 4  ;;  %v6399_v12 = vpop.f32.mrb[212].mxu1  ;;  %7221 = vmatprep.mubr.bf16.mxu1 %v14052_v43  ;;  %10548 = vmatprep.subr.bf16.mxu0 %v11424_v11  ;;  %v11446_v48 = vld [vmem:[%s14348_s5 + $0x68] sm:$0xff]  }
 0x538   : > { %v6757_v19 = vsel %vm11853_vm4, %v6755_v63, %v6756_v45  ;;  %v6610_v9 = vrot.slane %v6609_v39, 4  ;;  %v9290_v56 = vpack.c.bf16 %v6399_v12, %v6399_v12  ;;  %v6401_v30 = vpop.f32.mrb[213].mxu1  ;;  %v6758_v22 = vrot.slane %v6756_v45, 4  ;;  %7222 = vmatmul.mubr.bf16.gmra.mrb[232].mxu1 %v14054_v14  ;;  %v14090_v24 = vld [vmem:[#allocation3 + $0x48] ss:$12 sps:$4 sm:$0xff]   ;;  %v11454_v39 = vld [vmem:[%s14348_s5 + $0x70] sm:$0xff]  }
 0x539   : > { %6807 = vst [vmem:[#allocation3 + $0x68] sm:$0xf] %v6757_v19  ;;  %v6619_v20 = vor.u32 %v6618_v33, %v6614_v58  ;;  %v6402_v57 = vpop.f32.mrb[214].mxu1  ;;  %10090 = vmatpush3.bf16.msra.mxu1 %v11435_v40  ;;  %v11449_v45 = vld [vmem:[%s14348_s5 + $0x28] sm:$0xff]  }
 0x53a   : > { %v6615_v3 = vsel %vm11861_vm5, %v6610_v9, %v6614_v58  ;;  %6509 = vst [vmem:[#allocation3 + $0x78] sm:$0xf] %v9290_v56  ;;  %v6622_v42 = vshll.u32 %v9290_v56, 16  ;;  %v6626_v62 = vshrl.u32 %v9290_v56, 16  ;;  %v6759_v17 = vrot.slane %v9290_v56, 5  ;;  %v6404_v1 = vpop.f32.mrb[215].mxu1  ;;  %10091 = vmatprep.subr.bf16.mxu1 %v11436_v59  ;;  %10549 = vmatpush3.bf16.msra.mxu0 %v11424_v11 }
 0x53b   : > { %v6620_v34 = vrot.slane %v6619_v20, 4  ;;  %6721 = vst [vmem:[#allocation3 + $0x64] sm:$0xf] %v6615_v3  ;;  %v9291_v27 = vpack.c.bf16 %v6402_v57, %v6402_v57  ;;  %10550 = vmatprep.subr.bf16.mxu0 %v11427_v51  ;;  %v11444_v59 = vld [vmem:[%s14348_s5 + $0xa8] sm:$0xff]  }
 0x53c   : > { %v6624_v2 = vrot.slane %v6622_v42, 5  ;;  %v6628_v8 = vrot.slane %v6626_v62, 4  ;;  %v6760_v26 = vsel %vm11853_vm4, %v6758_v22, %v6759_v17  ;;  %v6761_v31 = vrot.slane %v6759_v17, 4  ;;  %v14081_v16 = vld [vmem:[#allocation3 + $0x50] ss:$12 sps:$4 sm:$0xff]  }
 0x53d   : > { %6808 = vst [vmem:[#allocation3 + $0x74] sm:$0xf] %v6760_v26  ;;  %6510 = vst [vmem:[#allocation3 + $0x84] sm:$0xf] %v9291_v27  ;;  %v6632_v49 = vshll.u32 %v9291_v27, 16  ;;  %v6636_v54 = vshrl.u32 %v9291_v27, 16  ;;  %10092 = vmatpush3.bf16.msra.mxu1 %v11439_v18  ;;  %10538 = vmatprep.mubr.bf16.mxu0 %v14081_v16 }
 0x53e   : > { %v6762_v41 = vrot.slane %v9291_v27, 5  ;;  %v6625_v25 = vsel %vm11861_vm5, %v6620_v34, %v6624_v2  ;;  %v6629_v36 = vor.u32 %v6628_v8, %v6624_v2  ;;  %v14088_v55 = vld [vmem:[#allocation3 + $0x4c] ss:$12 sps:$4 sm:$0xff]   ;;  %10093 = vmatprep.subr.bf16.mxu1 %v11443_v23  ;;  %10551 = vmatpush3.bf16.msra.mxu0 %v11427_v51  ;;  %v11456_v22 = vld [vmem:[%s14348_s5 + $0x30] sm:$0xff]   ;;  %v11460_v34 = vld [vmem:[%s14348_s5 + $0x78] sm:$0xff]  }
 0x53f   : > { %6722 = vst [vmem:[#allocation3 + $0x70] sm:$0xf] %v6625_v25  ;;  %v6634_v7 = vrot.slane %v6632_v49, 5  ;;  %v6638_v32 = vrot.slane %v6636_v54, 4  ;;  %v6407_v21 = vpop.f32.mrb[216].mxu1  ;;  %7229 = vmatprep.mubr.bf16.mxu1 %v14088_v55  ;;  %10552 = vmatprep.subr.bf16.mxu0 %v11434_v28 }
 0x540   : > { %v6763_v10 = vsel %vm11853_vm4, %v6761_v31, %v6762_v41  ;;  %v6630_v15 = vrot.slane %v6629_v36, 4  ;;  %v9292_v13 = vpack.c.bf16 %v6407_v21, %v6407_v21  ;;  %v6409_v52 = vpop.f32.mrb[217].mxu1  ;;  %v6764_v4 = vrot.slane %v6762_v41, 4  ;;  %7230 = vmatmul.mubr.bf16.gmra.mrb[236].mxu1 %v14090_v24  ;;  %v14125_v42 = vld [vmem:[#allocation3 + $0x60] ss:$12 sps:$4 sm:$0xff]   ;;  %v11462_v36 = vld [vmem:[%s14348_s5 + $0x38] sm:$0xff]  }
 0x541   : > { %6809 = vst [vmem:[#allocation3 + $0x80] sm:$0xf] %v6763_v10  ;;  %v6639_v37 = vor.u32 %v6638_v32, %v6634_v7  ;;  %v6410_v5 = vpop.f32.mrb[218].mxu1  ;;  %10094 = vmatpush3.bf16.msra.mxu1 %v11445_v38 }
 0x542   : > { %v6635_v0 = vsel %vm11861_vm5, %v6630_v15, %v6634_v7  ;;  %6511 = vst [vmem:[#allocation3 + $0x90] sm:$0xf] %v9292_v13  ;;  %v6642_v63 = vshll.u32 %v9292_v13, 16  ;;  %v6646_v11 = vshrl.u32 %v9292_v13, 16  ;;  %v6765_v50 = vrot.slane %v9292_v13, 5  ;;  %v6412_v60 = vpop.f32.mrb[219].mxu1  ;;  %10095 = vmatprep.subr.bf16.mxu1 %v11446_v48  ;;  %10553 = vmatpush3.bf16.msra.mxu0 %v11434_v28 }
 0x543   : > { %v6640_v40 = vrot.slane %v6639_v37, 4  ;;  %6723 = vst [vmem:[#allocation3 + $0x7c] sm:$0xf] %v6635_v0  ;;  %v9293_v47 = vpack.c.bf16 %v6410_v5, %v6410_v5  ;;  %10554 = vmatprep.subr.bf16.mxu0 %v11437_v61  ;;  %v11447_v28 = vld [vmem:[%s14348_s5 + $0xb0] sm:$0xff]   ;;  %v11455_v13 = vld [vmem:[%s14348_s5 + $0xb8] sm:$0xff]  }
 0x544   : > { %v6644_v58 = vrot.slane %v6642_v63, 5  ;;  %v6648_v33 = vrot.slane %v6646_v11, 4  ;;  %v6766_v19 = vsel %vm11853_vm4, %v6764_v4, %v6765_v50  ;;  %v6767_v12 = vrot.slane %v6765_v50, 4  ;;  %v14116_v20 = vld [vmem:[#allocation3 + $0x68] ss:$12 sps:$4 sm:$0xff]  }
 0x545   : > { %6810 = vst [vmem:[#allocation3 + $0x8c] sm:$0xf] %v6766_v19  ;;  %6512 = vst [vmem:[#allocation3 + $0x9c] sm:$0xf] %v9293_v47  ;;  %v6652_v9 = vshll.u32 %v9293_v47, 16  ;;  %v6656_v56 = vshrl.u32 %v9293_v47, 16  ;;  %10096 = vmatpush3.bf16.msra.mxu1 %v11449_v45  ;;  %10539 = vmatmul.mubr.bf16.gmra.mrb[4].mxu0 %v14116_v20 }
 0x546   : > { %v6768_v30 = vrot.slane %v9293_v47, 5  ;;  %v6645_v57 = vsel %vm11861_vm5, %v6640_v40, %v6644_v58  ;;  %v6649_v51 = vor.u32 %v6648_v33, %v6644_v58  ;;  %v14123_v3 = vld [vmem:[#allocation3 + $0x64] ss:$12 sps:$4 sm:$0xff]   ;;  %10097 = vmatprep.subr.bf16.mxu1 %v11454_v39  ;;  %10555 = vmatpush3.bf16.msra.mxu0 %v11437_v61 }
 0x547   : > { %6724 = vst [vmem:[#allocation3 + $0x88] sm:$0xf] %v6645_v57  ;;  %v6654_v62 = vrot.slane %v6652_v9, 5  ;;  %v6658_v17 = vrot.slane %v6656_v56, 4  ;;  %v6415_v18 = vpop.f32.mrb[220].mxu1  ;;  %7237 = vmatprep.mubr.bf16.mxu1 %v14123_v3  ;;  %10556 = vmatprep.subr.bf16.mxu0 %v11444_v59  ;;  %v11461_v61 = vld [vmem:[%s14348_s5 + $0x1c0] sm:$0xff]  }
 0x548   : > { %v6769_v1 = vsel %vm11853_vm4, %v6767_v12, %v6768_v30  ;;  %v6650_v27 = vrot.slane %v6649_v51, 4  ;;  %v9294_v23 = vpack.c.bf16 %v6415_v18, %v6415_v18  ;;  %v6417_v2 = vpop.f32.mrb[221].mxu1  ;;  %v6770_v26 = vrot.slane %v6768_v30, 4  ;;  %7238 = vmatmul.mubr.bf16.gmra.mrb[240].mxu1 %v14125_v42  ;;  %v14157_v50 = vld [vmem:[#allocation3 + $0x78] ss:$12 sps:$4 sm:$0xff]  }
 0x549   : > { %6811 = vst [vmem:[#allocation3 + $0x98] sm:$0xf] %v6769_v1  ;;  %v6659_v8 = vor.u32 %v6658_v17, %v6654_v62  ;;  %v6418_v31 = vpop.f32.mrb[222].mxu1  ;;  %10098 = vmatpush3.bf16.msra.mxu1 %v11456_v22  ;;  %v11450_v17 = vld [vmem:[#allocation3 + $0x8] ss:$12 sps:$4 sm:$0xff]  }
 0x54a   : > { %v6655_v49 = vsel %vm11861_vm5, %v6650_v27, %v6654_v62  ;;  %6513 = vst [vmem:[#allocation3 + $0xa8] sm:$0xf] %v9294_v23  ;;  %v6662_v54 = vshll.u32 %v9294_v23, 16  ;;  %v6666_v41 = vshrl.u32 %v9294_v23, 16  ;;  %v6771_v38 = vrot.slane %v9294_v23, 5  ;;  %v6420_v25 = vpop.f32.mrb[223].mxu1  ;;  %10099 = vmatprep.subr.bf16.mxu1 %v11460_v34  ;;  %10557 = vmatpush3.bf16.msra.mxu0 %v11444_v59 }
 0x54b   : > { %v6660_v7 = vrot.slane %v6659_v8, 4  ;;  %6725 = vst [vmem:[#allocation3 + $0x94] sm:$0xf] %v6655_v49  ;;  %v9295_v32 = vpack.c.bf16 %v6418_v31, %v6418_v31  ;;  %10558 = vmatprep.subr.bf16.mxu0 %v11447_v28  ;;  %v11459_v23 = vld [vmem:[#allocation3 + $0x4] ss:$12 sps:$4 sm:$0xff]   ;;  %v11465_v8 = vld [vmem:[%s14348_s5 + $0x188] sm:$0xff]  }
 0x54c   : > { %v6664_v10 = vrot.slane %v6662_v54, 5  ;;  %v6668_v21 = vrot.slane %v6666_v41, 4  ;;  %v6772_v48 = vsel %vm11853_vm4, %v6770_v26, %v6771_v38  ;;  %v6773_v15 = vrot.slane %v6771_v38, 4  ;;  %v14148_v5 = vld [vmem:[#allocation3 + $0x80] ss:$12 sps:$4 sm:$0xff]   ;;  %v11476_v49 = vld [vmem:[%s14348_s5 + $0x1f8] sm:$0xff]  }
 0x54d   : > { %6812 = vst [vmem:[#allocation3 + $0xa4] sm:$0xf] %v6772_v48  ;;  %6514 = vst [vmem:[#allocation3 + $0xb4] sm:$0xf] %v9295_v32  ;;  %v6672_v52 = vshll.u32 %v9295_v32, 16  ;;  %v6676_v37 = vshrl.u32 %v9295_v32, 16  ;;  %10100 = vmatpush3.bf16.msra.mxu1 %v11462_v36  ;;  %10542 = vmatprep.mubr.bf16.mxu0 %v14148_v5 }
 0x54e   : > { %v6774_v4 = vrot.slane %v9295_v32, 5  ;;  %v6665_v0 = vsel %vm11861_vm5, %v6660_v7, %v6664_v10  ;;  %v6669_v63 = vor.u32 %v6668_v21, %v6664_v10  ;;  %v14155_v11 = vld [vmem:[#allocation3 + $0x7c] ss:$12 sps:$4 sm:$0xff]   ;;  %10632 = vmatprep.subr.bf16.mxu1 %v11461_v61  ;;  %10559 = vmatpush3.bf16.msra.mxu0 %v11447_v28  ;;  %v11457_v2 = vld [vmem:[#allocation3] ss:$12 sps:$4 sm:$0xff]   ;;  %v11479_v38 = vld [vmem:[%s14348_s5 + $0x208] sm:$0xff]  }
 0x54f   : > { %6726 = vst [vmem:[#allocation3 + $0xa0] sm:$0xf] %v6665_v0  ;;  %v6674_v60 = vrot.slane %v6672_v52, 5  ;;  %v6678_v45 = vrot.slane %v6676_v37, 4  ;;  %v6423_v47 = vpop.f32.mrb[224].mxu1  ;;  %7245 = vmatprep.mubr.bf16.mxu1 %v14155_v11  ;;  %10560 = vmatprep.subr.bf16.mxu0 %v11455_v13  ;;  %v11466_v26 = vld [vmem:[%s14348_s5 + $0x1d0] sm:$0xff]  }
 0x550   : > { %v6775_v40 = vsel %vm11853_vm4, %v6773_v15, %v6774_v4  ;;  %v6670_v39 = vrot.slane %v6669_v63, 4  ;;  %v9296_v58 = vpack.c.bf16 %v6423_v47, %v6423_v47  ;;  %v6425_v33 = vpop.f32.mrb[225].mxu1  ;;  %v6776_v12 = vrot.slane %v6774_v4, 4  ;;  %7246 = vmatmul.mubr.bf16.gmra.mrb[244].mxu1 %v14157_v50  ;;  %v14172_v27 = vld [vmem:[#allocation3 + $0x90] ss:$12 sps:$4 sm:$0xff]   ;;  %v11477_v54 = vld [vmem:[%s14348_s5 + $0x1b8] sm:$0xff]  }
 0x551   : > { %6813 = vst [vmem:[#allocation3 + $0xb0] sm:$0xf] %v6775_v40  ;;  %v6679_v19 = vor.u32 %v6678_v45, %v6674_v60  ;;  %v6426_v59 = vpop.f32.mrb[226].mxu1  ;;  %v11470_v31 = vld [vmem:[%s14348_s5 + $0x1e0] sm:$0xff]   ;;  %v11474_v28 = vld [vmem:[%s14348_s5 + $0x1f0] sm:$0xff]   ;;  %v11481_v36 = vld [vmem:[%s14348_s5 + $0x218] sm:$0xff]  }
 0x552   : > { %v6675_v9 = vsel %vm11861_vm5, %v6670_v39, %v6674_v60  ;;  %v6682_v56 = vshll.u32 %v9296_v58, 16  ;;  %v6777_v30 = vrot.slane %v9296_v58, 5  ;;  %v6428_v22 = vpop.f32.mrb[227].mxu1  ;;  %10561 = vmatpush3.bf16.msra.mxu0 %v11455_v13  ;;  %v11478_v41 = vld [vmem:[%s14348_s5 + $0x200] sm:$0xff]   ;;  %v11480_v25 = vld [vmem:[%s14348_s5 + $0x210] sm:$0xff]   ;;  %v11489_v7 = vld [vmem:[%s14348_s5 + $0x238] sm:$0xff]  }
 0x553   : > { %v6680_v57 = vrot.slane %v6679_v19, 4  ;;  %6727 = vst [vmem:[#allocation3 + $0xac] sm:$0xf] %v6675_v9  ;;  %10151 = vmatprep.subr.bf16.mxu0 %v11461_v61  ;;  %v11488_v32 = vld [vmem:[#allocation3 + $0x38] ss:$12 sps:$4 sm:$0xff]   ;;  %v11588_v40 = vmov 0.0  }
 0x554   : > { %v6684_v51 = vrot.slane %v6682_v56, 5  ;;  %v6778_v62 = vsel %vm11853_vm4, %v6776_v12, %v6777_v30  ;;  %v11448_v1 = vld [vmem:[#allocation3 + $0x98] ss:$12 sps:$4 sm:$0xff]   ;;  %v11490_v10 = vld [vmem:[#allocation3 + $0x50] ss:$12 sps:$4 sm:$0xff]  }
 0x555   : > { %6814 = vst [vmem:[#allocation3 + $0xbc] sm:$0xf] %v6778_v62  ;;  %10543 = vmatmul.mubr.bf16.gmra.mrb[8].mxu0 %v11448_v1  ;;  %v11491_v21 = vld [vmem:[#allocation3 + $0x68] ss:$12 sps:$4 sm:$0xff]   ;;  %v11492_v48 = vld [vmem:[#allocation3 + $0x80] ss:$12 sps:$4 sm:$0xff]  }
 0x556   : > { %v6685_v18 = vsel %vm11861_vm5, %v6680_v57, %v6684_v51  ;;  %v14170_v34 = vld [vmem:[#allocation3 + $0x94] ss:$12 sps:$4 sm:$0xff]   ;;  %10562 = vmatprep.mubr.bf16.mxu0 %v11450_v17  ;;  %v11493_v15 = vld [vmem:[#allocation3 + $0x98] ss:$12 sps:$4 sm:$0xff]  }
 0x557   : > { %6728 = vst [vmem:[#allocation3 + $0xb8] sm:$0xf] %v6685_v18  ;;  %7253 = vmatprep.mubr.bf16.mxu1 %v14170_v34 }
 0x558   : > { %7254 = vmatmul.mubr.bf16.gmra.mrb[248].mxu1 %v14172_v27 }
 0x559   : > { %7535 = vmatprep.mubr.bf16.mxu1 %v11459_v23 }
 0x55c   : > { %v11494_v13 = vld [vmem:[#allocation3 + $0xb0] ss:$12 sps:$4 sm:$0xff]  }
 0x55d   : > { %10563 = vmatmul.mubr.bf16.vlgmr.msra.gmra.mrb[0].mxu0 %v14013_v46  ;;  %v11467_v46 = vld [vmem:[%s14348_s5 + $0x190] sm:$0xff]  }
 0x55e   : > { %10152 = vmatpush3.bf16.msra.mxu0 %v11463_v53  ;;  %10566 = vmatprep.mubr.bf16.mxu0 %v14045_v29  ;;  %v11468_v29 = vld [vmem:[%s14348_s5 + $0x1d8] sm:$0xff]  }
 0x55f   : > { %10153 = vmatprep.subr.bf16.mxu0 %v11464_v6 }
 0x560   : > { %7536 = vmatmul.mubr.bf16.vlgmr.msra.gmra.mrb[252].mxu1 %v11457_v2 }
 0x561   : > { %7543 = vmatprep.mubr.bf16.mxu1 %v14022_v44  ;;  %10640 = vmatpush3.bf16.msra.mxu1 %v11463_v53  ;;  %v11469_v44 = vld [vmem:[%s14348_s5 + $0x198] sm:$0xff]  }
 0x562   : > { %10633 = vmatprep.subr.bf16.mxu1 %v11464_v6  ;;  %10154 = vmatpush3.bf16.msra.mxu0 %v11465_v8 }
 0x563   : > { %10155 = vmatprep.subr.bf16.mxu0 %v11466_v26 }
 0x565   : > { %10641 = vmatpush3.bf16.msra.mxu1 %v11465_v8  ;;  %10567 = vmatmul.mubr.bf16.gmra.mrb[4].mxu0 %v14081_v16  ;;  %v11471_v16 = vld [vmem:[%s14348_s5 + $0x1a0] sm:$0xff]  }
 0x566   : > { %10634 = vmatprep.subr.bf16.mxu1 %v11466_v26  ;;  %10156 = vmatpush3.bf16.msra.mxu0 %v11467_v46 }
 0x567   : > { %10570 = vmatprep.mubr.bf16.mxu0 %v14116_v20  ;;  %10157 = vmatprep.subr.bf16.mxu0 %v11468_v29  ;;  %v11472_v20 = vld [vmem:[%s14348_s5 + $0x1e8] sm:$0xff]  }
 0x568   : > { %7544 = vmatmul.mubr.bf16.gmra.mrb[0].mxu1 %v14020_v35  ;;  %v11473_v35 = vld [vmem:[%s14348_s5 + $0x1a8] sm:$0xff]  }
 0x569   : > { %7551 = vmatprep.mubr.bf16.mxu1 %v14052_v43  ;;  %10642 = vmatpush3.bf16.msra.mxu1 %v11467_v46 }
 0x56a   : > { %10635 = vmatprep.subr.bf16.mxu1 %v11468_v29  ;;  %10158 = vmatpush3.bf16.msra.mxu0 %v11469_v44 }
 0x56b   : > { %10159 = vmatprep.subr.bf16.mxu0 %v11470_v31 }
 0x56d   : > { %10643 = vmatpush3.bf16.msra.mxu1 %v11469_v44  ;;  %10571 = vmatmul.mubr.bf16.gmra.mrb[8].mxu0 %v14148_v5 }
 0x56e   : > { %10636 = vmatprep.subr.bf16.mxu1 %v11470_v31  ;;  %10160 = vmatpush3.bf16.msra.mxu0 %v11471_v16 }
 0x56f   : > { %8010 = vmatprep.mubr.bf16.mxu0 %v14052_v43  ;;  %10161 = vmatprep.subr.bf16.mxu0 %v11472_v20  ;;  %v11475_v43 = vld [vmem:[%s14348_s5 + $0x1b0] sm:$0xff]  }
 0x570   : > { %7552 = vmatmul.mubr.bf16.gmra.mrb[4].mxu1 %v14054_v14 }
 0x571   : > { %7559 = vmatprep.mubr.bf16.mxu1 %v14088_v55  ;;  %10644 = vmatpush3.bf16.msra.mxu1 %v11471_v16 }
 0x572   : > { %10637 = vmatprep.subr.bf16.mxu1 %v11472_v20  ;;  %10162 = vmatpush3.bf16.msra.mxu0 %v11473_v35 }
 0x573   : > { %10163 = vmatprep.subr.bf16.mxu0 %v11474_v28 }
 0x575   : > { %10645 = vmatpush3.bf16.msra.mxu1 %v11473_v35 }
 0x576   : > { %10638 = vmatprep.subr.bf16.mxu1 %v11474_v28  ;;  %10164 = vmatpush3.bf16.msra.mxu0 %v11475_v43 }
 0x577   : > { %10165 = vmatprep.subr.bf16.mxu0 %v11476_v49 }
 0x578   : > { %7560 = vmatmul.mubr.bf16.gmra.mrb[8].mxu1 %v14090_v24 }
 0x579   : > { %7567 = vmatprep.mubr.bf16.mxu1 %v14123_v3  ;;  %10646 = vmatpush3.bf16.msra.mxu1 %v11475_v43 }
 0x57a   : > { %10639 = vmatprep.subr.bf16.mxu1 %v11476_v49  ;;  %10166 = vmatpush3.bf16.msra.mxu0 %v11477_v54 }
 0x57b   : > { %10574 = vmatprep.subr.bf16.mxu0 %v11478_v41 }
 0x57d   : > { %10647 = vmatpush3.bf16.msra.mxu1 %v11477_v54  ;;  %8011 = vmatmul.mubr.bf16.vlgmr.msra.gmra.mrb[12].mxu0 %v14054_v14  ;;  %v11482_v14 = vld [vmem:[%s14348_s5 + $0x220] sm:$0xff]  }
 0x57e   : > { %8018 = vmatprep.mubr.bf16.mxu0 %v14088_v55  ;;  %10575 = vmatpush3.bf16.msra.mxu0 %v11478_v41  ;;  %v11483_v55 = vld [vmem:[%s14348_s5 + $0x228] sm:$0xff]  }
 0x57f   : > { %10576 = vmatprep.subr.bf16.mxu0 %v11479_v38  ;;  %10602 = vmatprep.subr.bf16.mxu1 %v11588_v40 }
 0x580   : > { %7568 = vmatmul.mubr.bf16.gmra.mrb[12].mxu1 %v14125_v42 }
 0x581   : > { %7575 = vmatprep.mubr.bf16.mxu1 %v14155_v11 }
 0x582   : > { %10577 = vmatpush3.bf16.msra.mxu0 %v11479_v38 }
 0x583   : > { %10578 = vmatprep.subr.bf16.mxu0 %v11480_v25 }
 0x585   : > { %8019 = vmatmul.mubr.bf16.gmra.mrb[16].mxu0 %v14090_v24  ;;  %v11486_v24 = vld [vmem:[#allocation3 + $0xac] ss:$12 sps:$4 sm:$0xff]  }
 0x586   : > { %8026 = vmatprep.mubr.bf16.mxu0 %v14123_v3  ;;  %10579 = vmatpush3.bf16.msra.mxu0 %v11480_v25  ;;  %v11487_v3 = vld [vmem:[%s14348_s5 + $0x230] sm:$0xff]  }
 0x587   : > { %10580 = vmatprep.subr.bf16.mxu0 %v11481_v36 }
 0x588   : > { %7576 = vmatmul.mubr.bf16.gmra.mrb[16].mxu1 %v14157_v50 }
 0x589   : > { %8042 = vmatprep.mubr.bf16.mxu1 %v14170_v34 }
 0x58a   : > { %10581 = vmatpush3.bf16.msra.mxu0 %v11481_v36 }
 0x58b   : > { %10582 = vmatprep.subr.bf16.mxu0 %v11482_v14 }
 0x58d   : > { %8027 = vmatmul.mubr.bf16.gmra.mrb[20].mxu0 %v14125_v42  ;;  %v11484_v42 = vld [vmem:[#allocation3 + $0xa8] ss:$12 sps:$4 sm:$0xff]  }
 0x58e   : > { %8034 = vmatprep.mubr.bf16.mxu0 %v14155_v11  ;;  %10583 = vmatpush3.bf16.msra.mxu0 %v11482_v14 }
 0x58f   : > { %10584 = vmatprep.subr.bf16.mxu0 %v11483_v55 }
 0x590   : > { %8043 = vmatmul.mubr.bf16.vlgmr.msra.gmra.mrb[20].mxu1 %v14172_v27 }
 0x591   : > { %8050 = vmatprep.mubr.bf16.mxu1 %v11486_v24 }
 0x592   : > { %10585 = vmatpush3.bf16.msra.mxu0 %v11483_v55 }
 0x593   : > { %10586 = vmatprep.subr.bf16.mxu0 %v11487_v3 }
 0x595   : > { %8035 = vmatmul.mubr.bf16.gmra.mrb[24].mxu0 %v14157_v50 }
 0x596   : > { %10587 = vmatpush3.bf16.msra.mxu0 %v11487_v3  ;;  %10590 = vmatprep.mubr.bf16.mxu0 %v11488_v32 }
 0x597   : > { %10588 = vmatprep.subr.bf16.mxu0 %v11489_v7 }
 0x598   : > { %8051 = vmatmul.mubr.bf16.gmra.mrb[24].mxu1 %v11484_v42 }
 0x599   : > { %10608 = vmatprep.mubr.msk.bf16.mxu1 %vm11589_vm9, %v11588_v40 }
 0x59a   : > { %10589 = vmatpush3.bf16.msra.mxu0 %v11489_v7 }
 0x59d   : > { %10591 = vmatmul.mubr.bf16.vlgmr.msra.gmra.mrb[0].mxu0 %v11490_v10 }
 0x59e   : > { %10594 = vmatprep.mubr.bf16.mxu0 %v11491_v21 }
 0x5a5   : > { %10595 = vmatmul.mubr.bf16.gmra.mrb[4].mxu0 %v11492_v48 }
 0x5a6   : > { %10598 = vmatprep.mubr.bf16.mxu0 %v11493_v15 }
 0x5ad   : > { %10599 = vmatmul.mubr.bf16.gmra.mrb[8].mxu0 %v11494_v13 }
 0x603   : > { %v10035_v52 = vpop.f32.mrb[228].mxu1 }
 0x604   : > { %v10036_v37 = vpop.f32.mrb[229].mxu1 }
 0x605   : > { %v10037_v4 = vadd.f32 %v10036_v37, %v10035_v52  ;;  %v10038_v5 = vpop.f32.mrb[230].mxu1 }
 0x606   : > { %v10039_v61 = vpop.f32.mrb[231].mxu1 }
 0x607   : > { %v10040_v0 = vadd.f32 %v10039_v61, %v10038_v5 }
 0x60b   : > { %v10041_v63 = vpop.f32.mrb[232].mxu1 }
 0x60c   : > { %v10042_v11 = vpop.f32.mrb[233].mxu1 }
 0x60d   : > { %v10043_v50 = vadd.f32 %v10042_v11, %v10041_v63  ;;  %v10044_v60 = vpop.f32.mrb[234].mxu1 }
 0x60e   : > { %v10045_v45 = vpop.f32.mrb[235].mxu1 }
 0x60f   : > { %v10046_v47 = vadd.f32 %v10045_v45, %v10044_v60 }
 0x613   : > { %v10047_v39 = vpop.f32.mrb[236].mxu1 }
 0x614   : > { %v10048_v58 = vpop.f32.mrb[237].mxu1 }
 0x615   : > { %v10049_v33 = vadd.f32 %v10048_v58, %v10047_v39  ;;  %v10050_v19 = vpop.f32.mrb[238].mxu1 }
 0x616   : > { %v10051_v12 = vpop.f32.mrb[239].mxu1 }
 0x617   : > { %v10052_v59 = vadd.f32 %v10051_v12, %v10050_v19 }
 0x61b   : > { %v10053_v9 = vpop.f32.mrb[240].mxu1 }
 0x61c   : > { %v10054_v56 = vpop.f32.mrb[241].mxu1 }
 0x61d   : > { %v10055_v30 = vadd.f32 %v10054_v56, %v10053_v9  ;;  %v10056_v22 = vpop.f32.mrb[242].mxu1 }
 0x61e   : > { %v10057_v57 = vpop.f32.mrb[243].mxu1 }
 0x61f   : > { %v10058_v51 = vadd.f32 %v10057_v57, %v10056_v22 }
 0x623   : > { %v10059_v62 = vpop.f32.mrb[244].mxu1 }
 0x624   : > { %v10060_v17 = vpop.f32.mrb[245].mxu1 }
 0x625   : > { %v10061_v1 = vadd.f32 %v10060_v17, %v10059_v62  ;;  %v10062_v18 = vpop.f32.mrb[246].mxu1 }
 0x626   : > { %v10063_v34 = vpop.f32.mrb[247].mxu1 }
 0x627   : > { %v10064_v27 = vadd.f32 %v10063_v34, %v10062_v18 }
 0x62b   : > { %v10065_v23 = vpop.f32.mrb[248].mxu1 }
 0x62c   : > { %v10066_v53 = vpop.f32.mrb[249].mxu1 }
 0x62d   : > { %v14273_v6 = vadd.f32 %v10066_v53, %v10065_v23  ;;  %v10068_v2 = vpop.f32.mrb[250].mxu1 }
 0x62e   : > { %v10069_v8 = vpop.f32.mrb[251].mxu1 }
 0x62f   : > { %v14275_v26 = vadd.f32 %v10069_v8, %v10068_v2 }
 0x633   : > { %v10101_v46 = vpop.f32.mrb[252].mxu1 }
 0x634   : > { %v10102_v29 = vpop.f32.mrb[253].mxu1 }
 0x635   : > { %v10103_v44 = vadd.f32 %v10102_v29, %v10101_v46  ;;  %v10104_v31 = vpop.f32.mrb[254].mxu1 }
 0x636   : > { %v10105_v16 = vpop.f32.mrb[255].mxu1 }
 0x637   : > { %v10795_v20 = vadd.f32 %v10103_v44, %v10037_v4  ;;  %v10106_v35 = vadd.f32 %v10105_v16, %v10104_v31 }
 0x639   : > { %v10801_v28 = vadd.f32 %v10106_v35, %v10040_v0 }
 0x63b   : > { %v10107_v43 = vpop.f32.mrb[0].mxu1 }
 0x63c   : > { %v10108_v49 = vpop.f32.mrb[1].mxu1 }
 0x63d   : > { %v10109_v54 = vadd.f32 %v10108_v49, %v10107_v43  ;;  %v10110_v41 = vpop.f32.mrb[2].mxu1 }
 0x63e   : > { %v10111_v38 = vpop.f32.mrb[3].mxu1 }
 0x63f   : > { %v10792_v25 = vadd.f32 %v10109_v54, %v10043_v50  ;;  %v10112_v36 = vadd.f32 %v10111_v38, %v10110_v41 }
 0x641   : > { %v10798_v14 = vadd.f32 %v10112_v36, %v10046_v47 }
 0x643   : > { %v10113_v55 = vpop.f32.mrb[4].mxu1 }
 0x644   : > { %v10114_v24 = vpop.f32.mrb[5].mxu1 }
 0x645   : > { %v10115_v3 = vadd.f32 %v10114_v24, %v10113_v55  ;;  %v10116_v7 = vpop.f32.mrb[6].mxu1 }
 0x646   : > { %v10117_v32 = vpop.f32.mrb[7].mxu1 }
 0x647   : > { %v10807_v42 = vadd.f32 %v10115_v3, %v10049_v33  ;;  %v10118_v10 = vadd.f32 %v10117_v32, %v10116_v7 }
 0x649   : > { %v10813_v21 = vadd.f32 %v10118_v10, %v10052_v59 }
 0x64b   : > { %v10119_v48 = vpop.f32.mrb[8].mxu1 }
 0x64c   : > { %v10120_v15 = vpop.f32.mrb[9].mxu1 }
 0x64d   : > { %v10121_v13 = vadd.f32 %v10120_v15, %v10119_v48  ;;  %v10122_v52 = vpop.f32.mrb[10].mxu1 }
 0x64e   : > { %v10123_v37 = vpop.f32.mrb[11].mxu1 }
 0x64f   : > { %v10804_v4 = vadd.f32 %v10121_v13, %v10055_v30  ;;  %v10124_v5 = vadd.f32 %v10123_v37, %v10122_v52 }
 0x650   : > { %v10167_v0 = vpop.f32.mrb[12].mxu0 }
 0x651   : > { %v10810_v61 = vadd.f32 %v10124_v5, %v10058_v51  ;;  %v10168_v63 = vpop.f32.mrb[13].mxu0 }
 0x652   : > { %v10169_v11 = vadd.f32 %v10168_v63, %v10167_v0  ;;  %v10170_v50 = vpop.f32.mrb[14].mxu0 }
 0x653   : > { %v10125_v60 = vpop.f32.mrb[12].mxu1  ;;  %v10171_v45 = vpop.f32.mrb[15].mxu0 }
 0x654   : > { %v10126_v47 = vpop.f32.mrb[13].mxu1  ;;  %v10172_v39 = vadd.f32 %v10171_v45, %v10170_v50  ;;  %v10796_v19 = vadd.f32 %v10795_v20, %v10169_v11  ;;  %v9210_v50 = vld [vmem:[%s14349_s6] ss:$0 sm:$0xff] }
 0x655   : > { %v10127_v58 = vadd.f32 %v10126_v47, %v10125_v60  ;;  %v10128_v33 = vpop.f32.mrb[14].mxu1 }
 0x656   : > { %v10129_v12 = vpop.f32.mrb[15].mxu1  ;;  %v10802_v56 = vadd.f32 %v10801_v28, %v10172_v39 }
 0x657   : > { %v10819_v59 = vadd.f32 %v10127_v58, %v10061_v1  ;;  %v10130_v9 = vadd.f32 %v10129_v12, %v10128_v33 }
 0x658   : > { %v10173_v57 = vpop.f32.mrb[16].mxu0 }
 0x659   : > { %v10825_v22 = vadd.f32 %v10130_v9, %v10064_v27  ;;  %v10174_v30 = vpop.f32.mrb[17].mxu0 }
 0x65a   : > { %v10175_v62 = vadd.f32 %v10174_v30, %v10173_v57  ;;  %v10176_v51 = vpop.f32.mrb[18].mxu0 }
 0x65b   : > { %v10131_v17 = vpop.f32.mrb[16].mxu1  ;;  %v10177_v18 = vpop.f32.mrb[19].mxu0 }
 0x65c   : > { %v10132_v34 = vpop.f32.mrb[17].mxu1  ;;  %v10178_v23 = vadd.f32 %v10177_v18, %v10176_v51  ;;  %v10793_v8 = vadd.f32 %v10792_v25, %v10175_v62 }
 0x65d   : > { %v10133_v53 = vadd.f32 %v10132_v34, %v10131_v17  ;;  %v10134_v2 = vpop.f32.mrb[18].mxu1 }
 0x65e   : > { %v10135_v46 = vpop.f32.mrb[19].mxu1  ;;  %v10799_v31 = vadd.f32 %v10798_v14, %v10178_v23 }
 0x65f   : > { %v10816_v29 = vadd.f32 %v10133_v53, %v14273_v6  ;;  %v10136_v44 = vadd.f32 %v10135_v46, %v10134_v2 }
 0x660   : > { %v10179_v16 = vpop.f32.mrb[20].mxu0 }
 0x661   : > { %v10822_v1 = vadd.f32 %v10136_v44, %v14275_v26  ;;  %v10180_v27 = vpop.f32.mrb[21].mxu0 }
 0x662   : > { %v10181_v20 = vadd.f32 %v10180_v27, %v10179_v16  ;;  %v10182_v35 = vpop.f32.mrb[22].mxu0 }
 0x663   : > { %v10191_v28 = vpop.f32.mrb[20].mxu1  ;;  %v10183_v43 = vpop.f32.mrb[23].mxu0 }
 0x664   : > { %v10192_v49 = vpop.f32.mrb[21].mxu1  ;;  %v10184_v54 = vadd.f32 %v10183_v43, %v10182_v35  ;;  %v10808_v36 = vadd.f32 %v10807_v42, %v10181_v20 }
 0x665   : > { %v10193_v41 = vadd.f32 %v10192_v49, %v10191_v28  ;;  %v10194_v38 = vpop.f32.mrb[22].mxu1 }
 0x666   : > { %v10195_v55 = vpop.f32.mrb[23].mxu1  ;;  %v10814_v24 = vadd.f32 %v10813_v21, %v10184_v54 }
 0x667   : > { %v10196_v25 = vadd.f32 %v10195_v55, %v10194_v38  ;;  %v14279_v3 = vadd.f32 %v10819_v59, %v10193_v41 }
 0x668   : > { %v10185_v6 = vpop.f32.mrb[24].mxu0 }
 0x669   : > { %v14281_v14 = vadd.f32 %v10825_v22, %v10196_v25  ;;  %v10186_v26 = vpop.f32.mrb[25].mxu0 }
 0x66a   : > { %v10187_v7 = vadd.f32 %v10186_v26, %v10185_v6  ;;  %v10188_v32 = vpop.f32.mrb[26].mxu0 }
 0x66b   : > { %v10197_v10 = vpop.f32.mrb[24].mxu1  ;;  %v10189_v48 = vpop.f32.mrb[27].mxu0 }
 0x66c   : > { %v10198_v15 = vpop.f32.mrb[25].mxu1  ;;  %v10190_v13 = vadd.f32 %v10189_v48, %v10188_v32  ;;  %v10805_v5 = vadd.f32 %v10804_v4, %v10187_v7 }
 0x66d   : > { %v10199_v52 = vadd.f32 %v10198_v15, %v10197_v10  ;;  %v10200_v37 = vpop.f32.mrb[26].mxu1 }
 0x66e   : > { %v10201_v0 = vpop.f32.mrb[27].mxu1  ;;  %v10811_v63 = vadd.f32 %v10810_v61, %v10190_v13 }
 0x66f   : > { %v10202_v42 = vadd.f32 %v10201_v0, %v10200_v37  ;;  %v10817_v11 = vadd.f32 %v10816_v29, %v10199_v52 }
 0x670   : > { %v10592_v21 = vpop.f32.mrb[0].mxu0 }
 0x671   : > { %v10823_v60 = vadd.f32 %v10822_v1, %v10202_v42  ;;  %v10794_v45 = vadd.f32 %v10793_v8, %v10592_v21  ;;  %v8093_v47 = vpop.f32.mrb[1].mxu0 }
 0x672   : > { %v10797_v39 = vadd.f32 %v10796_v19, %v8093_v47  ;;  %v10593_v58 = vpop.f32.mrb[2].mxu0 }
 0x673   : > { %v8161_v33 = vadd.f32 %v10794_v45, %v9210_v50  ;;  %v10800_v12 = vadd.f32 %v10799_v31, %v10593_v58  ;;  %v8096_v59 = vpop.f32.mrb[3].mxu0 }
 0x674   : > { %v8159_v9 = vadd.f32 %v10797_v39, %v9210_v50  ;;  %v10803_v22 = vadd.f32 %v10802_v56, %v8096_v59 }
 0x675   : > { %v8173_v4 = vmax.f32 %v8161_v33, 0.0  ;;  %v8162_v57 = vadd.f32 %v10800_v12, %v9210_v50 }
 0x676   : > { %v8171_v30 = vmax.f32 %v8159_v9, 0.0  ;;  %v8160_v61 = vadd.f32 %v10803_v22, %v9210_v50 }
 0x677   : > { %v8174_v62 = vmax.f32 %v8162_v57, 0.0  ;;  %v8219_v57 = vld [vmem:[%s14351_s8] sm:$0xf] }
 0x678   : > { %v8183_v51 = vmax.f32 %v8171_v30, %v8173_v4  ;;  %v8172_v17 = vmax.f32 %v8160_v61, 0.0  ;;  %v10596_v18 = vpop.f32.mrb[4].mxu0  ;;  %v11495_v30 = vld [vmem:[%s14352_s9] sm:$0xff]   ;;  %v11496_v61 = vld [vmem:[%s14352_s9 + $0x8] sm:$0xff]  }
 0x679   : > { %v10806_v34 = vadd.f32 %v10805_v5, %v10596_v18  ;;  %v8109_v23 = vpop.f32.mrb[5].mxu0  ;;  %v11500_v18 = vld [vmem:[%s14352_s9 + $0x28] sm:$0xff]  }
 0x67a   : > { %v8184_v53 = vmax.f32 %v8172_v17, %v8174_v62  ;;  %v10809_v2 = vadd.f32 %v10808_v36, %v8109_v23  ;;  %v10597_v8 = vpop.f32.mrb[6].mxu0  ;;  %v8195_v44 = vrot.slane %v8183_v51, 1  ;;  %v11497_v62 = vld [vmem:[%s14352_s9 + $0x10] sm:$0xff]   ;;  %v11499_v17 = vld [vmem:[%s14352_s9 + $0x20] sm:$0xff]   ;;  %v11502_v23 = vld [vmem:[%s14352_s9 + $0x38] sm:$0xff]  }
 0x67b   : > { %v8165_v19 = vadd.f32 %v10806_v34, %v9210_v50  ;;  %v10812_v46 = vadd.f32 %v10811_v63, %v10597_v8  ;;  %v8112_v29 = vpop.f32.mrb[7].mxu0  ;;  %v11501_v34 = vld [vmem:[%s14352_s9 + $0x30] sm:$0xff]  }
 0x67c   : > { %v8196_v31 = vrot.slane %v8184_v53, 1  ;;  %v8163_v1 = vadd.f32 %v10809_v2, %v9210_v50  ;;  %v10815_v56 = vadd.f32 %v10814_v24, %v8112_v29  ;;  %v9212_v29 = vld [vmem:[%s14353_s10] ss:$0 sm:$0xff] }
 0x67d   : > { %v8177_v16 = vmax.f32 %v8165_v19, 0.0  ;;  %v8166_v27 = vadd.f32 %v10812_v46, %v9210_v50 }
 0x67e   : > { %v8175_v20 = vmax.f32 %v8163_v1, 0.0  ;;  %v8164_v35 = vadd.f32 %v10815_v56, %v9210_v50  ;;  %v8197_v28 = vsel %vm6088_vm6, %v8195_v44, %v8196_v31 }
 0x67f   : > { %v8178_v43 = vmax.f32 %v8166_v27, 0.0  ;;  %v8211_v49 = vmax.f32 %v8183_v51, %v8197_v28  ;;  %v11498_v51 = vld [vmem:[%s14352_s9 + $0x18] sm:$0xff]  }
 0x680   : > { %v8185_v54 = vmax.f32 %v8175_v20, %v8177_v16  ;;  %v8176_v41 = vmax.f32 %v8164_v35, 0.0  ;;  %v10600_v38 = vpop.f32.mrb[8].mxu0 }
 0x681   : > { %v10818_v36 = vadd.f32 %v10817_v11, %v10600_v38  ;;  %v8125_v55 = vpop.f32.mrb[9].mxu0 }
 0x682   : > { %v8198_v25 = vrot.slane %v8185_v54, 1  ;;  %v8186_v6 = vmax.f32 %v8176_v41, %v8178_v43  ;;  %v10821_v26 = vadd.f32 %v14279_v3, %v8125_v55  ;;  %v10601_v7 = vpop.f32.mrb[10].mxu0 }
 0x683   : > { %v8169_v32 = vadd.f32 %v10818_v36, %v9210_v50  ;;  %v10824_v24 = vadd.f32 %v10823_v60, %v10601_v7  ;;  %v8128_v10 = vpop.f32.mrb[11].mxu0 }
 0x684   : > { %v8200_v48 = vrot.slane %v8186_v6, 1  ;;  %v8167_v15 = vadd.f32 %v10821_v26, %v9210_v50  ;;  %v10827_v13 = vadd.f32 %v14281_v14, %v8128_v10  ;;  %v8199_v52 = vsel %vm6088_vm6, %v8196_v31, %v8198_v25 }
 0x685   : > { %v8181_v37 = vmax.f32 %v8169_v32, 0.0  ;;  %v8170_v5 = vadd.f32 %v10824_v24, %v9210_v50  ;;  %v8212_v0 = vmax.f32 %v8184_v53, %v8199_v52 }
 0x686   : > { %v8179_v42 = vmax.f32 %v8167_v15, 0.0  ;;  %v8168_v63 = vadd.f32 %v10827_v13, %v9210_v50  ;;  %v8201_v11 = vsel %vm6088_vm6, %v8198_v25, %v8200_v48 }
 0x687   : > { %v8182_v21 = vmax.f32 %v8170_v5, 0.0  ;;  %v8216_v45 = vpack.c.bf16 %v8212_v0, %v8211_v49  ;;  %v8213_v3 = vmax.f32 %v8185_v54, %v8201_v11 }
 0x688   : > { %v8187_v47 = vmax.f32 %v8179_v42, %v8181_v37  ;;  %v8180_v39 = vmax.f32 %v8168_v63, 0.0 }
 0x689   : > { %10603 = vmatpush3.bf16.msra.mxu1 %v8216_v45 }
 0x68a   : > { %v8202_v60 = vrot.slane %v8187_v47, 1  ;;  %v8188_v58 = vmax.f32 %v8180_v39, %v8182_v21  ;;  %10604 = vmatprep.subr.bf16.mxu1 %v11588_v40 }
 0x68c   : > { %v8204_v14 = vrot.slane %v8188_v58, 1  ;;  %v8203_v33 = vsel %vm6088_vm6, %v8200_v48, %v8202_v60 }
 0x68d   : > { %v8214_v12 = vmax.f32 %v8186_v6, %v8203_v33 }
 0x68e   : > { %v8205_v59 = vsel %vm6088_vm6, %v8202_v60, %v8204_v14 }
 0x68f   : > { %v8217_v9 = vpack.c.bf16 %v8214_v12, %v8213_v3  ;;  %v8215_v50 = vmax.f32 %v8187_v47, %v8205_v59 }
 0x691   : > { %10605 = vmatpush3.bf16.msra.mxu1 %v8217_v9  ;;  %v8218_v22 = vpack.c.bf16 %v8215_v50, %v8215_v50 }
 0x692   : > { %10606 = vmatprep.subr.bf16.mxu1 %v11588_v40 }
 0x693   : > { %v8225_v4 = vsel %vm6321_vm8, %v8218_v22, 0 }
 0x695   : > { %10607 = vmatpush3.bf16.msra.mxu1 %v8225_v4 }
 0x696   : > { %10612 = vmatprep.subr.bf16.mxu1 %v11588_v40 }
 0x698   : > { %10609 = vmatmul.mubr.msk.bf16.vlgmr.msra.gmra.mrb[28].mxu1 %vm8220_vm10, %v8219_v57 }
 0x699   : > { %10613 = vmatpush3.bf16.msra.mxu1 %v11495_v30  ;;  %10628 = vmatprep.mubr.msk.bf16.mxu1 %vm11589_vm9, %v11588_v40 }
 0x69a   : > { %10614 = vmatprep.subr.bf16.mxu1 %v11588_v40 }
 0x69d   : > { %10615 = vmatpush3.bf16.msra.mxu1 %v11496_v61 }
 0x69e   : > { %10616 = vmatprep.subr.bf16.mxu1 %v11588_v40 }
 0x6a1   : > { %10617 = vmatpush3.bf16.msra.mxu1 %v11497_v62 }
 0x6a2   : > { %10618 = vmatprep.subr.bf16.mxu1 %v11588_v40 }
 0x6a5   : > { %10619 = vmatpush3.bf16.msra.mxu1 %v11498_v51 }
 0x6a6   : > { %10620 = vmatprep.subr.bf16.mxu1 %v11588_v40 }
 0x6a9   : > { %10621 = vmatpush3.bf16.msra.mxu1 %v11499_v17 }
 0x6aa   : > { %10622 = vmatprep.subr.bf16.mxu1 %v11588_v40 }
 0x6ad   : > { %10623 = vmatpush3.bf16.msra.mxu1 %v11500_v18 }
 0x6ae   : > { %10624 = vmatprep.subr.bf16.mxu1 %v11588_v40 }
 0x6b1   : > { %10625 = vmatpush3.bf16.msra.mxu1 %v11501_v34 }
 0x6b2   : > { %10626 = vmatprep.subr.bf16.mxu1 %v11588_v40 }
 0x6b5   : > { %10627 = vmatpush3.bf16.msra.mxu1 %v11502_v23 }
 0x76b   : > { %v8261_v53 = vpop.f32.mrb[28].mxu1 }
 0x76c   : > { %v8267_v2 = vpack.c.bf16 %v8261_v53, %v8261_v53  ;;  %v10610_v8 = vpop.f32.mrb[29].mxu1 }
 0x76d   : > { %v8264_v19 = vpop.f32.mrb[30].mxu1 }
 0x76e   : > { %v10611_v46 = vpop.f32.mrb[31].mxu1  ;;  %10629 = vmatmul.mubr.bf16.vlgmr.msra.gmra.mrb[48].mxu1 %v8267_v2 }
 0x841   : > { %v8373_v40 = vpop.f32.mrb[48].mxu1 }
 0x842   : > { %v8374_v44 = vadd.f32 %v9212_v29, %v8373_v40  ;;  %v10630_v31 = vpop.f32.mrb[49].mxu1 }
 0x843   : > { %v8376_v1 = vpop.f32.mrb[50].mxu1 }
 0x844   : > { %8379 = vst [vmem:[%s384_s29] sm:$0xff] %v8374_v44  ;;  %v10631_v56 = vpop.f32.mrb[51].mxu1 }
 0x845 PF: > { %s21_s17 = sadd.s32 1, %s11585_s17  }
 0x846   : > { %p18_p4 = scmp.ge.s32.totalorder %s21_s17, 4  }
 0x848   :  { %20 = sbr.rel (!%p18_p4) target bundleno = 1 (0x1), region = 98 }

</bundles_post_ra>
